<compile_context>
chip_gen: v7x
topology: tpu7x:2x2x1
jax: 0.10.0
libtpu: 0.0.40
codegen_flags: <defaults>
</compile_context>

<pallas_src>
import functools

import jax
import jax.numpy as jnp
from jax.experimental import pallas as pl
from jax.experimental.pallas import tpu as pltpu


# ----------------------------------------------------------------------------
# Model dimensions / tiling knobs
# ----------------------------------------------------------------------------
EMB_DIM = 64        # embeddings_dim
KERNEL_DIM = 128    # kernel_dim (feats_dim)
M_DIM = 16          # m_dim
N_KERNELS = 3
RNN_DIM = 256       # small rnn_dim for the synthetic run (module default 1024)
PROP_DIM = 6

MAX_TILE = 512      # node-row tile (review: 512-1024 amortizes per-step overhead)
EDGE_TILE = 512     # edge-row tile
NODE_CHUNK = 1024   # scatter one-hot built per node chunk -> bounded VMEM on big graphs
NCORES = 2          # leading core-parallel axis for reduction kernels (v7x dual TC)
LN_EPS = 1e-5
# NOTE: all blocks stay well inside every generation's default scoped-VMEM limit
# (largest live block ~3 MiB), so vmem_limit_bytes is left at the compiler default.


def _round_up(n, m):
    return ((n + m - 1) // m) * m


def _tile_rows(n, cap):
    if n >= cap:
        return cap
    return _round_up(max(n, 8), 8)


def _pad_rows(x, n_pad, value=0):
    n = x.shape[0]
    if n == n_pad:
        return x
    pad = [(0, n_pad - n)] + [(0, 0)] * (x.ndim - 1)
    return jnp.pad(x, pad, constant_values=value)


# ----------------------------------------------------------------------------
# In-kernel helpers
# ----------------------------------------------------------------------------
def _silu(x):
    return x * jax.nn.sigmoid(x)


def _ln(x, g, b, eps=LN_EPS):
    mu = jnp.mean(x, axis=-1, keepdims=True)
    var = jnp.mean((x - mu) ** 2, axis=-1, keepdims=True)
    return (x - mu) * jax.lax.rsqrt(var + eps) * g + b


def _mm(a, b):
    return jnp.dot(a, b, preferred_element_type=jnp.float32)


# ----------------------------------------------------------------------------
# Kernel 1: pre_egnn_mlp (single K=256 first matmul on the concatenated embeddings)
# ----------------------------------------------------------------------------
def _pre_mlp_kernel(x_ref, w0, b0, w1, b1, w2, b2, o_ref):
    h = _silu(_mm(x_ref[...], w0[...]) + b0[...])
    h = _silu(_mm(h, w1[...]) + b1[...])
    o_ref[...] = (_mm(h, w2[...]) + b2[...]).astype(o_ref.dtype)


def pre_mlp(pk, emb, tn):
    n_pad = emb.shape[0]
    row = lambda i: (i, 0)
    const = lambda i: (0, 0)
    return pl.pallas_call(
        _pre_mlp_kernel,
        out_shape=jax.ShapeDtypeStruct((n_pad, KERNEL_DIM), jnp.float32),
        grid=(n_pad // tn,),
        in_specs=[
            pl.BlockSpec((tn, 4 * EMB_DIM), row),
            pl.BlockSpec((4 * EMB_DIM, KERNEL_DIM), const),
            pl.BlockSpec((1, KERNEL_DIM), const),
            pl.BlockSpec((KERNEL_DIM, KERNEL_DIM), const),
            pl.BlockSpec((1, KERNEL_DIM), const),
            pl.BlockSpec((KERNEL_DIM, KERNEL_DIM), const),
            pl.BlockSpec((1, KERNEL_DIM), const),
        ],
        out_specs=pl.BlockSpec((tn, KERNEL_DIM), row),
        compiler_params=pltpu.CompilerParams(dimension_semantics=("parallel",)),
    )(emb, pk["w0"], pk["b0"], pk["w1"], pk["b1"], pk["w2"], pk["b2"])


# ----------------------------------------------------------------------------
# Kernel 2: edge MLP (all 3 layers fused) + edge_norm1 + one-hot scatter-add.
#           Grid = (core, edge-tile); per-core partial accumulators of shape (n_pad, 48).
# ----------------------------------------------------------------------------
def _edge_kernel(xcat_ref, tgt_ref, w1, b1, w2, b2, g1, be1, gmat,
                 o_ref, acc_ref, *, node_chunk):
    e = pl.program_id(1)

    @pl.when(e == 0)
    def _():
        acc_ref[...] = jnp.zeros_like(acc_ref)

    # edge_mlp, 3 layers at once: K=256 first matmul (N=1536), block-diag second (N=48)
    h = _silu(_mm(xcat_ref[...], w1[...]) + b1[...])          # (te, 1536)
    m = _silu(_mm(h, w2[...]) + b2[...])                      # (te, 48)

    # edge_norm1: per-layer LayerNorm over each 16-wide group via the group-mean matrix
    mu = _mm(m, gmat[...])
    cen = m - mu
    var = _mm(cen * cen, gmat[...])
    m = cen * jax.lax.rsqrt(var + LN_EPS) * g1[...] + be1[...]

    # scatter-add into target nodes: one-hot built per node chunk, fed to the MXU (N=48).
    tgt = tgt_ref[...]                                        # (1, te); padded edges -> n_pad
    te = m.shape[0]
    n_pad = acc_ref.shape[0]
    for c in range(n_pad // node_chunk):
        base = c * node_chunk
        onehot = (jax.lax.broadcasted_iota(jnp.int32, (node_chunk, te), 0) + base
                  == tgt).astype(jnp.float32)
        acc_ref[base:base + node_chunk, :] += _mm(onehot, m)

    @pl.when(e == pl.num_programs(1) - 1)
    def _():
        o_ref[...] = acc_ref[...]


def edge_layers(ek, x_cat, tgt_row, n_pad, te, node_chunk):
    ncores, e_rows, _ = x_cat.shape
    e_steps = e_rows // te
    row = lambda c, e: (c, e, 0)
    tmap = lambda c, e: (c, 0, e)
    c2 = lambda c, e: (0, 0)
    return pl.pallas_call(
        functools.partial(_edge_kernel, node_chunk=node_chunk),
        out_shape=jax.ShapeDtypeStruct((ncores, n_pad, N_KERNELS * M_DIM), jnp.float32),
        grid=(ncores, e_steps),
        in_specs=[
            pl.BlockSpec((None, te, 2 * KERNEL_DIM), row),                         # x_i|x_j
            pl.BlockSpec((None, 1, te), tmap),                                     # targets
            pl.BlockSpec((2 * KERNEL_DIM, N_KERNELS * 4 * KERNEL_DIM), c2),        # W1 (256,1536)
            pl.BlockSpec((1, N_KERNELS * 4 * KERNEL_DIM), c2),                     # b1
            pl.BlockSpec((N_KERNELS * 4 * KERNEL_DIM, N_KERNELS * M_DIM), c2),     # W2 blockdiag
            pl.BlockSpec((1, N_KERNELS * M_DIM), c2),                              # b2
            pl.BlockSpec((1, N_KERNELS * M_DIM), c2),                              # edge_norm1 g
            pl.BlockSpec((1, N_KERNELS * M_DIM), c2),                              # edge_norm1 b
            pl.BlockSpec((N_KERNELS * M_DIM, N_KERNELS * M_DIM), c2),              # group-mean G
        ],
        out_specs=pl.BlockSpec((None, n_pad, N_KERNELS * M_DIM), lambda c, e: (c, 0, 0)),
        scratch_shapes=[pltpu.VMEM((n_pad, N_KERNELS * M_DIM), jnp.float32)],
        compiler_params=pltpu.CompilerParams(
            dimension_semantics=("parallel", "arbitrary")),
    )(x_cat, tgt_row, ek["w1"], ek["b1"], ek["w2"], ek["b2"], ek["g1"], ek["be1"],
      ek["gmat"])


# ----------------------------------------------------------------------------
# Kernel 3: node path (edge_norm2 + node_norm1 + node_mlp + node_norm2 + residual)
#           for all 3 layers in one pass; writes straight into the (N, 384) concat layout.
# ----------------------------------------------------------------------------
def _node_kernel(x_ref, m_ref, gmat, wh, wm, b1, w2, b2, g2, bt2, o_ref):
    x = x_ref[...]
    mu = jnp.mean(x, axis=-1, keepdims=True)
    var = jnp.mean((x - mu) ** 2, axis=-1, keepdims=True)
    xn = (x - mu) * jax.lax.rsqrt(var + LN_EPS)        # node_norm1 stats (affine folded into wh)

    m = m_ref[0]                                       # sum the per-core scatter partials
    for c in range(1, m_ref.shape[0]):
        m = m + m_ref[c]
    gmu = _mm(m, gmat[...])                            # edge_norm2 (group LN over 16-wide groups)
    cen = m - gmu
    gvar = _mm(cen * cen, gmat[...])
    mn = cen * jax.lax.rsqrt(gvar + LN_EPS)            # affine folded into wm

    h = _silu(_mm(xn, wh[...]) + _mm(mn, wm[...]) + b1[...])     # (tn, 768): all 3 layers

    for k in range(N_KERNELS):
        hk = h[:, k * 2 * KERNEL_DIM:(k + 1) * 2 * KERNEL_DIM]   # lane-aligned static slice
        h2 = _mm(hk, w2[k]) + b2[k]                              # node_mlp Linear2 (no act)
        h2 = _ln(h2, g2[k], bt2[k])                              # node_norm2
        o_ref[:, k * KERNEL_DIM:(k + 1) * KERNEL_DIM] = (x + h2).astype(o_ref.dtype)


def node_layers(nk, x, m_partials, tn):
    n_pad = x.shape[0]
    ncores = m_partials.shape[0]
    row = lambda i: (i, 0)
    c2 = lambda i: (0, 0)
    c3 = lambda i: (0, 0, 0)
    return pl.pallas_call(
        _node_kernel,
        out_shape=jax.ShapeDtypeStruct((n_pad, N_KERNELS * KERNEL_DIM), jnp.float32),
        grid=(n_pad // tn,),
        in_specs=[
            pl.BlockSpec((tn, KERNEL_DIM), row),                                   # x
            pl.BlockSpec((ncores, tn, N_KERNELS * M_DIM), lambda i: (0, i, 0)),    # m partials
            pl.BlockSpec((N_KERNELS * M_DIM, N_KERNELS * M_DIM), c2),              # group-mean G
            pl.BlockSpec((KERNEL_DIM, N_KERNELS * 2 * KERNEL_DIM), c2),            # Wh (128,768)
            pl.BlockSpec((N_KERNELS * M_DIM, N_KERNELS * 2 * KERNEL_DIM), c2),     # Wm (48,768)
            pl.BlockSpec((1, N_KERNELS * 2 * KERNEL_DIM), c2),                     # b1
            pl.BlockSpec((N_KERNELS, 2 * KERNEL_DIM, KERNEL_DIM), c3),             # W2 stack
            pl.BlockSpec((N_KERNELS, 1, KERNEL_DIM), c3),                          # b2 stack
            pl.BlockSpec((N_KERNELS, 1, KERNEL_DIM), c3),                          # node_norm2 g
            pl.BlockSpec((N_KERNELS, 1, KERNEL_DIM), c3),                          # node_norm2 b
        ],
        out_specs=pl.BlockSpec((tn, N_KERNELS * KERNEL_DIM), row),
        compiler_params=pltpu.CompilerParams(dimension_semantics=("parallel",)),
    )(x, m_partials, nk["gmat"], nk["wh"], nk["wm"], nk["b1"],
      nk["w2"], nk["b2"], nk["g2"], nk["bt2"])


# ----------------------------------------------------------------------------
# Kernel 4: post_egnn_mlp fused with the per-graph scatter_sum pooling
#           (grid = (core, node-tile); per-core partial pooled sums)
# ----------------------------------------------------------------------------
def _post_pool_kernel(x_ref, bidx_ref, w0, b0, w1, b1, w2, b2, o_ref, acc_ref):
    i = pl.program_id(1)

    @pl.when(i == 0)
    def _():
        acc_ref[...] = jnp.zeros_like(acc_ref)

    h = _silu(_mm(x_ref[...], w0[...]) + b0[...])
    h = _silu(_mm(h, w1[...]) + b1[...])
    h = _silu(_mm(h, w2[...]) + b2[...])

    b_pad = acc_ref.shape[0]
    tn = h.shape[0]
    onehot = (jax.lax.broadcasted_iota(jnp.int32, (b_pad, tn), 0)
              == bidx_ref[...]).astype(jnp.float32)      # padded nodes have bidx == b_pad -> 0
    acc_ref[...] += _mm(onehot, h)

    @pl.when(i == pl.num_programs(1) - 1)
    def _():
        o_ref[...] = acc_ref[...]


def post_mlp_pool(pk, feats_r, batch_row, b_pad, tn):
    ncores, rows_per_core, _ = feats_r.shape
    steps = rows_per_core // tn
    c2 = lambda c, i: (0, 0)
    return pl.pallas_call(
        _post_pool_kernel,
        out_shape=jax.ShapeDtypeStruct((ncores, b_pad, RNN_DIM), jnp.float32),
        grid=(ncores, steps),
        in_specs=[
            pl.BlockSpec((None, tn, N_KERNELS * KERNEL_DIM), lambda c, i: (c, i, 0)),
            pl.BlockSpec((None, 1, tn), lambda c, i: (c, 0, i)),
            pl.BlockSpec((N_KERNELS * KERNEL_DIM, RNN_DIM), c2),
            pl.BlockSpec((1, RNN_DIM), c2),
            pl.BlockSpec((RNN_DIM, RNN_DIM), c2),
            pl.BlockSpec((1, RNN_DIM), c2),
            pl.BlockSpec((RNN_DIM, RNN_DIM), c2),
            pl.BlockSpec((1, RNN_DIM), c2),
        ],
        out_specs=pl.BlockSpec((None, b_pad, RNN_DIM), lambda c, i: (c, 0, 0)),
        scratch_shapes=[pltpu.VMEM((b_pad, RNN_DIM), jnp.float32)],
        compiler_params=pltpu.CompilerParams(
            dimension_semantics=("parallel", "arbitrary")),
    )(feats_r, batch_row, pk["w0"], pk["b0"], pk["w1"], pk["b1"], pk["w2"], pk["b2"])


# ----------------------------------------------------------------------------
# Kernel 5: mol_property_lin + BOTH post_pooling MLPs in one body
#           (heads stacked along N / block-diagonal weights; also sums pooled partials)
# ----------------------------------------------------------------------------
def _pool_mlp_kernel(pooled_ref, props_ref, pw, pb, w0p, w0q, b0, w1, b1, w2, b2, o_ref):
    pooled = pooled_ref[0]
    for c in range(1, pooled_ref.shape[0]):
        pooled = pooled + pooled_ref[c]
    prop = _mm(props_ref[...], pw[...]) + pb[...]                       # mol_property_lin
    y = _silu(_mm(pooled, w0p[...]) + _mm(prop, w0q[...]) + b0[...])    # both heads, N=512
    y = _silu(_mm(y, w1[...]) + b1[...])                                # block-diag Linear2
    y = _mm(y, w2[...]) + b2[...]                                       # block-diag Linear3 (no act)
    o_ref[0] = y[:, :RNN_DIM].astype(o_ref.dtype)
    o_ref[1] = y[:, RNN_DIM:].astype(o_ref.dtype)


def pooling_mlps(pk, pooled, props):
    ncores, b_pad, _ = pooled.shape
    c2 = lambda i: (0, 0)
    c3 = lambda i: (0, 0, 0)
    return pl.pallas_call(
        _pool_mlp_kernel,
        out_shape=jax.ShapeDtypeStruct((2, b_pad, RNN_DIM), jnp.float32),
        grid=(1,),
        in_specs=[
            pl.BlockSpec((ncores, b_pad, RNN_DIM), c3),
            pl.BlockSpec((b_pad, PROP_DIM), c2),
            pl.BlockSpec((PROP_DIM, KERNEL_DIM), c2),
            pl.BlockSpec((1, KERNEL_DIM), c2),
            pl.BlockSpec((RNN_DIM, 2 * RNN_DIM), c2),
            pl.BlockSpec((KERNEL_DIM, 2 * RNN_DIM), c2),
            pl.BlockSpec((1, 2 * RNN_DIM), c2),
            pl.BlockSpec((2 * RNN_DIM, 2 * RNN_DIM), c2),
            pl.BlockSpec((1, 2 * RNN_DIM), c2),
            pl.BlockSpec((2 * RNN_DIM, 2 * RNN_DIM), c2),
            pl.BlockSpec((1, 2 * RNN_DIM), c2),
        ],
        out_specs=pl.BlockSpec((2, b_pad, RNN_DIM), c3),
        compiler_params=pltpu.CompilerParams(dimension_semantics=("arbitrary",)),
    )(pooled, props, pk["pw"], pk["pb"], pk["w0p"], pk["w0q"], pk["b0"],
      pk["w1"], pk["b1"], pk["w2"], pk["b2"])


# ----------------------------------------------------------------------------
# Parameter construction (deterministic, synthetic) + packing for the kernels
# ----------------------------------------------------------------------------
def _xavier(key, din, dout):
    scale = jnp.sqrt(2.0 / (din + dout)).astype(jnp.float32)
    return scale * jax.random.normal(key, (din, dout), jnp.float32)


def _linear(key, din, dout):
    return {"w": _xavier(key, din, dout), "b": jnp.zeros((dout,), jnp.float32)}


def _ln_params(d):
    return {"g": jnp.ones((d,), jnp.float32), "b": jnp.zeros((d,), jnp.float32)}


def init_params(key):
    keys = iter(jax.random.split(key, 64))
    p = {}
    p["atom_emb"] = _xavier(next(keys), 11, EMB_DIM)
    p["ring_emb"] = _xavier(next(keys), 2, EMB_DIM)
    p["hyb_emb"] = _xavier(next(keys), 4, EMB_DIM)
    p["arom_emb"] = _xavier(next(keys), 2, EMB_DIM)

    p["pre_mlp"] = [
        _linear(next(keys), EMB_DIM * 4, KERNEL_DIM),
        _linear(next(keys), KERNEL_DIM, KERNEL_DIM),
        _linear(next(keys), KERNEL_DIM, KERNEL_DIM),
    ]

    p["kernels"] = []
    for _ in range(N_KERNELS):
        p["kernels"].append({
            "edge_l1": _linear(next(keys), KERNEL_DIM * 2, KERNEL_DIM * 4),
            "edge_l2": _linear(next(keys), KERNEL_DIM * 4, M_DIM),
            "edge_norm1": _ln_params(M_DIM),
            "edge_norm2": _ln_params(M_DIM),
            "node_norm1": _ln_params(KERNEL_DIM),
            "node_norm2": _ln_params(KERNEL_DIM),
            "node_l1": _linear(next(keys), KERNEL_DIM + M_DIM, KERNEL_DIM * 2),
            "node_l2": _linear(next(keys), KERNEL_DIM * 2, KERNEL_DIM),
        })

    p["post_mlp"] = [
        _linear(next(keys), KERNEL_DIM * N_KERNELS, RNN_DIM),
        _linear(next(keys), RNN_DIM, RNN_DIM),
        _linear(next(keys), RNN_DIM, RNN_DIM),
    ]
    p["mol_property_lin"] = _linear(next(keys), PROP_DIM, KERNEL_DIM)

    mlp_in = RNN_DIM + KERNEL_DIM
    p["pooling_mlps"] = []
    for _ in range(2):
        p["pooling_mlps"].append([
            _linear(next(keys), mlp_in, RNN_DIM),
            _linear(next(keys), RNN_DIM, RNN_DIM),
            _linear(next(keys), RNN_DIM, RNN_DIM),
        ])
    return p


def _block_diag(blocks):
    rows = sum(b.shape[0] for b in blocks)
    cols = sum(b.shape[1] for b in blocks)
    out = jnp.zeros((rows, cols), jnp.float32)
    r = c = 0
    for b in blocks:
        out = out.at[r:r + b.shape[0], c:c + b.shape[1]].set(b)
        r += b.shape[0]
        c += b.shape[1]
    return out


def _group_mean_matrix(n_groups, group):
    idx = jnp.arange(n_groups * group) // group
    return (idx[:, None] == idx[None, :]).astype(jnp.float32) / float(group)


def pack_params(p):
    """Concat / block-diag the 3 EGNN layers' weights, fold LN affines into node Linear1,
    and stack the 2 pooling heads along N."""
    rb = lambda b: b.reshape(1, -1)
    cat1 = lambda xs: jnp.concatenate(xs, axis=1)
    stack = lambda xs: jnp.stack(xs, axis=0)
    gmat = _group_mean_matrix(N_KERNELS, M_DIM)

    packed = {"atom_emb": p["atom_emb"], "ring_emb": p["ring_emb"],
              "hyb_emb": p["hyb_emb"], "arom_emb": p["arom_emb"]}

    packed["pre"] = {
        "w0": p["pre_mlp"][0]["w"], "b0": rb(p["pre_mlp"][0]["b"]),
        "w1": p["pre_mlp"][1]["w"], "b1": rb(p["pre_mlp"][1]["b"]),
        "w2": p["pre_mlp"][2]["w"], "b2": rb(p["pre_mlp"][2]["b"]),
    }

    ks = p["kernels"]
    packed["edge"] = {
        "w1": cat1([k["edge_l1"]["w"] for k in ks]),                       # (256, 1536)
        "b1": rb(jnp.concatenate([k["edge_l1"]["b"] for k in ks])),        # (1, 1536)
        "w2": _block_diag([k["edge_l2"]["w"] for k in ks]),                # (1536, 48)
        "b2": rb(jnp.concatenate([k["edge_l2"]["b"] for k in ks])),        # (1, 48)
        "g1": rb(jnp.concatenate([k["edge_norm1"]["g"] for k in ks])),
        "be1": rb(jnp.concatenate([k["edge_norm1"]["b"] for k in ks])),
        "gmat": gmat,
    }

    # Fold node_norm1 / edge_norm2 affine params into the first node Linear.
    # hid_k = (xn*g1 + b1n);  hid_k @ Wh = xn @ (g1[:,None]*Wh) + b1n @ Wh   (same for m path)
    wh_list, wm_list, b1_list = [], [], []
    for k in ks:
        wh = k["node_l1"]["w"][:KERNEL_DIM]                 # (128, 256)
        wm = k["node_l1"]["w"][KERNEL_DIM:]                 # (16, 256)
        ng1, nb1 = k["node_norm1"]["g"], k["node_norm1"]["b"]
        eg2, eb2 = k["edge_norm2"]["g"], k["edge_norm2"]["b"]
        wh_list.append(ng1[:, None] * wh)
        wm_list.append(eg2[:, None] * wm)
        b1_list.append(k["node_l1"]["b"] + nb1 @ wh + eb2 @ wm)
    packed["node"] = {
        "gmat": gmat,
        "wh": cat1(wh_list),                                # (128, 768)
        "wm": _block_diag(wm_list),                         # (48, 768)
        "b1": rb(jnp.concatenate(b1_list)),                 # (1, 768)
        "w2": stack([k["node_l2"]["w"] for k in ks]),       # (3, 256, 128)
        "b2": stack([rb(k["node_l2"]["b"]) for k in ks]),
        "g2": stack([rb(k["node_norm2"]["g"]) for k in ks]),
        "bt2": stack([rb(k["node_norm2"]["b"]) for k in ks]),
    }

    packed["post"] = {
        "w0": p["post_mlp"][0]["w"], "b0": rb(p["post_mlp"][0]["b"]),
        "w1": p["post_mlp"][1]["w"], "b1": rb(p["post_mlp"][1]["b"]),
        "w2": p["post_mlp"][2]["w"], "b2": rb(p["post_mlp"][2]["b"]),
    }

    mps = p["pooling_mlps"]
    packed["pool"] = {
        "pw": p["mol_property_lin"]["w"], "pb": rb(p["mol_property_lin"]["b"]),
        "w0p": cat1([mp[0]["w"][:RNN_DIM] for mp in mps]),                 # (256, 512)
        "w0q": cat1([mp[0]["w"][RNN_DIM:] for mp in mps]),                 # (128, 512)
        "b0": rb(jnp.concatenate([mp[0]["b"] for mp in mps])),             # (1, 512)
        "w1": _block_diag([mp[1]["w"] for mp in mps]),                     # (512, 512)
        "b1": rb(jnp.concatenate([mp[1]["b"] for mp in mps])),
        "w2": _block_diag([mp[2]["w"] for mp in mps]),
        "b2": rb(jnp.concatenate([mp[2]["b"] for mp in mps])),
    }
    return packed


# ----------------------------------------------------------------------------
# Forward pass
# ----------------------------------------------------------------------------
def egnn_forward(packed, atomids, is_ring, hyb, arom, edge_index, batch, properties,
                 num_graphs):
    num_nodes = atomids.shape[0]
    num_edges = edge_index.shape[1]

    tn = _tile_rows(num_nodes, MAX_TILE)
    n_pad = _round_up(num_nodes, NCORES * tn)          # divisible by NCORES*tn and NODE_CHUNK
    node_chunk = min(n_pad, NODE_CHUNK)

    per_core_edges = -(-num_edges // NCORES)
    te = _tile_rows(per_core_edges, EDGE_TILE)
    e_steps = max(1, -(-num_edges // (NCORES * te)))
    e_pad = NCORES * te * e_steps

    b_pad = _round_up(max(num_graphs, 8), 8)

    # TODO(synk): embedding lookups and per-edge x_i/x_j gathers are data-dependent
    #             gathers; kept as plain-JAX glue feeding the fused kernels.
    emb = jnp.concatenate([
        jnp.take(packed["atom_emb"], atomids, axis=0),
        jnp.take(packed["ring_emb"], is_ring, axis=0),
        jnp.take(packed["hyb_emb"], hyb, axis=0),
        jnp.take(packed["arom_emb"], arom, axis=0)], axis=1)
    emb = _pad_rows(emb, n_pad)                                           # (n_pad, 256)

    features = pre_mlp(packed["pre"], emb, tn)                            # (n_pad, 128)

    # PyG flow='source_to_target': x_i = x[target], x_j = x[source]
    src = edge_index[0]
    tgt = edge_index[1]
    x_cat = jnp.concatenate([jnp.take(features, tgt, axis=0),
                             jnp.take(features, src, axis=0)], axis=1)    # (E, 256)
    x_cat = _pad_rows(x_cat, e_pad).reshape(NCORES, e_steps * te, 2 * KERNEL_DIM)
    tgt_row = jnp.full((e_pad,), n_pad, jnp.int32).at[:num_edges].set(tgt.astype(jnp.int32))
    tgt_row = tgt_row.reshape(NCORES, 1, e_steps * te)                    # pad -> out of range

    m_partials = edge_layers(packed["edge"], x_cat, tgt_row, n_pad, te, node_chunk)

    feats = node_layers(packed["node"], features, m_partials, tn)         # (n_pad, 384)

    batch_row = jnp.full((n_pad,), b_pad, jnp.int32).at[:num_nodes].set(batch.astype(jnp.int32))
    batch_row = batch_row.reshape(NCORES, 1, n_pad // NCORES)             # pad -> out of range
    feats_r = feats.reshape(NCORES, n_pad // NCORES, N_KERNELS * KERNEL_DIM)
    pooled = post_mlp_pool(packed["post"], feats_r, batch_row, b_pad, tn)  # (NCORES, b_pad, 256)

    props = _pad_rows(properties.astype(jnp.float32), b_pad)              # (b_pad, 6)
    out = pooling_mlps(packed["pool"], pooled, props)                     # (2, b_pad, 256)
    out = out[:, :num_graphs, :]
    return out, jnp.zeros_like(out)


# ----------------------------------------------------------------------------
# Main
# ----------------------------------------------------------------------------
if __name__ == "__main__":
    key = jax.random.PRNGKey(0)
    k_param, k_a, k_r, k_h, k_ar, k_e, k_p = jax.random.split(key, 7)

    N_NODES, N_EDGES, N_GRAPHS = 16, 32, 2

    params = init_params(k_param)
    packed = pack_params(params)

    atomids = jax.random.randint(k_a, (N_NODES,), 0, 11)
    is_ring = jax.random.randint(k_r, (N_NODES,), 0, 2)
    hyb = jax.random.randint(k_h, (N_NODES,), 0, 4)
    arom = jax.random.randint(k_ar, (N_NODES,), 0, 2)
    edge_index = jax.random.randint(k_e, (2, N_EDGES), 0, N_NODES)
    batch = jnp.concatenate([jnp.zeros(N_NODES // 2, jnp.int32),
                             jnp.ones(N_NODES // 2, jnp.int32)])
    properties = jax.random.normal(k_p, (N_GRAPHS, PROP_DIM), jnp.float32)

    forward = jax.jit(egnn_forward, static_argnums=(8,))
    out = forward(packed, atomids, is_ring, hyb, arom, edge_index, batch,
                  properties, N_GRAPHS)
    out = jax.block_until_ready(out)

    assert out[0].shape == (2, N_GRAPHS, RNN_DIM)
    assert out[1].shape == (2, N_GRAPHS, RNN_DIM)
    assert bool(jnp.all(jnp.isfinite(out[0])))
    print("KERNEL_OK")
</pallas_src>

<mosaic_0001>
module attributes {stable_mosaic.version = 11 : i64} {
  func.func @_pre_mlp_kernel(%arg0: i32, %arg1: memref<16x256xf32, #tpu.memory_space<vmem>>, %arg2: memref<256x128xf32, #tpu.memory_space<vmem>>, %arg3: memref<1x128xf32, #tpu.memory_space<vmem>>, %arg4: memref<128x128xf32, #tpu.memory_space<vmem>>, %arg5: memref<1x128xf32, #tpu.memory_space<vmem>>, %arg6: memref<128x128xf32, #tpu.memory_space<vmem>>, %arg7: memref<1x128xf32, #tpu.memory_space<vmem>>, %arg8: memref<16x128xf32, #tpu.memory_space<vmem>>) attributes {dimension_semantics = [#tpu.dimension_semantics<parallel>], iteration_bounds = array<i64: 2>, scalar_prefetch = 0 : i64, scratch_operands = 0 : i64, tpu.core_type = #tpu.core_type<tc>, window_params = [{transform_indices = @transform_0, window_bounds = array<i64: 16, 256>}, {pipeline_mode = #tpu.pipeline_mode<synchronous>, transform_indices = @transform_1, window_bounds = array<i64: 256, 128>}, {pipeline_mode = #tpu.pipeline_mode<synchronous>, transform_indices = @transform_2, window_bounds = array<i64: 1, 128>}, {pipeline_mode = #tpu.pipeline_mode<synchronous>, transform_indices = @transform_3, window_bounds = array<i64: 128, 128>}, {pipeline_mode = #tpu.pipeline_mode<synchronous>, transform_indices = @transform_4, window_bounds = array<i64: 1, 128>}, {pipeline_mode = #tpu.pipeline_mode<synchronous>, transform_indices = @transform_5, window_bounds = array<i64: 128, 128>}, {pipeline_mode = #tpu.pipeline_mode<synchronous>, transform_indices = @transform_6, window_bounds = array<i64: 1, 128>}, {transform_indices = @transform_7, window_bounds = array<i64: 16, 128>}]} {
    %c0 = arith.constant 0 : index
    %c0_0 = arith.constant 0 : index
    %0 = vector.load %arg1[%c0, %c0_0] : memref<16x256xf32, #tpu.memory_space<vmem>>, vector<16x256xf32>
    %c0_1 = arith.constant 0 : index
    %c0_2 = arith.constant 0 : index
    %1 = vector.load %arg2[%c0_1, %c0_2] : memref<256x128xf32, #tpu.memory_space<vmem>>, vector<256x128xf32>
    %cst = arith.constant dense<0.000000e+00> : vector<16x128xf32>
    %2 = tpu.matmul %0, %1, %cst {dimension_numbers = #tpu.dot_dimension_numbers<[1], [0], [0], [1], [0, 0, 1, 1], [], []>} : vector<16x256xf32>, vector<256x128xf32>, vector<16x128xf32> -> vector<16x128xf32>
    %c0_3 = arith.constant 0 : index
    %c0_4 = arith.constant 0 : index
    %3 = vector.load %arg3[%c0_3, %c0_4] : memref<1x128xf32, #tpu.memory_space<vmem>>, vector<1x128xf32>
    %4 = vector.broadcast %3 : vector<1x128xf32> to vector<16x128xf32>
    %5 = arith.addf %2, %4 : vector<16x128xf32>
    %6 = arith.negf %5 : vector<16x128xf32>
    %7 = math.exp %6 : vector<16x128xf32>
    %cst_5 = arith.constant 1.000000e+00 : f32
    %8 = vector.broadcast %cst_5 : f32 to vector<16x128xf32>
    %9 = arith.addf %8, %7 : vector<16x128xf32>
    %10 = arith.divf %8, %9 : vector<16x128xf32>
    %11 = arith.mulf %5, %10 : vector<16x128xf32>
    %c0_6 = arith.constant 0 : index
    %c0_7 = arith.constant 0 : index
    %12 = vector.load %arg4[%c0_6, %c0_7] : memref<128x128xf32, #tpu.memory_space<vmem>>, vector<128x128xf32>
    %cst_8 = arith.constant dense<0.000000e+00> : vector<16x128xf32>
    %13 = tpu.matmul %11, %12, %cst_8 {dimension_numbers = #tpu.dot_dimension_numbers<[1], [0], [0], [1], [0, 0, 1, 1], [], []>} : vector<16x128xf32>, vector<128x128xf32>, vector<16x128xf32> -> vector<16x128xf32>
    %c0_9 = arith.constant 0 : index
    %c0_10 = arith.constant 0 : index
    %14 = vector.load %arg5[%c0_9, %c0_10] : memref<1x128xf32, #tpu.memory_space<vmem>>, vector<1x128xf32>
    %15 = vector.broadcast %14 : vector<1x128xf32> to vector<16x128xf32>
    %16 = arith.addf %13, %15 : vector<16x128xf32>
    %17 = arith.negf %16 : vector<16x128xf32>
    %18 = math.exp %17 : vector<16x128xf32>
    %cst_11 = arith.constant 1.000000e+00 : f32
    %19 = vector.broadcast %cst_11 : f32 to vector<16x128xf32>
    %20 = arith.addf %19, %18 : vector<16x128xf32>
    %21 = arith.divf %19, %20 : vector<16x128xf32>
    %22 = arith.mulf %16, %21 : vector<16x128xf32>
    %c0_12 = arith.constant 0 : index
    %c0_13 = arith.constant 0 : index
    %23 = vector.load %arg6[%c0_12, %c0_13] : memref<128x128xf32, #tpu.memory_space<vmem>>, vector<128x128xf32>
    %cst_14 = arith.constant dense<0.000000e+00> : vector<16x128xf32>
    %24 = tpu.matmul %22, %23, %cst_14 {dimension_numbers = #tpu.dot_dimension_numbers<[1], [0], [0], [1], [0, 0, 1, 1], [], []>} : vector<16x128xf32>, vector<128x128xf32>, vector<16x128xf32> -> vector<16x128xf32>
    %c0_15 = arith.constant 0 : index
    %c0_16 = arith.constant 0 : index
    %25 = vector.load %arg7[%c0_15, %c0_16] : memref<1x128xf32, #tpu.memory_space<vmem>>, vector<1x128xf32>
    %26 = vector.broadcast %25 : vector<1x128xf32> to vector<16x128xf32>
    %27 = arith.addf %24, %26 : vector<16x128xf32>
    %c0_17 = arith.constant 0 : index
    %c0_18 = arith.constant 0 : index
    %28 = vector.load %arg8[%c0_17, %c0_18] : memref<16x128xf32, #tpu.memory_space<vmem>>, vector<16x128xf32>
    tpu.vector_store %arg8[%c0_17, %c0_18], %27 {strides = array<i32>} : memref<16x128xf32, #tpu.memory_space<vmem>>, vector<16x128xf32>,
    return
  }
  func.func @transform_0(%arg0: i32) -> (i32, i32) {
    %c0_i32 = arith.constant 0 : i32
    %c0_i32_0 = arith.constant 0 : i32
    return %arg0, %c0_i32 : i32, i32
  }
  func.func @transform_1(%arg0: i32) -> (i32, i32) {
    %c0_i32 = arith.constant 0 : i32
    %c0_i32_0 = arith.constant 0 : i32
    %c0_i32_1 = arith.constant 0 : i32
    return %c0_i32, %c0_i32_0 : i32, i32
  }
  func.func @transform_2(%arg0: i32) -> (i32, i32) {
    %c0_i32 = arith.constant 0 : i32
    %c0_i32_0 = arith.constant 0 : i32
    %c0_i32_1 = arith.constant 0 : i32
    return %c0_i32, %c0_i32_0 : i32, i32
  }
  func.func @transform_3(%arg0: i32) -> (i32, i32) {
    %c0_i32 = arith.constant 0 : i32
    %c0_i32_0 = arith.constant 0 : i32
    %c0_i32_1 = arith.constant 0 : i32
    return %c0_i32, %c0_i32_0 : i32, i32
  }
  func.func @transform_4(%arg0: i32) -> (i32, i32) {
    %c0_i32 = arith.constant 0 : i32
    %c0_i32_0 = arith.constant 0 : i32
    %c0_i32_1 = arith.constant 0 : i32
    return %c0_i32, %c0_i32_0 : i32, i32
  }
  func.func @transform_5(%arg0: i32) -> (i32, i32) {
    %c0_i32 = arith.constant 0 : i32
    %c0_i32_0 = arith.constant 0 : i32
    %c0_i32_1 = arith.constant 0 : i32
    return %c0_i32, %c0_i32_0 : i32, i32
  }
  func.func @transform_6(%arg0: i32) -> (i32, i32) {
    %c0_i32 = arith.constant 0 : i32
    %c0_i32_0 = arith.constant 0 : i32
    %c0_i32_1 = arith.constant 0 : i32
    return %c0_i32, %c0_i32_0 : i32, i32
  }
  func.func @transform_7(%arg0: i32) -> (i32, i32) {
    %c0_i32 = arith.constant 0 : i32
    %c0_i32_0 = arith.constant 0 : i32
    return %arg0, %c0_i32 : i32, i32
  }
}

module attributes {stable_mosaic.version = 11 : i64} {
  func.func @_node_kernel(%arg0: i32, %arg1: memref<16x128xf32, #tpu.memory_space<vmem>>, %arg2: memref<2x16x48xf32, #tpu.memory_space<vmem>>, %arg3: memref<48x48xf32, #tpu.memory_space<vmem>>, %arg4: memref<128x768xf32, #tpu.memory_space<vmem>>, %arg5: memref<48x768xf32, #tpu.memory_space<vmem>>, %arg6: memref<1x768xf32, #tpu.memory_space<vmem>>, %arg7: memref<3x256x128xf32, #tpu.memory_space<vmem>>, %arg8: memref<3x1x128xf32, #tpu.memory_space<vmem>>, %arg9: memref<3x1x128xf32, #tpu.memory_space<vmem>>, %arg10: memref<3x1x128xf32, #tpu.memory_space<vmem>>, %arg11: memref<16x384xf32, #tpu.memory_space<vmem>>) attributes {dimension_semantics = [#tpu.dimension_semantics<parallel>], iteration_bounds = array<i64: 2>, scalar_prefetch = 0 : i64, scratch_operands = 0 : i64, tpu.core_type = #tpu.core_type<tc>, window_params = [{transform_indices = @transform_0, window_bounds = array<i64: 16, 128>}, {transform_indices = @transform_1, window_bounds = array<i64: 2, 16, 48>}, {pipeline_mode = #tpu.pipeline_mode<synchronous>, transform_indices = @transform_2, window_bounds = array<i64: 48, 48>}, {pipeline_mode = #tpu.pipeline_mode<synchronous>, transform_indices = @transform_3, window_bounds = array<i64: 128, 768>}, {pipeline_mode = #tpu.pipeline_mode<synchronous>, transform_indices = @transform_4, window_bounds = array<i64: 48, 768>}, {pipeline_mode = #tpu.pipeline_mode<synchronous>, transform_indices = @transform_5, window_bounds = array<i64: 1, 768>}, {pipeline_mode = #tpu.pipeline_mode<synchronous>, transform_indices = @transform_6, window_bounds = array<i64: 3, 256, 128>}, {pipeline_mode = #tpu.pipeline_mode<synchronous>, transform_indices = @transform_7, window_bounds = array<i64: 3, 1, 128>}, {pipeline_mode = #tpu.pipeline_mode<synchronous>, transform_indices = @transform_8, window_bounds = array<i64: 3, 1, 128>}, {pipeline_mode = #tpu.pipeline_mode<synchronous>, transform_indices = @transform_9, window_bounds = array<i64: 3, 1, 128>}, {transform_indices = @transform_10, window_bounds = array<i64: 16, 384>}]} {
    %c0 = arith.constant 0 : index
    %c0_0 = arith.constant 0 : index
    %0 = vector.load %arg1[%c0, %c0_0] : memref<16x128xf32, #tpu.memory_space<vmem>>, vector<16x128xf32>
    %cst = arith.constant dense<0.000000e+00> : vector<16xf32>
    %1 = vector.multi_reduction <add>, %0, %cst [1] : vector<16x128xf32> to vector<16xf32>
    %2 = vector.shape_cast %1 : vector<16xf32> to vector<16x1xf32>
    %cst_1 = arith.constant 1.280000e+02 : f32
    %3 = vector.broadcast %cst_1 : f32 to vector<16x1xf32>
    %4 = arith.divf %2, %3 : vector<16x1xf32>
    %5 = vector.broadcast %4 : vector<16x1xf32> to vector<16x128xf32>
    %6 = arith.subf %0, %5 : vector<16x128xf32>
    %7 = arith.mulf %6, %6 : vector<16x128xf32>
    %cst_2 = arith.constant dense<0.000000e+00> : vector<16xf32>
    %8 = vector.multi_reduction <add>, %7, %cst_2 [1] : vector<16x128xf32> to vector<16xf32>
    %9 = vector.shape_cast %8 : vector<16xf32> to vector<16x1xf32>
    %cst_3 = arith.constant 1.280000e+02 : f32
    %10 = vector.broadcast %cst_3 : f32 to vector<16x1xf32>
    %11 = arith.divf %9, %10 : vector<16x1xf32>
    %12 = vector.broadcast %4 : vector<16x1xf32> to vector<16x128xf32>
    %13 = arith.subf %0, %12 : vector<16x128xf32>
    %cst_4 = arith.constant 9.99999974E-6 : f32
    %14 = vector.broadcast %cst_4 : f32 to vector<16x1xf32>
    %15 = arith.addf %11, %14 : vector<16x1xf32>
    %16 = math.rsqrt %15 : vector<16x1xf32>
    %17 = vector.broadcast %16 : vector<16x1xf32> to vector<16x128xf32>
    %18 = arith.mulf %13, %17 : vector<16x128xf32>
    %c0_5 = arith.constant 0 : index
    %c0_6 = arith.constant 0 : index
    %c0_7 = arith.constant 0 : index
    %19 = vector.load %arg2[%c0_5, %c0_6, %c0_7] : memref<2x16x48xf32, #tpu.memory_space<vmem>>, vector<1x16x48xf32>
    %20 = vector.shape_cast %19 : vector<1x16x48xf32> to vector<16x48xf32>
    %c1 = arith.constant 1 : index
    %c0_8 = arith.constant 0 : index
    %c0_9 = arith.constant 0 : index
    %21 = vector.load %arg2[%c1, %c0_8, %c0_9] : memref<2x16x48xf32, #tpu.memory_space<vmem>>, vector<1x16x48xf32>
    %22 = vector.shape_cast %21 : vector<1x16x48xf32> to vector<16x48xf32>
    %23 = arith.addf %20, %22 : vector<16x48xf32>
    %c0_10 = arith.constant 0 : index
    %c0_11 = arith.constant 0 : index
    %24 = vector.load %arg3[%c0_10, %c0_11] : memref<48x48xf32, #tpu.memory_space<vmem>>, vector<48x48xf32>
    %cst_12 = arith.constant dense<0.000000e+00> : vector<16x48xf32>
    %25 = tpu.matmul %23, %24, %cst_12 {dimension_numbers = #tpu.dot_dimension_numbers<[1], [0], [0], [1], [0, 0, 1, 1], [], []>} : vector<16x48xf32>, vector<48x48xf32>, vector<16x48xf32> -> vector<16x48xf32>
    %26 = arith.subf %23, %25 : vector<16x48xf32>
    %27 = arith.mulf %26, %26 : vector<16x48xf32>
    %c0_13 = arith.constant 0 : index
    %c0_14 = arith.constant 0 : index
    %28 = vector.load %arg3[%c0_13, %c0_14] : memref<48x48xf32, #tpu.memory_space<vmem>>, vector<48x48xf32>
    %cst_15 = arith.constant dense<0.000000e+00> : vector<16x48xf32>
    %29 = tpu.matmul %27, %28, %cst_15 {dimension_numbers = #tpu.dot_dimension_numbers<[1], [0], [0], [1], [0, 0, 1, 1], [], []>} : vector<16x48xf32>, vector<48x48xf32>, vector<16x48xf32> -> vector<16x48xf32>
    %cst_16 = arith.constant 9.99999974E-6 : f32
    %30 = vector.broadcast %cst_16 : f32 to vector<16x48xf32>
    %31 = arith.addf %29, %30 : vector<16x48xf32>
    %32 = math.rsqrt %31 : vector<16x48xf32>
    %33 = arith.mulf %26, %32 : vector<16x48xf32>
    %c0_17 = arith.constant 0 : index
    %c0_18 = arith.constant 0 : index
    %34 = vector.load %arg4[%c0_17, %c0_18] : memref<128x768xf32, #tpu.memory_space<vmem>>, vector<128x768xf32>
    %cst_19 = arith.constant dense<0.000000e+00> : vector<16x768xf32>
    %35 = tpu.matmul %18, %34, %cst_19 {dimension_numbers = #tpu.dot_dimension_numbers<[1], [0], [0], [1], [0, 0, 1, 1], [], []>} : vector<16x128xf32>, vector<128x768xf32>, vector<16x768xf32> -> vector<16x768xf32>
    %c0_20 = arith.constant 0 : index
    %c0_21 = arith.constant 0 : index
    %36 = vector.load %arg5[%c0_20, %c0_21] : memref<48x768xf32, #tpu.memory_space<vmem>>, vector<48x768xf32>
    %cst_22 = arith.constant dense<0.000000e+00> : vector<16x768xf32>
    %37 = tpu.matmul %33, %36, %cst_22 {dimension_numbers = #tpu.dot_dimension_numbers<[1], [0], [0], [1], [0, 0, 1, 1], [], []>} : vector<16x48xf32>, vector<48x768xf32>, vector<16x768xf32> -> vector<16x768xf32>
    %38 = arith.addf %35, %37 : vector<16x768xf32>
    %c0_23 = arith.constant 0 : index
    %c0_24 = arith.constant 0 : index
    %39 = vector.load %arg6[%c0_23, %c0_24] : memref<1x768xf32, #tpu.memory_space<vmem>>, vector<1x768xf32>
    %40 = vector.broadcast %39 : vector<1x768xf32> to vector<16x768xf32>
    %41 = arith.addf %38, %40 : vector<16x768xf32>
    %42 = arith.negf %41 : vector<16x768xf32>
    %43 = math.exp %42 : vector<16x768xf32>
    %cst_25 = arith.constant 1.000000e+00 : f32
    %44 = vector.broadcast %cst_25 : f32 to vector<16x768xf32>
    %45 = arith.addf %44, %43 : vector<16x768xf32>
    %46 = arith.divf %44, %45 : vector<16x768xf32>
    %47 = arith.mulf %41, %46 : vector<16x768xf32>
    %48 = vector.extract_strided_slice %47 {offsets = [0, 0], sizes = [16, 256], strides = [1, 1]} : vector<16x768xf32> to vector<16x256xf32>
    %c0_26 = arith.constant 0 : index
    %c0_27 = arith.constant 0 : index
    %c0_28 = arith.constant 0 : index
    %49 = vector.load %arg7[%c0_26, %c0_27, %c0_28] : memref<3x256x128xf32, #tpu.memory_space<vmem>>, vector<1x256x128xf32>
    %50 = vector.shape_cast %49 : vector<1x256x128xf32> to vector<256x128xf32>
    %cst_29 = arith.constant dense<0.000000e+00> : vector<16x128xf32>
    %51 = tpu.matmul %48, %50, %cst_29 {dimension_numbers = #tpu.dot_dimension_numbers<[1], [0], [0], [1], [0, 0, 1, 1], [], []>} : vector<16x256xf32>, vector<256x128xf32>, vector<16x128xf32> -> vector<16x128xf32>
    %c0_30 = arith.constant 0 : index
    %c0_31 = arith.constant 0 : index
    %c0_32 = arith.constant 0 : index
    %52 = vector.load %arg8[%c0_30, %c0_31, %c0_32] : memref<3x1x128xf32, #tpu.memory_space<vmem>>, vector<1x1x128xf32>
    %53 = vector.shape_cast %52 : vector<1x1x128xf32> to vector<1x128xf32>
    %54 = vector.broadcast %53 : vector<1x128xf32> to vector<16x128xf32>
    %55 = arith.addf %51, %54 : vector<16x128xf32>
    %c0_33 = arith.constant 0 : index
    %c0_34 = arith.constant 0 : index
    %c0_35 = arith.constant 0 : index
    %56 = vector.load %arg9[%c0_33, %c0_34, %c0_35] : memref<3x1x128xf32, #tpu.memory_space<vmem>>, vector<1x1x128xf32>
    %57 = vector.shape_cast %56 : vector<1x1x128xf32> to vector<1x128xf32>
    %c0_36 = arith.constant 0 : index
    %c0_37 = arith.constant 0 : index
    %c0_38 = arith.constant 0 : index
    %58 = vector.load %arg10[%c0_36, %c0_37, %c0_38] : memref<3x1x128xf32, #tpu.memory_space<vmem>>, vector<1x1x128xf32>
    %59 = vector.shape_cast %58 : vector<1x1x128xf32> to vector<1x128xf32>
    %cst_39 = arith.constant dense<0.000000e+00> : vector<16xf32>
    %60 = vector.multi_reduction <add>, %55, %cst_39 [1] : vector<16x128xf32> to vector<16xf32>
    %61 = vector.shape_cast %60 : vector<16xf32> to vector<16x1xf32>
    %cst_40 = arith.constant 1.280000e+02 : f32
    %62 = vector.broadcast %cst_40 : f32 to vector<16x1xf32>
    %63 = arith.divf %61, %62 : vector<16x1xf32>
    %64 = vector.broadcast %63 : vector<16x1xf32> to vector<16x128xf32>
    %65 = arith.subf %55, %64 : vector<16x128xf32>
    %66 = arith.mulf %65, %65 : vector<16x128xf32>
    %cst_41 = arith.constant dense<0.000000e+00> : vector<16xf32>
    %67 = vector.multi_reduction <add>, %66, %cst_41 [1] : vector<16x128xf32> to vector<16xf32>
    %68 = vector.shape_cast %67 : vector<16xf32> to vector<16x1xf32>
    %cst_42 = arith.constant 1.280000e+02 : f32
    %69 = vector.broadcast %cst_42 : f32 to vector<16x1xf32>
    %70 = arith.divf %68, %69 : vector<16x1xf32>
    %71 = vector.broadcast %63 : vector<16x1xf32> to vector<16x128xf32>
    %72 = arith.subf %55, %71 : vector<16x128xf32>
    %cst_43 = arith.constant 9.99999974E-6 : f32
    %73 = vector.broadcast %cst_43 : f32 to vector<16x1xf32>
    %74 = arith.addf %70, %73 : vector<16x1xf32>
    %75 = math.rsqrt %74 : vector<16x1xf32>
    %76 = vector.broadcast %75 : vector<16x1xf32> to vector<16x128xf32>
    %77 = arith.mulf %72, %76 : vector<16x128xf32>
    %78 = vector.broadcast %57 : vector<1x128xf32> to vector<16x128xf32>
    %79 = arith.mulf %77, %78 : vector<16x128xf32>
    %80 = vector.broadcast %59 : vector<1x128xf32> to vector<16x128xf32>
    %81 = arith.addf %79, %80 : vector<16x128xf32>
    %82 = arith.addf %0, %81 : vector<16x128xf32>
    %c0_44 = arith.constant 0 : index
    %c0_45 = arith.constant 0 : index
    %83 = vector.load %arg11[%c0_44, %c0_45] : memref<16x384xf32, #tpu.memory_space<vmem>>, vector<16x128xf32>
    tpu.vector_store %arg11[%c0_44, %c0_45], %82 {strides = array<i32>} : memref<16x384xf32, #tpu.memory_space<vmem>>, vector<16x128xf32>,
    %84 = vector.extract_strided_slice %47 {offsets = [0, 256], sizes = [16, 256], strides = [1, 1]} : vector<16x768xf32> to vector<16x256xf32>
    %c1_46 = arith.constant 1 : index
    %c0_47 = arith.constant 0 : index
    %c0_48 = arith.constant 0 : index
    %85 = vector.load %arg7[%c1_46, %c0_47, %c0_48] : memref<3x256x128xf32, #tpu.memory_space<vmem>>, vector<1x256x128xf32>
    %86 = vector.shape_cast %85 : vector<1x256x128xf32> to vector<256x128xf32>
    %cst_49 = arith.constant dense<0.000000e+00> : vector<16x128xf32>
    %87 = tpu.matmul %84, %86, %cst_49 {dimension_numbers = #tpu.dot_dimension_numbers<[1], [0], [0], [1], [0, 0, 1, 1], [], []>} : vector<16x256xf32>, vector<256x128xf32>, vector<16x128xf32> -> vector<16x128xf32>
    %c1_50 = arith.constant 1 : index
    %c0_51 = arith.constant 0 : index
    %c0_52 = arith.constant 0 : index
    %88 = vector.load %arg8[%c1_50, %c0_51, %c0_52] : memref<3x1x128xf32, #tpu.memory_space<vmem>>, vector<1x1x128xf32>
    %89 = vector.shape_cast %88 : vector<1x1x128xf32> to vector<1x128xf32>
    %90 = vector.broadcast %89 : vector<1x128xf32> to vector<16x128xf32>
    %91 = arith.addf %87, %90 : vector<16x128xf32>
    %c1_53 = arith.constant 1 : index
    %c0_54 = arith.constant 0 : index
    %c0_55 = arith.constant 0 : index
    %92 = vector.load %arg9[%c1_53, %c0_54, %c0_55] : memref<3x1x128xf32, #tpu.memory_space<vmem>>, vector<1x1x128xf32>
    %93 = vector.shape_cast %92 : vector<1x1x128xf32> to vector<1x128xf32>
    %c1_56 = arith.constant 1 : index
    %c0_57 = arith.constant 0 : index
    %c0_58 = arith.constant 0 : index
    %94 = vector.load %arg10[%c1_56, %c0_57, %c0_58] : memref<3x1x128xf32, #tpu.memory_space<vmem>>, vector<1x1x128xf32>
    %95 = vector.shape_cast %94 : vector<1x1x128xf32> to vector<1x128xf32>
    %cst_59 = arith.constant dense<0.000000e+00> : vector<16xf32>
    %96 = vector.multi_reduction <add>, %91, %cst_59 [1] : vector<16x128xf32> to vector<16xf32>
    %97 = vector.shape_cast %96 : vector<16xf32> to vector<16x1xf32>
    %cst_60 = arith.constant 1.280000e+02 : f32
    %98 = vector.broadcast %cst_60 : f32 to vector<16x1xf32>
    %99 = arith.divf %97, %98 : vector<16x1xf32>
    %100 = vector.broadcast %99 : vector<16x1xf32> to vector<16x128xf32>
    %101 = arith.subf %91, %100 : vector<16x128xf32>
    %102 = arith.mulf %101, %101 : vector<16x128xf32>
    %cst_61 = arith.constant dense<0.000000e+00> : vector<16xf32>
    %103 = vector.multi_reduction <add>, %102, %cst_61 [1] : vector<16x128xf32> to vector<16xf32>
    %104 = vector.shape_cast %103 : vector<16xf32> to vector<16x1xf32>
    %cst_62 = arith.constant 1.280000e+02 : f32
    %105 = vector.broadcast %cst_62 : f32 to vector<16x1xf32>
    %106 = arith.divf %104, %105 : vector<16x1xf32>
    %107 = vector.broadcast %99 : vector<16x1xf32> to vector<16x128xf32>
    %108 = arith.subf %91, %107 : vector<16x128xf32>
    %cst_63 = arith.constant 9.99999974E-6 : f32
    %109 = vector.broadcast %cst_63 : f32 to vector<16x1xf32>
    %110 = arith.addf %106, %109 : vector<16x1xf32>
    %111 = math.rsqrt %110 : vector<16x1xf32>
    %112 = vector.broadcast %111 : vector<16x1xf32> to vector<16x128xf32>
    %113 = arith.mulf %108, %112 : vector<16x128xf32>
    %114 = vector.broadcast %93 : vector<1x128xf32> to vector<16x128xf32>
    %115 = arith.mulf %113, %114 : vector<16x128xf32>
    %116 = vector.broadcast %95 : vector<1x128xf32> to vector<16x128xf32>
    %117 = arith.addf %115, %116 : vector<16x128xf32>
    %118 = arith.addf %0, %117 : vector<16x128xf32>
    %c0_64 = arith.constant 0 : index
    %c128 = arith.constant 128 : index
    %119 = vector.load %arg11[%c0_64, %c128] : memref<16x384xf32, #tpu.memory_space<vmem>>, vector<16x128xf32>
    tpu.vector_store %arg11[%c0_64, %c128], %118 {strides = array<i32>} : memref<16x384xf32, #tpu.memory_space<vmem>>, vector<16x128xf32>,
    %120 = vector.extract_strided_slice %47 {offsets = [0, 512], sizes = [16, 256], strides = [1, 1]} : vector<16x768xf32> to vector<16x256xf32>
    %c2 = arith.constant 2 : index
    %c0_65 = arith.constant 0 : index
    %c0_66 = arith.constant 0 : index
    %121 = vector.load %arg7[%c2, %c0_65, %c0_66] : memref<3x256x128xf32, #tpu.memory_space<vmem>>, vector<1x256x128xf32>
    %122 = vector.shape_cast %121 : vector<1x256x128xf32> to vector<256x128xf32>
    %cst_67 = arith.constant dense<0.000000e+00> : vector<16x128xf32>
    %123 = tpu.matmul %120, %122, %cst_67 {dimension_numbers = #tpu.dot_dimension_numbers<[1], [0], [0], [1], [0, 0, 1, 1], [], []>} : vector<16x256xf32>, vector<256x128xf32>, vector<16x128xf32> -> vector<16x128xf32>
    %c2_68 = arith.constant 2 : index
    %c0_69 = arith.constant 0 : index
    %c0_70 = arith.constant 0 : index
    %124 = vector.load %arg8[%c2_68, %c0_69, %c0_70] : memref<3x1x128xf32, #tpu.memory_space<vmem>>, vector<1x1x128xf32>
    %125 = vector.shape_cast %124 : vector<1x1x128xf32> to vector<1x128xf32>
    %126 = vector.broadcast %125 : vector<1x128xf32> to vector<16x128xf32>
    %127 = arith.addf %123, %126 : vector<16x128xf32>
    %c2_71 = arith.constant 2 : index
    %c0_72 = arith.constant 0 : index
    %c0_73 = arith.constant 0 : index
    %128 = vector.load %arg9[%c2_71, %c0_72, %c0_73] : memref<3x1x128xf32, #tpu.memory_space<vmem>>, vector<1x1x128xf32>
    %129 = vector.shape_cast %128 : vector<1x1x128xf32> to vector<1x128xf32>
    %c2_74 = arith.constant 2 : index
    %c0_75 = arith.constant 0 : index
    %c0_76 = arith.constant 0 : index
    %130 = vector.load %arg10[%c2_74, %c0_75, %c0_76] : memref<3x1x128xf32, #tpu.memory_space<vmem>>, vector<1x1x128xf32>
    %131 = vector.shape_cast %130 : vector<1x1x128xf32> to vector<1x128xf32>
    %cst_77 = arith.constant dense<0.000000e+00> : vector<16xf32>
    %132 = vector.multi_reduction <add>, %127, %cst_77 [1] : vector<16x128xf32> to vector<16xf32>
    %133 = vector.shape_cast %132 : vector<16xf32> to vector<16x1xf32>
    %cst_78 = arith.constant 1.280000e+02 : f32
    %134 = vector.broadcast %cst_78 : f32 to vector<16x1xf32>
    %135 = arith.divf %133, %134 : vector<16x1xf32>
    %136 = vector.broadcast %135 : vector<16x1xf32> to vector<16x128xf32>
    %137 = arith.subf %127, %136 : vector<16x128xf32>
    %138 = arith.mulf %137, %137 : vector<16x128xf32>
    %cst_79 = arith.constant dense<0.000000e+00> : vector<16xf32>
    %139 = vector.multi_reduction <add>, %138, %cst_79 [1] : vector<16x128xf32> to vector<16xf32>
    %140 = vector.shape_cast %139 : vector<16xf32> to vector<16x1xf32>
    %cst_80 = arith.constant 1.280000e+02 : f32
    %141 = vector.broadcast %cst_80 : f32 to vector<16x1xf32>
    %142 = arith.divf %140, %141 : vector<16x1xf32>
    %143 = vector.broadcast %135 : vector<16x1xf32> to vector<16x128xf32>
    %144 = arith.subf %127, %143 : vector<16x128xf32>
    %cst_81 = arith.constant 9.99999974E-6 : f32
    %145 = vector.broadcast %cst_81 : f32 to vector<16x1xf32>
    %146 = arith.addf %142, %145 : vector<16x1xf32>
    %147 = math.rsqrt %146 : vector<16x1xf32>
    %148 = vector.broadcast %147 : vector<16x1xf32> to vector<16x128xf32>
    %149 = arith.mulf %144, %148 : vector<16x128xf32>
    %150 = vector.broadcast %129 : vector<1x128xf32> to vector<16x128xf32>
    %151 = arith.mulf %149, %150 : vector<16x128xf32>
    %152 = vector.broadcast %131 : vector<1x128xf32> to vector<16x128xf32>
    %153 = arith.addf %151, %152 : vector<16x128xf32>
    %154 = arith.addf %0, %153 : vector<16x128xf32>
    %c0_82 = arith.constant 0 : index
    %c256 = arith.constant 256 : index
    %155 = vector.load %arg11[%c0_82, %c256] : memref<16x384xf32, #tpu.memory_space<vmem>>, vector<16x128xf32>
    tpu.vector_store %arg11[%c0_82, %c256], %154 {strides = array<i32>} : memref<16x384xf32, #tpu.memory_space<vmem>>, vector<16x128xf32>,
    return
  }
  func.func @transform_0(%arg0: i32) -> (i32, i32) {
    %c0_i32 = arith.constant 0 : i32
    %c0_i32_0 = arith.constant 0 : i32
    return %arg0, %c0_i32 : i32, i32
  }
  func.func @transform_1(%arg0: i32) -> (i32, i32, i32) {
    %c0_i32 = arith.constant 0 : i32
    %c0_i32_0 = arith.constant 0 : i32
    %c0_i32_1 = arith.constant 0 : i32
    return %c0_i32, %arg0, %c0_i32_0 : i32, i32, i32
  }
  func.func @transform_2(%arg0: i32) -> (i32, i32) {
    %c0_i32 = arith.constant 0 : i32
    %c0_i32_0 = arith.constant 0 : i32
    %c0_i32_1 = arith.constant 0 : i32
    return %c0_i32, %c0_i32_0 : i32, i32
  }
  func.func @transform_3(%arg0: i32) -> (i32, i32) {
    %c0_i32 = arith.constant 0 : i32
    %c0_i32_0 = arith.constant 0 : i32
    %c0_i32_1 = arith.constant 0 : i32
    return %c0_i32, %c0_i32_0 : i32, i32
  }
  func.func @transform_4(%arg0: i32) -> (i32, i32) {
    %c0_i32 = arith.constant 0 : i32
    %c0_i32_0 = arith.constant 0 : i32
    %c0_i32_1 = arith.constant 0 : i32
    return %c0_i32, %c0_i32_0 : i32, i32
  }
  func.func @transform_5(%arg0: i32) -> (i32, i32) {
    %c0_i32 = arith.constant 0 : i32
    %c0_i32_0 = arith.constant 0 : i32
    %c0_i32_1 = arith.constant 0 : i32
    return %c0_i32, %c0_i32_0 : i32, i32
  }
  func.func @transform_6(%arg0: i32) -> (i32, i32, i32) {
    %c0_i32 = arith.constant 0 : i32
    %c0_i32_0 = arith.constant 0 : i32
    %c0_i32_1 = arith.constant 0 : i32
    %c0_i32_2 = arith.constant 0 : i32
    return %c0_i32, %c0_i32_0, %c0_i32_1 : i32, i32, i32
  }
  func.func @transform_7(%arg0: i32) -> (i32, i32, i32) {
    %c0_i32 = arith.constant 0 : i32
    %c0_i32_0 = arith.constant 0 : i32
    %c0_i32_1 = arith.constant 0 : i32
    %c0_i32_2 = arith.constant 0 : i32
    return %c0_i32, %c0_i32_0, %c0_i32_1 : i32, i32, i32
  }
  func.func @transform_8(%arg0: i32) -> (i32, i32, i32) {
    %c0_i32 = arith.constant 0 : i32
    %c0_i32_0 = arith.constant 0 : i32
    %c0_i32_1 = arith.constant 0 : i32
    %c0_i32_2 = arith.constant 0 : i32
    return %c0_i32, %c0_i32_0, %c0_i32_1 : i32, i32, i32
  }
  func.func @transform_9(%arg0: i32) -> (i32, i32, i32) {
    %c0_i32 = arith.constant 0 : i32
    %c0_i32_0 = arith.constant 0 : i32
    %c0_i32_1 = arith.constant 0 : i32
    %c0_i32_2 = arith.constant 0 : i32
    return %c0_i32, %c0_i32_0, %c0_i32_1 : i32, i32, i32
  }
  func.func @transform_10(%arg0: i32) -> (i32, i32) {
    %c0_i32 = arith.constant 0 : i32
    %c0_i32_0 = arith.constant 0 : i32
    return %arg0, %c0_i32 : i32, i32
  }
}

module attributes {stable_mosaic.version = 11 : i64} {
  func.func @_edge_kernel(%arg0: i32, %arg1: i32, %arg2: memref<1x16x256xf32, #tpu.memory_space<vmem>>, %arg3: memref<1x1x16xi32, #tpu.memory_space<vmem>>, %arg4: memref<256x1536xf32, #tpu.memory_space<vmem>>, %arg5: memref<1x1536xf32, #tpu.memory_space<vmem>>, %arg6: memref<1536x48xf32, #tpu.memory_space<vmem>>, %arg7: memref<1x48xf32, #tpu.memory_space<vmem>>, %arg8: memref<1x48xf32, #tpu.memory_space<vmem>>, %arg9: memref<1x48xf32, #tpu.memory_space<vmem>>, %arg10: memref<48x48xf32, #tpu.memory_space<vmem>>, %arg11: memref<1x32x48xf32, #tpu.memory_space<vmem>>, %arg12: memref<32x48xf32, #tpu.memory_space<vmem>>) attributes {dimension_semantics = [#tpu.dimension_semantics<parallel>, #tpu.dimension_semantics<arbitrary>], iteration_bounds = array<i64: 2, 1>, scalar_prefetch = 0 : i64, scratch_operands = 1 : i64, tpu.core_type = #tpu.core_type<tc>, window_params = [{transform_indices = @transform_0, window_bounds = array<i64: 1, 16, 256>}, {transform_indices = @transform_1, window_bounds = array<i64: 1, 1, 16>}, {pipeline_mode = #tpu.pipeline_mode<synchronous>, transform_indices = @transform_2, window_bounds = array<i64: 256, 1536>}, {pipeline_mode = #tpu.pipeline_mode<synchronous>, transform_indices = @transform_3, window_bounds = array<i64: 1, 1536>}, {pipeline_mode = #tpu.pipeline_mode<synchronous>, transform_indices = @transform_4, window_bounds = array<i64: 1536, 48>}, {pipeline_mode = #tpu.pipeline_mode<synchronous>, transform_indices = @transform_5, window_bounds = array<i64: 1, 48>}, {pipeline_mode = #tpu.pipeline_mode<synchronous>, transform_indices = @transform_6, window_bounds = array<i64: 1, 48>}, {pipeline_mode = #tpu.pipeline_mode<synchronous>, transform_indices = @transform_7, window_bounds = array<i64: 1, 48>}, {pipeline_mode = #tpu.pipeline_mode<synchronous>, transform_indices = @transform_8, window_bounds = array<i64: 48, 48>}, {transform_indices = @transform_9, window_bounds = array<i64: 1, 32, 48>}]} {
    %c0_i32 = arith.constant 0 : i32
    %0 = arith.cmpi eq, %arg1, %c0_i32 : i32
    %1 = arith.extui %0 : i1 to i32
    %c0_i32_0 = arith.constant 0 : i32
    %2 = arith.cmpi ne, %1, %c0_i32_0 : i32
    scf.if %2 {
      %cst_36 = arith.constant 0.000000e+00 : f32
      %59 = vector.broadcast %cst_36 : f32 to vector<32x48xf32>
      %c0_37 = arith.constant 0 : index
      %c0_38 = arith.constant 0 : index
      %60 = vector.load %arg12[%c0_37, %c0_38] : memref<32x48xf32, #tpu.memory_space<vmem>>, vector<32x48xf32>
      tpu.vector_store %arg12[%c0_37, %c0_38], %59 {strides = array<i32>} : memref<32x48xf32, #tpu.memory_space<vmem>>, vector<32x48xf32>,
    } else {
    }
    %c0 = arith.constant 0 : index
    %c0_1 = arith.constant 0 : index
    %c0_2 = arith.constant 0 : index
    %3 = vector.load %arg2[%c0, %c0_1, %c0_2] : memref<1x16x256xf32, #tpu.memory_space<vmem>>, vector<1x16x256xf32>
    %4 = vector.shape_cast %3 : vector<1x16x256xf32> to vector<16x256xf32>
    %c0_3 = arith.constant 0 : index
    %c0_4 = arith.constant 0 : index
    %5 = vector.load %arg4[%c0_3, %c0_4] : memref<256x1536xf32, #tpu.memory_space<vmem>>, vector<256x1536xf32>
    %cst = arith.constant dense<0.000000e+00> : vector<16x1536xf32>
    %6 = tpu.matmul %4, %5, %cst {dimension_numbers = #tpu.dot_dimension_numbers<[1], [0], [0], [1], [0, 0, 1, 1], [], []>} : vector<16x256xf32>, vector<256x1536xf32>, vector<16x1536xf32> -> vector<16x1536xf32>
    %c0_5 = arith.constant 0 : index
    %c0_6 = arith.constant 0 : index
    %7 = vector.load %arg5[%c0_5, %c0_6] : memref<1x1536xf32, #tpu.memory_space<vmem>>, vector<1x1536xf32>
    %8 = vector.broadcast %7 : vector<1x1536xf32> to vector<16x1536xf32>
    %9 = arith.addf %6, %8 : vector<16x1536xf32>
    %10 = arith.negf %9 : vector<16x1536xf32>
    %11 = math.exp %10 : vector<16x1536xf32>
    %cst_7 = arith.constant 1.000000e+00 : f32
    %12 = vector.broadcast %cst_7 : f32 to vector<16x1536xf32>
    %13 = arith.addf %12, %11 : vector<16x1536xf32>
    %14 = arith.divf %12, %13 : vector<16x1536xf32>
    %15 = arith.mulf %9, %14 : vector<16x1536xf32>
    %c0_8 = arith.constant 0 : index
    %c0_9 = arith.constant 0 : index
    %16 = vector.load %arg6[%c0_8, %c0_9] : memref<1536x48xf32, #tpu.memory_space<vmem>>, vector<1536x48xf32>
    %cst_10 = arith.constant dense<0.000000e+00> : vector<16x48xf32>
    %17 = tpu.matmul %15, %16, %cst_10 {dimension_numbers = #tpu.dot_dimension_numbers<[1], [0], [0], [1], [0, 0, 1, 1], [], []>} : vector<16x1536xf32>, vector<1536x48xf32>, vector<16x48xf32> -> vector<16x48xf32>
    %c0_11 = arith.constant 0 : index
    %c0_12 = arith.constant 0 : index
    %18 = vector.load %arg7[%c0_11, %c0_12] : memref<1x48xf32, #tpu.memory_space<vmem>>, vector<1x48xf32>
    %19 = vector.broadcast %18 : vector<1x48xf32> to vector<16x48xf32>
    %20 = arith.addf %17, %19 : vector<16x48xf32>
    %21 = arith.negf %20 : vector<16x48xf32>
    %22 = math.exp %21 : vector<16x48xf32>
    %cst_13 = arith.constant 1.000000e+00 : f32
    %23 = vector.broadcast %cst_13 : f32 to vector<16x48xf32>
    %24 = arith.addf %23, %22 : vector<16x48xf32>
    %25 = arith.divf %23, %24 : vector<16x48xf32>
    %26 = arith.mulf %20, %25 : vector<16x48xf32>
    %c0_14 = arith.constant 0 : index
    %c0_15 = arith.constant 0 : index
    %27 = vector.load %arg10[%c0_14, %c0_15] : memref<48x48xf32, #tpu.memory_space<vmem>>, vector<48x48xf32>
    %cst_16 = arith.constant dense<0.000000e+00> : vector<16x48xf32>
    %28 = tpu.matmul %26, %27, %cst_16 {dimension_numbers = #tpu.dot_dimension_numbers<[1], [0], [0], [1], [0, 0, 1, 1], [], []>} : vector<16x48xf32>, vector<48x48xf32>, vector<16x48xf32> -> vector<16x48xf32>
    %29 = arith.subf %26, %28 : vector<16x48xf32>
    %30 = arith.mulf %29, %29 : vector<16x48xf32>
    %c0_17 = arith.constant 0 : index
    %c0_18 = arith.constant 0 : index
    %31 = vector.load %arg10[%c0_17, %c0_18] : memref<48x48xf32, #tpu.memory_space<vmem>>, vector<48x48xf32>
    %cst_19 = arith.constant dense<0.000000e+00> : vector<16x48xf32>
    %32 = tpu.matmul %30, %31, %cst_19 {dimension_numbers = #tpu.dot_dimension_numbers<[1], [0], [0], [1], [0, 0, 1, 1], [], []>} : vector<16x48xf32>, vector<48x48xf32>, vector<16x48xf32> -> vector<16x48xf32>
    %cst_20 = arith.constant 9.99999974E-6 : f32
    %33 = vector.broadcast %cst_20 : f32 to vector<16x48xf32>
    %34 = arith.addf %32, %33 : vector<16x48xf32>
    %35 = math.rsqrt %34 : vector<16x48xf32>
    %36 = arith.mulf %29, %35 : vector<16x48xf32>
    %c0_21 = arith.constant 0 : index
    %c0_22 = arith.constant 0 : index
    %37 = vector.load %arg8[%c0_21, %c0_22] : memref<1x48xf32, #tpu.memory_space<vmem>>, vector<1x48xf32>
    %38 = vector.broadcast %37 : vector<1x48xf32> to vector<16x48xf32>
    %39 = arith.mulf %36, %38 : vector<16x48xf32>
    %c0_23 = arith.constant 0 : index
    %c0_24 = arith.constant 0 : index
    %40 = vector.load %arg9[%c0_23, %c0_24] : memref<1x48xf32, #tpu.memory_space<vmem>>, vector<1x48xf32>
    %41 = vector.broadcast %40 : vector<1x48xf32> to vector<16x48xf32>
    %42 = arith.addf %39, %41 : vector<16x48xf32>
    %c0_25 = arith.constant 0 : index
    %c0_26 = arith.constant 0 : index
    %c0_27 = arith.constant 0 : index
    %43 = vector.load %arg3[%c0_25, %c0_26, %c0_27] : memref<1x1x16xi32, #tpu.memory_space<vmem>>, vector<1x1x16xi32>
    %44 = vector.shape_cast %43 : vector<1x1x16xi32> to vector<1x16xi32>
    %45 = tpu.iota {dimensions = array<i32: 0>} : vector<32x16xi32>
    %c0_i32_28 = arith.constant 0 : i32
    %46 = vector.broadcast %c0_i32_28 : i32 to vector<32x16xi32>
    %47 = arith.addi %45, %46 : vector<32x16xi32>
    %48 = vector.broadcast %44 : vector<1x16xi32> to vector<32x16xi32>
    %49 = arith.cmpi eq, %47, %48 : vector<32x16xi32>
    %50 = arith.extui %49 : vector<32x16xi1> to vector<32x16xi32>
    %51 = arith.sitofp %50 : vector<32x16xi32> to vector<32x16xf32>
    %c0_29 = arith.constant 0 : index
    %c0_30 = arith.constant 0 : index
    %52 = vector.load %arg12[%c0_29, %c0_30] : memref<32x48xf32, #tpu.memory_space<vmem>>, vector<32x48xf32>
    %cst_31 = arith.constant dense<0.000000e+00> : vector<32x48xf32>
    %53 = tpu.matmul %51, %42, %cst_31 {dimension_numbers = #tpu.dot_dimension_numbers<[1], [0], [0], [1], [0, 0, 1, 1], [], []>} : vector<32x16xf32>, vector<16x48xf32>, vector<32x48xf32> -> vector<32x48xf32>
    %54 = arith.addf %52, %53 : vector<32x48xf32>
    %c0_32 = arith.constant 0 : index
    %c0_33 = arith.constant 0 : index
    %55 = vector.load %arg12[%c0_32, %c0_33] : memref<32x48xf32, #tpu.memory_space<vmem>>, vector<32x48xf32>
    tpu.vector_store %arg12[%c0_32, %c0_33], %54 {strides = array<i32>} : memref<32x48xf32, #tpu.memory_space<vmem>>, vector<32x48xf32>,
    %c0_i32_34 = arith.constant 0 : i32
    %56 = arith.cmpi eq, %arg1, %c0_i32_34 : i32
    %57 = arith.extui %56 : i1 to i32
    %c0_i32_35 = arith.constant 0 : i32
    %58 = arith.cmpi ne, %57, %c0_i32_35 : i32
    scf.if %58 {
      %c0_36 = arith.constant 0 : index
      %c0_37 = arith.constant 0 : index
      %59 = vector.load %arg12[%c0_36, %c0_37] : memref<32x48xf32, #tpu.memory_space<vmem>>, vector<32x48xf32>
      %c0_38 = arith.constant 0 : index
      %c0_39 = arith.constant 0 : index
      %c0_40 = arith.constant 0 : index
      %60 = vector.load %arg11[%c0_38, %c0_39, %c0_40] : memref<1x32x48xf32, #tpu.memory_space<vmem>>, vector<1x32x48xf32>
      %61 = vector.shape_cast %60 : vector<1x32x48xf32> to vector<32x48xf32>
      %62 = vector.shape_cast %59 : vector<32x48xf32> to vector<1x32x48xf32>
      tpu.vector_store %arg11[%c0_38, %c0_39, %c0_40], %62 {strides = array<i32>} : memref<1x32x48xf32, #tpu.memory_space<vmem>>, vector<1x32x48xf32>,
    } else {
    }
    return
  }
  func.func @transform_0(%arg0: i32, %arg1: i32) -> (i32, i32, i32) {
    %c0_i32 = arith.constant 0 : i32
    %c0_i32_0 = arith.constant 0 : i32
    return %arg0, %arg1, %c0_i32 : i32, i32, i32
  }
  func.func @transform_1(%arg0: i32, %arg1: i32) -> (i32, i32, i32) {
    %c0_i32 = arith.constant 0 : i32
    %c0_i32_0 = arith.constant 0 : i32
    return %arg0, %c0_i32, %arg1 : i32, i32, i32
  }
  func.func @transform_2(%arg0: i32, %arg1: i32) -> (i32, i32) {
    %c0_i32 = arith.constant 0 : i32
    %c0_i32_0 = arith.constant 0 : i32
    %c0_i32_1 = arith.constant 0 : i32
    return %c0_i32, %c0_i32_0 : i32, i32
  }
  func.func @transform_3(%arg0: i32, %arg1: i32) -> (i32, i32) {
    %c0_i32 = arith.constant 0 : i32
    %c0_i32_0 = arith.constant 0 : i32
    %c0_i32_1 = arith.constant 0 : i32
    return %c0_i32, %c0_i32_0 : i32, i32
  }
  func.func @transform_4(%arg0: i32, %arg1: i32) -> (i32, i32) {
    %c0_i32 = arith.constant 0 : i32
    %c0_i32_0 = arith.constant 0 : i32
    %c0_i32_1 = arith.constant 0 : i32
    return %c0_i32, %c0_i32_0 : i32, i32
  }
  func.func @transform_5(%arg0: i32, %arg1: i32) -> (i32, i32) {
    %c0_i32 = arith.constant 0 : i32
    %c0_i32_0 = arith.constant 0 : i32
    %c0_i32_1 = arith.constant 0 : i32
    return %c0_i32, %c0_i32_0 : i32, i32
  }
  func.func @transform_6(%arg0: i32, %arg1: i32) -> (i32, i32) {
    %c0_i32 = arith.constant 0 : i32
    %c0_i32_0 = arith.constant 0 : i32
    %c0_i32_1 = arith.constant 0 : i32
    return %c0_i32, %c0_i32_0 : i32, i32
  }
  func.func @transform_7(%arg0: i32, %arg1: i32) -> (i32, i32) {
    %c0_i32 = arith.constant 0 : i32
    %c0_i32_0 = arith.constant 0 : i32
    %c0_i32_1 = arith.constant 0 : i32
    return %c0_i32, %c0_i32_0 : i32, i32
  }
  func.func @transform_8(%arg0: i32, %arg1: i32) -> (i32, i32) {
    %c0_i32 = arith.constant 0 : i32
    %c0_i32_0 = arith.constant 0 : i32
    %c0_i32_1 = arith.constant 0 : i32
    return %c0_i32, %c0_i32_0 : i32, i32
  }
  func.func @transform_9(%arg0: i32, %arg1: i32) -> (i32, i32, i32) {
    %c0_i32 = arith.constant 0 : i32
    %c0_i32_0 = arith.constant 0 : i32
    %c0_i32_1 = arith.constant 0 : i32
    return %arg0, %c0_i32, %c0_i32_0 : i32, i32, i32
  }
}

module attributes {stable_mosaic.version = 11 : i64} {
  func.func @_post_pool_kernel(%arg0: i32, %arg1: i32, %arg2: memref<1x16x384xf32, #tpu.memory_space<vmem>>, %arg3: memref<1x1x16xi32, #tpu.memory_space<vmem>>, %arg4: memref<384x256xf32, #tpu.memory_space<vmem>>, %arg5: memref<1x256xf32, #tpu.memory_space<vmem>>, %arg6: memref<256x256xf32, #tpu.memory_space<vmem>>, %arg7: memref<1x256xf32, #tpu.memory_space<vmem>>, %arg8: memref<256x256xf32, #tpu.memory_space<vmem>>, %arg9: memref<1x256xf32, #tpu.memory_space<vmem>>, %arg10: memref<1x8x256xf32, #tpu.memory_space<vmem>>, %arg11: memref<8x256xf32, #tpu.memory_space<vmem>>) attributes {dimension_semantics = [#tpu.dimension_semantics<parallel>, #tpu.dimension_semantics<arbitrary>], iteration_bounds = array<i64: 2, 1>, scalar_prefetch = 0 : i64, scratch_operands = 1 : i64, tpu.core_type = #tpu.core_type<tc>, window_params = [{transform_indices = @transform_0, window_bounds = array<i64: 1, 16, 384>}, {transform_indices = @transform_1, window_bounds = array<i64: 1, 1, 16>}, {pipeline_mode = #tpu.pipeline_mode<synchronous>, transform_indices = @transform_2, window_bounds = array<i64: 384, 256>}, {pipeline_mode = #tpu.pipeline_mode<synchronous>, transform_indices = @transform_3, window_bounds = array<i64: 1, 256>}, {pipeline_mode = #tpu.pipeline_mode<synchronous>, transform_indices = @transform_4, window_bounds = array<i64: 256, 256>}, {pipeline_mode = #tpu.pipeline_mode<synchronous>, transform_indices = @transform_5, window_bounds = array<i64: 1, 256>}, {pipeline_mode = #tpu.pipeline_mode<synchronous>, transform_indices = @transform_6, window_bounds = array<i64: 256, 256>}, {pipeline_mode = #tpu.pipeline_mode<synchronous>, transform_indices = @transform_7, window_bounds = array<i64: 1, 256>}, {transform_indices = @transform_8, window_bounds = array<i64: 1, 8, 256>}]} {
    %c0_i32 = arith.constant 0 : i32
    %0 = arith.cmpi eq, %arg1, %c0_i32 : i32
    %1 = arith.extui %0 : i1 to i32
    %c0_i32_0 = arith.constant 0 : i32
    %2 = arith.cmpi ne, %1, %c0_i32_0 : i32
    scf.if %2 {
      %cst_30 = arith.constant 0.000000e+00 : f32
      %52 = vector.broadcast %cst_30 : f32 to vector<8x256xf32>
      %c0_31 = arith.constant 0 : index
      %c0_32 = arith.constant 0 : index
      %53 = vector.load %arg11[%c0_31, %c0_32] : memref<8x256xf32, #tpu.memory_space<vmem>>, vector<8x256xf32>
      tpu.vector_store %arg11[%c0_31, %c0_32], %52 {strides = array<i32>} : memref<8x256xf32, #tpu.memory_space<vmem>>, vector<8x256xf32>,
    } else {
    }
    %c0 = arith.constant 0 : index
    %c0_1 = arith.constant 0 : index
    %c0_2 = arith.constant 0 : index
    %3 = vector.load %arg2[%c0, %c0_1, %c0_2] : memref<1x16x384xf32, #tpu.memory_space<vmem>>, vector<1x16x384xf32>
    %4 = vector.shape_cast %3 : vector<1x16x384xf32> to vector<16x384xf32>
    %c0_3 = arith.constant 0 : index
    %c0_4 = arith.constant 0 : index
    %5 = vector.load %arg4[%c0_3, %c0_4] : memref<384x256xf32, #tpu.memory_space<vmem>>, vector<384x256xf32>
    %cst = arith.constant dense<0.000000e+00> : vector<16x256xf32>
    %6 = tpu.matmul %4, %5, %cst {dimension_numbers = #tpu.dot_dimension_numbers<[1], [0], [0], [1], [0, 0, 1, 1], [], []>} : vector<16x384xf32>, vector<384x256xf32>, vector<16x256xf32> -> vector<16x256xf32>
    %c0_5 = arith.constant 0 : index
    %c0_6 = arith.constant 0 : index
    %7 = vector.load %arg5[%c0_5, %c0_6] : memref<1x256xf32, #tpu.memory_space<vmem>>, vector<1x256xf32>
    %8 = vector.broadcast %7 : vector<1x256xf32> to vector<16x256xf32>
    %9 = arith.addf %6, %8 : vector<16x256xf32>
    %10 = arith.negf %9 : vector<16x256xf32>
    %11 = math.exp %10 : vector<16x256xf32>
    %cst_7 = arith.constant 1.000000e+00 : f32
    %12 = vector.broadcast %cst_7 : f32 to vector<16x256xf32>
    %13 = arith.addf %12, %11 : vector<16x256xf32>
    %14 = arith.divf %12, %13 : vector<16x256xf32>
    %15 = arith.mulf %9, %14 : vector<16x256xf32>
    %c0_8 = arith.constant 0 : index
    %c0_9 = arith.constant 0 : index
    %16 = vector.load %arg6[%c0_8, %c0_9] : memref<256x256xf32, #tpu.memory_space<vmem>>, vector<256x256xf32>
    %cst_10 = arith.constant dense<0.000000e+00> : vector<16x256xf32>
    %17 = tpu.matmul %15, %16, %cst_10 {dimension_numbers = #tpu.dot_dimension_numbers<[1], [0], [0], [1], [0, 0, 1, 1], [], []>} : vector<16x256xf32>, vector<256x256xf32>, vector<16x256xf32> -> vector<16x256xf32>
    %c0_11 = arith.constant 0 : index
    %c0_12 = arith.constant 0 : index
    %18 = vector.load %arg7[%c0_11, %c0_12] : memref<1x256xf32, #tpu.memory_space<vmem>>, vector<1x256xf32>
    %19 = vector.broadcast %18 : vector<1x256xf32> to vector<16x256xf32>
    %20 = arith.addf %17, %19 : vector<16x256xf32>
    %21 = arith.negf %20 : vector<16x256xf32>
    %22 = math.exp %21 : vector<16x256xf32>
    %cst_13 = arith.constant 1.000000e+00 : f32
    %23 = vector.broadcast %cst_13 : f32 to vector<16x256xf32>
    %24 = arith.addf %23, %22 : vector<16x256xf32>
    %25 = arith.divf %23, %24 : vector<16x256xf32>
    %26 = arith.mulf %20, %25 : vector<16x256xf32>
    %c0_14 = arith.constant 0 : index
    %c0_15 = arith.constant 0 : index
    %27 = vector.load %arg8[%c0_14, %c0_15] : memref<256x256xf32, #tpu.memory_space<vmem>>, vector<256x256xf32>
    %cst_16 = arith.constant dense<0.000000e+00> : vector<16x256xf32>
    %28 = tpu.matmul %26, %27, %cst_16 {dimension_numbers = #tpu.dot_dimension_numbers<[1], [0], [0], [1], [0, 0, 1, 1], [], []>} : vector<16x256xf32>, vector<256x256xf32>, vector<16x256xf32> -> vector<16x256xf32>
    %c0_17 = arith.constant 0 : index
    %c0_18 = arith.constant 0 : index
    %29 = vector.load %arg9[%c0_17, %c0_18] : memref<1x256xf32, #tpu.memory_space<vmem>>, vector<1x256xf32>
    %30 = vector.broadcast %29 : vector<1x256xf32> to vector<16x256xf32>
    %31 = arith.addf %28, %30 : vector<16x256xf32>
    %32 = arith.negf %31 : vector<16x256xf32>
    %33 = math.exp %32 : vector<16x256xf32>
    %cst_19 = arith.constant 1.000000e+00 : f32
    %34 = vector.broadcast %cst_19 : f32 to vector<16x256xf32>
    %35 = arith.addf %34, %33 : vector<16x256xf32>
    %36 = arith.divf %34, %35 : vector<16x256xf32>
    %37 = arith.mulf %31, %36 : vector<16x256xf32>
    %38 = tpu.iota {dimensions = array<i32: 0>} : vector<8x16xi32>
    %c0_20 = arith.constant 0 : index
    %c0_21 = arith.constant 0 : index
    %c0_22 = arith.constant 0 : index
    %39 = vector.load %arg3[%c0_20, %c0_21, %c0_22] : memref<1x1x16xi32, #tpu.memory_space<vmem>>, vector<1x1x16xi32>
    %40 = vector.shape_cast %39 : vector<1x1x16xi32> to vector<1x16xi32>
    %41 = vector.broadcast %40 : vector<1x16xi32> to vector<8x16xi32>
    %42 = arith.cmpi eq, %38, %41 : vector<8x16xi32>
    %43 = arith.extui %42 : vector<8x16xi1> to vector<8x16xi32>
    %44 = arith.sitofp %43 : vector<8x16xi32> to vector<8x16xf32>
    %c0_23 = arith.constant 0 : index
    %c0_24 = arith.constant 0 : index
    %45 = vector.load %arg11[%c0_23, %c0_24] : memref<8x256xf32, #tpu.memory_space<vmem>>, vector<8x256xf32>
    %cst_25 = arith.constant dense<0.000000e+00> : vector<8x256xf32>
    %46 = tpu.matmul %44, %37, %cst_25 {dimension_numbers = #tpu.dot_dimension_numbers<[1], [0], [0], [1], [0, 0, 1, 1], [], []>} : vector<8x16xf32>, vector<16x256xf32>, vector<8x256xf32> -> vector<8x256xf32>
    %47 = arith.addf %45, %46 : vector<8x256xf32>
    %c0_26 = arith.constant 0 : index
    %c0_27 = arith.constant 0 : index
    %48 = vector.load %arg11[%c0_26, %c0_27] : memref<8x256xf32, #tpu.memory_space<vmem>>, vector<8x256xf32>
    tpu.vector_store %arg11[%c0_26, %c0_27], %47 {strides = array<i32>} : memref<8x256xf32, #tpu.memory_space<vmem>>, vector<8x256xf32>,
    %c0_i32_28 = arith.constant 0 : i32
    %49 = arith.cmpi eq, %arg1, %c0_i32_28 : i32
    %50 = arith.extui %49 : i1 to i32
    %c0_i32_29 = arith.constant 0 : i32
    %51 = arith.cmpi ne, %50, %c0_i32_29 : i32
    scf.if %51 {
      %c0_30 = arith.constant 0 : index
      %c0_31 = arith.constant 0 : index
      %52 = vector.load %arg11[%c0_30, %c0_31] : memref<8x256xf32, #tpu.memory_space<vmem>>, vector<8x256xf32>
      %c0_32 = arith.constant 0 : index
      %c0_33 = arith.constant 0 : index
      %c0_34 = arith.constant 0 : index
      %53 = vector.load %arg10[%c0_32, %c0_33, %c0_34] : memref<1x8x256xf32, #tpu.memory_space<vmem>>, vector<1x8x256xf32>
      %54 = vector.shape_cast %53 : vector<1x8x256xf32> to vector<8x256xf32>
      %55 = vector.shape_cast %52 : vector<8x256xf32> to vector<1x8x256xf32>
      tpu.vector_store %arg10[%c0_32, %c0_33, %c0_34], %55 {strides = array<i32>} : memref<1x8x256xf32, #tpu.memory_space<vmem>>, vector<1x8x256xf32>,
    } else {
    }
    return
  }
  func.func @transform_0(%arg0: i32, %arg1: i32) -> (i32, i32, i32) {
    %c0_i32 = arith.constant 0 : i32
    %c0_i32_0 = arith.constant 0 : i32
    return %arg0, %arg1, %c0_i32 : i32, i32, i32
  }
  func.func @transform_1(%arg0: i32, %arg1: i32) -> (i32, i32, i32) {
    %c0_i32 = arith.constant 0 : i32
    %c0_i32_0 = arith.constant 0 : i32
    return %arg0, %c0_i32, %arg1 : i32, i32, i32
  }
  func.func @transform_2(%arg0: i32, %arg1: i32) -> (i32, i32) {
    %c0_i32 = arith.constant 0 : i32
    %c0_i32_0 = arith.constant 0 : i32
    %c0_i32_1 = arith.constant 0 : i32
    return %c0_i32, %c0_i32_0 : i32, i32
  }
  func.func @transform_3(%arg0: i32, %arg1: i32) -> (i32, i32) {
    %c0_i32 = arith.constant 0 : i32
    %c0_i32_0 = arith.constant 0 : i32
    %c0_i32_1 = arith.constant 0 : i32
    return %c0_i32, %c0_i32_0 : i32, i32
  }
  func.func @transform_4(%arg0: i32, %arg1: i32) -> (i32, i32) {
    %c0_i32 = arith.constant 0 : i32
    %c0_i32_0 = arith.constant 0 : i32
    %c0_i32_1 = arith.constant 0 : i32
    return %c0_i32, %c0_i32_0 : i32, i32
  }
  func.func @transform_5(%arg0: i32, %arg1: i32) -> (i32, i32) {
    %c0_i32 = arith.constant 0 : i32
    %c0_i32_0 = arith.constant 0 : i32
    %c0_i32_1 = arith.constant 0 : i32
    return %c0_i32, %c0_i32_0 : i32, i32
  }
  func.func @transform_6(%arg0: i32, %arg1: i32) -> (i32, i32) {
    %c0_i32 = arith.constant 0 : i32
    %c0_i32_0 = arith.constant 0 : i32
    %c0_i32_1 = arith.constant 0 : i32
    return %c0_i32, %c0_i32_0 : i32, i32
  }
  func.func @transform_7(%arg0: i32, %arg1: i32) -> (i32, i32) {
    %c0_i32 = arith.constant 0 : i32
    %c0_i32_0 = arith.constant 0 : i32
    %c0_i32_1 = arith.constant 0 : i32
    return %c0_i32, %c0_i32_0 : i32, i32
  }
  func.func @transform_8(%arg0: i32, %arg1: i32) -> (i32, i32, i32) {
    %c0_i32 = arith.constant 0 : i32
    %c0_i32_0 = arith.constant 0 : i32
    %c0_i32_1 = arith.constant 0 : i32
    return %arg0, %c0_i32, %c0_i32_0 : i32, i32, i32
  }
}

module attributes {stable_mosaic.version = 11 : i64} {
  func.func @_pool_mlp_kernel(%arg0: i32, %arg1: memref<2x8x256xf32, #tpu.memory_space<vmem>>, %arg2: memref<8x6xf32, #tpu.memory_space<vmem>>, %arg3: memref<6x128xf32, #tpu.memory_space<vmem>>, %arg4: memref<1x128xf32, #tpu.memory_space<vmem>>, %arg5: memref<256x512xf32, #tpu.memory_space<vmem>>, %arg6: memref<128x512xf32, #tpu.memory_space<vmem>>, %arg7: memref<1x512xf32, #tpu.memory_space<vmem>>, %arg8: memref<512x512xf32, #tpu.memory_space<vmem>>, %arg9: memref<1x512xf32, #tpu.memory_space<vmem>>, %arg10: memref<512x512xf32, #tpu.memory_space<vmem>>, %arg11: memref<1x512xf32, #tpu.memory_space<vmem>>, %arg12: memref<2x8x256xf32, #tpu.memory_space<vmem>>) attributes {dimension_semantics = [#tpu.dimension_semantics<arbitrary>], iteration_bounds = array<i64: 1>, scalar_prefetch = 0 : i64, scratch_operands = 0 : i64, tpu.core_type = #tpu.core_type<tc>, window_params = [{pipeline_mode = #tpu.pipeline_mode<synchronous>, transform_indices = @transform_0, window_bounds = array<i64: 2, 8, 256>}, {pipeline_mode = #tpu.pipeline_mode<synchronous>, transform_indices = @transform_1, window_bounds = array<i64: 8, 6>}, {pipeline_mode = #tpu.pipeline_mode<synchronous>, transform_indices = @transform_2, window_bounds = array<i64: 6, 128>}, {pipeline_mode = #tpu.pipeline_mode<synchronous>, transform_indices = @transform_3, window_bounds = array<i64: 1, 128>}, {pipeline_mode = #tpu.pipeline_mode<synchronous>, transform_indices = @transform_4, window_bounds = array<i64: 256, 512>}, {pipeline_mode = #tpu.pipeline_mode<synchronous>, transform_indices = @transform_5, window_bounds = array<i64: 128, 512>}, {pipeline_mode = #tpu.pipeline_mode<synchronous>, transform_indices = @transform_6, window_bounds = array<i64: 1, 512>}, {pipeline_mode = #tpu.pipeline_mode<synchronous>, transform_indices = @transform_7, window_bounds = array<i64: 512, 512>}, {pipeline_mode = #tpu.pipeline_mode<synchronous>, transform_indices = @transform_8, window_bounds = array<i64: 1, 512>}, {pipeline_mode = #tpu.pipeline_mode<synchronous>, transform_indices = @transform_9, window_bounds = array<i64: 512, 512>}, {pipeline_mode = #tpu.pipeline_mode<synchronous>, transform_indices = @transform_10, window_bounds = array<i64: 1, 512>}, {pipeline_mode = #tpu.pipeline_mode<synchronous>, transform_indices = @transform_11, window_bounds = array<i64: 2, 8, 256>}]} {
    %c0 = arith.constant 0 : index
    %c0_0 = arith.constant 0 : index
    %c0_1 = arith.constant 0 : index
    %0 = vector.load %arg1[%c0, %c0_0, %c0_1] : memref<2x8x256xf32, #tpu.memory_space<vmem>>, vector<1x8x256xf32>
    %1 = vector.shape_cast %0 : vector<1x8x256xf32> to vector<8x256xf32>
    %c1 = arith.constant 1 : index
    %c0_2 = arith.constant 0 : index
    %c0_3 = arith.constant 0 : index
    %2 = vector.load %arg1[%c1, %c0_2, %c0_3] : memref<2x8x256xf32, #tpu.memory_space<vmem>>, vector<1x8x256xf32>
    %3 = vector.shape_cast %2 : vector<1x8x256xf32> to vector<8x256xf32>
    %4 = arith.addf %1, %3 : vector<8x256xf32>
    %c0_4 = arith.constant 0 : index
    %c0_5 = arith.constant 0 : index
    %5 = vector.load %arg2[%c0_4, %c0_5] : memref<8x6xf32, #tpu.memory_space<vmem>>, vector<8x6xf32>
    %c0_6 = arith.constant 0 : index
    %c0_7 = arith.constant 0 : index
    %6 = vector.load %arg3[%c0_6, %c0_7] : memref<6x128xf32, #tpu.memory_space<vmem>>, vector<6x128xf32>
    %cst = arith.constant dense<0.000000e+00> : vector<8x128xf32>
    %7 = tpu.matmul %5, %6, %cst {dimension_numbers = #tpu.dot_dimension_numbers<[1], [0], [0], [1], [0, 0, 1, 1], [], []>} : vector<8x6xf32>, vector<6x128xf32>, vector<8x128xf32> -> vector<8x128xf32>
    %c0_8 = arith.constant 0 : index
    %c0_9 = arith.constant 0 : index
    %8 = vector.load %arg4[%c0_8, %c0_9] : memref<1x128xf32, #tpu.memory_space<vmem>>, vector<1x128xf32>
    %9 = vector.broadcast %8 : vector<1x128xf32> to vector<8x128xf32>
    %10 = arith.addf %7, %9 : vector<8x128xf32>
    %c0_10 = arith.constant 0 : index
    %c0_11 = arith.constant 0 : index
    %11 = vector.load %arg5[%c0_10, %c0_11] : memref<256x512xf32, #tpu.memory_space<vmem>>, vector<256x512xf32>
    %cst_12 = arith.constant dense<0.000000e+00> : vector<8x512xf32>
    %12 = tpu.matmul %4, %11, %cst_12 {dimension_numbers = #tpu.dot_dimension_numbers<[1], [0], [0], [1], [0, 0, 1, 1], [], []>} : vector<8x256xf32>, vector<256x512xf32>, vector<8x512xf32> -> vector<8x512xf32>
    %c0_13 = arith.constant 0 : index
    %c0_14 = arith.constant 0 : index
    %13 = vector.load %arg6[%c0_13, %c0_14] : memref<128x512xf32, #tpu.memory_space<vmem>>, vector<128x512xf32>
    %cst_15 = arith.constant dense<0.000000e+00> : vector<8x512xf32>
    %14 = tpu.matmul %10, %13, %cst_15 {dimension_numbers = #tpu.dot_dimension_numbers<[1], [0], [0], [1], [0, 0, 1, 1], [], []>} : vector<8x128xf32>, vector<128x512xf32>, vector<8x512xf32> -> vector<8x512xf32>
    %15 = arith.addf %12, %14 : vector<8x512xf32>
    %c0_16 = arith.constant 0 : index
    %c0_17 = arith.constant 0 : index
    %16 = vector.load %arg7[%c0_16, %c0_17] : memref<1x512xf32, #tpu.memory_space<vmem>>, vector<1x512xf32>
    %17 = vector.broadcast %16 : vector<1x512xf32> to vector<8x512xf32>
    %18 = arith.addf %15, %17 : vector<8x512xf32>
    %19 = arith.negf %18 : vector<8x512xf32>
    %20 = math.exp %19 : vector<8x512xf32>
    %cst_18 = arith.constant 1.000000e+00 : f32
    %21 = vector.broadcast %cst_18 : f32 to vector<8x512xf32>
    %22 = arith.addf %21, %20 : vector<8x512xf32>
    %23 = arith.divf %21, %22 : vector<8x512xf32>
    %24 = arith.mulf %18, %23 : vector<8x512xf32>
    %c0_19 = arith.constant 0 : index
    %c0_20 = arith.constant 0 : index
    %25 = vector.load %arg8[%c0_19, %c0_20] : memref<512x512xf32, #tpu.memory_space<vmem>>, vector<512x512xf32>
    %cst_21 = arith.constant dense<0.000000e+00> : vector<8x512xf32>
    %26 = tpu.matmul %24, %25, %cst_21 {dimension_numbers = #tpu.dot_dimension_numbers<[1], [0], [0], [1], [0, 0, 1, 1], [], []>} : vector<8x512xf32>, vector<512x512xf32>, vector<8x512xf32> -> vector<8x512xf32>
    %c0_22 = arith.constant 0 : index
    %c0_23 = arith.constant 0 : index
    %27 = vector.load %arg9[%c0_22, %c0_23] : memref<1x512xf32, #tpu.memory_space<vmem>>, vector<1x512xf32>
    %28 = vector.broadcast %27 : vector<1x512xf32> to vector<8x512xf32>
    %29 = arith.addf %26, %28 : vector<8x512xf32>
    %30 = arith.negf %29 : vector<8x512xf32>
    %31 = math.exp %30 : vector<8x512xf32>
    %cst_24 = arith.constant 1.000000e+00 : f32
    %32 = vector.broadcast %cst_24 : f32 to vector<8x512xf32>
    %33 = arith.addf %32, %31 : vector<8x512xf32>
    %34 = arith.divf %32, %33 : vector<8x512xf32>
    %35 = arith.mulf %29, %34 : vector<8x512xf32>
    %c0_25 = arith.constant 0 : index
    %c0_26 = arith.constant 0 : index
    %36 = vector.load %arg10[%c0_25, %c0_26] : memref<512x512xf32, #tpu.memory_space<vmem>>, vector<512x512xf32>
    %cst_27 = arith.constant dense<0.000000e+00> : vector<8x512xf32>
    %37 = tpu.matmul %35, %36, %cst_27 {dimension_numbers = #tpu.dot_dimension_numbers<[1], [0], [0], [1], [0, 0, 1, 1], [], []>} : vector<8x512xf32>, vector<512x512xf32>, vector<8x512xf32> -> vector<8x512xf32>
    %c0_28 = arith.constant 0 : index
    %c0_29 = arith.constant 0 : index
    %38 = vector.load %arg11[%c0_28, %c0_29] : memref<1x512xf32, #tpu.memory_space<vmem>>, vector<1x512xf32>
    %39 = vector.broadcast %38 : vector<1x512xf32> to vector<8x512xf32>
    %40 = arith.addf %37, %39 : vector<8x512xf32>
    %41 = vector.extract_strided_slice %40 {offsets = [0, 0], sizes = [8, 256], strides = [1, 1]} : vector<8x512xf32> to vector<8x256xf32>
    %c0_30 = arith.constant 0 : index
    %c0_31 = arith.constant 0 : index
    %c0_32 = arith.constant 0 : index
    %42 = vector.load %arg12[%c0_30, %c0_31, %c0_32] : memref<2x8x256xf32, #tpu.memory_space<vmem>>, vector<1x8x256xf32>
    %43 = vector.shape_cast %42 : vector<1x8x256xf32> to vector<8x256xf32>
    %44 = vector.shape_cast %41 : vector<8x256xf32> to vector<1x8x256xf32>
    tpu.vector_store %arg12[%c0_30, %c0_31, %c0_32], %44 {strides = array<i32>} : memref<2x8x256xf32, #tpu.memory_space<vmem>>, vector<1x8x256xf32>,
    %45 = vector.extract_strided_slice %40 {offsets = [0, 256], sizes = [8, 256], strides = [1, 1]} : vector<8x512xf32> to vector<8x256xf32>
    %c1_33 = arith.constant 1 : index
    %c0_34 = arith.constant 0 : index
    %c0_35 = arith.constant 0 : index
    %46 = vector.load %arg12[%c1_33, %c0_34, %c0_35] : memref<2x8x256xf32, #tpu.memory_space<vmem>>, vector<1x8x256xf32>
    %47 = vector.shape_cast %46 : vector<1x8x256xf32> to vector<8x256xf32>
    %48 = vector.shape_cast %45 : vector<8x256xf32> to vector<1x8x256xf32>
    tpu.vector_store %arg12[%c1_33, %c0_34, %c0_35], %48 {strides = array<i32>} : memref<2x8x256xf32, #tpu.memory_space<vmem>>, vector<1x8x256xf32>,
    return
  }
  func.func @transform_0(%arg0: i32) -> (i32, i32, i32) {
    %c0_i32 = arith.constant 0 : i32
    %c0_i32_0 = arith.constant 0 : i32
    %c0_i32_1 = arith.constant 0 : i32
    %c0_i32_2 = arith.constant 0 : i32
    return %c0_i32, %c0_i32_0, %c0_i32_1 : i32, i32, i32
  }
  func.func @transform_1(%arg0: i32) -> (i32, i32) {
    %c0_i32 = arith.constant 0 : i32
    %c0_i32_0 = arith.constant 0 : i32
    %c0_i32_1 = arith.constant 0 : i32
    return %c0_i32, %c0_i32_0 : i32, i32
  }
  func.func @transform_2(%arg0: i32) -> (i32, i32) {
    %c0_i32 = arith.constant 0 : i32
    %c0_i32_0 = arith.constant 0 : i32
    %c0_i32_1 = arith.constant 0 : i32
    return %c0_i32, %c0_i32_0 : i32, i32
  }
  func.func @transform_3(%arg0: i32) -> (i32, i32) {
    %c0_i32 = arith.constant 0 : i32
    %c0_i32_0 = arith.constant 0 : i32
    %c0_i32_1 = arith.constant 0 : i32
    return %c0_i32, %c0_i32_0 : i32, i32
  }
  func.func @transform_4(%arg0: i32) -> (i32, i32) {
    %c0_i32 = arith.constant 0 : i32
    %c0_i32_0 = arith.constant 0 : i32
    %c0_i32_1 = arith.constant 0 : i32
    return %c0_i32, %c0_i32_0 : i32, i32
  }
  func.func @transform_5(%arg0: i32) -> (i32, i32) {
    %c0_i32 = arith.constant 0 : i32
    %c0_i32_0 = arith.constant 0 : i32
    %c0_i32_1 = arith.constant 0 : i32
    return %c0_i32, %c0_i32_0 : i32, i32
  }
  func.func @transform_6(%arg0: i32) -> (i32, i32) {
    %c0_i32 = arith.constant 0 : i32
    %c0_i32_0 = arith.constant 0 : i32
    %c0_i32_1 = arith.constant 0 : i32
    return %c0_i32, %c0_i32_0 : i32, i32
  }
  func.func @transform_7(%arg0: i32) -> (i32, i32) {
    %c0_i32 = arith.constant 0 : i32
    %c0_i32_0 = arith.constant 0 : i32
    %c0_i32_1 = arith.constant 0 : i32
    return %c0_i32, %c0_i32_0 : i32, i32
  }
  func.func @transform_8(%arg0: i32) -> (i32, i32) {
    %c0_i32 = arith.constant 0 : i32
    %c0_i32_0 = arith.constant 0 : i32
    %c0_i32_1 = arith.constant 0 : i32
    return %c0_i32, %c0_i32_0 : i32, i32
  }
  func.func @transform_9(%arg0: i32) -> (i32, i32) {
    %c0_i32 = arith.constant 0 : i32
    %c0_i32_0 = arith.constant 0 : i32
    %c0_i32_1 = arith.constant 0 : i32
    return %c0_i32, %c0_i32_0 : i32, i32
  }
  func.func @transform_10(%arg0: i32) -> (i32, i32) {
    %c0_i32 = arith.constant 0 : i32
    %c0_i32_0 = arith.constant 0 : i32
    %c0_i32_1 = arith.constant 0 : i32
    return %c0_i32, %c0_i32_0 : i32, i32
  }
  func.func @transform_11(%arg0: i32) -> (i32, i32, i32) {
    %c0_i32 = arith.constant 0 : i32
    %c0_i32_0 = arith.constant 0 : i32
    %c0_i32_1 = arith.constant 0 : i32
    %c0_i32_2 = arith.constant 0 : i32
    return %c0_i32, %c0_i32_0, %c0_i32_1 : i32, i32, i32
  }
}

</mosaic_0001>

<bundles_post_ra>
// kernel: egnn_forward.5
= control target key start
LH: loop header
LB: loop body
LE: loop exit
PB: predicated region body
PF: predicated region fallthrough
CT: control target
= control target key end

     0   :  { %12 = vsyncpa [#allocation3], 0  ;;  %s1640_s0 = inlined_call_operand.vmem [shape: f32[32,256], index: 0, kind: input, shape index: {}]   ;;  %s1641_s1 = inlined_call_operand.hbm [shape: f32[256,128], index: 1, kind: input, shape index: {}]   ;;  %s1642_s2 = inlined_call_operand.hbm [shape: f32[1,128], index: 2, kind: input, shape index: {}]   ;;  %s1643_s3 = inlined_call_operand.hbm [shape: f32[128,128], index: 3, kind: input, shape index: {}]   ;;  %s1644_s4 = inlined_call_operand.hbm [shape: f32[1,128], index: 4, kind: input, shape index: {}]   ;;  %s1645_s5 = inlined_call_operand.hbm [shape: f32[128,128], index: 5, kind: input, shape index: {}]   ;;  %s1646_s6 = inlined_call_operand.hbm [shape: f32[1,128], index: 6, kind: input, shape index: {}]   ;;  %s1647_s7 = inlined_call_operand.vmem [shape: f32[32,128], index: 7, kind: output, shape index: {}]  }
   0x1   :  { %13 = vsyncpa [#allocation5], 0 }
   0x2   :  { %14 = vsyncpa [#allocation8], 0 }
   0x3   :  { %15 = vsyncpa [#allocation11], 0  ;;  %s1426_s24 = smov 0  }
   0x4 LB: > { %s1378_s25 = smov [#allocation4]   ;;  %s827_s27 = sadd.s32 4294967295, %s1376_s24   ;;  %s1376_s24 = sphi %s1426_s24, %s21_s24  }
   0x5   : > { %s230_s26 = sshll.u32 %s1378_s25, 4  ;;  %p829_p0 = scmp.ge.s32.totalorder %s1376_s24, 1  ;;  %s1440_s26 = int_to_ptr.vmem [resolvable:$true] %s230_s26 }
   0x6   : > { %p204_p1 = scmp.lt.s32.totalorder %s1376_s24, 3  ;;  %p1436_p2 = scmp.eq.s32.totalorder %s827_s27, 0 }
   0x7   : > { %s1379_s30 = smov [#allocation7]   ;;  %s1380_s9 = smov [#allocation2]  }
   0x8   : > { %s1651_s28 = scalar_select %p1436_p2, 1, 0 }
   0x9   : > { %p1442_p3 = pnand %p829_p0, %p204_p1  ;;  %s254_s8 = sshll.u32 %s1379_s30, 4  ;;  %s1448_s8 = int_to_ptr.vmem [resolvable:$true] %s254_s8 }
   0xa   : > { %s216_s10 = sshll.u32 %s1380_s9, 4  ;;  %s1381_s12 = smov [#allocation6]   ;;  %s1456_s10 = int_to_ptr.vmem [resolvable:$true] %s216_s10 }
   0xb   : > { %s1652_s29 = scalar_select %p1442_p3, 1, 0 }
   0xc   : > { %p1123_p4 = pneg %p1442_p3  ;;  %s1458_s13 = sshll.u32 %s1381_s12, 4  ;;  %s241_s13 = int_to_ptr.vmem [resolvable:$true] %s1458_s13 }
   0xd   : > { %s1186_s16 = scalar_lea.hbm %s1642_s2, 16 }
   0xe   : > { %p1452_p5 = pnand %p1436_p2, %p1123_p4  ;;  %p1187_p6 = scmp.ne.s32.totalorder %s1642_s2, %s1186_s16 }
   0xf   : > { %p1193_p10 = scmp.lt.u32.totalorder %s1186_s16, %s1642_s2 }
  0x10   : > { %p1468_p7 = pneg %p1452_p5 }
  0x12   : > { %p1189_p8 = pnand %p1468_p7, %p1187_p6 }
  0x14   : > { %p1190_p9 = pneg %p1189_p8 }
  0x16   : > { %p1195_p11 = pnand %p1193_p10, %p1190_p9 }
  0x18   : > { %1198 = shalt.err (!%p1195_p11)
}
  0x19   : > { %s1199_s22 = scalar_lea.vmem %s1440_s26, 16  ;;  %s1206_s23 = scalar_lea.vmem %s1440_s26, 32 }
  0x1a   : > { %p1200_p12 = scmp.ne.s32.totalorder %s1440_s26, %s1199_s22  ;;  %p1207_p1 = scmp.lt.s32.totalorder %s1440_s26, %s1440_s26 }
  0x1b   : > { %p1208_p4 = scmp.lt.s32.totalorder %s1206_s23, %s1199_s22 }
  0x1c   : > { %p1202_p13 = pnand %p1200_p12, %p1468_p7 }
  0x1d   : > { %p1209_p6 = por %p1208_p4, %p1207_p1 }
  0x1e   : > { %p1203_p0 = pneg %p1202_p13 }
  0x20   : > { %p1210_p8 = pnand %p1209_p6, %p1203_p0 }
  0x22   : > { %1213 = shalt.err (!%p1210_p8)
}
  0x23   : > { %1129 = dma.hbm_to_vmem [thread:$0]  (!%p1452_p5), %s1642_s2, 16, %s1440_s26, [#allocation5]  }
  0x24   : > { %s1214_s14 = scalar_lea.hbm %s1644_s4, 16 }
  0x25   : > { %p1215_p9 = scmp.ne.s32.totalorder %s1644_s4, %s1214_s14  ;;  %p1221_p12 = scmp.lt.u32.totalorder %s1214_s14, %s1644_s4 }
  0x27   : > { %p1217_p10 = pnand %p1215_p9, %p1468_p7 }
  0x29   : > { %p1218_p11 = pneg %p1217_p10 }
  0x2b   : > { %p1223_p13 = pnand %p1221_p12, %p1218_p11 }
  0x2d   : > { %1226 = shalt.err (!%p1223_p13)
}
  0x2e   : > { %s1227_s26 = scalar_lea.vmem %s1448_s8, 16  ;;  %s1234_s20 = scalar_lea.vmem %s1448_s8, 32 }
  0x2f   : > { %p1228_p0 = scmp.ne.s32.totalorder %s1448_s8, %s1227_s26  ;;  %p1235_p6 = scmp.lt.s32.totalorder %s1448_s8, %s1448_s8 }
  0x30   : > { %p1236_p8 = scmp.lt.s32.totalorder %s1234_s20, %s1227_s26 }
  0x31   : > { %p1230_p1 = pnand %p1228_p0, %p1468_p7 }
  0x32   : > { %p1237_p9 = por %p1236_p8, %p1235_p6 }
  0x33   : > { %p1231_p4 = pneg %p1230_p1 }
  0x35   : > { %p1238_p10 = pnand %p1237_p9, %p1231_p4 }
  0x37   : > { %1241 = shalt.err (!%p1238_p10)
}
  0x38   : > { %1135 = dma.hbm_to_vmem [thread:$0]  (!%p1452_p5), %s1644_s4, 16, %s1448_s8, [#allocation8]  }
  0x39   : > { %s1242_s30 = scalar_lea.hbm %s1641_s1, 4096 }
  0x3a   : > { %p1243_p11 = scmp.ne.s32.totalorder %s1641_s1, %s1242_s30  ;;  %p1249_p0 = scmp.lt.u32.totalorder %s1242_s30, %s1641_s1 }
  0x3c   : > { %p1245_p12 = pnand %p1243_p11, %p1468_p7 }
  0x3e   : > { %p1246_p13 = pneg %p1245_p12 }
  0x40   : > { %p1251_p1 = pnand %p1249_p0, %p1246_p13 }
  0x42   : > { %1254 = shalt.err (!%p1251_p1)
}
  0x43   : > { %s1255_s8 = scalar_lea.vmem %s1456_s10, 4096  ;;  %p1263_p9 = scmp.lt.s32.totalorder %s1456_s10, %s1456_s10 }
  0x44   : > { %p1256_p4 = scmp.ne.s32.totalorder %s1456_s10, %s1255_s8  ;;  %p1264_p10 = scmp.lt.s32.totalorder %s1255_s8, %s1255_s8 }
  0x46   : > { %p1258_p6 = pnand %p1256_p4, %p1468_p7  ;;  %p1265_p11 = por %p1264_p10, %p1263_p9 }
  0x48   : > { %p1259_p8 = pneg %p1258_p6 }
  0x4a   : > { %p1266_p12 = pnand %p1265_p11, %p1259_p8 }
  0x4c   : > { %1269 = shalt.err (!%p1266_p12)
}
  0x4d   : > { %s1382_s16 = smov 128   ;;  %s1383_s17 = smov 8  }
  0x4e   : > { %1126 = dma.hbm_to_vmem [thread:$0]  (!%p1452_p5), %s1641_s1, 4096, %s1456_s10, [#allocation3], %s1382_s16, %s1382_s16, %s1383_s17  }
  0x4f   : > { %s1270_s22 = scalar_lea.hbm %s1643_s3, 2048 }
  0x50   : > { %p1271_p13 = scmp.ne.s32.totalorder %s1643_s3, %s1270_s22  ;;  %p1277_p4 = scmp.lt.u32.totalorder %s1270_s22, %s1643_s3 }
  0x52   : > { %p1273_p0 = pnand %p1271_p13, %p1468_p7 }
  0x54   : > { %p1274_p1 = pneg %p1273_p0 }
  0x56   : > { %p1279_p6 = pnand %p1277_p4, %p1274_p1 }
  0x58   : > { %1282 = shalt.err (!%p1279_p6)
}
  0x59   : > { %s1283_s12 = scalar_lea.vmem %s241_s13, 2048  ;;  %p1291_p11 = scmp.lt.s32.totalorder %s241_s13, %s241_s13 }
  0x5a   : > { %p1284_p8 = scmp.ne.s32.totalorder %s241_s13, %s1283_s12  ;;  %p1292_p12 = scmp.lt.s32.totalorder %s1283_s12, %s1283_s12 }
  0x5c   : > { %p1286_p9 = pnand %p1284_p8, %p1468_p7  ;;  %p1293_p2 = por %p1292_p12, %p1291_p11 }
  0x5e   : > { %p1287_p10 = pneg %p1286_p9 }
  0x60   : > { %p1294_p3 = pnand %p1293_p2, %p1287_p10 }
  0x62   : > { %1297 = shalt.err (!%p1294_p3)
}
  0x63   : > { %1132 = dma.hbm_to_vmem [thread:$0]  (!%p1452_p5), %s1643_s3, 2048, %s241_s13, [#allocation5], %s1382_s16, %s1382_s16, %s1383_s17  }
  0x64   : > { %s1384_s15 = smov [#allocation9]   ;;  %s1385_s18 = smov [#allocation10]  }
  0x65   : > { %s264_s8 = sshll.u32 %s1384_s15, 4  ;;  %s278_s26 = sshll.u32 %s1385_s18, 4  ;;  %s265_s8 = int_to_ptr.vmem [resolvable:$true] %s264_s8  ;;  %s279_s26 = int_to_ptr.vmem [resolvable:$true] %s278_s26 }
  0x66   : > { %s1298_s22 = scalar_lea.hbm %s1645_s5, 2048 }
  0x67   : > { %p1299_p2 = scmp.ne.s32.totalorder %s1645_s5, %s1298_s22  ;;  %p1305_p0 = scmp.lt.u32.totalorder %s1298_s22, %s1645_s5 }
  0x69   : > { %p1301_p3 = pnand %p1299_p2, %p1468_p7 }
  0x6b   : > { %p1302_p13 = pneg %p1301_p3 }
  0x6d   : > { %p1307_p1 = pnand %p1305_p0, %p1302_p13 }
  0x6f   : > { %1310 = shalt.err (!%p1307_p1)
}
  0x70   : > { %s1311_s13 = scalar_lea.vmem %s265_s8, 2048  ;;  %p1319_p9 = scmp.lt.s32.totalorder %s265_s8, %s265_s8 }
  0x71   : > { %p1312_p4 = scmp.ne.s32.totalorder %s265_s8, %s1311_s13  ;;  %p1320_p10 = scmp.lt.s32.totalorder %s1311_s13, %s1311_s13 }
  0x73   : > { %p1314_p6 = pnand %p1312_p4, %p1468_p7  ;;  %p1321_p11 = por %p1320_p10, %p1319_p9 }
  0x75   : > { %p1315_p8 = pneg %p1314_p6 }
  0x77   : > { %p1322_p12 = pnand %p1321_p11, %p1315_p8 }
  0x79   : > { %1325 = shalt.err (!%p1322_p12)
}
  0x7a   : > { %1138 = dma.hbm_to_vmem [thread:$0]  (!%p1452_p5), %s1645_s5, 2048, %s265_s8, [#allocation8], %s1382_s16, %s1382_s16, %s1383_s17  }
  0x7b   : > { %s1326_s18 = scalar_lea.hbm %s1646_s6, 16 }
  0x7c   : > { %p1327_p2 = scmp.ne.s32.totalorder %s1646_s6, %s1326_s18  ;;  %p1333_p0 = scmp.lt.u32.totalorder %s1326_s18, %s1646_s6 }
  0x7e   : > { %p1329_p3 = pnand %p1327_p2, %p1468_p7 }
  0x80   : > { %p1330_p13 = pneg %p1329_p3 }
  0x82   : > { %p1335_p1 = pnand %p1333_p0, %p1330_p13 }
  0x84   : > { %1338 = shalt.err (!%p1335_p1)
}
  0x85   : > { %s1339_s25 = scalar_lea.vmem %s279_s26, 16  ;;  %s1346_s16 = scalar_lea.vmem %s279_s26, 32 }
  0x86   : > { %p1340_p4 = scmp.ne.s32.totalorder %s279_s26, %s1339_s25  ;;  %p1347_p9 = scmp.lt.s32.totalorder %s279_s26, %s279_s26 }
  0x87   : > { %p1348_p10 = scmp.lt.s32.totalorder %s1346_s16, %s1339_s25 }
  0x88   : > { %p1342_p6 = pnand %p1340_p4, %p1468_p7 }
  0x89   : > { %p1349_p11 = por %p1348_p10, %p1347_p9 }
  0x8a   : > { %p1343_p8 = pneg %p1342_p6 }
  0x8c   : > { %p1350_p12 = pnand %p1349_p11, %p1343_p8 }
  0x8e   : > { %1353 = shalt.err (!%p1350_p12)
}
  0x8f   : > { %1141 = dma.hbm_to_vmem [thread:$0]  (!%p1452_p5), %s1646_s6, 16, %s279_s26, [#allocation11]  }
  0x90   : > { %p1655_p2 = scmp.ne.s32.totalorder %s1652_s29, 0 }
  0x91   : > { %p1656_p3 = scmp.ne.s32.totalorder (!%p1655_p2), %s1651_s28, 0 }
  0x92   : > { %301 = sbr.rel (%p1655_p2) target bundleno = 904 (0x388), region = 48 }
  0x99   : > { %1359 = dma.done.wait (%p1656_p3), [#allocation3], 4096  }
  0x9a   : > { %1361 = vsyncadd (%p1656_p3), [#allocation3], 4294963200 }
  0x9b   : > { %1363 = dma.done.wait (%p1656_p3), [#allocation5], 2064  }
  0x9c   : > { %1365 = vsyncadd (%p1656_p3), [#allocation5], 4294965232 }
  0x9d   : > { %1367 = dma.done.wait (%p1656_p3), [#allocation8], 2064  }
  0x9e   : > { %1369 = vsyncadd (%p1656_p3), [#allocation8], 4294965232 }
  0x9f   : > { %1371 = dma.done.wait (%p1656_p3), [#allocation11], 16  }
  0xa0   : > { %1373 = vsyncadd (%p1656_p3), [#allocation11], 4294967280  ;;  %s844_s29 = sshll.u32 %s827_s27, 1  ;;  %v387_v0 = vld [vmem:[#allocation2 + $0x80] sm:$0xff]  ;;  %v388_v1 = vld [vmem:[#allocation2 + $0x88] sm:$0xff] }
  0xa1   : > { %p355_p5 = scmp.lt.s32.totalorder %s844_s29, 3  ;;  %v371_v2 = vld [vmem:[#allocation2] sm:$0xff]  ;;  %v1003_v3 = vpack.c.bf16 %v388_v1, %v387_v0  ;;  %v372_v4 = vld [vmem:[#allocation2 + $0x8] sm:$0xff]  ;;  %v389_v5 = vld [vmem:[#allocation2 + $0x90] sm:$0xff] }
  0xa2   : > { %v390_v6 = vld [vmem:[#allocation2 + $0x98] sm:$0xff]  ;;  %v1005_v7 = vpack.c.bf16 %v372_v4, %v371_v2  ;;  %v373_v9 = vld [vmem:[#allocation2 + $0x10] sm:$0xff]  ;;  %v391_v11 = vld [vmem:[#allocation2 + $0xa0] sm:$0xff] }
  0xa3   : > { %s1658_s29 = smov (!%p355_p5, %s844_s29), 3  ;;  %v1007_v8 = vpack.c.bf16 %v390_v6, %v389_v5  ;;  %v374_v10 = vld [vmem:[#allocation2 + $0x18] sm:$0xff]  ;;  %1004 = vmatprep.subr.bf16.mxu0 %v1003_v3  ;;  %v392_v12 = vld [vmem:[#allocation2 + $0xa8] sm:$0xff]  ;;  %v375_v15 = vld [vmem:[#allocation2 + $0x20] sm:$0xff] }
  0xa4   : > { %1006 = vmatpush3.bf16.msra.mxu0 %v1005_v7  ;;  %v1009_v13 = vpack.c.bf16 %v374_v10, %v373_v9  ;;  %s858_s27 = sshll.u32 %s1658_s29, 4  ;;  %v1011_v14 = vpack.c.bf16 %v392_v12, %v391_v11  ;;  %v376_v16 = vld [vmem:[#allocation2 + $0x28] sm:$0xff]  ;;  %v393_v17 = vld [vmem:[#allocation2 + $0xb0] sm:$0xff]  ;;  %v394_v18 = vld [vmem:[#allocation2 + $0xb8] sm:$0xff]  ;;  %s848_s26 = sshll.u32 %s1658_s29, 3 }
  0xa5   : > { %1008 = vmatprep.subr.bf16.mxu0 %v1007_v8  ;;  %s1627_s19 = scalar_lea.vmem %s1640_s0, %s858_s27  ;;  %v1013_v19 = vpack.c.bf16 %v376_v16, %v375_v15  ;;  %v1015_v20 = vpack.c.bf16 %v394_v18, %v393_v17  ;;  %v377_v21 = vld [vmem:[#allocation2 + $0x30] sm:$0xff]  ;;  %v378_v22 = vld [vmem:[#allocation2 + $0x38] sm:$0xff]  ;;  %v395_v23 = vld [vmem:[#allocation2 + $0xc0] sm:$0xff]  ;;  %s365_s13 = scalar_lea.vmem %s1647_s7, %s848_s26 }
  0xa6   : > { %v396_v24 = vld [vmem:[#allocation2 + $0xc8] sm:$0xff]  ;;  %v1017_v26 = vpack.c.bf16 %v378_v22, %v377_v21  ;;  %v379_v28 = vld [vmem:[#allocation2 + $0x40] sm:$0xff]  ;;  %v397_v30 = vld [vmem:[#allocation2 + $0xd0] sm:$0xff] }
  0xa7   : > { %v368_v25 = vld [vmem:[%s1627_s19 + $0x8] sm:$0xff]  ;;  %v1019_v27 = vpack.c.bf16 %v396_v24, %v395_v23  ;;  %v398_v31 = vld [vmem:[#allocation2 + $0xd8] sm:$0xff]  ;;  %v381_v34 = vld [vmem:[#allocation2 + $0x50] sm:$0xff] }
  0xa8   : > { %1010 = vmatpush3.bf16.msra.mxu0 %v1009_v13  ;;  %474 = vmatprep.mubr.f32.mxu0 %v368_v25  ;;  %v380_v29 = vld [vmem:[#allocation2 + $0x48] sm:$0xff]  ;;  %v1023_v33 = vpack.c.bf16 %v398_v31, %v397_v30  ;;  %v382_v35 = vld [vmem:[#allocation2 + $0x58] sm:$0xff]  ;;  %v399_v36 = vld [vmem:[#allocation2 + $0xe0] sm:$0xff] }
  0xa9   : > { %1012 = vmatprep.subr.bf16.mxu0 %v1011_v14  ;;  %v1021_v32 = vpack.c.bf16 %v380_v29, %v379_v28  ;;  %v400_v37 = vld [vmem:[#allocation2 + $0xe8] sm:$0xff]  ;;  %v1025_v38 = vpack.c.bf16 %v382_v35, %v381_v34  ;;  %v383_v40 = vld [vmem:[#allocation2 + $0x60] sm:$0xff]  ;;  %v401_v42 = vld [vmem:[#allocation2 + $0xf0] sm:$0xff] }
  0xaa   : > { %v1027_v39 = vpack.c.bf16 %v400_v37, %v399_v36  ;;  %v384_v41 = vld [vmem:[#allocation2 + $0x68] sm:$0xff]  ;;  %v402_v43 = vld [vmem:[#allocation2 + $0xf8] sm:$0xff]  ;;  %v385_v46 = vld [vmem:[#allocation2 + $0x70] sm:$0xff] }
  0xab   : > { %v1029_v44 = vpack.c.bf16 %v384_v41, %v383_v40  ;;  %v1031_v45 = vpack.c.bf16 %v402_v43, %v401_v42  ;;  %v386_v47 = vld [vmem:[#allocation2 + $0x78] sm:$0xff]  ;;  %v367_v49 = vld [vmem:[%s1627_s19] sm:$0xff]  ;;  %v369_v51 = vld [vmem:[%s1627_s19 + $0x10] sm:$0xff] }
  0xac   : > { %1014 = vmatpush3.bf16.msra.mxu0 %v1013_v19  ;;  %v1033_v48 = vpack.c.bf16 %v386_v47, %v385_v46  ;;  %v370_v50 = vld [vmem:[%s1627_s19 + $0x18] sm:$0xff]  ;;  %v499_v52 = vld [vmem:[#allocation6] sm:$0xff]  ;;  %v500_v53 = vld [vmem:[#allocation6 + $0x8] sm:$0xff] }
  0xad   : > { %1016 = vmatprep.subr.bf16.mxu0 %v1015_v20  ;;  %v1035_v54 = vpack.c.bf16 %v500_v53, %v499_v52  ;;  %v501_v55 = vld [vmem:[#allocation6 + $0x10] sm:$0xff]  ;;  %v502_v56 = vld [vmem:[#allocation6 + $0x18] sm:$0xff]  ;;  %v503_v58 = vld [vmem:[#allocation6 + $0x20] sm:$0xff] }
  0xae   : > { %v1039_v57 = vpack.c.bf16 %v502_v56, %v501_v55  ;;  %v504_v59 = vld [vmem:[#allocation6 + $0x28] sm:$0xff]  ;;  %v505_v61 = vld [vmem:[#allocation6 + $0x30] sm:$0xff]  ;;  %v506_v62 = vld [vmem:[#allocation6 + $0x38] sm:$0xff] }
  0xaf   : > { %1036 = vmatprep.subr.bf16.mxu1 %v1035_v54  ;;  %v1043_v60 = vpack.c.bf16 %v504_v59, %v503_v58  ;;  %v1047_v63 = vpack.c.bf16 %v506_v62, %v505_v61  ;;  %v507_v0 = vld [vmem:[#allocation6 + $0x40] sm:$0xff]  ;;  %v508_v1 = vld [vmem:[#allocation6 + $0x48] sm:$0xff]  ;;  %v509_v3 = vld [vmem:[#allocation6 + $0x50] sm:$0xff] }
  0xb0   : > { %1018 = vmatpush3.bf16.msra.mxu0 %v1017_v26  ;;  %1038 = vmatpush3.bf16.msra.mxu1 %v1035_v54  ;;  %v1051_v2 = vpack.c.bf16 %v508_v1, %v507_v0  ;;  %v510_v4 = vld [vmem:[#allocation6 + $0x58] sm:$0xff]  ;;  %v511_v6 = vld [vmem:[#allocation6 + $0x60] sm:$0xff]  ;;  %v512_v7 = vld [vmem:[#allocation6 + $0x68] sm:$0xff] }
  0xb1   : > { %1020 = vmatprep.subr.bf16.mxu0 %v1019_v27  ;;  %1040 = vmatprep.subr.bf16.mxu1 %v1039_v57  ;;  %v1055_v5 = vpack.c.bf16 %v510_v4, %v509_v3  ;;  %v513_v8 = vld [vmem:[#allocation6 + $0x70] sm:$0xff]  ;;  %v1059_v9 = vpack.c.bf16 %v512_v7, %v511_v6  ;;  %v514_v10 = vld [vmem:[#allocation6 + $0x78] sm:$0xff]  ;;  %v611_v31 = vld [vmem:[#allocation9] sm:$0xff] }
  0xb2   : > { %v1063_v11 = vpack.c.bf16 %v514_v10, %v513_v8  ;;  %v849_v14 = vld [vmem:[#allocation4] ss:$0 sm:$0xff]  ;;  %v613_v34 = vld [vmem:[#allocation9 + $0x10] sm:$0xff]  ;;  %v615_v37 = vld [vmem:[#allocation9 + $0x20] sm:$0xff] }
  0xb3   : > { %v614_v35 = vld [vmem:[#allocation9 + $0x18] sm:$0xff]  ;;  %v617_v40 = vld [vmem:[#allocation9 + $0x30] sm:$0xff]  ;;  %v619_v43 = vld [vmem:[#allocation9 + $0x40] sm:$0xff] }
  0xb4   : > { %1022 = vmatpush3.bf16.msra.mxu0 %v1021_v32  ;;  %1042 = vmatpush3.bf16.msra.mxu1 %v1039_v57  ;;  %v612_v32 = vld [vmem:[#allocation9 + $0x8] sm:$0xff]  ;;  %v1071_v36 = vpack.c.bf16 %v614_v35, %v613_v34  ;;  %v618_v41 = vld [vmem:[#allocation9 + $0x38] sm:$0xff]  ;;  %v621_v46 = vld [vmem:[#allocation9 + $0x50] sm:$0xff] }
  0xb5   : > { %1024 = vmatprep.subr.bf16.mxu0 %v1023_v33  ;;  %1044 = vmatprep.subr.bf16.mxu1 %v1043_v60  ;;  %v1067_v33 = vpack.c.bf16 %v612_v32, %v611_v31  ;;  %v1079_v42 = vpack.c.bf16 %v618_v41, %v617_v40  ;;  %v622_v47 = vld [vmem:[#allocation9 + $0x58] sm:$0xff]  ;;  %v625_v52 = vld [vmem:[#allocation9 + $0x70] sm:$0xff]  ;;  %v855_v6 = vld [vmem:[#allocation10] ss:$0 sm:$0xff] }
  0xb6   : > { %v626_v53 = vld [vmem:[#allocation9 + $0x78] sm:$0xff] }
  0xb7   : > { %v1095_v54 = vpack.c.bf16 %v626_v53, %v625_v52  ;;  %v852_v55 = vld [vmem:[#allocation7] ss:$0 sm:$0xff] }
  0xb8   : > { %1026 = vmatpush3.bf16.msra.mxu0 %v1025_v38  ;;  %1046 = vmatpush3.bf16.msra.mxu1 %v1043_v60  ;;  %v616_v38 = vld [vmem:[#allocation9 + $0x28] sm:$0xff] }
  0xb9   : > { %1028 = vmatprep.subr.bf16.mxu0 %v1027_v39  ;;  %1048 = vmatprep.subr.bf16.mxu1 %v1047_v63  ;;  %v1075_v39 = vpack.c.bf16 %v616_v38, %v615_v37 }
  0xbc   : > { %1030 = vmatpush3.bf16.msra.mxu0 %v1029_v44  ;;  %1050 = vmatpush3.bf16.msra.mxu1 %v1047_v63  ;;  %v620_v44 = vld [vmem:[#allocation9 + $0x48] sm:$0xff] }
  0xbd   : > { %1032 = vmatprep.subr.bf16.mxu0 %v1031_v45  ;;  %1052 = vmatprep.subr.bf16.mxu1 %v1051_v2  ;;  %v1083_v45 = vpack.c.bf16 %v620_v44, %v619_v43 }
  0xc0   : > { %1034 = vmatpush3.bf16.msra.mxu0 %v1033_v48  ;;  %1054 = vmatpush3.bf16.msra.mxu1 %v1051_v2  ;;  %v1087_v48 = vpack.c.bf16 %v622_v47, %v621_v46 }
  0xc1   : > { %1056 = vmatprep.subr.bf16.mxu1 %v1055_v5  ;;  %1068 = vmatprep.subr.bf16.mxu0 %v1067_v33 }
  0xc3   : > { %475 = vmatmul.mubr.f32.vlgmr.msra.gmra.mrb[0].mxu0 %v367_v49  ;;  %v623_v49 = vld [vmem:[#allocation9 + $0x60] sm:$0xff] }
  0xc4   : > { %479 = vmatprep.mubr.f32.mxu0 %v370_v50  ;;  %1058 = vmatpush3.bf16.msra.mxu1 %v1055_v5  ;;  %v624_v50 = vld [vmem:[#allocation9 + $0x68] sm:$0xff] }
  0xc5   : > { %1060 = vmatprep.subr.bf16.mxu1 %v1059_v9  ;;  %1070 = vmatpush3.bf16.msra.mxu0 %v1067_v33 }
  0xc6   : > { %1072 = vmatprep.subr.bf16.mxu0 %v1071_v36 }
  0xc7   : > { %480 = vmatmul.mubr.f32.gmra.mrb[2].mxu0 %v369_v51  ;;  %v1091_v51 = vpack.c.bf16 %v624_v50, %v623_v49 }
  0xc8   : > { %1062 = vmatpush3.bf16.msra.mxu1 %v1059_v9 }
  0xc9   : > { %1064 = vmatprep.subr.bf16.mxu1 %v1063_v11  ;;  %1074 = vmatpush3.bf16.msra.mxu0 %v1071_v36 }
  0xca   : > { %1076 = vmatprep.subr.bf16.mxu0 %v1075_v39 }
  0xcc   : > { %1066 = vmatpush3.bf16.msra.mxu1 %v1063_v11 }
  0xcd   : > { %1078 = vmatpush3.bf16.msra.mxu0 %v1075_v39 }
  0xce   : > { %1080 = vmatprep.subr.bf16.mxu0 %v1079_v42 }
  0xd1   : > { %1082 = vmatpush3.bf16.msra.mxu0 %v1079_v42 }
  0xd2   : > { %1084 = vmatprep.subr.bf16.mxu0 %v1083_v45 }
  0xd5   : > { %1086 = vmatpush3.bf16.msra.mxu0 %v1083_v45 }
  0xd6   : > { %1088 = vmatprep.subr.bf16.mxu0 %v1087_v48 }
  0xd9   : > { %1090 = vmatpush3.bf16.msra.mxu0 %v1087_v48 }
  0xda   : > { %1092 = vmatprep.subr.bf16.mxu0 %v1091_v51 }
  0xdd   : > { %1094 = vmatpush3.bf16.msra.mxu0 %v1091_v51 }
  0xde   : > { %1096 = vmatprep.subr.bf16.mxu0 %v1095_v54 }
  0xe1   : > { %1098 = vmatpush3.bf16.msra.mxu0 %v1095_v54 }
 0x196   : > { %v891_v12 = vpop.f32.mrb[0].mxu0 }
 0x197   : > { %v892_v13 = vpop.f32.mrb[1].mxu0 }
 0x198   : > { %v893_v15 = vadd.f32 %v892_v13, %v891_v12 }
 0x19a   : > { %v894_v16 = vpop.f32.mrb[2].mxu0  ;;  %v477_v17 = vadd.f32 %v893_v15, %v849_v14 }
 0x19b   : > { %v895_v18 = vpop.f32.mrb[3].mxu0 }
 0x19c   : > { %v896_v19 = vadd.f32 %v895_v18, %v894_v16  ;;  %v850_v20 = vmul.f32 -1.442695, %v477_v17 }
 0x19e   : > { %v482_v21 = vadd.f32 %v896_v19, %v849_v14  ;;  %1170 = vpow2.f32 %v850_v20 }
 0x1a0   : > { %v851_v22 = vmul.f32 -1.442695, %v482_v21 }
 0x1a2   : > { %1172 = vpow2.f32 %v851_v22 }
 0x1a8   : > { %v1171_v23 = vpop.eup %1170 }
 0x1a9   : > { %v491_v24 = vadd.f32 1.0, %v1171_v23 }
 0x1ab   : > { %1174 = vrcp.f32 %v491_v24 }
 0x1ac   : > { %v1173_v25 = vpop.eup %1172 }
 0x1ad   : > { %v492_v26 = vadd.f32 1.0, %v1173_v25 }
 0x1af   : > { %1176 = vrcp.f32 %v492_v26 }
 0x1b5   : > { %v1175_v27 = vpop.eup %1174 }
 0x1b6   : > { %v497_v28 = vmul.f32 %v1175_v27, %v477_v17 }
 0x1b8   : > { %965 = vmatprep.mubr.f32.mxu1 %v497_v28 }
 0x1b9   : > { %v1177_v29 = vpop.eup %1176 }
 0x1ba   : > { %v498_v30 = vmul.f32 %v1177_v29, %v482_v21 }
 0x1bc   : > { %966 = vmatmul.mubr.f32.vlgmr.msra.gmra.mrb[0].mxu1 %v498_v30 }
 0x28f   : > { %v967_v56 = vpop.f32.mrb[0].mxu1 }
 0x290   : > { %v594_v57 = vadd.f32 %v967_v56, %v852_v55  ;;  %v588_v58 = vpop.f32.mrb[1].mxu1 }
 0x291   : > { %v589_v59 = vadd.f32 %v852_v55, %v588_v58 }
 0x292   : > { %v854_v60 = vmul.f32 -1.442695, %v594_v57 }
 0x293   : > { %v853_v61 = vmul.f32 -1.442695, %v589_v59 }
 0x294   : > { %1178 = vpow2.f32 %v854_v60 }
 0x295   : > { %1180 = vpow2.f32 %v853_v61 }
 0x29e   : > { %v1179_v62 = vpop.eup %1178 }
 0x29f   : > { %v1181_v63 = vpop.eup %1180  ;;  %v604_v0 = vadd.f32 1.0, %v1179_v62 }
 0x2a0   : > { %v603_v1 = vadd.f32 1.0, %v1181_v63 }
 0x2a1   : > { %1182 = vrcp.f32 %v604_v0 }
 0x2a2   : > { %1184 = vrcp.f32 %v603_v1 }
 0x2ab   : > { %v1183_v2 = vpop.eup %1182 }
 0x2ac   : > { %v1185_v3 = vpop.eup %1184  ;;  %v610_v5 = vmul.f32 %v1183_v2, %v594_v57 }
 0x2ad   : > { %v609_v4 = vmul.f32 %v1185_v3, %v589_v59 }
 0x2af   : > { %1000 = vmatprep.mubr.f32.mxu0 %v609_v4 }
 0x2b0   : > { %1001 = vmatmul.mubr.f32.vlgmr.msra.gmra.mrb[4].mxu0 %v610_v5 }
 0x383   : > { %v1002_v7 = vpop.f32.mrb[4].mxu0 }
 0x384   : > { %v700_v8 = vpop.f32.mrb[5].mxu0  ;;  %v706_v10 = vadd.f32 %v1002_v7, %v855_v6 }
 0x385   : > { %v701_v9 = vadd.f32 %v855_v6, %v700_v8 }
 0x386   : > { %710 = vst [vmem:[%s365_s13 + $0x8] sm:$0xff] %v706_v10 }
 0x387   : > { %709 = vst [vmem:[%s365_s13] sm:$0xff] %v701_v9 }
 0x388 PF: > { %s21_s24 = sadd.s32 1, %s1376_s24  }
 0x389   : > { %p18_p7 = scmp.ge.s32.totalorder %s21_s24, 4  }
 0x38b   :  { %20 = sbr.rel (!%p18_p7) target bundleno = 4 (0x4), region = 103 }
 0x392   :  { %733 = vsyncpa [#allocation3], 1 }
 0x393   :  { %735 = vsyncpa [#allocation3 + $0x1], 1 }
 0x394   :  { %736 = vsyncpa [#allocation5], 1 }
 0x395   :  { %737 = vsyncpa [#allocation8], 1 }
 0x396   :  { %738 = vsyncpa [#allocation11], 1 }

// kernel: egnn_forward.7
= control target key start
LH: loop header
LB: loop body
LE: loop exit
PB: predicated region body
PF: predicated region fallthrough
CT: control target
= control target key end

     0   :  { %s2647_s13 = smov 0   ;;  %s2649_s14 = smov 0   ;;  %s3565_s0 = inlined_call_operand.vmem [shape: f32[32,128], index: 0, kind: input, shape index: {}]   ;;  %s3566_s1 = inlined_call_operand.vmem [shape: f32[2,32,48], index: 1, kind: input, shape index: {}]   ;;  %s3567_s2 = inlined_call_operand.vmem [shape: f32[48,48], index: 2, kind: input, shape index: {}]   ;;  %s3568_s3 = inlined_call_operand.vmem [shape: f32[128,768], index: 3, kind: input, shape index: {}]   ;;  %s3569_s4 = inlined_call_operand.vmem [shape: f32[48,768], index: 4, kind: input, shape index: {}]   ;;  %s3570_s5 = inlined_call_operand.vmem [shape: f32[1,768], index: 5, kind: input, shape index: {}]   ;;  %s3571_s6 = inlined_call_operand.vmem [shape: f32[3,256,128], index: 6, kind: input, shape index: {}]   ;;  %s3572_s7 = inlined_call_operand.vmem [shape: f32[3,1,128], index: 7, kind: input, shape index: {}]   ;;  %s3573_s8 = inlined_call_operand.vmem [shape: f32[3,1,128], index: 8, kind: input, shape index: {}]   ;;  %s3574_s9 = inlined_call_operand.vmem [shape: f32[3,1,128], index: 9, kind: input, shape index: {}]   ;;  %s3575_s10 = inlined_call_operand.vmem [shape: f32[32,384], index: 10, kind: output, shape index: {}]  }
   0x1   :  { %s2651_s15 = smov 0  }
   0x2 LB: > { %s1928_s16 = sadd.s32 4294967295, %s2589_s15   ;;  %s2664_s17 = sadd.s32 1, %s2589_s15   ;;  %s2589_s15 = sphi %s2651_s15, %s3578_s15   ;;  %s2585_s14 = sphi %s2649_s14, %s3577_s14   ;;  %s2581_s13 = sphi %s2647_s13, %s3576_s13  }
   0x3   : > { %s50_s18 = ssub.s32 %s2589_s15, %s2664_s17  ;;  %s53_s19 = sadd.s32 1, %s2585_s14 }
   0x4   : > { %p51_p0 = scmp.eq.s32.totalorder %s50_s18, 0  ;;  %p60_p1 = scmp.ne.s32.totalorder %s2585_s14, %s2581_s13 }
   0x5   : > { %p61_p2 = scmp.eq.s32.totalorder %s2589_s15, 0  ;;  %p1931_p4 = scmp.ge.s32.totalorder %s2589_s15, 2 }
   0x6   : > { %s2673_s20 = scalar_select %p51_p0, %s2585_s14, %s53_s19  }
   0x7   : > { %p62_p3 = por %p61_p2, %p60_p1  ;;  %304 = sbr.rel (%p1931_p4) target bundleno = 21 (0x15), region = 48 }
   0xe   : > { %316 = sbr.rel (!%p62_p3) target bundleno = 21 (0x15), region = 56  ;;  %s318_s21 = sand.u32 (%p62_p3), 1, %s2585_s14  }
   0xf   : > { %s2046_s22 = sshll.u32 (%p62_p3), %s2589_s15, 4  ;;  %s1932_s23 = sshll.u32 (%p62_p3), %s318_s21, 5 }
  0x10   : > { %s323_s26 = scalar_lea.vmem (%p62_p3), %s3566_s1, %s2046_s22  ;;  %s320_s27 = scalar_lea.vmem (%p62_p3), [#allocation2], %s1932_s23 }
  0x11   : > { %v357_v0 = vld [vmem:[%s323_s26] sm:$0xff] (%p62_p3)  ;;  %v359_v1 = vld [vmem:[%s323_s26 + $0x8] sm:$0xff] (%p62_p3) }
  0x12   : > { %v361_v2 = vld [vmem:[%s323_s26 + $0x20] sm:$0xff] (%p62_p3)  ;;  %358 = vst [vmem:[%s320_s27] sm:$0xff] (%p62_p3), %v357_v0  ;;  %360 = vst [vmem:[%s320_s27 + $0x8] sm:$0xff] (%p62_p3), %v359_v1  ;;  %v363_v3 = vld [vmem:[%s323_s26 + $0x28] sm:$0xff] (%p62_p3) }
  0x13   : > { %362 = vst [vmem:[%s320_s27 + $0x10] sm:$0xff] (%p62_p3), %v361_v2  ;;  %364 = vst [vmem:[%s320_s27 + $0x18] sm:$0xff] (%p62_p3), %v363_v3 }
  0x15 PF: > { %p1935_p5 = scmp.ge.s32.totalorder %s2589_s15, 1  ;;  %p369_p6 = scmp.lt.s32.totalorder %s2589_s15, 3 }
  0x17   : > { %p370_p7 = pnand %p1935_p5, %p369_p6 }
  0x18   : > { %v465_v4 = vld [vmem:[%s3567_s2] sm:$0xff] (!%p370_p7)  ;;  %v466_v5 = vld [vmem:[%s3567_s2 + $0x8] sm:$0xff] (!%p370_p7)  ;;  %v467_v6 = vld [vmem:[%s3567_s2 + $0x10] sm:$0xff] (!%p370_p7)  ;;  %s376_s19 = sand.u32 (!%p370_p7), 1, %s2581_s13   ;;  %s1937_s21 = sshll.u32 (!%p370_p7), %s1928_s16, 1  ;;  %vm471_vm0 = vcmask (!%p370_p7), 392192  }
  0x19   : > { %373 = sbr.rel (%p370_p7) target bundleno = 1342 (0x53e), region = 94  ;;  %v2207_v7 = vpack.c.bf16 (!%p370_p7), %v466_v5, %v465_v4  ;;  %v468_v8 = vld [vmem:[%s3567_s2 + $0x18] sm:$0xff] (!%p370_p7)  ;;  %s1936_s24 = sshll.u32 (!%p370_p7), %s376_s19, 5  ;;  %v469_v10 = vld [vmem:[%s3567_s2 + $0x20] sm:$0xff] (!%p370_p7)  ;;  %v470_v11 = vld [vmem:[%s3567_s2 + $0x28] sm:$0xff] (!%p370_p7)  ;;  %v2591_v59 = vmov (!%p370_p7), 0.0  }
  0x1a   : > { %p420_p8 = scmp.lt.s32.totalorder (!%p370_p7), %s1937_s21, 3  ;;  %v2211_v9 = vpack.c.bf16 (!%p370_p7), %v468_v8, %v467_v6  ;;  %s378_s13 = scalar_lea.vmem (!%p370_p7), [#allocation2], %s1936_s24  ;;  %v2215_v15 = vpack.c.bf16 (!%p370_p7), %v470_v11, %v469_v10  ;;  %v739_v35 = vld [vmem:[%s3569_s4 + $0x8] sm:$0xff] (!%p370_p7)  ;;  %v745_v36 = vld [vmem:[%s3569_s4 + $0x38] sm:$0xff] (!%p370_p7)  ;;  %v738_v40 = vld [vmem:[%s3569_s4] sm:$0xff] (!%p370_p7) }
  0x1b   : > { %2208 = vmatprep.subr.bf16.mxu0 (!%p370_p7), %v2207_v7  ;;  %v458_v12 = vld [vmem:[%s378_s13] sm:$0xff] (!%p370_p7)  ;;  %v1941_v13 = vld [vmem:[%s378_s13 + $0x10] sm:$0xff] (!%p370_p7)  ;;  %2220 = vmatprep.subr.bf16.mxu1 (!%p370_p7), %v2207_v7  ;;  %v459_v17 = vld [vmem:[%s378_s13 + $0x8] sm:$0xff] (!%p370_p7)  ;;  %v2231_v38 = vpack.c.bf16 (!%p370_p7), %v745_v36, %v739_v35 }
  0x1c   : > { %2210 = vmatpush3.bf16.msra.mxu0 (!%p370_p7), %v2207_v7  ;;  %v463_v14 = vadd.f32 (!%p370_p7), %v1941_v13, %v458_v12  ;;  %2222 = vmatpush3.bf16.msra.mxu1 (!%p370_p7), %v2207_v7  ;;  %v1942_v18 = vld [vmem:[%s378_s13 + $0x18] sm:$0xff] (!%p370_p7)  ;;  %v747_v39 = vld [vmem:[%s3569_s4 + $0x48] sm:$0xff] (!%p370_p7)  ;;  %v744_v41 = vld [vmem:[%s3569_s4 + $0x30] sm:$0xff] (!%p370_p7) }
  0x1d   : > { %2212 = vmatprep.subr.bf16.mxu0 (!%p370_p7), %v2211_v9  ;;  %2224 = vmatprep.subr.bf16.mxu1 (!%p370_p7), %v2211_v9  ;;  %v464_v20 = vadd.f32 (!%p370_p7), %v1942_v18, %v459_v17  ;;  %v741_v37 = vld [vmem:[%s3569_s4 + $0x18] sm:$0xff] (!%p370_p7)  ;;  %v2233_v43 = vpack.c.bf16 (!%p370_p7), %v744_v41, %v738_v40  ;;  %v740_v44 = vld [vmem:[%s3569_s4 + $0x10] sm:$0xff] (!%p370_p7)  ;;  %v746_v45 = vld [vmem:[%s3569_s4 + $0x40] sm:$0xff] (!%p370_p7) }
  0x1e   : > { %2189 = vmatprep.mubr.msk.f32.mxu0 (!%p370_p7), %vm471_vm0, %v463_v14  ;;  %v2243_v42 = vpack.c.bf16 (!%p370_p7), %v747_v39, %v741_v37  ;;  %v2245_v46 = vpack.c.bf16 (!%p370_p7), %v746_v45, %v740_v44  ;;  %v751_v47 = vld [vmem:[%s3569_s4 + $0x68] sm:$0xff] (!%p370_p7)  ;;  %v757_v48 = vld [vmem:[%s3569_s4 + $0x98] sm:$0xff] (!%p370_p7)  ;;  %v750_v52 = vld [vmem:[%s3569_s4 + $0x60] sm:$0xff] (!%p370_p7) }
  0x1f   : > { %v753_v49 = vld [vmem:[%s3569_s4 + $0x78] sm:$0xff] (!%p370_p7)  ;;  %v2235_v50 = vpack.c.bf16 (!%p370_p7), %v757_v48, %v751_v47  ;;  %v759_v51 = vld [vmem:[%s3569_s4 + $0xa8] sm:$0xff] (!%p370_p7)  ;;  %v756_v53 = vld [vmem:[%s3569_s4 + $0x90] sm:$0xff] (!%p370_p7) }
  0x20   : > { %s3580_s21 = smov (!%p420_p8, %s1937_s21), 3  ;;  %2214 = vmatpush3.bf16.msra.mxu0 %v2211_v9  ;;  %2226 = vmatpush3.bf16.msra.mxu1 %v2211_v9  ;;  %v2247_v54 = vpack.c.bf16 %v759_v51, %v753_v49  ;;  %v2237_v55 = vpack.c.bf16 %v756_v53, %v750_v52  ;;  %v752_v56 = vld [vmem:[%s3569_s4 + $0x70] sm:$0xff]  ;;  %v758_v57 = vld [vmem:[%s3569_s4 + $0xa0] sm:$0xff]  ;;  %v763_v58 = vld [vmem:[%s3569_s4 + $0xc8] sm:$0xff] }
  0x21   : > { %s1938_s15 = sshll.u32 %s3580_s21, 3  ;;  %2216 = vmatprep.subr.bf16.mxu0 %v2215_v15  ;;  %2228 = vmatprep.subr.bf16.mxu1 %v2215_v15  ;;  %v2249_v60 = vpack.c.bf16 %v758_v57, %v752_v56  ;;  %v769_v61 = vld [vmem:[%s3569_s4 + $0xf8] sm:$0xff]  ;;  %v771_v63 = vld [vmem:[%s3569_s4 + $0x108] sm:$0xff]  ;;  %v762_v2 = vld [vmem:[%s3569_s4 + $0xc0] sm:$0xff]  ;;  %s2471_s12 = smul.u32 24, %s3580_s21 }
  0x22   : > { %s2711_s30 = scalar_lea.vmem %s3565_s0, %s1938_s15  ;;  %v765_v62 = vld [vmem:[%s3569_s4 + $0xd8] sm:$0xff]  ;;  %v2239_v0 = vpack.c.bf16 %v769_v61, %v763_v58  ;;  %v768_v3 = vld [vmem:[%s3569_s4 + $0xf0] sm:$0xff]  ;;  %v770_v6 = vld [vmem:[%s3569_s4 + $0x100] sm:$0xff] }
  0x23   : > { %v433_v16 = vld [vmem:[%s2711_s30] sm:$0xff]  ;;  %v434_v19 = vld [vmem:[%s2711_s30 + $0x8] sm:$0xff]  ;;  %v2251_v1 = vpack.c.bf16 %v771_v63, %v765_v62  ;;  %v764_v4 = vld [vmem:[%s3569_s4 + $0xd0] sm:$0xff]  ;;  %v2241_v5 = vpack.c.bf16 %v768_v3, %v762_v2  ;;  %s3530_s24 = scalar_lea.vmem %s3575_s10, %s2471_s12 }
  0x24   : > { %435 = vadd.xlane.f32.xlu0 %v433_v16  ;;  %2218 = vmatpush3.bf16.msra.mxu0 %v2215_v15  ;;  %v743_v7 = vld [vmem:[%s3569_s4 + $0x28] sm:$0xff]  ;;  %v749_v8 = vld [vmem:[%s3569_s4 + $0x58] sm:$0xff]  ;;  %v2253_v9 = vpack.c.bf16 %v770_v6, %v764_v4  ;;  %v742_v18 = vld [vmem:[%s3569_s4 + $0x20] sm:$0xff] }
  0x25   : > { %2230 = vmatpush3.bf16.msra.mxu1 %v2215_v15  ;;  %2232 = vmatprep.subr.bf16.mxu0 %v2231_v38  ;;  %v2255_v10 = vpack.c.bf16 %v749_v8, %v743_v7  ;;  %v645_v11 = vld [vmem:[%s3568_s3 + $0x18] sm:$0xff]  ;;  %v651_v12 = vld [vmem:[%s3568_s3 + $0x48] sm:$0xff]  ;;  %v656_v36 = vld [vmem:[%s3568_s3 + $0x70] sm:$0xff] }
  0x26   : > { %2244 = vmatprep.subr.bf16.mxu1 %v2243_v42  ;;  %v2299_v13 = vpack.c.bf16 %v651_v12, %v645_v11  ;;  %v662_v37 = vld [vmem:[%s3568_s3 + $0xa0] sm:$0xff]  ;;  %v767_v38 = vld [vmem:[%s3569_s4 + $0xe8] sm:$0xff]  ;;  %v669_v42 = vld [vmem:[%s3568_s3 + $0xd8] sm:$0xff] }
  0x27   : > { %2190 = vmatmul.mubr.msk.f32.vlgmr.msra.gmra.mrb[0].mxu0 %vm471_vm0, %v464_v20  ;;  %v2305_v45 = vpack.c.bf16 %v662_v37, %v656_v36  ;;  %v772_v47 = vld [vmem:[%s3569_s4 + $0x110] sm:$0xff]  ;;  %v674_v52 = vld [vmem:[%s3568_s3 + $0x100] sm:$0xff]  ;;  %v643_v53 = vld [vmem:[%s3568_s3 + $0x8] sm:$0xff] }
  0x28   : > { %437 = vadd.xlane.f32.xlu0 %v434_v19  ;;  %2234 = vmatpush1.bf16.msra.mxu0 %v2233_v43  ;;  %v675_v43 = vld [vmem:[%s3568_s3 + $0x108] sm:$0xff]  ;;  %v668_v51 = vld [vmem:[%s3568_s3 + $0xd0] sm:$0xff]  ;;  %v642_v58 = vld [vmem:[%s3568_s3] sm:$0xff] }
  0x29   : > { %844 = vmatprep.mubr.f32.mxu0 %v2591_v59  ;;  %2236 = vmatprep.subr.bf16.mxu0 %v2235_v50  ;;  %v2307_v50 = vpack.c.bf16 %v675_v43, %v669_v42  ;;  %v2309_v57 = vpack.c.bf16 %v674_v52, %v668_v51  ;;  %v648_v63 = vld [vmem:[%s3568_s3 + $0x30] sm:$0xff]  ;;  %v655_v2 = vld [vmem:[%s3568_s3 + $0x68] sm:$0xff]  ;;  %v661_v3 = vld [vmem:[%s3568_s3 + $0x98] sm:$0xff] }
  0x2a   : > { %v693_v4 = vld [vmem:[%s3568_s3 + $0x198] sm:$0xff]  ;;  %v2269_v7 = vpack.c.bf16 %v648_v63, %v642_v58  ;;  %v2271_v12 = vpack.c.bf16 %v661_v3, %v655_v2  ;;  %v723_v37 = vld [vmem:[%s3568_s3 + $0x288] sm:$0xff]  ;;  %v690_v52 = vld [vmem:[%s3568_s3 + $0x180] sm:$0xff] }
  0x2b   : > { %v717_v36 = vld [vmem:[%s3568_s3 + $0x258] sm:$0xff]  ;;  %v702_v63 = vld [vmem:[%s3568_s3 + $0x1e0] sm:$0xff]  ;;  %v715_v2 = vld [vmem:[%s3568_s3 + $0x248] sm:$0xff] }
  0x2c   : > { %2238 = vmatpush1.bf16.msra.mxu0 %v2237_v55  ;;  %v687_v55 = vld [vmem:[%s3568_s3 + $0x168] sm:$0xff]  ;;  %v2323_v43 = vpack.c.bf16 %v723_v37, %v717_v36  ;;  %v709_v58 = vld [vmem:[%s3568_s3 + $0x218] sm:$0xff]  ;;  %v676_v36 = vld [vmem:[%s3568_s3 + $0x110] sm:$0xff] }
  0x2d   : > { %2240 = vmatprep.subr.bf16.mxu0 %v2239_v0  ;;  %v680_v0 = vld [vmem:[%s3568_s3 + $0x130] sm:$0xff]  ;;  %v721_v3 = vld [vmem:[%s3568_s3 + $0x278] sm:$0xff]  ;;  %v683_v37 = vld [vmem:[%s3568_s3 + $0x148] sm:$0xff] }
  0x30   : > { %2242 = vmatpush1.bf16.msra.mxu0 %v2241_v5  ;;  %v699_v5 = vld [vmem:[%s3568_s3 + $0x1c8] sm:$0xff] }
  0x31   : > { %2256 = vmatprep.subr.bf16.mxu0 %v2255_v10  ;;  %v660_v10 = vld [vmem:[%s3568_s3 + $0x90] sm:$0xff] }
  0xb1   : > { %v436_v21 = vpop.xlane.xlu0 %435 }
  0xb2   : > { %v440_v22 = vmul.f32 0.0078125, %v436_v21  ;;  %v650_v21 = vld [vmem:[%s3568_s3 + $0x40] sm:$0xff] }
  0xb4   : > { %v2716_v23 = vsub.f32 %v433_v16, %v440_v22  ;;  %v755_v22 = vld [vmem:[%s3569_s4 + $0x88] sm:$0xff] }
  0xb5   : > { %v438_v24 = vpop.xlane.xlu0 %437 }
  0xb6   : > { %v444_v25 = vmul.f32 %v2716_v23, %v2716_v23  ;;  %v441_v26 = vmul.f32 0.0078125, %v438_v24  ;;  %v761_v24 = vld [vmem:[%s3569_s4 + $0xb8] sm:$0xff] }
  0xb7   : > { %v2259_v40 = vpack.c.bf16 %v761_v24, %v755_v22 }
  0xb8   : > { %446 = vadd.xlane.f32.xlu1 %v444_v25  ;;  %v2720_v27 = vsub.f32 %v434_v19, %v441_v26  ;;  %v748_v19 = vld [vmem:[%s3569_s4 + $0x50] sm:$0xff]  ;;  %v657_v25 = vld [vmem:[%s3568_s3 + $0x78] sm:$0xff]  ;;  %v663_v26 = vld [vmem:[%s3568_s3 + $0xa8] sm:$0xff] }
  0xb9   : > { %v2303_v41 = vpack.c.bf16 %v663_v26, %v657_v25  ;;  %v666_v25 = vld [vmem:[%s3568_s3 + $0xc0] sm:$0xff]  ;;  %v672_v26 = vld [vmem:[%s3568_s3 + $0xf0] sm:$0xff] }
  0xba   : > { %v445_v28 = vmul.f32 %v2720_v27, %v2720_v27 }
  0xbc   : > { %448 = vadd.xlane.f32.xlu1 %v445_v28 }
  0xfa   : > { %v2191_v29 = vpop.f32.mrb[0].mxu0 }
  0xfb   : > { %v2724_v30 = vsub.f32 %v464_v20, %v2191_v29  ;;  %v544_v31 = vpop.f32.mrb[1].mxu0  ;;  %v644_v20 = vld [vmem:[%s3568_s3 + $0x10] sm:$0xff]  ;;  %v2257_v29 = vpack.c.bf16 %v748_v19, %v742_v18  ;;  %v705_v18 = vld [vmem:[%s3568_s3 + $0x1f8] sm:$0xff]  ;;  %v711_v19 = vld [vmem:[%s3568_s3 + $0x228] sm:$0xff] }
  0xfc   : > { %v2726_v32 = vsub.f32 %v463_v14, %v544_v31  ;;  %v2301_v31 = vpack.c.bf16 %v650_v21, %v644_v20 }
  0xfd   : > { %v556_v34 = vmul.f32 %v2724_v30, %v2724_v30 }
  0xfe   : > { %v555_v33 = vmul.f32 %v2726_v32, %v2726_v32 }
 0x100   : > { %2204 = vmatprep.mubr.msk.f32.mxu1 %vm471_vm0, %v555_v33  ;;  %v754_v33 = vld [vmem:[%s3569_s4 + $0x80] sm:$0xff] }
 0x101   : > { %2205 = vmatmul.mubr.msk.f32.vlgmr.msra.gmra.mrb[0].mxu1 %vm471_vm0, %v556_v34  ;;  %v760_v34 = vld [vmem:[%s3569_s4 + $0xb0] sm:$0xff] }
 0x102   : > { %2246 = vmatpush1.bf16.msra.mxu1 %v2245_v46  ;;  %921 = vmatprep.mubr.f32.mxu1 %v2591_v59  ;;  %v2261_v44 = vpack.c.bf16 %v760_v34, %v754_v33  ;;  %v766_v46 = vld [vmem:[%s3569_s4 + $0xe0] sm:$0xff]  ;;  %v679_v34 = vld [vmem:[%s3568_s3 + $0x128] sm:$0xff] }
 0x103   : > { %2248 = vmatprep.subr.bf16.mxu1 %v2247_v54  ;;  %v681_v54 = vld [vmem:[%s3568_s3 + $0x138] sm:$0xff]  ;;  %v2265_v56 = vpack.c.bf16 %v772_v47, %v766_v46  ;;  %v710_v33 = vld [vmem:[%s3568_s3 + $0x220] sm:$0xff]  ;;  %v691_v46 = vld [vmem:[%s3568_s3 + $0x188] sm:$0xff] }
 0x104   : > { %v2311_v62 = vpack.c.bf16 %v687_v55, %v681_v54  ;;  %v697_v47 = vld [vmem:[%s3568_s3 + $0x1b8] sm:$0xff]  ;;  %v696_v54 = vld [vmem:[%s3568_s3 + $0x1b0] sm:$0xff] }
 0x105   : > { %v728_v55 = vld [vmem:[%s3568_s3 + $0x2b0] sm:$0xff] }
 0x106   : > { %2250 = vmatpush1.bf16.msra.mxu1 %v2249_v60 }
 0x107   : > { %2252 = vmatprep.subr.bf16.mxu1 %v2251_v1  ;;  %v686_v1 = vld [vmem:[%s3568_s3 + $0x160] sm:$0xff] }
 0x108   : > { %v2313_v8 = vpack.c.bf16 %v686_v1, %v680_v0  ;;  %v708_v0 = vld [vmem:[%s3568_s3 + $0x210] sm:$0xff] }
 0x10a   : > { %2254 = vmatpush1.bf16.msra.mxu1 %v2253_v9  ;;  %v654_v9 = vld [vmem:[%s3568_s3 + $0x60] sm:$0xff] }
 0x10b   : > { %2300 = vmatprep.subr.bf16.mxu1 %v2299_v13  ;;  %v692_v13 = vld [vmem:[%s3568_s3 + $0x190] sm:$0xff]  ;;  %v2273_v22 = vpack.c.bf16 %v660_v10, %v654_v9  ;;  %v727_v10 = vld [vmem:[%s3568_s3 + $0x2a8] sm:$0xff] }
 0x145   : > { %v447_v60 = vpop.xlane.xlu1 %446 }
 0x146   : > { %v450_v6 = vmul.f32 0.0078125, %v447_v60  ;;  %v2285_v60 = vpack.c.bf16 %v696_v54, %v690_v52  ;;  %v706_v52 = vld [vmem:[%s3568_s3 + $0x200] sm:$0xff]  ;;  %v725_v54 = vld [vmem:[%s3568_s3 + $0x298] sm:$0xff] }
 0x148   : > { %v452_v20 = vadd.f32 1e-05, %v450_v6  ;;  %v2291_v6 = vpack.c.bf16 %v721_v3, %v715_v2  ;;  %v1386_v3 = vld [vmem:[%s3571_s6 + $0x80] sm:$0xff] }
 0x149   : > { %v449_v11 = vpop.xlane.xlu1 %448 }
 0x14a   : > { %v451_v21 = vmul.f32 0.0078125, %v449_v11  ;;  %v733_v11 = vld [vmem:[%s3568_s3 + $0x2d8] sm:$0xff] }
 0x1d4   : > { %v2206_v14 = vpop.f32.mrb[0].mxu1 }
 0x1d5   : > { %v629_v15 = vpop.f32.mrb[1].mxu1  ;;  %v635_v16 = vadd.f32 1e-05, %v2206_v14  ;;  %v698_v14 = vld [vmem:[%s3568_s3 + $0x1c0] sm:$0xff] }
 0x1d6   : > { %v630_v17 = vadd.f32 1e-05, %v629_v15  ;;  %v667_v15 = vld [vmem:[%s3568_s3 + $0xc8] sm:$0xff]  ;;  %v2317_v24 = vpack.c.bf16 %v698_v14, %v692_v13  ;;  %v2295_v13 = vpack.c.bf16 %v733_v11, %v727_v10  ;;  %v726_v14 = vld [vmem:[%s3568_s3 + $0x2a0] sm:$0xff]  ;;  %v1372_v11 = vld [vmem:[%s3571_s6 + $0x10] sm:$0xff] }
 0x1d8   : > { %2497 = vrsqrt.f32 %v630_v17  ;;  %v673_v17 = vld [vmem:[%s3568_s3 + $0xf8] sm:$0xff] }
 0x1d9   : > { %2499 = vrsqrt.f32 %v635_v16  ;;  %v2315_v16 = vpack.c.bf16 %v699_v5, %v693_v4  ;;  %v2289_v4 = vpack.c.bf16 %v708_v0, %v702_v63  ;;  %v730_v0 = vld [vmem:[%s3568_s3 + $0x2c0] sm:$0xff] }
 0x1da   : > { %2501 = vrsqrt.f32 %v452_v20  ;;  %v652_v20 = vld [vmem:[%s3568_s3 + $0x50] sm:$0xff] }
 0x1e2   : > { %v2498_v28 = vpop.eup %2497 }
 0x1e3   : > { %v2851_v35 = vmul.f32 %v2498_v28, %v2726_v32  ;;  %v2500_v39 = vpop.eup %2499  ;;  %v773_v32 = vld [vmem:[%s3569_s4 + $0x118] sm:$0xff]  ;;  %v2275_v28 = vpack.c.bf16 %v673_v17, %v667_v15  ;;  %v732_v15 = vld [vmem:[%s3568_s3 + $0x2d0] sm:$0xff] }
 0x1e4   : > { %v2884_v48 = vmul.f32 %v2500_v39, %v2724_v30  ;;  %v2263_v49 = vpack.c.bf16 %v773_v32, %v767_v38  ;;  %v649_v30 = vld [vmem:[%s3568_s3 + $0x38] sm:$0xff]  ;;  %v453_v38 = vadd.f32 1e-05, %v451_v21  ;;  %v2277_v39 = vpack.c.bf16 %v672_v26, %v666_v25  ;;  %v684_v32 = vld [vmem:[%s3568_s3 + $0x150] sm:$0xff]  ;;  %v2502_v1 = vpop.eup %2501  ;;  %v659_v21 = vld [vmem:[%s3568_s3 + $0x88] sm:$0xff] }
 0x1e5   : > { %1947 = vmatmul.mubr.msk.f32.vlgmr.msra.gmra.mrb[2].mxu0 %vm471_vm0, %v2851_v35  ;;  %1949 = vmatmul.mubr.msk.f32.vlgmr.msra.gmra.mrb[2].mxu1 %vm471_vm0, %v2851_v35  ;;  %v2267_v61 = vpack.c.bf16 %v649_v30, %v643_v53  ;;  %v2283_v53 = vpack.c.bf16 %v697_v47, %v691_v46  ;;  %v3043_v5 = vmul.f32 %v2502_v1, %v2716_v23  ;;  %v653_v17 = vld [vmem:[%s3568_s3 + $0x58] sm:$0xff]  ;;  %v658_v26 = vld [vmem:[%s3568_s3 + $0x80] sm:$0xff]  ;;  %v700_v47 = vld [vmem:[%s3568_s3 + $0x1d0] sm:$0xff] }
 0x1e6   : > { %2258 = vmatpush1.bf16.msra.mxu0 %v2257_v29  ;;  %2302 = vmatpush1.bf16.msra.mxu1 %v2301_v31  ;;  %v2319_v29 = vpack.c.bf16 %v711_v19, %v705_v18  ;;  %v704_v31 = vld [vmem:[%s3568_s3 + $0x1f0] sm:$0xff]  ;;  %2503 = vrsqrt.f32 %v453_v38  ;;  %v646_v19 = vld [vmem:[%s3568_s3 + $0x20] sm:$0xff]  ;;  %v689_v38 = vld [vmem:[%s3568_s3 + $0x178] sm:$0xff] }
 0x1e7   : > { %850 = vmatprep.mubr.f32.mxu0 %v2591_v59  ;;  %927 = vmatprep.mubr.f32.mxu1 %v2591_v59  ;;  %v694_v46 = vld [vmem:[%s3568_s3 + $0x1a0] sm:$0xff]  ;;  %v736_v1 = vld [vmem:[%s3568_s3 + $0x2f0] sm:$0xff] }
 0x1e8   : > { %2260 = vmatprep.subr.bf16.mxu0 %v2259_v40  ;;  %2304 = vmatprep.subr.bf16.mxu1 %v2303_v41  ;;  %v2321_v40 = vpack.c.bf16 %v710_v33, %v704_v31  ;;  %v678_v41 = vld [vmem:[%s3568_s3 + $0x120] sm:$0xff]  ;;  %v677_v31 = vld [vmem:[%s3568_s3 + $0x118] sm:$0xff]  ;;  %v2361_v2 = vpack.c.bf16 %v736_v1, %v730_v0 }
 0x1e9   : > { %1948 = vmatmul.mubr.msk.f32.gmra.mrb[4].mxu0 %vm471_vm0, %v2884_v48  ;;  %1950 = vmatmul.mubr.msk.f32.gmra.mrb[4].mxu1 %vm471_vm0, %v2884_v48 }
 0x1ea   : > { %2262 = vmatpush1.bf16.msra.mxu0 %v2261_v44  ;;  %2306 = vmatpush1.bf16.msra.mxu1 %v2305_v45  ;;  %v716_v44 = vld [vmem:[%s3568_s3 + $0x250] sm:$0xff]  ;;  %v722_v45 = vld [vmem:[%s3568_s3 + $0x280] sm:$0xff] }
 0x1eb   : > { %2264 = vmatprep.subr.bf16.mxu0 %v2263_v49  ;;  %2308 = vmatprep.subr.bf16.mxu1 %v2307_v50  ;;  %v735_v49 = vld [vmem:[%s3568_s3 + $0x2e8] sm:$0xff]  ;;  %v2281_v50 = vpack.c.bf16 %v684_v32, %v678_v41  ;;  %v2325_v51 = vpack.c.bf16 %v722_v45, %v716_v44  ;;  %v682_v41 = vld [vmem:[%s3568_s3 + $0x140] sm:$0xff]  ;;  %v688_v32 = vld [vmem:[%s3568_s3 + $0x170] sm:$0xff] }
 0x1ec   : > { %998 = vmatprep.mubr.f32.mxu0 %v2591_v59  ;;  %1152 = vmatprep.mubr.f32.mxu1 %v2591_v59  ;;  %v2345_v44 = vpack.c.bf16 %v688_v32, %v682_v41  ;;  %v1399_v41 = vld [vmem:[%s3571_s6 + $0xe8] sm:$0xff] }
 0x1ee   : > { %2266 = vmatpush1.bf16.msra.mxu0 %v2265_v56  ;;  %2310 = vmatpush1.bf16.msra.mxu1 %v2309_v57  ;;  %v734_v56 = vld [vmem:[%s3568_s3 + $0x2e0] sm:$0xff]  ;;  %v703_v57 = vld [vmem:[%s3568_s3 + $0x1e8] sm:$0xff] }
 0x1ef   : > { %2268 = vmatprep.subr.bf16.mxu0 %v2267_v61  ;;  %2312 = vmatprep.subr.bf16.mxu1 %v2311_v62  ;;  %v2329_v61 = vpack.c.bf16 %v734_v56, %v728_v55  ;;  %v2287_v62 = vpack.c.bf16 %v709_v58, %v703_v57  ;;  %v718_v57 = vld [vmem:[%s3568_s3 + $0x260] sm:$0xff]  ;;  %v724_v58 = vld [vmem:[%s3568_s3 + $0x290] sm:$0xff] }
 0x1f0   : > { %v2504_v9 = vpop.eup %2503 }
 0x1f1   : > { %1951 = vmatmul.mubr.msk.f32.vlgmr.msra.gmra.mrb[6].mxu0 %vm471_vm0, %v2851_v35  ;;  %v685_v35 = vld [vmem:[%s3568_s3 + $0x158] sm:$0xff] }
 0x1f2   : > { %2270 = vmatpush1.bf16.msra.mxu0 %v2269_v7  ;;  %2314 = vmatpush1.bf16.msra.mxu1 %v2313_v8  ;;  %v2279_v42 = vpack.c.bf16 %v685_v35, %v679_v34  ;;  %v714_v7 = vld [vmem:[%s3568_s3 + $0x240] sm:$0xff]  ;;  %v720_v8 = vld [vmem:[%s3568_s3 + $0x270] sm:$0xff] }
 0x1f3   : > { %1004 = vmatprep.mubr.f32.mxu0 %v2591_v59  ;;  %2272 = vmatprep.subr.bf16.mxu0 %v2271_v12  ;;  %v2293_v23 = vpack.c.bf16 %v720_v8, %v714_v7  ;;  %v3060_v12 = vmul.f32 %v2504_v9, %v2720_v27  ;;  %v2297_v27 = vpack.c.bf16 %v732_v15, %v726_v14  ;;  %v670_v35 = vld [vmem:[%s3568_s3 + $0xe0] sm:$0xff]  ;;  %v1388_v8 = vld [vmem:[%s3571_s6 + $0x90] sm:$0xff]  ;;  %v1389_v9 = vld [vmem:[%s3571_s6 + $0x98] sm:$0xff] }
 0x1f4   : > { %2316 = vmatprep.subr.bf16.mxu1 %v2315_v16  ;;  %v647_v16 = vld [vmem:[%s3568_s3 + $0x28] sm:$0xff]  ;;  %v1370_v7 = vld [vmem:[%s3571_s6] sm:$0xff]  ;;  %v2367_v10 = vpack.c.bf16 %v1389_v9, %v1388_v8  ;;  %v2029_v8 = vld [vmem:[%s3571_s6 + $0x2b8] sm:$0xff] }
 0x1f5   : > { %1952 = vmatmul.mubr.msk.f32.gmra.mrb[8].mxu0 %vm471_vm0, %v2884_v48  ;;  %v729_v48 = vld [vmem:[%s3568_s3 + $0x2b8] sm:$0xff]  ;;  %v2331_v18 = vpack.c.bf16 %v653_v17, %v647_v16  ;;  %v1391_v14 = vld [vmem:[%s3571_s6 + $0xa8] sm:$0xff]  ;;  %v1374_v16 = vld [vmem:[%s3571_s6 + $0x20] sm:$0xff] }
 0x1f6   : > { %2274 = vmatpush1.bf16.msra.mxu0 %v2273_v22  ;;  %2318 = vmatpush1.bf16.msra.mxu1 %v2317_v24  ;;  %v2327_v30 = vpack.c.bf16 %v735_v49, %v729_v48  ;;  %v665_v22 = vld [vmem:[%s3568_s3 + $0xb8] sm:$0xff]  ;;  %v2333_v24 = vpack.c.bf16 %v652_v20, %v646_v19  ;;  %v707_v48 = vld [vmem:[%s3568_s3 + $0x208] sm:$0xff]  ;;  %v2012_v9 = vld [vmem:[%s3571_s6 + $0x230] sm:$0xff] }
 0x1f7   : > { %2276 = vmatprep.subr.bf16.mxu0 %v2275_v28  ;;  %2320 = vmatprep.subr.bf16.mxu1 %v2319_v29  ;;  %v2335_v25 = vpack.c.bf16 %v665_v22, %v659_v21  ;;  %v664_v28 = vld [vmem:[%s3568_s3 + $0xb0] sm:$0xff]  ;;  %v671_v29 = vld [vmem:[%s3568_s3 + $0xe8] sm:$0xff]  ;;  %v713_v49 = vld [vmem:[%s3568_s3 + $0x238] sm:$0xff] }
 0x1f8   : > { %1075 = vmatprep.mubr.f32.mxu0 %v2591_v59  ;;  %v2337_v33 = vpack.c.bf16 %v664_v28, %v658_v26  ;;  %v2339_v34 = vpack.c.bf16 %v677_v31, %v671_v29  ;;  %v1375_v17 = vld [vmem:[%s3571_s6 + $0x28] sm:$0xff]  ;;  %v1393_v19 = vld [vmem:[%s3571_s6 + $0xb8] sm:$0xff]  ;;  %v1376_v21 = vld [vmem:[%s3571_s6 + $0x30] sm:$0xff] }
 0x1f9   : > { %v1377_v22 = vld [vmem:[%s3571_s6 + $0x38] sm:$0xff]  ;;  %v1395_v26 = vld [vmem:[%s3571_s6 + $0xc8] sm:$0xff]  ;;  %v1378_v29 = vld [vmem:[%s3571_s6 + $0x40] sm:$0xff] }
 0x1fa   : > { %2278 = vmatpush1.bf16.msra.mxu0 %v2277_v39  ;;  %2322 = vmatpush1.bf16.msra.mxu1 %v2321_v40  ;;  %v2341_v39 = vpack.c.bf16 %v676_v36, %v670_v35  ;;  %v2343_v40 = vpack.c.bf16 %v689_v38, %v683_v37  ;;  %v1379_v31 = vld [vmem:[%s3571_s6 + $0x48] sm:$0xff]  ;;  %v1397_v35 = vld [vmem:[%s3571_s6 + $0xd8] sm:$0xff]  ;;  %v1380_v37 = vld [vmem:[%s3571_s6 + $0x50] sm:$0xff] }
 0x1fb   : > { %2280 = vmatprep.subr.bf16.mxu0 %v2279_v42  ;;  %2324 = vmatprep.subr.bf16.mxu1 %v2323_v43  ;;  %v695_v42 = vld [vmem:[%s3568_s3 + $0x1a8] sm:$0xff]  ;;  %v701_v43 = vld [vmem:[%s3568_s3 + $0x1d8] sm:$0xff] }
 0x1fc   : > { %v2347_v45 = vpack.c.bf16 %v701_v43, %v695_v42  ;;  %v1381_v38 = vld [vmem:[%s3571_s6 + $0x58] sm:$0xff]  ;;  %v1382_v42 = vld [vmem:[%s3571_s6 + $0x60] sm:$0xff]  ;;  %v1383_v43 = vld [vmem:[%s3571_s6 + $0x68] sm:$0xff] }
 0x1fe   : > { %2282 = vmatpush1.bf16.msra.mxu0 %v2281_v50  ;;  %2326 = vmatpush1.bf16.msra.mxu1 %v2325_v51  ;;  %v2349_v50 = vpack.c.bf16 %v700_v47, %v694_v46  ;;  %v2351_v51 = vpack.c.bf16 %v713_v49, %v707_v48  ;;  %v1401_v46 = vld [vmem:[%s3571_s6 + $0xf8] sm:$0xff]  ;;  %v1384_v48 = vld [vmem:[%s3571_s6 + $0x70] sm:$0xff] }
 0x1ff   : > { %2284 = vmatprep.subr.bf16.mxu0 %v2283_v53  ;;  %2328 = vmatprep.subr.bf16.mxu1 %v2327_v30  ;;  %v712_v53 = vld [vmem:[%s3568_s3 + $0x230] sm:$0xff]  ;;  %v719_v30 = vld [vmem:[%s3568_s3 + $0x268] sm:$0xff]  ;;  %v1385_v49 = vld [vmem:[%s3571_s6 + $0x78] sm:$0xff] }
 0x200   : > { %v2353_v55 = vpack.c.bf16 %v712_v53, %v706_v52  ;;  %v2355_v56 = vpack.c.bf16 %v725_v54, %v719_v30  ;;  %v1985_v52 = vld [vmem:[%s3571_s6 + $0x188] sm:$0xff]  ;;  %v2022_v30 = vld [vmem:[%s3571_s6 + $0x280] sm:$0xff] }
 0x201   : > { %v2023_v54 = vld [vmem:[%s3571_s6 + $0x288] sm:$0xff] }
 0x202   : > { %2286 = vmatpush1.bf16.msra.mxu0 %v2285_v60  ;;  %2330 = vmatpush1.bf16.msra.mxu1 %v2329_v61  ;;  %v731_v60 = vld [vmem:[%s3568_s3 + $0x2c8] sm:$0xff]  ;;  %v737_v61 = vld [vmem:[%s3568_s3 + $0x2f8] sm:$0xff] }
 0x203   : > { %2288 = vmatprep.subr.bf16.mxu0 %v2287_v62  ;;  %v2357_v62 = vpack.c.bf16 %v724_v58, %v718_v57  ;;  %v2359_v63 = vpack.c.bf16 %v737_v61, %v731_v60  ;;  %v2007_v57 = vld [vmem:[%s3571_s6 + $0x208] sm:$0xff]  ;;  %v2024_v60 = vld [vmem:[%s3571_s6 + $0x290] sm:$0xff]  ;;  %v2025_v61 = vld [vmem:[%s3571_s6 + $0x298] sm:$0xff] }
 0x204   : > { %v2431_v0 = vpack.c.bf16 %v2025_v61, %v2024_v60 }
 0x205   : > { %1153 = vmatmul.mubr.f32.vlgmr.msra.gmra.mrb[2].mxu1 %v3043_v5 }
 0x206   : > { %2290 = vmatpush1.bf16.msra.mxu0 %v2289_v4  ;;  %1158 = vmatprep.mubr.f32.mxu1 %v2591_v59  ;;  %v1387_v4 = vld [vmem:[%s3571_s6 + $0x88] sm:$0xff] }
 0x207   : > { %2292 = vmatprep.subr.bf16.mxu0 %v2291_v6  ;;  %v2363_v6 = vpack.c.bf16 %v1387_v4, %v1386_v3  ;;  %v2027_v3 = vld [vmem:[%s3571_s6 + $0x2a8] sm:$0xff]  ;;  %v2010_v4 = vld [vmem:[%s3571_s6 + $0x220] sm:$0xff] }
 0x209   : > { %1159 = vmatmul.mubr.f32.gmra.mrb[4].mxu1 %v3060_v12  ;;  %2364 = vmatprep.subr.bf16.mxu1 %v2363_v6  ;;  %v2011_v6 = vld [vmem:[%s3571_s6 + $0x228] sm:$0xff] }
 0x20a   : > { %2294 = vmatpush1.bf16.msra.mxu0 %v2293_v23  ;;  %v1373_v23 = vld [vmem:[%s3571_s6 + $0x18] sm:$0xff] }
 0x20b   : > { %2296 = vmatprep.subr.bf16.mxu0 %v2295_v13  ;;  %v1390_v13 = vld [vmem:[%s3571_s6 + $0xa0] sm:$0xff] }
 0x20c   : > { %v2371_v15 = vpack.c.bf16 %v1391_v14, %v1390_v13  ;;  %v2031_v13 = vld [vmem:[%s3571_s6 + $0x2c8] sm:$0xff]  ;;  %v2014_v14 = vld [vmem:[%s3571_s6 + $0x240] sm:$0xff] }
 0x20e   : > { %2298 = vmatpush1.bf16.msra.mxu0 %v2297_v27  ;;  %v2373_v27 = vpack.c.bf16 %v1375_v17, %v1374_v16 }
 0x20f   : > { %2332 = vmatprep.subr.bf16.mxu0 %v2331_v18  ;;  %v1392_v18 = vld [vmem:[%s3571_s6 + $0xb0] sm:$0xff] }
 0x210   : > { %v2375_v20 = vpack.c.bf16 %v1393_v19, %v1392_v18  ;;  %v2033_v18 = vld [vmem:[%s3571_s6 + $0x2d8] sm:$0xff]  ;;  %v2016_v19 = vld [vmem:[%s3571_s6 + $0x250] sm:$0xff] }
 0x211   : > { %1076 = vmatmul.mubr.f32.vlgmr.msra.gmra.mrb[2].mxu0 %v3043_v5 }
 0x212   : > { %2334 = vmatpush1.bf16.msra.mxu0 %v2333_v24  ;;  %1081 = vmatprep.mubr.f32.mxu0 %v2591_v59  ;;  %v2377_v24 = vpack.c.bf16 %v1377_v22, %v1376_v21 }
 0x213   : > { %2336 = vmatprep.subr.bf16.mxu0 %v2335_v25  ;;  %v1394_v25 = vld [vmem:[%s3571_s6 + $0xc0] sm:$0xff] }
 0x214   : > { %v2379_v28 = vpack.c.bf16 %v1395_v26, %v1394_v25  ;;  %v2035_v25 = vld [vmem:[%s3571_s6 + $0x2e8] sm:$0xff]  ;;  %v2018_v26 = vld [vmem:[%s3571_s6 + $0x260] sm:$0xff] }
 0x215   : > { %1082 = vmatmul.mubr.f32.gmra.mrb[4].mxu0 %v3060_v12 }
 0x216   : > { %2338 = vmatpush1.bf16.msra.mxu0 %v2337_v33  ;;  %1229 = vmatprep.mubr.f32.mxu0 %v2591_v59  ;;  %v2381_v33 = vpack.c.bf16 %v1379_v31, %v1378_v29 }
 0x217   : > { %2340 = vmatprep.subr.bf16.mxu0 %v2339_v34  ;;  %v1396_v34 = vld [vmem:[%s3571_s6 + $0xd0] sm:$0xff] }
 0x218   : > { %v2383_v36 = vpack.c.bf16 %v1397_v35, %v1396_v34  ;;  %v2037_v34 = vld [vmem:[%s3571_s6 + $0x2f8] sm:$0xff]  ;;  %v2020_v35 = vld [vmem:[%s3571_s6 + $0x270] sm:$0xff] }
 0x21a   : > { %2342 = vmatpush1.bf16.msra.mxu0 %v2341_v39  ;;  %v2385_v39 = vpack.c.bf16 %v1381_v38, %v1380_v37 }
 0x21b   : > { %2344 = vmatprep.subr.bf16.mxu0 %v2343_v40  ;;  %v1398_v40 = vld [vmem:[%s3571_s6 + $0xe0] sm:$0xff] }
 0x21c   : > { %v2387_v32 = vpack.c.bf16 %v1399_v41, %v1398_v40 }
 0x21e   : > { %2346 = vmatpush1.bf16.msra.mxu0 %v2345_v44  ;;  %v2389_v44 = vpack.c.bf16 %v1383_v43, %v1382_v42  ;;  %v1242_v43 = vld [vmem:[%s3570_s5] sm:$0x3f] }
 0x21f   : > { %2348 = vmatprep.subr.bf16.mxu0 %v2347_v45  ;;  %v1400_v45 = vld [vmem:[%s3571_s6 + $0xf0] sm:$0xff] }
 0x220   : > { %v2391_v47 = vpack.c.bf16 %v1401_v46, %v1400_v45 }
 0x222   : > { %2350 = vmatpush1.bf16.msra.mxu0 %v2349_v50  ;;  %v2393_v50 = vpack.c.bf16 %v1385_v49, %v1384_v48 }
 0x223   : > { %2352 = vmatprep.subr.bf16.mxu0 %v2351_v51  ;;  %v1984_v51 = vld [vmem:[%s3571_s6 + $0x180] sm:$0xff] }
 0x224   : > { %v2395_v53 = vpack.c.bf16 %v1985_v52, %v1984_v51 }
 0x226   : > { %2354 = vmatpush1.bf16.msra.mxu0 %v2353_v55  ;;  %v2427_v55 = vpack.c.bf16 %v2023_v54, %v2022_v30 }
 0x227   : > { %2356 = vmatprep.subr.bf16.mxu0 %v2355_v56  ;;  %v2006_v56 = vld [vmem:[%s3571_s6 + $0x200] sm:$0xff] }
 0x228   : > { %v2429_v58 = vpack.c.bf16 %v2007_v57, %v2006_v56 }
 0x22a   : > { %2358 = vmatpush1.bf16.msra.mxu0 %v2357_v62  ;;  %v2008_v62 = vld [vmem:[%s3571_s6 + $0x210] sm:$0xff] }
 0x22b   : > { %2360 = vmatprep.subr.bf16.mxu0 %v2359_v63  ;;  %v2009_v63 = vld [vmem:[%s3571_s6 + $0x218] sm:$0xff] }
 0x22c   : > { %v2433_v1 = vpack.c.bf16 %v2009_v63, %v2008_v62 }
 0x22e   : > { %2362 = vmatpush1.bf16.msra.mxu0 %v2361_v2  ;;  %v2026_v2 = vld [vmem:[%s3571_s6 + $0x2a0] sm:$0xff] }
 0x22f   : > { %2428 = vmatprep.subr.bf16.mxu0 %v2427_v55 }
 0x231   : > { %1230 = vmatmul.mubr.f32.vlgmr.msra.gmra.mrb[6].mxu0 %v3043_v5 }
 0x232   : > { %1235 = vmatprep.mubr.f32.mxu0 %v2591_v59  ;;  %v1371_v59 = vld [vmem:[%s3571_s6 + $0x8] sm:$0xff]  ;;  %2430 = vmatpush3.bf16.msra.mxu0 %v2429_v58 }
 0x233   : > { %v2365_v5 = vpack.c.bf16 %v1371_v59, %v1370_v7  ;;  %2432 = vmatprep.subr.bf16.mxu0 %v2431_v0  ;;  %v2435_v7 = vpack.c.bf16 %v2027_v3, %v2026_v2  ;;  %v2437_v59 = vpack.c.bf16 %v2011_v6, %v2010_v4 }
 0x235   : > { %1236 = vmatmul.mubr.f32.gmra.mrb[8].mxu0 %v3060_v12  ;;  %2366 = vmatpush3.bf16.msra.mxu1 %v2365_v5  ;;  %v2369_v12 = vpack.c.bf16 %v1373_v23, %v1372_v11  ;;  %v2028_v5 = vld [vmem:[%s3571_s6 + $0x2b0] sm:$0xff] }
 0x236   : > { %2368 = vmatprep.subr.bf16.mxu1 %v2367_v10  ;;  %2434 = vmatpush3.bf16.msra.mxu0 %v2433_v1  ;;  %v2013_v10 = vld [vmem:[%s3571_s6 + $0x238] sm:$0xff]  ;;  %v2439_v11 = vpack.c.bf16 %v2029_v8, %v2028_v5 }
 0x237   : > { %2436 = vmatprep.subr.bf16.mxu0 %v2435_v7  ;;  %v2441_v23 = vpack.c.bf16 %v2013_v10, %v2012_v9 }
 0x239   : > { %2370 = vmatpush3.bf16.msra.mxu1 %v2369_v12  ;;  %v2030_v12 = vld [vmem:[%s3571_s6 + $0x2c0] sm:$0xff] }
 0x23a   : > { %2372 = vmatprep.subr.bf16.mxu1 %v2371_v15  ;;  %2438 = vmatpush3.bf16.msra.mxu0 %v2437_v59  ;;  %v2015_v15 = vld [vmem:[%s3571_s6 + $0x248] sm:$0xff]  ;;  %v2443_v16 = vpack.c.bf16 %v2031_v13, %v2030_v12 }
 0x23b   : > { %2440 = vmatprep.subr.bf16.mxu0 %v2439_v11  ;;  %v2445_v17 = vpack.c.bf16 %v2015_v15, %v2014_v14 }
 0x23d   : > { %2374 = vmatpush3.bf16.msra.mxu1 %v2373_v27  ;;  %v2032_v27 = vld [vmem:[%s3571_s6 + $0x2d0] sm:$0xff] }
 0x23e   : > { %2376 = vmatprep.subr.bf16.mxu1 %v2375_v20  ;;  %2442 = vmatpush3.bf16.msra.mxu0 %v2441_v23  ;;  %v2017_v20 = vld [vmem:[%s3571_s6 + $0x258] sm:$0xff]  ;;  %v2447_v21 = vpack.c.bf16 %v2033_v18, %v2032_v27 }
 0x23f   : > { %2444 = vmatprep.subr.bf16.mxu0 %v2443_v16  ;;  %v2449_v22 = vpack.c.bf16 %v2017_v20, %v2016_v19  ;;  %v1968_v16 = vld [vmem:[%s3571_s6 + $0x100] sm:$0xff]  ;;  %v1986_v19 = vld [vmem:[%s3571_s6 + $0x190] sm:$0xff]  ;;  %v1987_v20 = vld [vmem:[%s3571_s6 + $0x198] sm:$0xff] }
 0x241   : > { %2378 = vmatpush3.bf16.msra.mxu1 %v2377_v24  ;;  %v2034_v24 = vld [vmem:[%s3571_s6 + $0x2e0] sm:$0xff] }
 0x242   : > { %2380 = vmatprep.subr.bf16.mxu1 %v2379_v28  ;;  %2446 = vmatpush3.bf16.msra.mxu0 %v2445_v17  ;;  %v2019_v28 = vld [vmem:[%s3571_s6 + $0x268] sm:$0xff]  ;;  %v2451_v29 = vpack.c.bf16 %v2035_v25, %v2034_v24 }
 0x243   : > { %2448 = vmatprep.subr.bf16.mxu0 %v2447_v21  ;;  %v2453_v31 = vpack.c.bf16 %v2019_v28, %v2018_v26  ;;  %v1969_v17 = vld [vmem:[%s3571_s6 + $0x108] sm:$0xff] }
 0x245   : > { %2382 = vmatpush3.bf16.msra.mxu1 %v2381_v33  ;;  %v2036_v33 = vld [vmem:[%s3571_s6 + $0x2f0] sm:$0xff] }
 0x246   : > { %2384 = vmatprep.subr.bf16.mxu1 %v2383_v36  ;;  %2450 = vmatpush3.bf16.msra.mxu0 %v2449_v22  ;;  %v2021_v36 = vld [vmem:[%s3571_s6 + $0x278] sm:$0xff]  ;;  %v2455_v37 = vpack.c.bf16 %v2037_v34, %v2036_v33 }
 0x247   : > { %2452 = vmatprep.subr.bf16.mxu0 %v2451_v29  ;;  %v2457_v38 = vpack.c.bf16 %v2021_v36, %v2020_v35  ;;  %v2397_v29 = vpack.c.bf16 %v1969_v17, %v1968_v16  ;;  %v2399_v36 = vpack.c.bf16 %v1987_v20, %v1986_v19  ;;  %v1978_v19 = vld [vmem:[%s3571_s6 + $0x150] sm:$0xff]  ;;  %v1979_v20 = vld [vmem:[%s3571_s6 + $0x158] sm:$0xff] }
 0x249   : > { %2386 = vmatpush3.bf16.msra.mxu1 %v2385_v39  ;;  %v1244_v39 = vlaneseq }
 0x24a   : > { %2388 = vmatprep.subr.bf16.mxu1 %v2387_v32  ;;  %2454 = vmatpush3.bf16.msra.mxu0 %v2453_v31 }
 0x24b   : > { %2456 = vmatprep.subr.bf16.mxu0 %v2455_v37  ;;  %v1245_v40 = vshrl.u32 %v1244_v39, 7  ;;  %v1970_v37 = vld [vmem:[%s3571_s6 + $0x110] sm:$0xff] }
 0x24d   : > { %2390 = vmatpush3.bf16.msra.mxu1 %v2389_v44  ;;  %v1258_v42 = vsub.s32 3, %v1245_v40  ;;  %v1246_v46 = vsub.s32 0, %v1245_v40  ;;  %v1250_v48 = vsub.s32 1, %v1245_v40  ;;  %v1254_v7 = vsub.s32 2, %v1245_v40 }
 0x24e   : > { %2392 = vmatprep.subr.bf16.mxu1 %v2391_v47  ;;  %2458 = vmatpush3.bf16.msra.mxu0 %v2457_v38  ;;  %v1262_v23 = vsub.s32 4, %v1245_v40  ;;  %v1266_v12 = vsub.s32 5, %v1245_v40  ;;  %v1971_v38 = vld [vmem:[%s3571_s6 + $0x118] sm:$0xff] }
 0x24f   : > { %v1259_v47 = vrot.slane %v1242_v43, %v1258_v42  ;;  %v1247_v49 = vrot.slane %v1242_v43, %v1246_v46  ;;  %v1251_v51 = vrot.slane %v1242_v43, %v1250_v48  ;;  %v1255_v10 = vrot.slane %v1242_v43, %v1254_v7  ;;  %v1976_v7 = vld [vmem:[%s3571_s6 + $0x140] sm:$0xff] }
 0x250   : > { %v1263_v15 = vrot.slane %v1242_v43, %v1262_v23  ;;  %v1267_v18 = vrot.slane %v1242_v43, %v1266_v12  ;;  %v2401_v48 = vpack.c.bf16 %v1971_v38, %v1970_v37  ;;  %v1981_v37 = vld [vmem:[%s3571_s6 + $0x168] sm:$0xff]  ;;  %v1998_v38 = vld [vmem:[%s3571_s6 + $0x1f0] sm:$0xff] }
 0x251   : > { %2394 = vmatpush3.bf16.msra.mxu1 %v2393_v50 }
 0x252   : > { %2396 = vmatprep.subr.bf16.mxu1 %v2395_v53 }
 0x2d8   : > { %v1154_v41 = vpop.f32.mrb[2].mxu1 }
 0x2d9   : > { %v1156_v32 = vpop.f32.mrb[3].mxu1  ;;  %v3379_v13 = vadd.f32 %v1255_v10, %v1154_v41  ;;  %v1988_v41 = vld [vmem:[%s3571_s6 + $0x1a0] sm:$0xff] }
 0x2da   : > { %v3373_v50 = vadd.f32 %v1259_v47, %v1156_v32  ;;  %v1989_v32 = vld [vmem:[%s3571_s6 + $0x1a8] sm:$0xff] }
 0x2db   : > { %v1955_v22 = vmul.f32 -1.442695, %v3379_v13 }
 0x2dc   : > { %v1160_v44 = vpop.f32.mrb[4].mxu1  ;;  %v1956_v54 = vmul.f32 -1.442695, %v3373_v50 }
 0x2dd   : > { %v1162_v45 = vpop.f32.mrb[5].mxu1  ;;  %v3396_v24 = vadd.f32 %v1255_v10, %v1160_v44 }
 0x2de   : > { %v3381_v14 = vadd.f32 %v1259_v47, %v1162_v45 }
 0x2df   : > { %v1961_v43 = vmul.f32 -1.442695, %v3396_v24 }
 0x2e0   : > { %v1962_v25 = vmul.f32 -1.442695, %v3381_v14 }
 0x2e4   : > { %v1077_v52 = vpop.f32.mrb[2].mxu0 }
 0x2e5   : > { %v1274_v53 = vadd.f32 %v1247_v49, %v1077_v52  ;;  %v1079_v30 = vpop.f32.mrb[3].mxu0 }
 0x2e6   : > { %v1275_v55 = vadd.f32 %v1251_v51, %v1079_v30  ;;  %v1972_v30 = vld [vmem:[%s3571_s6 + $0x120] sm:$0xff] }
 0x2e7   : > { %v1953_v56 = vmul.f32 -1.442695, %v1274_v53 }
 0x2e8   : > { %v1954_v57 = vmul.f32 -1.442695, %v1275_v55  ;;  %v1083_v58 = vpop.f32.mrb[4].mxu0 }
 0x2e9   : > { %2505 = vpow2.f32 %v1953_v56  ;;  %v3376_v60 = vadd.f32 %v1247_v49, %v1083_v58  ;;  %v1085_v61 = vpop.f32.mrb[5].mxu0  ;;  %v1991_v58 = vld [vmem:[%s3571_s6 + $0x1b8] sm:$0xff] }
 0x2ea   : > { %2507 = vpow2.f32 %v1956_v54  ;;  %v1281_v62 = vadd.f32 %v1251_v51, %v1085_v61  ;;  %v1973_v54 = vld [vmem:[%s3571_s6 + $0x128] sm:$0xff] }
 0x2eb   : > { %v1959_v63 = vmul.f32 -1.442695, %v3376_v60  ;;  %2509 = vpow2.f32 %v1954_v57  ;;  %v1990_v57 = vld [vmem:[%s3571_s6 + $0x1b0] sm:$0xff] }
 0x2ec   : > { %v1960_v0 = vmul.f32 -1.442695, %v1281_v62 }
 0x2ed   : > { %2511 = vpow2.f32 %v1959_v63  ;;  %v1974_v63 = vld [vmem:[%s3571_s6 + $0x130] sm:$0xff] }
 0x2ee   : > { %2513 = vpow2.f32 %v1960_v0  ;;  %v1975_v0 = vld [vmem:[%s3571_s6 + $0x138] sm:$0xff] }
 0x2f3   : > { %v2506_v1 = vpop.eup %2505 }
 0x2f4   : > { %v2508_v2 = vpop.eup %2507  ;;  %v1322_v3 = vadd.f32 1.0, %v2506_v1  ;;  %v1992_v1 = vld [vmem:[%s3571_s6 + $0x1c0] sm:$0xff] }
 0x2f5   : > { %v2510_v4 = vpop.eup %2509  ;;  %v1325_v59 = vadd.f32 1.0, %v2508_v2  ;;  %v1993_v2 = vld [vmem:[%s3571_s6 + $0x1c8] sm:$0xff] }
 0x2f6   : > { %v1323_v5 = vadd.f32 1.0, %v2510_v4  ;;  %2515 = vrcp.f32 %v1322_v3  ;;  %v2409_v3 = vpack.c.bf16 %v1975_v0, %v1974_v63 }
 0x2f7   : > { %v2512_v6 = vpop.eup %2511 }
 0x2f8   : > { %v1328_v8 = vadd.f32 1.0, %v2512_v6  ;;  %2517 = vrcp.f32 %v1323_v5  ;;  %v2514_v9 = vpop.eup %2513  ;;  %v2411_v6 = vpack.c.bf16 %v1993_v2, %v1992_v1 }
 0x2f9   : > { %2519 = vrcp.f32 %v1325_v59  ;;  %v1329_v11 = vadd.f32 1.0, %v2514_v9  ;;  %v1977_v59 = vld [vmem:[%s3571_s6 + $0x148] sm:$0xff]  ;;  %v1995_v9 = vld [vmem:[%s3571_s6 + $0x1d8] sm:$0xff] }
 0x2fa   : > { %2521 = vrcp.f32 %v1328_v8  ;;  %v1994_v8 = vld [vmem:[%s3571_s6 + $0x1d0] sm:$0xff] }
 0x2fb   : > { %2523 = vrcp.f32 %v1329_v11 }
 0x2fc   : > { %2525 = vpow2.f32 %v1955_v22  ;;  %v1997_v22 = vld [vmem:[%s3571_s6 + $0x1e8] sm:$0xff] }
 0x2fd   : > { %2527 = vpow2.f32 %v1962_v25 }
 0x300   : > { %v2516_v27 = vpop.eup %2515 }
 0x301   : > { %v1358_v33 = vmul.f32 %v2516_v27, %v1274_v53  ;;  %v2403_v53 = vpack.c.bf16 %v1989_v32, %v1988_v41 }
 0x302   : > { %v2518_v21 = vpop.eup %2517 }
 0x303   : > { %v1359_v26 = vmul.f32 %v2518_v21, %v1275_v55  ;;  %v2520_v31 = vpop.eup %2519  ;;  %v1996_v21 = vld [vmem:[%s3571_s6 + $0x1e0] sm:$0xff] }
 0x304   : > { %v1231_v28 = vpop.f32.mrb[6].mxu0  ;;  %v2522_v39 = vpop.eup %2521  ;;  %v1361_v55 = vmul.f32 %v2520_v31, %v3373_v50  ;;  %v2405_v50 = vpack.c.bf16 %v1973_v54, %v1972_v30  ;;  %v2417_v31 = vpack.c.bf16 %v1979_v20, %v1978_v19 }
 0x305   : > { %v3399_v34 = vadd.f32 %v1263_v15, %v1231_v28  ;;  %v1233_v35 = vpop.f32.mrb[7].mxu0  ;;  %1473 = vmatprep.mubr.f32.mxu1 %v1359_v26  ;;  %v2524_v42 = vpop.eup %2523  ;;  %v1364_v49 = vmul.f32 %v2522_v39, %v3376_v60  ;;  %v1999_v39 = vld [vmem:[%s3571_s6 + $0x1f8] sm:$0xff] }
 0x306   : > { %v3407_v40 = vadd.f32 %v1267_v18, %v1233_v35  ;;  %1474 = vmatmul.mubr.f32.vlgmr.msra.gmra.mrb[6].mxu1 %v1358_v33  ;;  %v1365_v45 = vmul.f32 %v2524_v42, %v1281_v62  ;;  %v2407_v62 = vpack.c.bf16 %v1991_v58, %v1990_v57  ;;  %v2526_v4 = vpop.eup %2525  ;;  %v2419_v35 = vpack.c.bf16 %v1997_v22, %v1996_v21  ;;  %v1982_v42 = vld [vmem:[%s3571_s6 + $0x170] sm:$0xff] }
 0x307   : > { %v1957_v44 = vmul.f32 -1.442695, %v3399_v34  ;;  %2398 = vmatpush3.bf16.msra.mxu1 %v2397_v29  ;;  %v2528_v5 = vpop.eup %2527  ;;  %v1324_v23 = vadd.f32 1.0, %v2526_v4  ;;  %v2423_v32 = vpack.c.bf16 %v1999_v39, %v1998_v38 }
 0x308   : > { %v1958_v46 = vmul.f32 -1.442695, %v3407_v40  ;;  %v1237_v47 = vpop.f32.mrb[8].mxu0  ;;  %2400 = vmatprep.subr.bf16.mxu1 %v2399_v36  ;;  %1478 = vmatprep.mubr.f32.mxu1 %v1365_v45  ;;  %v1331_v17 = vadd.f32 1.0, %v2528_v5  ;;  %v1980_v36 = vld [vmem:[%s3571_s6 + $0x160] sm:$0xff] }
 0x309   : > { %2529 = vpow2.f32 %v1957_v44  ;;  %v3419_v51 = vadd.f32 %v1263_v15, %v1237_v47  ;;  %v1239_v52 = vpop.f32.mrb[9].mxu0  ;;  %v2413_v15 = vpack.c.bf16 %v1977_v59, %v1976_v7  ;;  %v2421_v41 = vpack.c.bf16 %v1981_v37, %v1980_v36 }
 0x30a   : > { %2531 = vpow2.f32 %v1958_v46  ;;  %v3428_v56 = vadd.f32 %v1267_v18, %v1239_v52  ;;  %1479 = vmatmul.mubr.f32.gmra.mrb[8].mxu1 %v1364_v49  ;;  %v2415_v18 = vpack.c.bf16 %v1995_v9, %v1994_v8 }
 0x30b   : > { %2533 = vpow2.f32 %v1961_v43  ;;  %v1963_v60 = vmul.f32 -1.442695, %v3419_v51  ;;  %2402 = vmatpush3.bf16.msra.mxu1 %v2401_v48  ;;  %1633 = vmatprep.mubr.f32.mxu1 %v1361_v55  ;;  %v1983_v43 = vld [vmem:[%s3571_s6 + $0x178] sm:$0xff] }
 0x30c   : > { %v1964_v61 = vmul.f32 -1.442695, %v3428_v56  ;;  %2404 = vmatprep.subr.bf16.mxu1 %v2403_v53  ;;  %v2425_v45 = vpack.c.bf16 %v1983_v43, %v1982_v42 }
 0x30d   : > { %2535 = vpow2.f32 %v1963_v60 }
 0x30e   : > { %2537 = vpow2.f32 %v1964_v61 }
 0x30f   : > { %2406 = vmatpush3.bf16.msra.mxu1 %v2405_v50 }
 0x310   : > { %2408 = vmatprep.subr.bf16.mxu1 %v2407_v62 }
 0x313   : > { %v2530_v10 = vpop.eup %2529  ;;  %2410 = vmatpush3.bf16.msra.mxu1 %v2409_v3 }
 0x314   : > { %v2532_v11 = vpop.eup %2531  ;;  %v1326_v12 = vadd.f32 1.0, %v2530_v10  ;;  %2412 = vmatprep.subr.bf16.mxu1 %v2411_v6  ;;  %v2001_v6 = vld [vmem:[%s3572_s7 + $0x1] ss:$0 sm:$0xff] }
 0x315   : > { %v2534_v16 = vpop.eup %2533  ;;  %v1327_v27 = vadd.f32 1.0, %v2532_v11 }
 0x316   : > { %2539 = vrcp.f32 %v1326_v12  ;;  %v1330_v28 = vadd.f32 1.0, %v2534_v16 }
 0x317   : > { %v2536_v25 = vpop.eup %2535  ;;  %2541 = vrcp.f32 %v1327_v27  ;;  %2414 = vmatpush3.bf16.msra.mxu1 %v2413_v15 }
 0x318   : > { %v2538_v26 = vpop.eup %2537  ;;  %2543 = vrcp.f32 %v1324_v23  ;;  %v1332_v29 = vadd.f32 1.0, %v2536_v25  ;;  %2416 = vmatprep.subr.bf16.mxu1 %v2415_v18 }
 0x319   : > { %2545 = vrcp.f32 %v1331_v17  ;;  %v1333_v33 = vadd.f32 1.0, %v2538_v26 }
 0x31a   : > { %2547 = vrcp.f32 %v1332_v29 }
 0x31b   : > { %2549 = vrcp.f32 %v1333_v33  ;;  %2418 = vmatpush3.bf16.msra.mxu1 %v2417_v31 }
 0x31c   : > { %2551 = vrcp.f32 %v1330_v28  ;;  %2420 = vmatprep.subr.bf16.mxu1 %v2419_v35 }
 0x31f   : > { %2422 = vmatpush3.bf16.msra.mxu1 %v2421_v41 }
 0x320   : > { %v2540_v44 = vpop.eup %2539  ;;  %2424 = vmatprep.subr.bf16.mxu1 %v2423_v32 }
 0x321   : > { %v2542_v46 = vpop.eup %2541  ;;  %v1362_v52 = vmul.f32 %v2540_v44, %v3399_v34 }
 0x322   : > { %v2544_v47 = vpop.eup %2543  ;;  %v1363_v48 = vmul.f32 %v2542_v46, %v3407_v40 }
 0x323   : > { %v2546_v49 = vpop.eup %2545  ;;  %2426 = vmatpush3.bf16.msra.mxu1 %v2425_v45  ;;  %v1360_v54 = vmul.f32 %v2544_v47, %v3379_v13  ;;  %v1965_v13 = vld [vmem:[%s3572_s7] ss:$0 sm:$0xff] }
 0x324   : > { %v2548_v53 = vpop.eup %2547  ;;  %1795 = vmatprep.mubr.f32.mxu0 %v1363_v48  ;;  %v1367_v57 = vmul.f32 %v2546_v49, %v3381_v14 }
 0x325   : > { %v2550_v30 = vpop.eup %2549  ;;  %1796 = vmatmul.mubr.f32.vlgmr.msra.gmra.mrb[10].mxu0 %v1362_v52  ;;  %v1368_v60 = vmul.f32 %v2548_v53, %v3419_v51 }
 0x326   : > { %v2552_v55 = vpop.eup %2551  ;;  %v1369_v58 = vmul.f32 %v2550_v30, %v3428_v56  ;;  %1634 = vmatmul.mubr.f32.vlgmr.msra.gmra.mrb[10].mxu1 %v1360_v54  ;;  %v1966_v54 = vld [vmem:[%s3573_s8] ss:$0 sm:$0xff] }
 0x327   : > { %1638 = vmatprep.mubr.f32.mxu1 %v1367_v57  ;;  %v1366_v40 = vmul.f32 %v2552_v55, %v3396_v24  ;;  %v2039_v24 = vld [vmem:[%s3572_s7 + $0x2] ss:$0 sm:$0xff]  ;;  %v1967_v57 = vld [vmem:[%s3574_s9] ss:$0 sm:$0xff] }
 0x328   : > { %1800 = vmatprep.mubr.f32.mxu0 %v1369_v58 }
 0x329   : > { %1801 = vmatmul.mubr.f32.gmra.mrb[12].mxu0 %v1368_v60 }
 0x32a   : > { %1639 = vmatmul.mubr.f32.gmra.mrb[12].mxu1 %v1366_v40 }
 0x3d9   : > { %v2095_v34 = vpop.f32.mrb[6].mxu1 }
 0x3da   : > { %v2096_v61 = vpop.f32.mrb[7].mxu1 }
 0x3db   : > { %v2097_v50 = vadd.f32 %v2096_v61, %v2095_v34  ;;  %v2565_v61 = vld [vmem:[%s2711_s30] sm:$0xff] }
 0x3dd   : > { %v2098_v62 = vpop.f32.mrb[8].mxu1  ;;  %v1476_v14 = vadd.f32 %v2097_v50, %v1965_v13 }
 0x3de   : > { %v2099_v63 = vpop.f32.mrb[9].mxu1 }
 0x3df   : > { %v2100_v56 = vadd.f32 %v2099_v63, %v2098_v62  ;;  %1486 = vadd.xlane.f32.xlu0 %v1476_v14 }
 0x3e1   : > { %v1481_v51 = vadd.f32 %v2100_v56, %v1965_v13 }
 0x3e3   : > { %1488 = vadd.xlane.f32.xlu1 %v1481_v51 }
 0x3f8   : > { %v2171_v0 = vpop.f32.mrb[10].mxu0 }
 0x3f9   : > { %v2172_v1 = vpop.f32.mrb[11].mxu0  ;;  %v2133_v2 = vpop.f32.mrb[10].mxu1 }
 0x3fa   : > { %v2173_v3 = vadd.f32 %v2172_v1, %v2171_v0  ;;  %v2134_v4 = vpop.f32.mrb[11].mxu1 }
 0x3fb   : > { %v2135_v7 = vadd.f32 %v2134_v4, %v2133_v2 }
 0x3fc   : > { %v2174_v59 = vpop.f32.mrb[12].mxu0  ;;  %v1798_v5 = vadd.f32 %v2173_v3, %v2039_v24 }
 0x3fd   : > { %v2175_v8 = vpop.f32.mrb[13].mxu0  ;;  %v2136_v9 = vpop.f32.mrb[12].mxu1  ;;  %v1636_v10 = vadd.f32 %v2135_v7, %v2001_v6 }
 0x3fe   : > { %v2176_v11 = vadd.f32 %v2175_v8, %v2174_v59  ;;  %1810 = vadd.xlane.f32.xlu0 %v1798_v5  ;;  %v2137_v23 = vpop.f32.mrb[13].mxu1 }
 0x3ff   : > { %v2138_v12 = vadd.f32 %v2137_v23, %v2136_v9  ;;  %1648 = vadd.xlane.f32.xlu1 %v1636_v10  ;;  %v2042_v9 = vld [vmem:[%s3573_s8 + $0x2] ss:$0 sm:$0xff]  ;;  %v2004_v23 = vld [vmem:[%s3573_s8 + $0x1] ss:$0 sm:$0xff] }
 0x400   : > { %v1803_v15 = vadd.f32 %v2176_v11, %v2039_v24 }
 0x401   : > { %v1641_v16 = vadd.f32 %v2138_v12, %v2001_v6  ;;  %v2043_v12 = vld [vmem:[%s3574_s9 + $0x2] ss:$0 sm:$0xff] }
 0x403   : > { %1650 = vadd.xlane.f32.xlu0 %v1641_v16  ;;  %1812 = vadd.xlane.f32.xlu1 %v1803_v15 }
 0x46c   : > { %v1487_v17 = vpop.xlane.xlu0 %1486 }
 0x46d   : > { %v1490_v27 = vmul.f32 0.0078125, %v1487_v17  ;;  %v2005_v17 = vld [vmem:[%s3574_s9 + $0x1] ss:$0 sm:$0xff] }
 0x46f   : > { %v1492_v18 = vsub.f32 %v1476_v14, %v1490_v27  ;;  %v2566_v14 = vld [vmem:[%s2711_s30 + $0x8] sm:$0xff] }
 0x470   : > { %v1489_v19 = vpop.xlane.xlu1 %1488 }
 0x471   : > { %v1491_v20 = vmul.f32 0.0078125, %v1489_v19  ;;  %v1494_v21 = vmul.f32 %v1492_v18, %v1492_v18 }
 0x473   : > { %v1493_v22 = vsub.f32 %v1481_v51, %v1491_v20  ;;  %1496 = vadd.xlane.f32.xlu0 %v1494_v21 }
 0x475   : > { %v1495_v25 = vmul.f32 %v1493_v22, %v1493_v22 }
 0x477   : > { %1498 = vadd.xlane.f32.xlu1 %v1495_v25 }
 0x48b   : > { %v1811_v26 = vpop.xlane.xlu0 %1810 }
 0x48c   : > { %v1814_v28 = vmul.f32 0.0078125, %v1811_v26  ;;  %v1649_v29 = vpop.xlane.xlu1 %1648 }
 0x48d   : > { %v1652_v31 = vmul.f32 0.0078125, %v1649_v29 }
 0x48e   : > { %v1816_v33 = vsub.f32 %v1798_v5, %v1814_v28 }
 0x48f   : > { %v3508_v35 = vsub.f32 %v1636_v10, %v1652_v31 }
 0x490   : > { %v1818_v36 = vmul.f32 %v1816_v33, %v1816_v33  ;;  %v1651_v37 = vpop.xlane.xlu0 %1650  ;;  %v1813_v38 = vpop.xlane.xlu1 %1812 }
 0x491   : > { %v1653_v39 = vmul.f32 0.0078125, %v1651_v37  ;;  %v1815_v41 = vmul.f32 0.0078125, %v1813_v38  ;;  %v1656_v32 = vmul.f32 %v3508_v35, %v3508_v35 }
 0x492   : > { %1820 = vadd.xlane.f32.xlu0 %v1818_v36 }
 0x493   : > { %v3512_v42 = vsub.f32 %v1641_v16, %v1653_v39  ;;  %v3514_v43 = vsub.f32 %v1803_v15, %v1815_v41  ;;  %1658 = vadd.xlane.f32.xlu1 %v1656_v32 }
 0x495   : > { %v1657_v44 = vmul.f32 %v3512_v42, %v3512_v42  ;;  %v1819_v45 = vmul.f32 %v3514_v43, %v3514_v43 }
 0x497   : > { %1660 = vadd.xlane.f32.xlu0 %v1657_v44  ;;  %1822 = vadd.xlane.f32.xlu1 %v1819_v45 }
 0x500   : > { %v1497_v46 = vpop.xlane.xlu0 %1496 }
 0x501   : > { %v1500_v47 = vmul.f32 0.0078125, %v1497_v46 }
 0x503   : > { %v1502_v48 = vadd.f32 1e-05, %v1500_v47 }
 0x504   : > { %v1499_v49 = vpop.xlane.xlu1 %1498 }
 0x505   : > { %2553 = vrsqrt.f32 %v1502_v48  ;;  %v1501_v52 = vmul.f32 0.0078125, %v1499_v49 }
 0x507   : > { %v1503_v53 = vadd.f32 1e-05, %v1501_v52 }
 0x509   : > { %2555 = vrsqrt.f32 %v1503_v53 }
 0x50f   : > { %v2554_v30 = vpop.eup %2553 }
 0x510   : > { %v1506_v55 = vmul.f32 %v2554_v30, %v1492_v18 }
 0x512   : > { %v1514_v58 = vmul.f32 %v1966_v54, %v1506_v55 }
 0x513   : > { %v2556_v60 = vpop.eup %2555 }
 0x514   : > { %v1522_v40 = vadd.f32 %v1967_v57, %v1514_v58  ;;  %v1507_v34 = vmul.f32 %v2556_v60, %v1493_v22 }
 0x516   : > { %v1524_v13 = vadd.f32 %v2565_v61, %v1522_v40  ;;  %v1515_v50 = vmul.f32 %v1966_v54, %v1507_v34 }
 0x518   : > { %1526 = vst [vmem:[%s3530_s24] sm:$0xff] %v1524_v13  ;;  %v1523_v62 = vadd.f32 %v1967_v57, %v1515_v50 }
 0x51a   : > { %v1525_v63 = vadd.f32 %v2566_v14, %v1523_v62 }
 0x51c   : > { %1527 = vst [vmem:[%s3530_s24 + $0x18] sm:$0xff] %v1525_v63 }
 0x51f   : > { %v1821_v56 = vpop.xlane.xlu0 %1820 }
 0x520   : > { %v1824_v51 = vmul.f32 0.0078125, %v1821_v56  ;;  %v1659_v0 = vpop.xlane.xlu1 %1658 }
 0x521   : > { %v1662_v1 = vmul.f32 0.0078125, %v1659_v0 }
 0x522   : > { %v1826_v24 = vadd.f32 1e-05, %v1824_v51 }
 0x523   : > { %v1664_v2 = vadd.f32 1e-05, %v1662_v1 }
 0x524   : > { %2557 = vrsqrt.f32 %v1826_v24  ;;  %v1661_v3 = vpop.xlane.xlu0 %1660  ;;  %v1823_v4 = vpop.xlane.xlu1 %1822 }
 0x525   : > { %2559 = vrsqrt.f32 %v1664_v2  ;;  %v1663_v6 = vmul.f32 0.0078125, %v1661_v3  ;;  %v1825_v7 = vmul.f32 0.0078125, %v1823_v4 }
 0x527   : > { %v1665_v59 = vadd.f32 1e-05, %v1663_v6  ;;  %v1827_v5 = vadd.f32 1e-05, %v1825_v7 }
 0x529   : > { %2561 = vrsqrt.f32 %v1665_v59 }
 0x52a   : > { %2563 = vrsqrt.f32 %v1827_v5 }
 0x52e   : > { %v2558_v8 = vpop.eup %2557 }
 0x52f   : > { %v1830_v10 = vmul.f32 %v2558_v8, %v1816_v33  ;;  %v2560_v11 = vpop.eup %2559 }
 0x530   : > { %v1668_v15 = vmul.f32 %v2560_v11, %v3508_v35 }
 0x531   : > { %v1838_v16 = vmul.f32 %v2042_v9, %v1830_v10 }
 0x532   : > { %v1676_v27 = vmul.f32 %v2004_v23, %v1668_v15 }
 0x533   : > { %v1846_v18 = vadd.f32 %v2043_v12, %v1838_v16  ;;  %v2562_v19 = vpop.eup %2561 }
 0x534   : > { %v2564_v20 = vpop.eup %2563  ;;  %v1684_v21 = vadd.f32 %v2005_v17, %v1676_v27  ;;  %v1669_v25 = vmul.f32 %v2562_v19, %v3512_v42 }
 0x535   : > { %v1848_v22 = vadd.f32 %v2565_v61, %v1846_v18  ;;  %v1831_v26 = vmul.f32 %v2564_v20, %v3514_v43 }
 0x536   : > { %v1686_v28 = vadd.f32 %v2565_v61, %v1684_v21  ;;  %v1677_v29 = vmul.f32 %v2004_v23, %v1669_v25 }
 0x537   : > { %1850 = vst [vmem:[%s3530_s24 + $0x10] sm:$0xff] %v1848_v22  ;;  %v1839_v31 = vmul.f32 %v2042_v9, %v1831_v26 }
 0x538   : > { %1688 = vst [vmem:[%s3530_s24 + $0x8] sm:$0xff] %v1686_v28  ;;  %v1685_v33 = vadd.f32 %v2005_v17, %v1677_v29 }
 0x539   : > { %v1847_v35 = vadd.f32 %v2043_v12, %v1839_v31 }
 0x53a   : > { %v1687_v36 = vadd.f32 %v2566_v14, %v1685_v33 }
 0x53b   : > { %v1849_v37 = vadd.f32 %v2566_v14, %v1847_v35 }
 0x53c   : > { %1689 = vst [vmem:[%s3530_s24 + $0x20] sm:$0xff] %v1687_v36 }
 0x53d   : > { %1851 = vst [vmem:[%s3530_s24 + $0x28] sm:$0xff] %v1849_v37 }
 0x53e PF: > { %p17_p9 = scmp.ge.s32.totalorder %s2664_s17, 4   ;;  %s3576_s13 = smov %s2585_s14 }
 0x53f   : > { %s3577_s14 = smov %s2673_s20  ;;  %s3578_s15 = smov %s2664_s17 }
 0x540   :  { %19 = sbr.rel (!%p17_p9) target bundleno = 2 (0x2), region = 145 }

// kernel: egnn_forward.8
= control target key start
LH: loop header
LB: loop body
LE: loop exit
PB: predicated region body
PF: predicated region fallthrough
CT: control target
= control target key end

     0   :  { %s1614_s27 = smov 0   ;;  %s1616_s28 = smov 0   ;;  %s2367_s0 = inlined_call_operand.vmem [shape: f32[2,16,384], index: 0, kind: input, shape index: {}]   ;;  %s2368_s1 = inlined_call_operand.vmem [shape: s32[2,1,16], index: 1, kind: input, shape index: {}]   ;;  %s2369_s2 = inlined_call_operand.vmem [shape: f32[384,256], index: 2, kind: input, shape index: {}]   ;;  %s2370_s3 = inlined_call_operand.vmem [shape: f32[1,256], index: 3, kind: input, shape index: {}]   ;;  %s2371_s4 = inlined_call_operand.vmem [shape: f32[256,256], index: 4, kind: input, shape index: {}]   ;;  %s2372_s5 = inlined_call_operand.vmem [shape: f32[1,256], index: 5, kind: input, shape index: {}]   ;;  %s2373_s6 = inlined_call_operand.vmem [shape: f32[256,256], index: 6, kind: input, shape index: {}]   ;;  %s2374_s7 = inlined_call_operand.vmem [shape: f32[1,256], index: 7, kind: input, shape index: {}]   ;;  %s2375_s8 = inlined_call_operand.vmem [shape: f32[2,8,256], index: 8, kind: output, shape index: {}]  }
   0x1   :  { %s1618_s29 = smov 0  }
   0x2 LB: > { %s30_s30 = sadd.s32 1, %s1562_s28  ;;  %p1212_p0 = scmp.ge.s32.totalorder %s1566_s29, 1  ;;  %s1566_s29 = sphi %s1618_s29, %s18_s29   ;;  %s1562_s28 = sphi %s1616_s28, %s2377_s28   ;;  %s1558_s27 = sphi %s1614_s27, %s2376_s27  }
   0x3   : > { %p32_p1 = scmp.ge.s32.totalorder %s30_s30, 2  ;;  %p295_p2 = scmp.lt.s32.totalorder %s1566_s29, 3 }
   0x5   : > { %s2379_s30 = smov (%p32_p1, %s30_s30), 0  ;;  %p296_p3 = pnand %p1212_p0, %p295_p2 }
   0x6   : > { %v375_v0 = vld [vmem:[%s2369_s2 + $0x8] sm:$0xff] (!%p296_p3)  ;;  %v377_v1 = vld [vmem:[%s2369_s2 + $0x18] sm:$0xff] (!%p296_p3)  ;;  %v374_v2 = vld [vmem:[%s2369_s2] sm:$0xff] (!%p296_p3)  ;;  %p341_p4 = scmp.lt.s32.totalorder (!%p296_p3), %s1558_s27, 1  ;;  %vm1038_vm1 = vcmask (!%p296_p3), 130048  }
   0x7   : > { %299 = sbr.rel (%p296_p3) target bundleno = 1060 (0x424), region = 52  ;;  %v1234_v3 = vpack.c.bf16 (!%p296_p3), %v377_v1, %v375_v0  ;;  %v376_v4 = vld [vmem:[%s2369_s2 + $0x10] sm:$0xff] (!%p296_p3)  ;;  %v379_v5 = vld [vmem:[%s2369_s2 + $0x28] sm:$0xff] (!%p296_p3)  ;;  %v381_v6 = vld [vmem:[%s2369_s2 + $0x38] sm:$0xff] (!%p296_p3) }
   0x8   : > { %v1236_v7 = vpack.c.bf16 (!%p296_p3), %v376_v4, %v374_v2  ;;  %v1238_v8 = vpack.c.bf16 (!%p296_p3), %v381_v6, %v379_v5  ;;  %v378_v9 = vld [vmem:[%s2369_s2 + $0x20] sm:$0xff] (!%p296_p3)  ;;  %v380_v10 = vld [vmem:[%s2369_s2 + $0x30] sm:$0xff] (!%p296_p3)  ;;  %v383_v11 = vld [vmem:[%s2369_s2 + $0x48] sm:$0xff] (!%p296_p3) }
   0x9   : > { %1235 = vmatprep.subr.bf16.mxu0 (!%p296_p3), %v1234_v3  ;;  %v385_v12 = vld [vmem:[%s2369_s2 + $0x58] sm:$0xff] (!%p296_p3)  ;;  %v1240_v13 = vpack.c.bf16 (!%p296_p3), %v380_v10, %v378_v9  ;;  %v382_v15 = vld [vmem:[%s2369_s2 + $0x40] sm:$0xff] (!%p296_p3)  ;;  %v384_v16 = vld [vmem:[%s2369_s2 + $0x50] sm:$0xff] (!%p296_p3) }
   0xa   : > { %1237 = vmatpush1.bf16.msra.mxu0 (!%p296_p3), %v1236_v7  ;;  %v1242_v14 = vpack.c.bf16 (!%p296_p3), %v385_v12, %v383_v11  ;;  %v387_v17 = vld [vmem:[%s2369_s2 + $0x68] sm:$0xff] (!%p296_p3)  ;;  %v389_v18 = vld [vmem:[%s2369_s2 + $0x78] sm:$0xff] (!%p296_p3)  ;;  %v1244_v19 = vpack.c.bf16 (!%p296_p3), %v384_v16, %v382_v15  ;;  %v386_v21 = vld [vmem:[%s2369_s2 + $0x60] sm:$0xff] (!%p296_p3) }
   0xb   : > { %1239 = vmatprep.subr.bf16.mxu0 (!%p296_p3), %v1238_v8  ;;  %v1246_v20 = vpack.c.bf16 (!%p296_p3), %v389_v18, %v387_v17  ;;  %v388_v22 = vld [vmem:[%s2369_s2 + $0x70] sm:$0xff] (!%p296_p3)  ;;  %v391_v23 = vld [vmem:[%s2369_s2 + $0x88] sm:$0xff] (!%p296_p3)  ;;  %v393_v24 = vld [vmem:[%s2369_s2 + $0x98] sm:$0xff] (!%p296_p3) }
   0xc   : > { %v1248_v25 = vpack.c.bf16 (!%p296_p3), %v388_v22, %v386_v21  ;;  %v1250_v26 = vpack.c.bf16 (!%p296_p3), %v393_v24, %v391_v23  ;;  %v390_v27 = vld [vmem:[%s2369_s2 + $0x80] sm:$0xff] (!%p296_p3)  ;;  %v392_v28 = vld [vmem:[%s2369_s2 + $0x90] sm:$0xff] (!%p296_p3)  ;;  %v395_v29 = vld [vmem:[%s2369_s2 + $0xa8] sm:$0xff] (!%p296_p3) }
   0xd   : > { %v397_v30 = vld [vmem:[%s2369_s2 + $0xb8] sm:$0xff] (!%p296_p3)  ;;  %v1252_v31 = vpack.c.bf16 (!%p296_p3), %v392_v28, %v390_v27  ;;  %v394_v33 = vld [vmem:[%s2369_s2 + $0xa0] sm:$0xff] (!%p296_p3)  ;;  %v396_v34 = vld [vmem:[%s2369_s2 + $0xb0] sm:$0xff] (!%p296_p3) }
   0xe   : > { %1241 = vmatpush1.bf16.msra.mxu0 %v1240_v13  ;;  %s2381_s27 = smov (!%p341_p4, %s1558_s27), 1  ;;  %v1254_v32 = vpack.c.bf16 %v397_v30, %v395_v29  ;;  %v399_v35 = vld [vmem:[%s2369_s2 + $0xc8] sm:$0xff]  ;;  %v401_v36 = vld [vmem:[%s2369_s2 + $0xd8] sm:$0xff]  ;;  %v1256_v37 = vpack.c.bf16 %v396_v34, %v394_v33  ;;  %v398_v39 = vld [vmem:[%s2369_s2 + $0xc0] sm:$0xff] }
   0xf   : > { %1243 = vmatprep.subr.bf16.mxu0 %v1242_v14  ;;  %s1470_s17 = smul.u32 48, %s2381_s27  ;;  %v1258_v38 = vpack.c.bf16 %v401_v36, %v399_v35  ;;  %v400_v40 = vld [vmem:[%s2369_s2 + $0xd0] sm:$0xff]  ;;  %v403_v42 = vld [vmem:[%s2369_s2 + $0xe8] sm:$0xff]  ;;  %v405_v43 = vld [vmem:[%s2369_s2 + $0xf8] sm:$0xff]  ;;  %s356_s13 = scalar_lea.vmem %s2368_s1, %s2381_s27 }
  0x10   : > { %v1260_v44 = vpack.c.bf16 %v400_v40, %v398_v39  ;;  %v1262_v45 = vpack.c.bf16 %v405_v43, %v403_v42  ;;  %v402_v46 = vld [vmem:[%s2369_s2 + $0xe0] sm:$0xff]  ;;  %v404_v47 = vld [vmem:[%s2369_s2 + $0xf0] sm:$0xff]  ;;  %v407_v48 = vld [vmem:[%s2369_s2 + $0x108] sm:$0xff]  ;;  %s1233_s14 = sshll.u32 %s2381_s27, 4 }
  0x11   : > { %s1720_s10 = scalar_lea.vmem %s2367_s0, %s1470_s17  ;;  %v409_v49 = vld [vmem:[%s2369_s2 + $0x118] sm:$0xff]  ;;  %v1264_v50 = vpack.c.bf16 %v404_v47, %v402_v46  ;;  %v406_v52 = vld [vmem:[%s2369_s2 + $0x100] sm:$0xff]  ;;  %v408_v53 = vld [vmem:[%s2369_s2 + $0x110] sm:$0xff]  ;;  %s361_s17 = scalar_lea.vmem %s2375_s8, %s1233_s14 }
  0x12   : > { %1245 = vmatpush1.bf16.msra.mxu0 %v1244_v19  ;;  %v369_v41 = vld [vmem:[%s1720_s10 + $0x8] sm:$0xff]  ;;  %v1266_v51 = vpack.c.bf16 %v409_v49, %v407_v48  ;;  %v413_v55 = vld [vmem:[%s2369_s2 + $0x138] sm:$0xff]  ;;  %v1268_v56 = vpack.c.bf16 %v408_v53, %v406_v52  ;;  %v410_v58 = vld [vmem:[%s2369_s2 + $0x120] sm:$0xff] }
  0x13   : > { %1247 = vmatprep.subr.bf16.mxu0 %v1246_v20  ;;  %546 = vmatprep.mubr.f32.mxu0 %v369_v41  ;;  %v411_v54 = vld [vmem:[%s2369_s2 + $0x128] sm:$0xff]  ;;  %v412_v59 = vld [vmem:[%s2369_s2 + $0x130] sm:$0xff]  ;;  %v417_v61 = vld [vmem:[%s2369_s2 + $0x158] sm:$0xff] }
  0x14   : > { %v1270_v57 = vpack.c.bf16 %v413_v55, %v411_v54  ;;  %v415_v60 = vld [vmem:[%s2369_s2 + $0x148] sm:$0xff]  ;;  %v667_v63 = vld [vmem:[%s2371_s4 + $0x18] sm:$0xff]  ;;  %v414_v0 = vld [vmem:[%s2369_s2 + $0x140] sm:$0xff]  ;;  %v1272_v5 = vpack.c.bf16 %v412_v59, %v410_v58 }
  0x15   : > { %v665_v62 = vld [vmem:[%s2371_s4 + $0x8] sm:$0xff]  ;;  %v664_v2 = vld [vmem:[%s2371_s4] sm:$0xff]  ;;  %v666_v3 = vld [vmem:[%s2371_s4 + $0x10] sm:$0xff]  ;;  %v1274_v10 = vpack.c.bf16 %v417_v61, %v415_v60 }
  0x16   : > { %1249 = vmatpush1.bf16.msra.mxu0 %v1248_v25  ;;  %v1330_v1 = vpack.c.bf16 %v667_v63, %v665_v62  ;;  %v669_v4 = vld [vmem:[%s2371_s4 + $0x28] sm:$0xff]  ;;  %v1332_v6 = vpack.c.bf16 %v666_v3, %v664_v2  ;;  %v671_v7 = vld [vmem:[%s2371_s4 + $0x38] sm:$0xff]  ;;  %v668_v8 = vld [vmem:[%s2371_s4 + $0x20] sm:$0xff] }
  0x17   : > { %1251 = vmatprep.subr.bf16.mxu0 %v1250_v26  ;;  %v670_v9 = vld [vmem:[%s2371_s4 + $0x30] sm:$0xff]  ;;  %v1334_v12 = vpack.c.bf16 %v671_v7, %v669_v4  ;;  %v673_v13 = vld [vmem:[%s2371_s4 + $0x48] sm:$0xff]  ;;  %v675_v14 = vld [vmem:[%s2371_s4 + $0x58] sm:$0xff] }
  0x18   : > { %v416_v11 = vld [vmem:[%s2369_s2 + $0x150] sm:$0xff]  ;;  %1331 = vmatprep.subr.bf16.mxu1 %v1330_v1  ;;  %v419_v15 = vld [vmem:[%s2369_s2 + $0x168] sm:$0xff]  ;;  %v421_v16 = vld [vmem:[%s2369_s2 + $0x178] sm:$0xff]  ;;  %v1336_v17 = vpack.c.bf16 %v670_v9, %v668_v8  ;;  %v1338_v18 = vpack.c.bf16 %v675_v14, %v673_v13 }
  0x19   : > { %1333 = vmatpush1.bf16.msra.mxu1 %v1332_v6  ;;  %v672_v19 = vld [vmem:[%s2371_s4 + $0x40] sm:$0xff]  ;;  %v674_v20 = vld [vmem:[%s2371_s4 + $0x50] sm:$0xff]  ;;  %v1276_v21 = vpack.c.bf16 %v416_v11, %v414_v0  ;;  %v677_v22 = vld [vmem:[%s2371_s4 + $0x68] sm:$0xff]  ;;  %v1278_v24 = vpack.c.bf16 %v421_v16, %v419_v15 }
  0x1a   : > { %1253 = vmatpush1.bf16.msra.mxu0 %v1252_v31  ;;  %1335 = vmatprep.subr.bf16.mxu1 %v1334_v12  ;;  %v679_v23 = vld [vmem:[%s2371_s4 + $0x78] sm:$0xff]  ;;  %v418_v25 = vld [vmem:[%s2369_s2 + $0x160] sm:$0xff]  ;;  %v420_v26 = vld [vmem:[%s2369_s2 + $0x170] sm:$0xff]  ;;  %v1340_v29 = vpack.c.bf16 %v674_v20, %v672_v19 }
  0x1b   : > { %1255 = vmatprep.subr.bf16.mxu0 %v1254_v32  ;;  %v423_v27 = vld [vmem:[%s2369_s2 + $0x188] sm:$0xff]  ;;  %v425_v28 = vld [vmem:[%s2369_s2 + $0x198] sm:$0xff]  ;;  %v1342_v30 = vpack.c.bf16 %v679_v23, %v677_v22  ;;  %v676_v31 = vld [vmem:[%s2371_s4 + $0x60] sm:$0xff]  ;;  %v1280_v33 = vpack.c.bf16 %v420_v26, %v418_v25 }
  0x1c   : > { %v678_v32 = vld [vmem:[%s2371_s4 + $0x70] sm:$0xff]  ;;  %v681_v34 = vld [vmem:[%s2371_s4 + $0x88] sm:$0xff]  ;;  %v683_v35 = vld [vmem:[%s2371_s4 + $0x98] sm:$0xff]  ;;  %v1282_v36 = vpack.c.bf16 %v425_v28, %v423_v27 }
  0x1d   : > { %1337 = vmatpush1.bf16.msra.mxu1 %v1336_v17  ;;  %v427_v39 = vld [vmem:[%s2369_s2 + $0x1a8] sm:$0xff]  ;;  %v429_v40 = vld [vmem:[%s2369_s2 + $0x1b8] sm:$0xff]  ;;  %v1344_v41 = vpack.c.bf16 %v678_v32, %v676_v31  ;;  %v1346_v42 = vpack.c.bf16 %v683_v35, %v681_v34  ;;  %v680_v43 = vld [vmem:[%s2371_s4 + $0x80] sm:$0xff] }
  0x1e   : > { %1257 = vmatpush1.bf16.msra.mxu0 %v1256_v37  ;;  %1339 = vmatprep.subr.bf16.mxu1 %v1338_v18  ;;  %v422_v37 = vld [vmem:[%s2369_s2 + $0x180] sm:$0xff]  ;;  %v685_v46 = vld [vmem:[%s2371_s4 + $0xa8] sm:$0xff]  ;;  %v687_v47 = vld [vmem:[%s2371_s4 + $0xb8] sm:$0xff]  ;;  %v1286_v48 = vpack.c.bf16 %v429_v40, %v427_v39  ;;  %v1568_v40 = vmov 0.0  }
  0x1f   : > { %1259 = vmatprep.subr.bf16.mxu0 %v1258_v38  ;;  %v424_v38 = vld [vmem:[%s2369_s2 + $0x190] sm:$0xff]  ;;  %v426_v49 = vld [vmem:[%s2369_s2 + $0x1a0] sm:$0xff]  ;;  %v433_v52 = vld [vmem:[%s2369_s2 + $0x1d8] sm:$0xff]  ;;  %v1350_v54 = vpack.c.bf16 %v687_v47, %v685_v46 }
  0x20   : > { %v684_v55 = vld [vmem:[%s2371_s4 + $0xa0] sm:$0xff]  ;;  %v689_v58 = vld [vmem:[%s2371_s4 + $0xc8] sm:$0xff]  ;;  %v691_v59 = vld [vmem:[%s2371_s4 + $0xd8] sm:$0xff] }
  0x21   : > { %1341 = vmatpush1.bf16.msra.mxu1 %v1340_v29  ;;  %v430_v61 = vld [vmem:[%s2369_s2 + $0x1c0] sm:$0xff]  ;;  %v432_v62 = vld [vmem:[%s2369_s2 + $0x1d0] sm:$0xff]  ;;  %v435_v63 = vld [vmem:[%s2369_s2 + $0x1e8] sm:$0xff]  ;;  %v1354_v2 = vpack.c.bf16 %v691_v59, %v689_v58 }
  0x22   : > { %1261 = vmatpush1.bf16.msra.mxu0 %v1260_v44  ;;  %1343 = vmatprep.subr.bf16.mxu1 %v1342_v30  ;;  %v682_v44 = vld [vmem:[%s2371_s4 + $0x90] sm:$0xff]  ;;  %v437_v0 = vld [vmem:[%s2369_s2 + $0x1f8] sm:$0xff]  ;;  %v688_v3 = vld [vmem:[%s2371_s4 + $0xc0] sm:$0xff] }
  0x23   : > { %1263 = vmatprep.subr.bf16.mxu0 %v1262_v45  ;;  %v1284_v45 = vpack.c.bf16 %v424_v38, %v422_v37  ;;  %v1348_v53 = vpack.c.bf16 %v682_v44, %v680_v43  ;;  %v690_v4 = vld [vmem:[%s2371_s4 + $0xd0] sm:$0xff]  ;;  %v693_v6 = vld [vmem:[%s2371_s4 + $0xe8] sm:$0xff]  ;;  %v695_v7 = vld [vmem:[%s2371_s4 + $0xf8] sm:$0xff]  ;;  %v1294_v8 = vpack.c.bf16 %v437_v0, %v435_v63 }
  0x24   : > { %v434_v9 = vld [vmem:[%s2369_s2 + $0x1e0] sm:$0xff]  ;;  %v439_v11 = vld [vmem:[%s2369_s2 + $0x208] sm:$0xff]  ;;  %v441_v12 = vld [vmem:[%s2369_s2 + $0x218] sm:$0xff]  ;;  %v1356_v13 = vpack.c.bf16 %v690_v4, %v688_v3  ;;  %v1358_v14 = vpack.c.bf16 %v695_v7, %v693_v6 }
  0x25   : > { %1345 = vmatpush1.bf16.msra.mxu1 %v1344_v41  ;;  %v692_v15 = vld [vmem:[%s2371_s4 + $0xe0] sm:$0xff]  ;;  %v694_v16 = vld [vmem:[%s2371_s4 + $0xf0] sm:$0xff]  ;;  %v1298_v18 = vpack.c.bf16 %v441_v12, %v439_v11  ;;  %v445_v22 = vld [vmem:[%s2369_s2 + $0x238] sm:$0xff] }
  0x26   : > { %1265 = vmatpush1.bf16.msra.mxu0 %v1264_v50  ;;  %v428_v50 = vld [vmem:[%s2369_s2 + $0x1b0] sm:$0xff]  ;;  %1347 = vmatprep.subr.bf16.mxu1 %v1346_v42  ;;  %v438_v19 = vld [vmem:[%s2369_s2 + $0x200] sm:$0xff]  ;;  %v1360_v23 = vpack.c.bf16 %v694_v16, %v692_v15  ;;  %v447_v30 = vld [vmem:[%s2369_s2 + $0x248] sm:$0xff] }
  0x27   : > { %1267 = vmatprep.subr.bf16.mxu0 %v1266_v51  ;;  %v431_v51 = vld [vmem:[%s2369_s2 + $0x1c8] sm:$0xff]  ;;  %v440_v20 = vld [vmem:[%s2369_s2 + $0x210] sm:$0xff]  ;;  %v442_v27 = vld [vmem:[%s2369_s2 + $0x220] sm:$0xff] }
  0x28   : > { %v1290_v60 = vpack.c.bf16 %v433_v52, %v431_v51  ;;  %v1300_v25 = vpack.c.bf16 %v440_v20, %v438_v19  ;;  %v444_v28 = vld [vmem:[%s2369_s2 + $0x230] sm:$0xff]  ;;  %v372_v29 = vld [vmem:[%s1720_s10 + $0x20] sm:$0xff]  ;;  %v449_v31 = vld [vmem:[%s2369_s2 + $0x258] sm:$0xff] }
  0x29   : > { %1349 = vmatpush1.bf16.msra.mxu1 %v1348_v53  ;;  %v1304_v32 = vpack.c.bf16 %v444_v28, %v442_v27  ;;  %v1306_v34 = vpack.c.bf16 %v449_v31, %v447_v30  ;;  %v446_v35 = vld [vmem:[%s2369_s2 + $0x240] sm:$0xff]  ;;  %v451_v37 = vld [vmem:[%s2369_s2 + $0x268] sm:$0xff]  ;;  %v453_v38 = vld [vmem:[%s2369_s2 + $0x278] sm:$0xff] }
  0x2a   : > { %1269 = vmatpush1.bf16.msra.mxu0 %v1268_v56  ;;  %v686_v56 = vld [vmem:[%s2371_s4 + $0xb0] sm:$0xff]  ;;  %1351 = vmatprep.subr.bf16.mxu1 %v1350_v54  ;;  %v1310_v41 = vpack.c.bf16 %v453_v38, %v451_v37  ;;  %v450_v42 = vld [vmem:[%s2369_s2 + $0x260] sm:$0xff]  ;;  %v455_v44 = vld [vmem:[%s2369_s2 + $0x288] sm:$0xff] }
  0x2b   : > { %1271 = vmatprep.subr.bf16.mxu0 %v1270_v57  ;;  %v1288_v57 = vpack.c.bf16 %v428_v50, %v426_v49  ;;  %v1352_v1 = vpack.c.bf16 %v686_v56, %v684_v55  ;;  %v452_v43 = vld [vmem:[%s2369_s2 + $0x270] sm:$0xff]  ;;  %v459_v50 = vld [vmem:[%s2369_s2 + $0x2a8] sm:$0xff]  ;;  %v461_v51 = vld [vmem:[%s2369_s2 + $0x2b8] sm:$0xff] }
  0x2c   : > { %v1312_v46 = vpack.c.bf16 %v452_v43, %v450_v42  ;;  %v456_v49 = vld [vmem:[%s2369_s2 + $0x290] sm:$0xff]  ;;  %v1318_v53 = vpack.c.bf16 %v461_v51, %v459_v50  ;;  %v458_v54 = vld [vmem:[%s2369_s2 + $0x2a0] sm:$0xff]  ;;  %v463_v56 = vld [vmem:[%s2369_s2 + $0x2c8] sm:$0xff] }
  0x2d   : > { %1353 = vmatpush1.bf16.msra.mxu1 %v1352_v1  ;;  %v460_v55 = vld [vmem:[%s2369_s2 + $0x2b0] sm:$0xff]  ;;  %v469_v63 = vld [vmem:[%s2369_s2 + $0x2f8] sm:$0xff]  ;;  %v373_v6 = vld [vmem:[%s1720_s10 + $0x28] sm:$0xff] }
  0x2e   : > { %1273 = vmatpush1.bf16.msra.mxu0 %v1272_v5  ;;  %v1292_v5 = vpack.c.bf16 %v432_v62, %v430_v61  ;;  %1355 = vmatprep.subr.bf16.mxu1 %v1354_v2  ;;  %v1320_v58 = vpack.c.bf16 %v460_v55, %v458_v54  ;;  %v464_v61 = vld [vmem:[%s2369_s2 + $0x2d0] sm:$0xff]  ;;  %v467_v62 = vld [vmem:[%s2369_s2 + $0x2e8] sm:$0xff]  ;;  %v466_v2 = vld [vmem:[%s2369_s2 + $0x2e0] sm:$0xff] }
  0x2f   : > { %1275 = vmatprep.subr.bf16.mxu0 %v1274_v10  ;;  %v436_v10 = vld [vmem:[%s2369_s2 + $0x1f0] sm:$0xff]  ;;  %v1326_v1 = vpack.c.bf16 %v469_v63, %v467_v62  ;;  %v697_v7 = vld [vmem:[%s2371_s4 + $0x108] sm:$0xff]  ;;  %v700_v16 = vld [vmem:[%s2371_s4 + $0x120] sm:$0xff] }
  0x30   : > { %v1296_v17 = vpack.c.bf16 %v436_v10, %v434_v9  ;;  %v468_v3 = vld [vmem:[%s2369_s2 + $0x2f0] sm:$0xff]  ;;  %v696_v10 = vld [vmem:[%s2371_s4 + $0x100] sm:$0xff]  ;;  %v705_v19 = vld [vmem:[%s2371_s4 + $0x148] sm:$0xff] }
  0x31   : > { %1357 = vmatpush1.bf16.msra.mxu1 %v1356_v13  ;;  %v1328_v4 = vpack.c.bf16 %v468_v3, %v466_v2  ;;  %v698_v11 = vld [vmem:[%s2371_s4 + $0x110] sm:$0xff]  ;;  %v701_v13 = vld [vmem:[%s2371_s4 + $0x128] sm:$0xff]  ;;  %v707_v20 = vld [vmem:[%s2371_s4 + $0x158] sm:$0xff] }
  0x32   : > { %1277 = vmatpush1.bf16.msra.mxu0 %v1276_v21  ;;  %v443_v21 = vld [vmem:[%s2369_s2 + $0x228] sm:$0xff]  ;;  %1359 = vmatprep.subr.bf16.mxu1 %v1358_v14  ;;  %v1364_v12 = vpack.c.bf16 %v698_v11, %v696_v10  ;;  %v703_v14 = vld [vmem:[%s2371_s4 + $0x138] sm:$0xff]  ;;  %v708_v28 = vld [vmem:[%s2371_s4 + $0x160] sm:$0xff] }
  0x33   : > { %1279 = vmatprep.subr.bf16.mxu0 %v1278_v24  ;;  %v368_v24 = vld [vmem:[%s1720_s10] sm:$0xff]  ;;  %v1302_v26 = vpack.c.bf16 %v445_v22, %v443_v21  ;;  %v1366_v15 = vpack.c.bf16 %v703_v14, %v701_v13  ;;  %v1370_v21 = vpack.c.bf16 %v707_v20, %v705_v19  ;;  %v713_v31 = vld [vmem:[%s2371_s4 + $0x188] sm:$0xff]  ;;  %v719_v38 = vld [vmem:[%s2371_s4 + $0x1b8] sm:$0xff] }
  0x34   : > { %v704_v22 = vld [vmem:[%s2371_s4 + $0x140] sm:$0xff]  ;;  %v717_v37 = vld [vmem:[%s2371_s4 + $0x1a8] sm:$0xff]  ;;  %v718_v42 = vld [vmem:[%s2371_s4 + $0x1b0] sm:$0xff] }
  0x35   : > { %1361 = vmatpush1.bf16.msra.mxu1 %v1360_v23  ;;  %v706_v23 = vld [vmem:[%s2371_s4 + $0x150] sm:$0xff]  ;;  %v725_v50 = vld [vmem:[%s2371_s4 + $0x1e8] sm:$0xff]  ;;  %v727_v51 = vld [vmem:[%s2371_s4 + $0x1f8] sm:$0xff] }
  0x36   : > { %1281 = vmatpush1.bf16.msra.mxu0 %v1280_v33  ;;  %v371_v33 = vld [vmem:[%s1720_s10 + $0x18] sm:$0xff]  ;;  %v726_v54 = vld [vmem:[%s2371_s4 + $0x1f0] sm:$0xff]  ;;  %v470_v62 = vld [vmem:[%s2370_s3] sm:$0x3] }
  0x37   : > { %1283 = vmatprep.subr.bf16.mxu0 %v1282_v36  ;;  %v448_v36 = vld [vmem:[%s2369_s2 + $0x250] sm:$0xff] }
  0x38   : > { %v1308_v39 = vpack.c.bf16 %v448_v36, %v446_v35  ;;  %v714_v35 = vld [vmem:[%s2371_s4 + $0x190] sm:$0xff] }
  0x3a   : > { %1285 = vmatpush1.bf16.msra.mxu0 %v1284_v45  ;;  %v457_v45 = vld [vmem:[%s2369_s2 + $0x298] sm:$0xff] }
  0x3b   : > { %1287 = vmatprep.subr.bf16.mxu0 %v1286_v48  ;;  %v1314_v47 = vpack.c.bf16 %v457_v45, %v455_v44  ;;  %v454_v48 = vld [vmem:[%s2369_s2 + $0x280] sm:$0xff]  ;;  %v721_v44 = vld [vmem:[%s2371_s4 + $0x1c8] sm:$0xff]  ;;  %v723_v45 = vld [vmem:[%s2371_s4 + $0x1d8] sm:$0xff] }
  0x3c   : > { %v1316_v52 = vpack.c.bf16 %v456_v49, %v454_v48  ;;  %v722_v48 = vld [vmem:[%s2371_s4 + $0x1d0] sm:$0xff] }
  0x3e   : > { %1289 = vmatpush1.bf16.msra.mxu0 %v1288_v57  ;;  %v465_v57 = vld [vmem:[%s2369_s2 + $0x2d8] sm:$0xff] }
  0x3f   : > { %1291 = vmatprep.subr.bf16.mxu0 %v1290_v60  ;;  %v1322_v59 = vpack.c.bf16 %v465_v57, %v463_v56  ;;  %v462_v60 = vld [vmem:[%s2369_s2 + $0x2c0] sm:$0xff]  ;;  %v846_v56 = vld [vmem:[%s2373_s6 + $0x8] sm:$0xff]  ;;  %v848_v57 = vld [vmem:[%s2373_s6 + $0x18] sm:$0xff] }
  0x40   : > { %v1324_v0 = vpack.c.bf16 %v464_v61, %v462_v60 }
  0x42   : > { %1293 = vmatpush1.bf16.msra.mxu0 %v1292_v5  ;;  %v370_v5 = vld [vmem:[%s1720_s10 + $0x10] sm:$0xff] }
  0x43   : > { %1295 = vmatprep.subr.bf16.mxu0 %v1294_v8  ;;  %v699_v8 = vld [vmem:[%s2371_s4 + $0x118] sm:$0xff] }
  0x44   : > { %v1362_v9 = vpack.c.bf16 %v699_v8, %v697_v7 }
  0x46   : > { %1297 = vmatpush1.bf16.msra.mxu0 %v1296_v17  ;;  %1363 = vmatprep.subr.bf16.mxu1 %v1362_v9  ;;  %v702_v17 = vld [vmem:[%s2371_s4 + $0x130] sm:$0xff] }
  0x47   : > { %1299 = vmatprep.subr.bf16.mxu0 %v1298_v18  ;;  %1365 = vmatpush1.bf16.msra.mxu1 %v1364_v12  ;;  %v1368_v18 = vpack.c.bf16 %v702_v17, %v700_v16 }
  0x48   : > { %1367 = vmatprep.subr.bf16.mxu1 %v1366_v15 }
  0x49   : > { %547 = vmatmul.mubr.f32.vlgmr.msra.gmra.mrb[0].mxu0 %v368_v24  ;;  %v1372_v24 = vpack.c.bf16 %v706_v23, %v704_v22  ;;  %v845_v22 = vld [vmem:[%s2373_s6] sm:$0xff]  ;;  %v847_v23 = vld [vmem:[%s2373_s6 + $0x10] sm:$0xff] }
  0x4a   : > { %1301 = vmatpush1.bf16.msra.mxu0 %v1300_v25  ;;  %552 = vmatprep.mubr.f32.mxu0 %v372_v29  ;;  %v709_v25 = vld [vmem:[%s2371_s4 + $0x168] sm:$0xff]  ;;  %v710_v29 = vld [vmem:[%s2371_s4 + $0x170] sm:$0xff] }
  0x4b   : > { %1303 = vmatprep.subr.bf16.mxu0 %v1302_v26  ;;  %1369 = vmatpush1.bf16.msra.mxu1 %v1368_v18  ;;  %v711_v26 = vld [vmem:[%s2371_s4 + $0x178] sm:$0xff]  ;;  %v1376_v30 = vpack.c.bf16 %v710_v29, %v708_v28  ;;  %v1396_v29 = vpack.c.bf16 %v847_v23, %v845_v22 }
  0x4c   : > { %1371 = vmatprep.subr.bf16.mxu1 %v1370_v21  ;;  %v1374_v27 = vpack.c.bf16 %v711_v26, %v709_v25  ;;  %v850_v25 = vld [vmem:[%s2373_s6 + $0x28] sm:$0xff]  ;;  %v852_v26 = vld [vmem:[%s2373_s6 + $0x38] sm:$0xff] }
  0x4d   : > { %553 = vmatmul.mubr.f32.gmra.mrb[2].mxu0 %v371_v33  ;;  %v884_v22 = vld [vmem:[%s2373_s6 + $0x138] sm:$0xff] }
  0x4e   : > { %1305 = vmatpush1.bf16.msra.mxu0 %v1304_v32  ;;  %623 = vmatprep.mubr.f32.mxu0 %v1568_v40  ;;  %v715_v32 = vld [vmem:[%s2371_s4 + $0x198] sm:$0xff] }
  0x4f   : > { %1307 = vmatprep.subr.bf16.mxu0 %v1306_v34  ;;  %1373 = vmatpush1.bf16.msra.mxu1 %v1372_v24  ;;  %v1378_v33 = vpack.c.bf16 %v715_v32, %v713_v31  ;;  %v712_v34 = vld [vmem:[%s2371_s4 + $0x180] sm:$0xff]  ;;  %v1398_v31 = vpack.c.bf16 %v852_v26, %v850_v25  ;;  %v883_v25 = vld [vmem:[%s2373_s6 + $0x130] sm:$0xff] }
  0x50   : > { %1375 = vmatprep.subr.bf16.mxu1 %v1374_v27  ;;  %v1380_v36 = vpack.c.bf16 %v714_v35, %v712_v34  ;;  %v849_v32 = vld [vmem:[%s2373_s6 + $0x20] sm:$0xff]  ;;  %v854_v35 = vld [vmem:[%s2373_s6 + $0x48] sm:$0xff] }
  0x52   : > { %1309 = vmatpush1.bf16.msra.mxu0 %v1308_v39  ;;  %v1382_v39 = vpack.c.bf16 %v719_v38, %v717_v37 }
  0x53   : > { %1311 = vmatprep.subr.bf16.mxu0 %v1310_v41  ;;  %1377 = vmatpush1.bf16.msra.mxu1 %v1376_v30  ;;  %v716_v41 = vld [vmem:[%s2371_s4 + $0x1a0] sm:$0xff] }
  0x54   : > { %1379 = vmatprep.subr.bf16.mxu1 %v1378_v33  ;;  %v1384_v43 = vpack.c.bf16 %v718_v42, %v716_v41  ;;  %v851_v33 = vld [vmem:[%s2373_s6 + $0x30] sm:$0xff] }
  0x56   : > { %1313 = vmatpush1.bf16.msra.mxu0 %v1312_v46  ;;  %v1386_v46 = vpack.c.bf16 %v723_v45, %v721_v44  ;;  %v855_v44 = vld [vmem:[%s2373_s6 + $0x50] sm:$0xff]  ;;  %v858_v45 = vld [vmem:[%s2373_s6 + $0x68] sm:$0xff] }
  0x57   : > { %1315 = vmatprep.subr.bf16.mxu0 %v1314_v47  ;;  %1381 = vmatpush1.bf16.msra.mxu1 %v1380_v36  ;;  %v720_v47 = vld [vmem:[%s2371_s4 + $0x1c0] sm:$0xff]  ;;  %v856_v36 = vld [vmem:[%s2373_s6 + $0x58] sm:$0xff] }
  0x58   : > { %1383 = vmatprep.subr.bf16.mxu1 %v1382_v39  ;;  %v1388_v49 = vpack.c.bf16 %v722_v48, %v720_v47  ;;  %v1400_v39 = vpack.c.bf16 %v851_v33, %v849_v32  ;;  %v1402_v42 = vpack.c.bf16 %v856_v36, %v854_v35  ;;  %v890_v33 = vld [vmem:[%s2373_s6 + $0x168] sm:$0xff]  ;;  %v889_v36 = vld [vmem:[%s2373_s6 + $0x160] sm:$0xff] }
  0x5a   : > { %1317 = vmatpush1.bf16.msra.mxu0 %v1316_v52  ;;  %v1390_v52 = vpack.c.bf16 %v727_v51, %v725_v50  ;;  %v859_v50 = vld [vmem:[%s2373_s6 + $0x70] sm:$0xff]  ;;  %v862_v51 = vld [vmem:[%s2373_s6 + $0x88] sm:$0xff] }
  0x5b   : > { %1319 = vmatprep.subr.bf16.mxu0 %v1318_v53  ;;  %1385 = vmatpush1.bf16.msra.mxu1 %v1384_v43  ;;  %v724_v53 = vld [vmem:[%s2371_s4 + $0x1e0] sm:$0xff] }
  0x5c   : > { %1387 = vmatprep.subr.bf16.mxu1 %v1386_v46  ;;  %v1392_v55 = vpack.c.bf16 %v726_v54, %v724_v53  ;;  %v853_v43 = vld [vmem:[%s2373_s6 + $0x40] sm:$0xff]  ;;  %v860_v46 = vld [vmem:[%s2373_s6 + $0x78] sm:$0xff] }
  0x5d   : > { %v1404_v47 = vpack.c.bf16 %v855_v44, %v853_v43  ;;  %v1406_v48 = vpack.c.bf16 %v860_v46, %v858_v45  ;;  %v893_v43 = vld [vmem:[%s2373_s6 + $0x180] sm:$0xff]  ;;  %v895_v44 = vld [vmem:[%s2373_s6 + $0x190] sm:$0xff]  ;;  %v898_v46 = vld [vmem:[%s2373_s6 + $0x1a8] sm:$0xff] }
  0x5e   : > { %1321 = vmatpush1.bf16.msra.mxu0 %v1320_v58  ;;  %v1394_v58 = vpack.c.bf16 %v848_v57, %v846_v56  ;;  %v863_v56 = vld [vmem:[%s2373_s6 + $0x90] sm:$0xff]  ;;  %v866_v57 = vld [vmem:[%s2373_s6 + $0xa8] sm:$0xff]  ;;  %v1444_v45 = vpack.c.bf16 %v895_v44, %v893_v43 }
  0x5f   : > { %1323 = vmatprep.subr.bf16.mxu0 %v1322_v59  ;;  %1389 = vmatpush1.bf16.msra.mxu1 %v1388_v49  ;;  %v472_v59 = vlaneseq  ;;  %v857_v49 = vld [vmem:[%s2373_s6 + $0x60] sm:$0xff] }
  0x60   : > { %1391 = vmatprep.subr.bf16.mxu1 %v1390_v52  ;;  %v864_v52 = vld [vmem:[%s2373_s6 + $0x98] sm:$0xff]  ;;  %v1408_v53 = vpack.c.bf16 %v859_v50, %v857_v49  ;;  %v897_v49 = vld [vmem:[%s2373_s6 + $0x1a0] sm:$0xff]  ;;  %v899_v50 = vld [vmem:[%s2373_s6 + $0x1b0] sm:$0xff] }
  0x61   : > { %v2139_v60 = vshrl.u32 %v472_v59, 7  ;;  %v1410_v54 = vpack.c.bf16 %v864_v52, %v862_v51  ;;  %v1448_v51 = vpack.c.bf16 %v899_v50, %v897_v49  ;;  %v902_v52 = vld [vmem:[%s2373_s6 + $0x1c8] sm:$0xff] }
  0x62   : > { %1325 = vmatpush1.bf16.msra.mxu0 %v1324_v0 }
  0x63   : > { %1327 = vmatprep.subr.bf16.mxu0 %v1326_v1  ;;  %1393 = vmatpush1.bf16.msra.mxu1 %v1392_v55  ;;  %v2142_v61 = vsub.s32 0, %v2139_v60  ;;  %v2148_v63 = vsub.s32 1, %v2139_v60  ;;  %v861_v55 = vld [vmem:[%s2373_s6 + $0x80] sm:$0xff] }
  0x64   : > { %1395 = vmatprep.subr.bf16.mxu1 %v1394_v58  ;;  %v868_v58 = vld [vmem:[%s2373_s6 + $0xb8] sm:$0xff]  ;;  %v1412_v59 = vpack.c.bf16 %v863_v56, %v861_v55  ;;  %v901_v55 = vld [vmem:[%s2373_s6 + $0x1c0] sm:$0xff]  ;;  %v903_v56 = vld [vmem:[%s2373_s6 + $0x1d0] sm:$0xff] }
  0x65   : > { %v475_v0 = vrot.slane %v470_v62, %v2142_v61  ;;  %v479_v1 = vrot.slane %v470_v62, %v2148_v63  ;;  %v1414_v62 = vpack.c.bf16 %v868_v58, %v866_v57  ;;  %v1452_v57 = vpack.c.bf16 %v903_v56, %v901_v55  ;;  %v906_v58 = vld [vmem:[%s2373_s6 + $0x1e8] sm:$0xff] }
  0x66   : > { %1329 = vmatpush1.bf16.msra.mxu0 %v1328_v4 }
  0x69   : > { %624 = vmatmul.mubr.f32.vlgmr.msra.gmra.mrb[0].mxu0 %v370_v5 }
  0x6a   : > { %629 = vmatprep.mubr.f32.mxu0 %v1568_v40 }
  0x6d   : > { %630 = vmatmul.mubr.f32.gmra.mrb[2].mxu0 %v373_v6 }
  0x6e   : > { %1106 = vmatprep.mubr.f32.mxu0 %v1568_v40 }
 0x13c   : > { %v625_v2 = vpop.f32.mrb[0].mxu0 }
 0x13d   : > { %v1462_v3 = vadd.f32 %v625_v2, %v475_v0  ;;  %v627_v4 = vpop.f32.mrb[1].mxu0  ;;  %v870_v2 = vld [vmem:[%s2373_s6 + $0xc8] sm:$0xff] }
 0x13e   : > { %v1463_v5 = vadd.f32 %v627_v4, %v479_v1 }
 0x13f   : > { %v1216_v6 = vmul.f32 -1.442695, %v1462_v3 }
 0x140   : > { %v1217_v7 = vmul.f32 -1.442695, %v1463_v5  ;;  %v631_v8 = vpop.f32.mrb[2].mxu0 }
 0x141   : > { %1496 = vpow2.f32 %v1216_v6  ;;  %v1464_v9 = vadd.f32 %v631_v8, %v475_v0  ;;  %v633_v10 = vpop.f32.mrb[3].mxu0  ;;  %v865_v0 = vld [vmem:[%s2373_s6 + $0xa0] sm:$0xff]  ;;  %v874_v8 = vld [vmem:[%s2373_s6 + $0xe8] sm:$0xff] }
 0x142   : > { %1498 = vpow2.f32 %v1217_v7  ;;  %v1465_v11 = vadd.f32 %v633_v10, %v479_v1  ;;  %v867_v1 = vld [vmem:[%s2373_s6 + $0xb0] sm:$0xff]  ;;  %v869_v6 = vld [vmem:[%s2373_s6 + $0xc0] sm:$0xff] }
 0x143   : > { %v1218_v12 = vmul.f32 -1.442695, %v1464_v9  ;;  %v1416_v4 = vpack.c.bf16 %v867_v1, %v865_v0  ;;  %v871_v7 = vld [vmem:[%s2373_s6 + $0xd0] sm:$0xff]  ;;  %v905_v0 = vld [vmem:[%s2373_s6 + $0x1e0] sm:$0xff] }
 0x144   : > { %v1219_v13 = vmul.f32 -1.442695, %v1465_v11  ;;  %v1420_v10 = vpack.c.bf16 %v871_v7, %v869_v6  ;;  %v907_v1 = vld [vmem:[%s2373_s6 + $0x1f0] sm:$0xff] }
 0x145   : > { %1500 = vpow2.f32 %v1218_v12  ;;  %v873_v12 = vld [vmem:[%s2373_s6 + $0xe0] sm:$0xff] }
 0x146   : > { %1502 = vpow2.f32 %v1219_v13  ;;  %v875_v13 = vld [vmem:[%s2373_s6 + $0xf0] sm:$0xff] }
 0x14b   : > { %v1497_v14 = vpop.eup %1496 }
 0x14c   : > { %v1499_v15 = vpop.eup %1498  ;;  %v648_v16 = vadd.f32 1.0, %v1497_v14  ;;  %v1424_v14 = vpack.c.bf16 %v875_v13, %v873_v12 }
 0x14d   : > { %v649_v17 = vadd.f32 1.0, %v1499_v15  ;;  %v878_v15 = vld [vmem:[%s2373_s6 + $0x108] sm:$0xff] }
 0x14e   : > { %1504 = vrcp.f32 %v648_v16  ;;  %v880_v16 = vld [vmem:[%s2373_s6 + $0x118] sm:$0xff] }
 0x14f   : > { %v1501_v18 = vpop.eup %1500  ;;  %1506 = vrcp.f32 %v649_v17  ;;  %v1426_v17 = vpack.c.bf16 %v880_v16, %v878_v15 }
 0x150   : > { %v1503_v19 = vpop.eup %1502  ;;  %v650_v20 = vadd.f32 1.0, %v1501_v18  ;;  %v877_v18 = vld [vmem:[%s2373_s6 + $0x100] sm:$0xff] }
 0x151   : > { %v651_v21 = vadd.f32 1.0, %v1503_v19  ;;  %v879_v19 = vld [vmem:[%s2373_s6 + $0x110] sm:$0xff] }
 0x152   : > { %1508 = vrcp.f32 %v650_v20  ;;  %v1428_v20 = vpack.c.bf16 %v879_v19, %v877_v18 }
 0x153   : > { %1510 = vrcp.f32 %v651_v21  ;;  %v882_v21 = vld [vmem:[%s2373_s6 + $0x128] sm:$0xff] }
 0x154   : > { %v1430_v23 = vpack.c.bf16 %v884_v22, %v882_v21 }
 0x158   : > { %v1505_v24 = vpop.eup %1504 }
 0x159   : > { %v1507_v27 = vpop.eup %1506  ;;  %v660_v30 = vmul.f32 %v1505_v24, %v1462_v3  ;;  %v872_v3 = vld [vmem:[%s2373_s6 + $0xd8] sm:$0xff]  ;;  %v881_v24 = vld [vmem:[%s2373_s6 + $0x120] sm:$0xff] }
 0x15a   : > { %v661_v28 = vmul.f32 %v1507_v27, %v1463_v5  ;;  %v1418_v5 = vpack.c.bf16 %v872_v3, %v870_v2  ;;  %v1432_v26 = vpack.c.bf16 %v883_v25, %v881_v24  ;;  %v886_v27 = vld [vmem:[%s2373_s6 + $0x148] sm:$0xff]  ;;  %v1456_v2 = vpack.c.bf16 %v907_v1, %v905_v0  ;;  %v728_v3 = vld [vmem:[%s2372_s5] sm:$0x3] }
 0x15c   : > { %v1509_v34 = vpop.eup %1508  ;;  %804 = vmatprep.mubr.f32.mxu1 %v661_v28  ;;  %v888_v28 = vld [vmem:[%s2373_s6 + $0x158] sm:$0xff] }
 0x15d   : > { %v1511_v37 = vpop.eup %1510  ;;  %805 = vmatmul.mubr.f32.vlgmr.msra.gmra.mrb[0].mxu1 %v660_v30  ;;  %v662_v41 = vmul.f32 %v1509_v34, %v1464_v9  ;;  %v876_v9 = vld [vmem:[%s2373_s6 + $0xf8] sm:$0xff]  ;;  %v885_v30 = vld [vmem:[%s2373_s6 + $0x140] sm:$0xff] }
 0x15e   : > { %v663_v38 = vmul.f32 %v1511_v37, %v1465_v11  ;;  %1397 = vmatpush1.bf16.msra.mxu1 %v1396_v29  ;;  %v1422_v11 = vpack.c.bf16 %v876_v9, %v874_v8  ;;  %v1434_v29 = vpack.c.bf16 %v888_v28, %v886_v27  ;;  %v892_v34 = vld [vmem:[%s2373_s6 + $0x178] sm:$0xff]  ;;  %v891_v37 = vld [vmem:[%s2373_s6 + $0x170] sm:$0xff] }
 0x15f   : > { %1399 = vmatprep.subr.bf16.mxu1 %v1398_v31  ;;  %v887_v31 = vld [vmem:[%s2373_s6 + $0x150] sm:$0xff]  ;;  %v1438_v35 = vpack.c.bf16 %v892_v34, %v890_v33  ;;  %v909_v34 = vld [vmem:[%s2374_s7] sm:$0x3] }
 0x160   : > { %810 = vmatprep.mubr.f32.mxu1 %v663_v38  ;;  %v1436_v32 = vpack.c.bf16 %v887_v31, %v885_v30  ;;  %v1440_v38 = vpack.c.bf16 %v891_v37, %v889_v36  ;;  %v918_v36 = vrot.slane %v909_v34, %v2148_v63 }
 0x161   : > { %811 = vmatmul.mubr.f32.gmra.mrb[2].mxu1 %v662_v41  ;;  %v896_v41 = vld [vmem:[%s2373_s6 + $0x198] sm:$0xff] }
 0x162   : > { %1401 = vmatpush1.bf16.msra.mxu1 %v1400_v39  ;;  %v894_v39 = vld [vmem:[%s2373_s6 + $0x188] sm:$0xff] }
 0x163   : > { %1403 = vmatprep.subr.bf16.mxu1 %v1402_v42  ;;  %v1442_v42 = vpack.c.bf16 %v896_v41, %v894_v39 }
 0x166   : > { %1405 = vmatpush1.bf16.msra.mxu1 %v1404_v47  ;;  %v900_v47 = vld [vmem:[%s2373_s6 + $0x1b8] sm:$0xff] }
 0x167   : > { %1407 = vmatprep.subr.bf16.mxu1 %v1406_v48  ;;  %v1446_v48 = vpack.c.bf16 %v900_v47, %v898_v46 }
 0x16a   : > { %1409 = vmatpush1.bf16.msra.mxu1 %v1408_v53  ;;  %v904_v53 = vld [vmem:[%s2373_s6 + $0x1d8] sm:$0xff] }
 0x16b   : > { %1411 = vmatprep.subr.bf16.mxu1 %v1410_v54  ;;  %v1450_v54 = vpack.c.bf16 %v904_v53, %v902_v52 }
 0x16e   : > { %1413 = vmatpush1.bf16.msra.mxu1 %v1412_v59  ;;  %v908_v59 = vld [vmem:[%s2373_s6 + $0x1f8] sm:$0xff] }
 0x16f   : > { %1415 = vmatprep.subr.bf16.mxu1 %v1414_v62  ;;  %v1454_v62 = vpack.c.bf16 %v908_v59, %v906_v58 }
 0x172   : > { %1417 = vmatpush1.bf16.msra.mxu1 %v1416_v4  ;;  %v733_v4 = vrot.slane %v728_v3, %v2142_v61 }
 0x173   : > { %1419 = vmatprep.subr.bf16.mxu1 %v1418_v5  ;;  %v737_v5 = vrot.slane %v728_v3, %v2148_v63 }
 0x176   : > { %1421 = vmatpush1.bf16.msra.mxu1 %v1420_v10 }
 0x177   : > { %1423 = vmatprep.subr.bf16.mxu1 %v1422_v11 }
 0x17a   : > { %1425 = vmatpush1.bf16.msra.mxu1 %v1424_v14 }
 0x17b   : > { %1427 = vmatprep.subr.bf16.mxu1 %v1426_v17 }
 0x17e   : > { %1429 = vmatpush1.bf16.msra.mxu1 %v1428_v20 }
 0x17f   : > { %1431 = vmatprep.subr.bf16.mxu1 %v1430_v23 }
 0x182   : > { %1433 = vmatpush1.bf16.msra.mxu1 %v1432_v26 }
 0x183   : > { %1435 = vmatprep.subr.bf16.mxu1 %v1434_v29 }
 0x186   : > { %1437 = vmatpush1.bf16.msra.mxu1 %v1436_v32 }
 0x187   : > { %1439 = vmatprep.subr.bf16.mxu1 %v1438_v35  ;;  %v914_v35 = vrot.slane %v909_v34, %v2142_v61 }
 0x18a   : > { %1441 = vmatpush1.bf16.msra.mxu1 %v1440_v38 }
 0x18b   : > { %1443 = vmatprep.subr.bf16.mxu1 %v1442_v42 }
 0x18e   : > { %1445 = vmatpush1.bf16.msra.mxu1 %v1444_v45 }
 0x18f   : > { %1447 = vmatprep.subr.bf16.mxu1 %v1446_v48 }
 0x192   : > { %1449 = vmatpush1.bf16.msra.mxu1 %v1448_v51 }
 0x193   : > { %1451 = vmatprep.subr.bf16.mxu1 %v1450_v54 }
 0x196   : > { %1453 = vmatpush1.bf16.msra.mxu1 %v1452_v57 }
 0x197   : > { %1455 = vmatprep.subr.bf16.mxu1 %v1454_v62  ;;  %v1228_v62 = vld [vmem:[%s356_s13] ss:$0 sm:$0xff] }
 0x198   : > { %vm1033_vm0 = vcmp.eq.s32.totalorder %v2139_v60, %v1228_v62 }
 0x19a   : > { %1457 = vmatpush1.bf16.msra.mxu1 %v1456_v2 }
 0x230   : > { %v806_v6 = vpop.f32.mrb[0].mxu1 }
 0x231   : > { %v807_v7 = vadd.f32 %v806_v6, %v733_v4  ;;  %v808_v8 = vpop.f32.mrb[1].mxu1  ;;  %v1229_v6 = vsel %vm1033_vm0, 1.0, %v1568_v40 }
 0x232   : > { %v809_v9 = vadd.f32 %v808_v8, %v737_v5 }
 0x233   : > { %v1220_v10 = vmul.f32 -1.442695, %v807_v7 }
 0x234   : > { %v1221_v11 = vmul.f32 -1.442695, %v809_v9  ;;  %v812_v12 = vpop.f32.mrb[2].mxu1 }
 0x235   : > { %1512 = vpow2.f32 %v1220_v10  ;;  %v813_v13 = vadd.f32 %v812_v12, %v733_v4  ;;  %v814_v14 = vpop.f32.mrb[3].mxu1 }
 0x236   : > { %1514 = vpow2.f32 %v1221_v11  ;;  %v815_v15 = vadd.f32 %v814_v14, %v737_v5 }
 0x237   : > { %v1222_v16 = vmul.f32 -1.442695, %v813_v13 }
 0x238   : > { %v1223_v17 = vmul.f32 -1.442695, %v815_v15 }
 0x239   : > { %1516 = vpow2.f32 %v1222_v16 }
 0x23a   : > { %1518 = vpow2.f32 %v1223_v17 }
 0x23f   : > { %v1513_v18 = vpop.eup %1512 }
 0x240   : > { %v1515_v19 = vpop.eup %1514  ;;  %v829_v20 = vadd.f32 1.0, %v1513_v18 }
 0x241   : > { %v830_v21 = vadd.f32 1.0, %v1515_v19 }
 0x242   : > { %1520 = vrcp.f32 %v829_v20 }
 0x243   : > { %v1517_v22 = vpop.eup %1516  ;;  %1522 = vrcp.f32 %v830_v21 }
 0x244   : > { %v1519_v23 = vpop.eup %1518  ;;  %v831_v24 = vadd.f32 1.0, %v1517_v22 }
 0x245   : > { %v832_v25 = vadd.f32 1.0, %v1519_v23 }
 0x246   : > { %1524 = vrcp.f32 %v831_v24 }
 0x247   : > { %1526 = vrcp.f32 %v832_v25 }
 0x24c   : > { %v1521_v26 = vpop.eup %1520 }
 0x24d   : > { %v1523_v27 = vpop.eup %1522  ;;  %v841_v29 = vmul.f32 %v1521_v26, %v807_v7 }
 0x24e   : > { %v842_v28 = vmul.f32 %v1523_v27, %v809_v9 }
 0x250   : > { %v1525_v30 = vpop.eup %1524  ;;  %985 = vmatprep.mubr.f32.mxu1 %v842_v28 }
 0x251   : > { %v1527_v31 = vpop.eup %1526  ;;  %986 = vmatmul.mubr.f32.vlgmr.msra.gmra.mrb[4].mxu1 %v841_v29  ;;  %v843_v33 = vmul.f32 %v1525_v30, %v813_v13 }
 0x252   : > { %v844_v32 = vmul.f32 %v1527_v31, %v815_v15 }
 0x254   : > { %991 = vmatprep.mubr.f32.mxu1 %v844_v32 }
 0x255   : > { %992 = vmatmul.mubr.f32.gmra.mrb[6].mxu1 %v843_v33 }
 0x324   : > { %v987_v37 = vpop.f32.mrb[4].mxu1 }
 0x325   : > { %v988_v38 = vadd.f32 %v987_v37, %v914_v35  ;;  %v989_v39 = vpop.f32.mrb[5].mxu1 }
 0x326   : > { %v990_v41 = vadd.f32 %v989_v39, %v918_v36 }
 0x327   : > { %v1224_v42 = vmul.f32 -1.442695, %v988_v38 }
 0x328   : > { %v1225_v43 = vmul.f32 -1.442695, %v990_v41  ;;  %v993_v44 = vpop.f32.mrb[6].mxu1 }
 0x329   : > { %1528 = vpow2.f32 %v1224_v42  ;;  %v994_v45 = vadd.f32 %v993_v44, %v914_v35  ;;  %v995_v46 = vpop.f32.mrb[7].mxu1 }
 0x32a   : > { %1530 = vpow2.f32 %v1225_v43  ;;  %v996_v47 = vadd.f32 %v995_v46, %v918_v36 }
 0x32b   : > { %v1226_v48 = vmul.f32 -1.442695, %v994_v45 }
 0x32c   : > { %v1227_v49 = vmul.f32 -1.442695, %v996_v47 }
 0x32d   : > { %1532 = vpow2.f32 %v1226_v48 }
 0x32e   : > { %1534 = vpow2.f32 %v1227_v49 }
 0x333   : > { %v1529_v61 = vpop.eup %1528 }
 0x334   : > { %v1531_v50 = vpop.eup %1530  ;;  %v1010_v63 = vadd.f32 1.0, %v1529_v61 }
 0x335   : > { %v1011_v51 = vadd.f32 1.0, %v1531_v50 }
 0x336   : > { %1536 = vrcp.f32 %v1010_v63 }
 0x337   : > { %v1533_v52 = vpop.eup %1532  ;;  %1538 = vrcp.f32 %v1011_v51 }
 0x338   : > { %v1535_v53 = vpop.eup %1534  ;;  %v1012_v54 = vadd.f32 1.0, %v1533_v52 }
 0x339   : > { %v1013_v55 = vadd.f32 1.0, %v1535_v53 }
 0x33a   : > { %1540 = vrcp.f32 %v1012_v54 }
 0x33b   : > { %1542 = vrcp.f32 %v1013_v55 }
 0x340   : > { %v1537_v56 = vpop.eup %1536 }
 0x341   : > { %v1539_v57 = vpop.eup %1538  ;;  %v1022_v0 = vmul.f32 %v1537_v56, %v988_v38 }
 0x342   : > { %v1023_v2 = vmul.f32 %v1539_v57, %v990_v41 }
 0x344   : > { %v1541_v58 = vpop.eup %1540 }
 0x345   : > { %v1543_v59 = vpop.eup %1542  ;;  %v1024_v1 = vmul.f32 %v1541_v58, %v994_v45 }
 0x346   : > { %v1025_v3 = vmul.f32 %v1543_v59, %v996_v47 }
 0x347   : > { %v1460_v4 = vpack.c.bf16 %v1024_v1, %v1022_v0 }
 0x348   : > { %v1458_v5 = vpack.c.bf16 %v1025_v3, %v1023_v2 }
 0x34a   : > { %1459 = vmatprep.subr.bf16.mxu0 %v1458_v5 }
 0x34b   : > { %1461 = vmatpush1.bf16.msra.mxu0 %v1460_v4 }
 0x34e   : > { %1230 = vmatmul.mubr.msk.f32.vlgmr.msra.gmra.mrb[4].mxu0 %vm1038_vm1, %v1229_v6 }
 0x421   : > { %v1108_v7 = vpop.f32.mrb[4].mxu0 }
 0x422   : > { %1122 = vst [vmem:[%s361_s17] sm:$0xff] %v1108_v7  ;;  %v1110_v8 = vpop.f32.mrb[5].mxu0 }
 0x423   : > { %1123 = vst [vmem:[%s361_s17 + $0x8] sm:$0xff] %v1110_v8 }
 0x424 PF: > { %s18_s29 = sadd.s32 1, %s1566_s29   ;;  %s2376_s27 = smov %s1562_s28 }
 0x425   : > { %p15_p5 = scmp.ge.s32.totalorder %s18_s29, 4   ;;  %s2377_s28 = smov %s2379_s30 }
 0x427   :  { %17 = sbr.rel (!%p15_p5) target bundleno = 2 (0x2), region = 93 }

// kernel: egnn_forward.6
= control target key start
LH: loop header
LB: loop body
LE: loop exit
PB: predicated region body
PF: predicated region fallthrough
CT: control target
= control target key end

     0   :  { %s3727_s30 = smov 0   ;;  %s3729_s10 = smov 0   ;;  %s5697_s0 = inlined_call_operand.vmem [shape: f32[2,16,256], index: 0, kind: input, shape index: {}]   ;;  %s5698_s1 = inlined_call_operand.vmem [shape: s32[2,1,16], index: 1, kind: input, shape index: {}]   ;;  %s5699_s2 = inlined_call_operand.vmem [shape: f32[256,1536], index: 2, kind: input, shape index: {}]   ;;  %s5700_s3 = inlined_call_operand.vmem [shape: f32[1,1536], index: 3, kind: input, shape index: {}]   ;;  %s5701_s4 = inlined_call_operand.vmem [shape: f32[1536,48], index: 4, kind: input, shape index: {}]   ;;  %s5702_s5 = inlined_call_operand.vmem [shape: f32[1,48], index: 5, kind: input, shape index: {}]   ;;  %s5703_s6 = inlined_call_operand.vmem [shape: f32[1,48], index: 6, kind: input, shape index: {}]   ;;  %s5704_s7 = inlined_call_operand.vmem [shape: f32[1,48], index: 7, kind: input, shape index: {}]   ;;  %s5705_s8 = inlined_call_operand.vmem [shape: f32[48,48], index: 8, kind: input, shape index: {}]   ;;  %s5706_s9 = inlined_call_operand.vmem [shape: f32[2,32,48], index: 9, kind: output, shape index: {}]  }
   0x1   :  { %s3731_s11 = smov 0  }
   0x2 LB: > { %s31_s12 = sadd.s32 1, %s3670_s10  ;;  %p2569_p0 = scmp.ge.s32.totalorder %s3674_s11, 1  ;;  %s3674_s11 = sphi %s3731_s11, %s19_s11   ;;  %s3670_s10 = sphi %s3729_s10, %s5708_s10   ;;  %s3666_s30 = sphi %s3727_s30, %s5707_s30  }
   0x3   : > { %p33_p1 = scmp.ge.s32.totalorder %s31_s12, 2  ;;  %p320_p2 = scmp.lt.s32.totalorder %s3674_s11, 3 }
   0x5   : > { %s5710_s12 = smov (%p33_p1, %s31_s12), 0  ;;  %p321_p3 = pnand %p2569_p0, %p320_p2 }
   0x6   : > { %v403_v0 = vld [vmem:[%s5699_s2 + $0x8] sm:$0xff] (!%p321_p3)  ;;  %v405_v2 = vld [vmem:[%s5699_s2 + $0x18] sm:$0xff] (!%p321_p3)  ;;  %v402_v5 = vld [vmem:[%s5699_s2] sm:$0xff] (!%p321_p3)  ;;  %p368_p4 = scmp.lt.s32.totalorder (!%p321_p3), %s3666_s30, 1  ;;  %vm393_vm0 = vcmask (!%p321_p3), 392192   ;;  %vm2364_vm1 = vcmask (!%p321_p3), 130048  }
   0x7   : > { %324 = sbr.rel (%p321_p3) target bundleno = 1378 (0x562), region = 56  ;;  %v415_v1 = vld [vmem:[%s5699_s2 + $0x68] sm:$0xff] (!%p321_p3)  ;;  %v417_v4 = vld [vmem:[%s5699_s2 + $0x78] sm:$0xff] (!%p321_p3)  ;;  %v414_v6 = vld [vmem:[%s5699_s2 + $0x60] sm:$0xff] (!%p321_p3) }
   0x8   : > { %v2910_v3 = vpack.c.bf16 (!%p321_p3), %v415_v1, %v403_v0  ;;  %v2974_v7 = vpack.c.bf16 (!%p321_p3), %v417_v4, %v405_v2  ;;  %v2912_v8 = vpack.c.bf16 (!%p321_p3), %v414_v6, %v402_v5  ;;  %v404_v9 = vld [vmem:[%s5699_s2 + $0x10] sm:$0xff] (!%p321_p3)  ;;  %v427_v11 = vld [vmem:[%s5699_s2 + $0xc8] sm:$0xff] (!%p321_p3)  ;;  %v429_v14 = vld [vmem:[%s5699_s2 + $0xd8] sm:$0xff] (!%p321_p3) }
   0x9   : > { %v416_v10 = vld [vmem:[%s5699_s2 + $0x70] sm:$0xff] (!%p321_p3)  ;;  %v439_v13 = vld [vmem:[%s5699_s2 + $0x128] sm:$0xff] (!%p321_p3)  ;;  %v441_v15 = vld [vmem:[%s5699_s2 + $0x138] sm:$0xff] (!%p321_p3) }
   0xa   : > { %2911 = vmatprep.subr.bf16.mxu0 (!%p321_p3), %v2910_v3  ;;  %v2976_v12 = vpack.c.bf16 (!%p321_p3), %v416_v10, %v404_v9  ;;  %2975 = vmatprep.subr.bf16.mxu1 (!%p321_p3), %v2974_v7  ;;  %v2914_v16 = vpack.c.bf16 (!%p321_p3), %v439_v13, %v427_v11  ;;  %v2978_v17 = vpack.c.bf16 (!%p321_p3), %v441_v15, %v429_v14  ;;  %v426_v18 = vld [vmem:[%s5699_s2 + $0xc0] sm:$0xff] (!%p321_p3)  ;;  %v428_v20 = vld [vmem:[%s5699_s2 + $0xd0] sm:$0xff] (!%p321_p3)  ;;  %v451_v23 = vld [vmem:[%s5699_s2 + $0x188] sm:$0xff] (!%p321_p3) }
   0xb   : > { %2913 = vmatpush1.bf16.msra.mxu0 (!%p321_p3), %v2912_v8  ;;  %v438_v19 = vld [vmem:[%s5699_s2 + $0x120] sm:$0xff] (!%p321_p3)  ;;  %v440_v22 = vld [vmem:[%s5699_s2 + $0x130] sm:$0xff] (!%p321_p3)  ;;  %v463_v24 = vld [vmem:[%s5699_s2 + $0x1e8] sm:$0xff] (!%p321_p3) }
   0xc   : > { %2977 = vmatpush1.bf16.msra.mxu1 (!%p321_p3), %v2976_v12  ;;  %v2916_v21 = vpack.c.bf16 (!%p321_p3), %v438_v19, %v426_v18  ;;  %2915 = vmatprep.subr.bf16.mxu0 (!%p321_p3), %v2914_v16  ;;  %v2980_v25 = vpack.c.bf16 (!%p321_p3), %v440_v22, %v428_v20  ;;  %v2918_v26 = vpack.c.bf16 (!%p321_p3), %v463_v24, %v451_v23  ;;  %v453_v27 = vld [vmem:[%s5699_s2 + $0x198] sm:$0xff] (!%p321_p3)  ;;  %v450_v29 = vld [vmem:[%s5699_s2 + $0x180] sm:$0xff] (!%p321_p3)  ;;  %v452_v32 = vld [vmem:[%s5699_s2 + $0x190] sm:$0xff] (!%p321_p3) }
   0xd   : > { %2979 = vmatprep.subr.bf16.mxu1 (!%p321_p3), %v2978_v17  ;;  %v465_v28 = vld [vmem:[%s5699_s2 + $0x1f8] sm:$0xff] (!%p321_p3)  ;;  %v462_v31 = vld [vmem:[%s5699_s2 + $0x1e0] sm:$0xff] (!%p321_p3)  ;;  %v464_v33 = vld [vmem:[%s5699_s2 + $0x1f0] sm:$0xff] (!%p321_p3) }
   0xe   : > { %v2982_v30 = vpack.c.bf16 %v465_v28, %v453_v27  ;;  %v2920_v34 = vpack.c.bf16 %v462_v31, %v450_v29  ;;  %v475_v35 = vld [vmem:[%s5699_s2 + $0x248] sm:$0xff]  ;;  %v477_v37 = vld [vmem:[%s5699_s2 + $0x258] sm:$0xff]  ;;  %v2984_v38 = vpack.c.bf16 %v464_v33, %v452_v32  ;;  %v474_v41 = vld [vmem:[%s5699_s2 + $0x240] sm:$0xff]  ;;  %s5712_s30 = smov (!%p368_p4, %s3666_s30), 1 }
   0xf   : > { %2917 = vmatpush1.bf16.msra.mxu0 %v2916_v21  ;;  %v487_v36 = vld [vmem:[%s5699_s2 + $0x2a8] sm:$0xff]  ;;  %v489_v40 = vld [vmem:[%s5699_s2 + $0x2b8] sm:$0xff]  ;;  %v486_v42 = vld [vmem:[%s5699_s2 + $0x2a0] sm:$0xff]  ;;  %s2618_s28 = sshll.u32 %s5712_s30, 5  ;;  %s383_s21 = scalar_lea.vmem %s5698_s1, %s5712_s30 }
  0x10   : > { %2981 = vmatpush1.bf16.msra.mxu1 %v2980_v25  ;;  %2919 = vmatprep.subr.bf16.mxu0 %v2918_v26  ;;  %v2922_v39 = vpack.c.bf16 %v487_v36, %v475_v35  ;;  %v2986_v43 = vpack.c.bf16 %v489_v40, %v477_v37  ;;  %v476_v44 = vld [vmem:[%s5699_s2 + $0x250] sm:$0xff]  ;;  %v499_v46 = vld [vmem:[%s5699_s2 + $0x308] sm:$0xff]  ;;  %v501_v48 = vld [vmem:[%s5699_s2 + $0x318] sm:$0xff]  ;;  %v2924_v50 = vpack.c.bf16 %v486_v42, %v474_v41  ;;  %s4035_s14 = scalar_lea.vmem %s5697_s0, %s2618_s28  ;;  %s388_s27 = scalar_lea.vmem %s5706_s9, %s2618_s28 }
  0x11   : > { %2983 = vmatprep.subr.bf16.mxu1 %v2982_v30  ;;  %v488_v45 = vld [vmem:[%s5699_s2 + $0x2b0] sm:$0xff]  ;;  %v511_v47 = vld [vmem:[%s5699_s2 + $0x368] sm:$0xff]  ;;  %v513_v49 = vld [vmem:[%s5699_s2 + $0x378] sm:$0xff] }
  0x12   : > { %v2988_v51 = vpack.c.bf16 %v488_v45, %v476_v44  ;;  %v2926_v52 = vpack.c.bf16 %v511_v47, %v499_v46  ;;  %v498_v53 = vld [vmem:[%s5699_s2 + $0x300] sm:$0xff]  ;;  %v500_v55 = vld [vmem:[%s5699_s2 + $0x310] sm:$0xff]  ;;  %v2990_v56 = vpack.c.bf16 %v513_v49, %v501_v48  ;;  %v523_v58 = vld [vmem:[%s5699_s2 + $0x3c8] sm:$0xff] }
  0x13   : > { %2921 = vmatpush1.bf16.msra.mxu0 %v2920_v34  ;;  %v510_v54 = vld [vmem:[%s5699_s2 + $0x360] sm:$0xff]  ;;  %v512_v57 = vld [vmem:[%s5699_s2 + $0x370] sm:$0xff]  ;;  %v535_v59 = vld [vmem:[%s5699_s2 + $0x428] sm:$0xff] }
  0x14   : > { %2985 = vmatpush1.bf16.msra.mxu1 %v2984_v38  ;;  %2923 = vmatprep.subr.bf16.mxu0 %v2922_v39  ;;  %v525_v60 = vld [vmem:[%s5699_s2 + $0x3d8] sm:$0xff]  ;;  %v2928_v62 = vpack.c.bf16 %v510_v54, %v498_v53  ;;  %v2992_v63 = vpack.c.bf16 %v512_v57, %v500_v55  ;;  %v2930_v0 = vpack.c.bf16 %v535_v59, %v523_v58  ;;  %v522_v1 = vld [vmem:[%s5699_s2 + $0x3c0] sm:$0xff]  ;;  %v524_v3 = vld [vmem:[%s5699_s2 + $0x3d0] sm:$0xff] }
  0x15   : > { %2987 = vmatprep.subr.bf16.mxu1 %v2986_v43  ;;  %v537_v61 = vld [vmem:[%s5699_s2 + $0x438] sm:$0xff]  ;;  %v534_v2 = vld [vmem:[%s5699_s2 + $0x420] sm:$0xff]  ;;  %v536_v5 = vld [vmem:[%s5699_s2 + $0x430] sm:$0xff] }
  0x16   : > { %v2994_v4 = vpack.c.bf16 %v537_v61, %v525_v60  ;;  %v547_v6 = vld [vmem:[%s5699_s2 + $0x488] sm:$0xff]  ;;  %v549_v8 = vld [vmem:[%s5699_s2 + $0x498] sm:$0xff]  ;;  %v2932_v10 = vpack.c.bf16 %v534_v2, %v522_v1  ;;  %v2996_v11 = vpack.c.bf16 %v536_v5, %v524_v3  ;;  %v546_v13 = vld [vmem:[%s5699_s2 + $0x480] sm:$0xff] }
  0x17   : > { %2925 = vmatpush1.bf16.msra.mxu0 %v2924_v50  ;;  %v559_v7 = vld [vmem:[%s5699_s2 + $0x4e8] sm:$0xff]  ;;  %v561_v9 = vld [vmem:[%s5699_s2 + $0x4f8] sm:$0xff]  ;;  %v558_v14 = vld [vmem:[%s5699_s2 + $0x4e0] sm:$0xff] }
  0x18   : > { %2989 = vmatpush1.bf16.msra.mxu1 %v2988_v51  ;;  %2927 = vmatprep.subr.bf16.mxu0 %v2926_v52  ;;  %v2934_v12 = vpack.c.bf16 %v559_v7, %v547_v6  ;;  %v548_v15 = vld [vmem:[%s5699_s2 + $0x490] sm:$0xff]  ;;  %v2998_v16 = vpack.c.bf16 %v561_v9, %v549_v8  ;;  %v571_v18 = vld [vmem:[%s5699_s2 + $0x548] sm:$0xff]  ;;  %v573_v20 = vld [vmem:[%s5699_s2 + $0x558] sm:$0xff]  ;;  %v2936_v22 = vpack.c.bf16 %v558_v14, %v546_v13 }
  0x19   : > { %2991 = vmatprep.subr.bf16.mxu1 %v2990_v56  ;;  %v560_v17 = vld [vmem:[%s5699_s2 + $0x4f0] sm:$0xff]  ;;  %v583_v19 = vld [vmem:[%s5699_s2 + $0x5a8] sm:$0xff]  ;;  %v585_v21 = vld [vmem:[%s5699_s2 + $0x5b8] sm:$0xff] }
  0x1a   : > { %v3000_v23 = vpack.c.bf16 %v560_v17, %v548_v15  ;;  %v2938_v24 = vpack.c.bf16 %v583_v19, %v571_v18  ;;  %v570_v25 = vld [vmem:[%s5699_s2 + $0x540] sm:$0xff]  ;;  %v572_v27 = vld [vmem:[%s5699_s2 + $0x550] sm:$0xff]  ;;  %v3002_v28 = vpack.c.bf16 %v585_v21, %v573_v20  ;;  %v595_v30 = vld [vmem:[%s5699_s2 + $0x608] sm:$0xff] }
  0x1b   : > { %2929 = vmatpush1.bf16.msra.mxu0 %v2928_v62  ;;  %v582_v26 = vld [vmem:[%s5699_s2 + $0x5a0] sm:$0xff]  ;;  %v584_v29 = vld [vmem:[%s5699_s2 + $0x5b0] sm:$0xff]  ;;  %v607_v31 = vld [vmem:[%s5699_s2 + $0x668] sm:$0xff] }
  0x1c   : > { %2993 = vmatpush1.bf16.msra.mxu1 %v2992_v63  ;;  %2931 = vmatprep.subr.bf16.mxu0 %v2930_v0  ;;  %v597_v32 = vld [vmem:[%s5699_s2 + $0x618] sm:$0xff]  ;;  %v2940_v34 = vpack.c.bf16 %v582_v26, %v570_v25  ;;  %v3004_v35 = vpack.c.bf16 %v584_v29, %v572_v27  ;;  %v2942_v36 = vpack.c.bf16 %v607_v31, %v595_v30  ;;  %v594_v37 = vld [vmem:[%s5699_s2 + $0x600] sm:$0xff]  ;;  %v596_v39 = vld [vmem:[%s5699_s2 + $0x610] sm:$0xff] }
  0x1d   : > { %2995 = vmatprep.subr.bf16.mxu1 %v2994_v4  ;;  %v609_v33 = vld [vmem:[%s5699_s2 + $0x678] sm:$0xff]  ;;  %v606_v38 = vld [vmem:[%s5699_s2 + $0x660] sm:$0xff]  ;;  %v608_v41 = vld [vmem:[%s5699_s2 + $0x670] sm:$0xff] }
  0x1e   : > { %v3006_v40 = vpack.c.bf16 %v609_v33, %v597_v32  ;;  %v619_v42 = vld [vmem:[%s5699_s2 + $0x6c8] sm:$0xff]  ;;  %v621_v44 = vld [vmem:[%s5699_s2 + $0x6d8] sm:$0xff]  ;;  %v2944_v46 = vpack.c.bf16 %v606_v38, %v594_v37  ;;  %v3008_v47 = vpack.c.bf16 %v608_v41, %v596_v39  ;;  %v618_v49 = vld [vmem:[%s5699_s2 + $0x6c0] sm:$0xff] }
  0x1f   : > { %2933 = vmatpush1.bf16.msra.mxu0 %v2932_v10  ;;  %v631_v43 = vld [vmem:[%s5699_s2 + $0x728] sm:$0xff]  ;;  %v633_v45 = vld [vmem:[%s5699_s2 + $0x738] sm:$0xff]  ;;  %v630_v50 = vld [vmem:[%s5699_s2 + $0x720] sm:$0xff] }
  0x20   : > { %2997 = vmatpush1.bf16.msra.mxu1 %v2996_v11  ;;  %2935 = vmatprep.subr.bf16.mxu0 %v2934_v12  ;;  %v2946_v48 = vpack.c.bf16 %v631_v43, %v619_v42  ;;  %v620_v51 = vld [vmem:[%s5699_s2 + $0x6d0] sm:$0xff]  ;;  %v3010_v52 = vpack.c.bf16 %v633_v45, %v621_v44  ;;  %v643_v54 = vld [vmem:[%s5699_s2 + $0x788] sm:$0xff]  ;;  %v645_v56 = vld [vmem:[%s5699_s2 + $0x798] sm:$0xff]  ;;  %v2948_v58 = vpack.c.bf16 %v630_v50, %v618_v49 }
  0x21   : > { %2999 = vmatprep.subr.bf16.mxu1 %v2998_v16  ;;  %v632_v53 = vld [vmem:[%s5699_s2 + $0x730] sm:$0xff]  ;;  %v655_v55 = vld [vmem:[%s5699_s2 + $0x7e8] sm:$0xff]  ;;  %v657_v57 = vld [vmem:[%s5699_s2 + $0x7f8] sm:$0xff] }
  0x22   : > { %v3012_v59 = vpack.c.bf16 %v632_v53, %v620_v51  ;;  %v2950_v60 = vpack.c.bf16 %v655_v55, %v643_v54  ;;  %v642_v61 = vld [vmem:[%s5699_s2 + $0x780] sm:$0xff]  ;;  %v644_v63 = vld [vmem:[%s5699_s2 + $0x790] sm:$0xff]  ;;  %v3014_v0 = vpack.c.bf16 %v657_v57, %v645_v56  ;;  %v667_v2 = vld [vmem:[%s5699_s2 + $0x848] sm:$0xff] }
  0x23   : > { %2937 = vmatpush1.bf16.msra.mxu0 %v2936_v22  ;;  %v654_v62 = vld [vmem:[%s5699_s2 + $0x7e0] sm:$0xff]  ;;  %v656_v1 = vld [vmem:[%s5699_s2 + $0x7f0] sm:$0xff]  ;;  %v679_v3 = vld [vmem:[%s5699_s2 + $0x8a8] sm:$0xff] }
  0x24   : > { %3001 = vmatpush1.bf16.msra.mxu1 %v3000_v23  ;;  %2939 = vmatprep.subr.bf16.mxu0 %v2938_v24  ;;  %v669_v4 = vld [vmem:[%s5699_s2 + $0x858] sm:$0xff]  ;;  %v2952_v6 = vpack.c.bf16 %v654_v62, %v642_v61  ;;  %v666_v7 = vld [vmem:[%s5699_s2 + $0x840] sm:$0xff]  ;;  %v3016_v8 = vpack.c.bf16 %v656_v1, %v644_v63  ;;  %v2954_v9 = vpack.c.bf16 %v679_v3, %v667_v2  ;;  %v668_v11 = vld [vmem:[%s5699_s2 + $0x850] sm:$0xff] }
  0x25   : > { %3003 = vmatprep.subr.bf16.mxu1 %v3002_v28  ;;  %v681_v5 = vld [vmem:[%s5699_s2 + $0x8b8] sm:$0xff]  ;;  %v678_v10 = vld [vmem:[%s5699_s2 + $0x8a0] sm:$0xff]  ;;  %v680_v12 = vld [vmem:[%s5699_s2 + $0x8b0] sm:$0xff] }
  0x26   : > { %v3018_v13 = vpack.c.bf16 %v681_v5, %v669_v4  ;;  %v691_v14 = vld [vmem:[%s5699_s2 + $0x908] sm:$0xff]  ;;  %v693_v17 = vld [vmem:[%s5699_s2 + $0x918] sm:$0xff]  ;;  %v2956_v19 = vpack.c.bf16 %v678_v10, %v666_v7  ;;  %v3020_v20 = vpack.c.bf16 %v680_v12, %v668_v11  ;;  %v690_v22 = vld [vmem:[%s5699_s2 + $0x900] sm:$0xff] }
  0x27   : > { %2941 = vmatpush1.bf16.msra.mxu0 %v2940_v34  ;;  %v703_v15 = vld [vmem:[%s5699_s2 + $0x968] sm:$0xff]  ;;  %v705_v18 = vld [vmem:[%s5699_s2 + $0x978] sm:$0xff]  ;;  %v702_v23 = vld [vmem:[%s5699_s2 + $0x960] sm:$0xff] }
  0x28   : > { %3005 = vmatpush1.bf16.msra.mxu1 %v3004_v35  ;;  %2943 = vmatprep.subr.bf16.mxu0 %v2942_v36  ;;  %v4056_v16 = vld [vmem:[%s4035_s14 + $0x8] sm:$0xff]  ;;  %v2958_v21 = vpack.c.bf16 %v703_v15, %v691_v14  ;;  %v692_v24 = vld [vmem:[%s5699_s2 + $0x910] sm:$0xff]  ;;  %v3022_v25 = vpack.c.bf16 %v705_v18, %v693_v17  ;;  %v717_v29 = vld [vmem:[%s5699_s2 + $0x9d8] sm:$0xff]  ;;  %v2960_v31 = vpack.c.bf16 %v702_v23, %v690_v22 }
  0x29   : > { %3007 = vmatprep.subr.bf16.mxu1 %v3006_v40  ;;  %914 = vmatprep.mubr.f32.mxu0 %v4056_v16  ;;  %v704_v26 = vld [vmem:[%s5699_s2 + $0x970] sm:$0xff]  ;;  %v715_v27 = vld [vmem:[%s5699_s2 + $0x9c8] sm:$0xff]  ;;  %v729_v30 = vld [vmem:[%s5699_s2 + $0xa38] sm:$0xff] }
  0x2a   : > { %991 = vmatprep.mubr.f32.mxu1 %v4056_v16  ;;  %v727_v28 = vld [vmem:[%s5699_s2 + $0xa28] sm:$0xff]  ;;  %v3024_v32 = vpack.c.bf16 %v704_v26, %v692_v24  ;;  %v714_v34 = vld [vmem:[%s5699_s2 + $0x9c0] sm:$0xff]  ;;  %v716_v36 = vld [vmem:[%s5699_s2 + $0x9d0] sm:$0xff]  ;;  %v3026_v37 = vpack.c.bf16 %v729_v30, %v717_v29 }
  0x2b   : > { %2945 = vmatpush1.bf16.msra.mxu0 %v2944_v46  ;;  %v2962_v33 = vpack.c.bf16 %v727_v28, %v715_v27  ;;  %v726_v35 = vld [vmem:[%s5699_s2 + $0xa20] sm:$0xff]  ;;  %v728_v38 = vld [vmem:[%s5699_s2 + $0xa30] sm:$0xff]  ;;  %v739_v39 = vld [vmem:[%s5699_s2 + $0xa88] sm:$0xff] }
  0x2c   : > { %3009 = vmatpush1.bf16.msra.mxu1 %v3008_v47  ;;  %2947 = vmatprep.subr.bf16.mxu0 %v2946_v48  ;;  %v751_v40 = vld [vmem:[%s5699_s2 + $0xae8] sm:$0xff]  ;;  %v741_v41 = vld [vmem:[%s5699_s2 + $0xa98] sm:$0xff]  ;;  %v2964_v43 = vpack.c.bf16 %v726_v35, %v714_v34  ;;  %v3028_v44 = vpack.c.bf16 %v728_v38, %v716_v36  ;;  %v738_v46 = vld [vmem:[%s5699_s2 + $0xa80] sm:$0xff] }
  0x2d   : > { %3011 = vmatprep.subr.bf16.mxu1 %v3010_v52  ;;  %v753_v42 = vld [vmem:[%s5699_s2 + $0xaf8] sm:$0xff]  ;;  %v2966_v45 = vpack.c.bf16 %v751_v40, %v739_v39  ;;  %v750_v47 = vld [vmem:[%s5699_s2 + $0xae0] sm:$0xff]  ;;  %v740_v48 = vld [vmem:[%s5699_s2 + $0xa90] sm:$0xff] }
  0x2e   : > { %v3030_v49 = vpack.c.bf16 %v753_v42, %v741_v41  ;;  %v752_v50 = vld [vmem:[%s5699_s2 + $0xaf0] sm:$0xff]  ;;  %v763_v51 = vld [vmem:[%s5699_s2 + $0xb48] sm:$0xff]  ;;  %v765_v53 = vld [vmem:[%s5699_s2 + $0xb58] sm:$0xff]  ;;  %v2968_v55 = vpack.c.bf16 %v750_v47, %v738_v46 }
  0x2f   : > { %2949 = vmatpush1.bf16.msra.mxu0 %v2948_v58  ;;  %v775_v52 = vld [vmem:[%s5699_s2 + $0xba8] sm:$0xff]  ;;  %v777_v54 = vld [vmem:[%s5699_s2 + $0xbb8] sm:$0xff]  ;;  %v3032_v56 = vpack.c.bf16 %v752_v50, %v740_v48  ;;  %v762_v58 = vld [vmem:[%s5699_s2 + $0xb40] sm:$0xff] }
  0x30   : > { %3013 = vmatpush1.bf16.msra.mxu1 %v3012_v59  ;;  %2951 = vmatprep.subr.bf16.mxu0 %v2950_v60  ;;  %v2970_v57 = vpack.c.bf16 %v775_v52, %v763_v51  ;;  %v774_v59 = vld [vmem:[%s5699_s2 + $0xba0] sm:$0xff]  ;;  %v764_v60 = vld [vmem:[%s5699_s2 + $0xb50] sm:$0xff]  ;;  %v3034_v61 = vpack.c.bf16 %v777_v54, %v765_v53  ;;  %v407_v63 = vld [vmem:[%s5699_s2 + $0x28] sm:$0xff] }
  0x31   : > { %3015 = vmatprep.subr.bf16.mxu1 %v3014_v0  ;;  %v776_v62 = vld [vmem:[%s5699_s2 + $0xbb0] sm:$0xff]  ;;  %v419_v0 = vld [vmem:[%s5699_s2 + $0x88] sm:$0xff]  ;;  %v409_v1 = vld [vmem:[%s5699_s2 + $0x38] sm:$0xff]  ;;  %v2972_v3 = vpack.c.bf16 %v774_v59, %v762_v58 }
  0x32   : > { %v421_v2 = vld [vmem:[%s5699_s2 + $0x98] sm:$0xff]  ;;  %v3036_v4 = vpack.c.bf16 %v776_v62, %v764_v60  ;;  %v3038_v5 = vpack.c.bf16 %v419_v0, %v407_v63  ;;  %v418_v7 = vld [vmem:[%s5699_s2 + $0x80] sm:$0xff]  ;;  %v420_v10 = vld [vmem:[%s5699_s2 + $0x90] sm:$0xff] }
  0x33   : > { %2953 = vmatpush1.bf16.msra.mxu0 %v2952_v6  ;;  %v406_v6 = vld [vmem:[%s5699_s2 + $0x20] sm:$0xff]  ;;  %v431_v11 = vld [vmem:[%s5699_s2 + $0xe8] sm:$0xff]  ;;  %v445_v14 = vld [vmem:[%s5699_s2 + $0x158] sm:$0xff] }
  0x34   : > { %3017 = vmatpush1.bf16.msra.mxu1 %v3016_v8  ;;  %2955 = vmatprep.subr.bf16.mxu0 %v2954_v9  ;;  %v408_v8 = vld [vmem:[%s5699_s2 + $0x30] sm:$0xff]  ;;  %v3102_v9 = vpack.c.bf16 %v421_v2, %v409_v1  ;;  %v443_v12 = vld [vmem:[%s5699_s2 + $0x148] sm:$0xff]  ;;  %v4187_v15 = vld [vmem:[%s4035_s14] sm:$0xff]  ;;  %v3040_v17 = vpack.c.bf16 %v418_v7, %v406_v6 }
  0x35   : > { %3019 = vmatprep.subr.bf16.mxu1 %v3018_v13  ;;  %v433_v13 = vld [vmem:[%s5699_s2 + $0xf8] sm:$0xff]  ;;  %v3104_v18 = vpack.c.bf16 %v420_v10, %v408_v8  ;;  %v432_v22 = vld [vmem:[%s5699_s2 + $0xf0] sm:$0xff]  ;;  %v467_v26 = vld [vmem:[%s5699_s2 + $0x208] sm:$0xff] }
  0x36   : > { %v3106_v23 = vpack.c.bf16 %v445_v14, %v433_v13  ;;  %v444_v24 = vld [vmem:[%s5699_s2 + $0x150] sm:$0xff]  ;;  %v457_v27 = vld [vmem:[%s5699_s2 + $0x1b8] sm:$0xff]  ;;  %v454_v34 = vld [vmem:[%s5699_s2 + $0x1a0] sm:$0xff] }
  0x37   : > { %2957 = vmatpush1.bf16.msra.mxu0 %v2956_v19  ;;  %v3042_v19 = vpack.c.bf16 %v443_v12, %v431_v11  ;;  %v469_v28 = vld [vmem:[%s5699_s2 + $0x218] sm:$0xff]  ;;  %v466_v35 = vld [vmem:[%s5699_s2 + $0x200] sm:$0xff]  ;;  %v456_v36 = vld [vmem:[%s5699_s2 + $0x1b0] sm:$0xff] }
  0x38   : > { %3021 = vmatpush1.bf16.msra.mxu1 %v3020_v20  ;;  %2959 = vmatprep.subr.bf16.mxu0 %v2958_v21  ;;  %v430_v20 = vld [vmem:[%s5699_s2 + $0xe0] sm:$0xff]  ;;  %v4215_v29 = vld [vmem:[%s4035_s14 + $0x18] sm:$0xff]  ;;  %v468_v38 = vld [vmem:[%s5699_s2 + $0x210] sm:$0xff] }
  0x39   : > { %3023 = vmatprep.subr.bf16.mxu1 %v3022_v25  ;;  %v442_v21 = vld [vmem:[%s5699_s2 + $0x140] sm:$0xff]  ;;  %v455_v25 = vld [vmem:[%s5699_s2 + $0x1a8] sm:$0xff]  ;;  %v481_v41 = vld [vmem:[%s5699_s2 + $0x278] sm:$0xff] }
  0x3a   : > { %v3044_v30 = vpack.c.bf16 %v442_v21, %v430_v20  ;;  %v479_v39 = vld [vmem:[%s5699_s2 + $0x268] sm:$0xff]  ;;  %v493_v42 = vld [vmem:[%s5699_s2 + $0x2d8] sm:$0xff]  ;;  %v478_v46 = vld [vmem:[%s5699_s2 + $0x260] sm:$0xff] }
  0x3b   : > { %2961 = vmatpush1.bf16.msra.mxu0 %v2960_v31  ;;  %v4219_v31 = vld [vmem:[%s4035_s14 + $0x10] sm:$0xff]  ;;  %v491_v40 = vld [vmem:[%s5699_s2 + $0x2c8] sm:$0xff]  ;;  %v490_v47 = vld [vmem:[%s5699_s2 + $0x2c0] sm:$0xff] }
  0x3c   : > { %3025 = vmatpush1.bf16.msra.mxu1 %v3024_v32  ;;  %2963 = vmatprep.subr.bf16.mxu0 %v2962_v33  ;;  %v3108_v32 = vpack.c.bf16 %v444_v24, %v432_v22  ;;  %v3046_v33 = vpack.c.bf16 %v467_v26, %v455_v25  ;;  %v480_v48 = vld [vmem:[%s5699_s2 + $0x270] sm:$0xff]  ;;  %v503_v51 = vld [vmem:[%s5699_s2 + $0x328] sm:$0xff]  ;;  %v505_v53 = vld [vmem:[%s5699_s2 + $0x338] sm:$0xff] }
  0x3d   : > { %3027 = vmatprep.subr.bf16.mxu1 %v3026_v37  ;;  %v3110_v37 = vpack.c.bf16 %v469_v28, %v457_v27  ;;  %v492_v50 = vld [vmem:[%s5699_s2 + $0x2d0] sm:$0xff]  ;;  %v515_v52 = vld [vmem:[%s5699_s2 + $0x388] sm:$0xff]  ;;  %v517_v54 = vld [vmem:[%s5699_s2 + $0x398] sm:$0xff] }
  0x3e   : > { %v502_v58 = vld [vmem:[%s5699_s2 + $0x320] sm:$0xff]  ;;  %v504_v60 = vld [vmem:[%s5699_s2 + $0x330] sm:$0xff]  ;;  %v527_v63 = vld [vmem:[%s5699_s2 + $0x3e8] sm:$0xff] }
  0x3f   : > { %2965 = vmatpush1.bf16.msra.mxu0 %v2964_v43  ;;  %v3048_v43 = vpack.c.bf16 %v466_v35, %v454_v34  ;;  %v514_v59 = vld [vmem:[%s5699_s2 + $0x380] sm:$0xff]  ;;  %v516_v62 = vld [vmem:[%s5699_s2 + $0x390] sm:$0xff]  ;;  %v539_v0 = vld [vmem:[%s5699_s2 + $0x448] sm:$0xff] }
  0x40   : > { %3029 = vmatpush1.bf16.msra.mxu1 %v3028_v44  ;;  %2967 = vmatprep.subr.bf16.mxu0 %v2966_v45  ;;  %v3112_v44 = vpack.c.bf16 %v468_v38, %v456_v36  ;;  %v3050_v45 = vpack.c.bf16 %v491_v40, %v479_v39  ;;  %v529_v1 = vld [vmem:[%s5699_s2 + $0x3f8] sm:$0xff]  ;;  %v526_v6 = vld [vmem:[%s5699_s2 + $0x3e0] sm:$0xff]  ;;  %v528_v8 = vld [vmem:[%s5699_s2 + $0x3f0] sm:$0xff] }
  0x41   : > { %3031 = vmatprep.subr.bf16.mxu1 %v3030_v49  ;;  %v3114_v49 = vpack.c.bf16 %v493_v42, %v481_v41  ;;  %v541_v2 = vld [vmem:[%s5699_s2 + $0x458] sm:$0xff]  ;;  %v538_v7 = vld [vmem:[%s5699_s2 + $0x440] sm:$0xff]  ;;  %v540_v10 = vld [vmem:[%s5699_s2 + $0x450] sm:$0xff] }
  0x42   : > { %v551_v11 = vld [vmem:[%s5699_s2 + $0x4a8] sm:$0xff]  ;;  %v553_v13 = vld [vmem:[%s5699_s2 + $0x4b8] sm:$0xff]  ;;  %v550_v20 = vld [vmem:[%s5699_s2 + $0x4a0] sm:$0xff] }
  0x43   : > { %2969 = vmatpush1.bf16.msra.mxu0 %v2968_v55  ;;  %v3052_v55 = vpack.c.bf16 %v490_v47, %v478_v46  ;;  %v563_v12 = vld [vmem:[%s5699_s2 + $0x508] sm:$0xff]  ;;  %v565_v14 = vld [vmem:[%s5699_s2 + $0x518] sm:$0xff]  ;;  %v562_v21 = vld [vmem:[%s5699_s2 + $0x500] sm:$0xff] }
  0x44   : > { %3033 = vmatpush1.bf16.msra.mxu1 %v3032_v56  ;;  %2971 = vmatprep.subr.bf16.mxu0 %v2970_v57  ;;  %v3116_v56 = vpack.c.bf16 %v492_v50, %v480_v48  ;;  %v3054_v57 = vpack.c.bf16 %v515_v52, %v503_v51  ;;  %v552_v22 = vld [vmem:[%s5699_s2 + $0x4b0] sm:$0xff]  ;;  %v575_v25 = vld [vmem:[%s5699_s2 + $0x568] sm:$0xff]  ;;  %v577_v27 = vld [vmem:[%s5699_s2 + $0x578] sm:$0xff] }
  0x45   : > { %3035 = vmatprep.subr.bf16.mxu1 %v3034_v61  ;;  %v3118_v61 = vpack.c.bf16 %v517_v54, %v505_v53  ;;  %v564_v24 = vld [vmem:[%s5699_s2 + $0x510] sm:$0xff]  ;;  %v587_v26 = vld [vmem:[%s5699_s2 + $0x5c8] sm:$0xff]  ;;  %v589_v28 = vld [vmem:[%s5699_s2 + $0x5d8] sm:$0xff] }
  0x46   : > { %v574_v34 = vld [vmem:[%s5699_s2 + $0x560] sm:$0xff]  ;;  %v576_v36 = vld [vmem:[%s5699_s2 + $0x570] sm:$0xff]  ;;  %v599_v39 = vld [vmem:[%s5699_s2 + $0x628] sm:$0xff] }
  0x47   : > { %2973 = vmatpush1.bf16.msra.mxu0 %v2972_v3  ;;  %v3056_v3 = vpack.c.bf16 %v514_v59, %v502_v58  ;;  %v586_v35 = vld [vmem:[%s5699_s2 + $0x5c0] sm:$0xff]  ;;  %v588_v38 = vld [vmem:[%s5699_s2 + $0x5d0] sm:$0xff]  ;;  %v611_v40 = vld [vmem:[%s5699_s2 + $0x688] sm:$0xff] }
  0x48   : > { %3037 = vmatpush1.bf16.msra.mxu1 %v3036_v4  ;;  %3039 = vmatprep.subr.bf16.mxu0 %v3038_v5  ;;  %v3120_v4 = vpack.c.bf16 %v516_v62, %v504_v60  ;;  %v3058_v5 = vpack.c.bf16 %v539_v0, %v527_v63  ;;  %v601_v41 = vld [vmem:[%s5699_s2 + $0x638] sm:$0xff]  ;;  %v598_v46 = vld [vmem:[%s5699_s2 + $0x620] sm:$0xff]  ;;  %v600_v48 = vld [vmem:[%s5699_s2 + $0x630] sm:$0xff] }
  0x49   : > { %3103 = vmatprep.subr.bf16.mxu1 %v3102_v9  ;;  %v3122_v9 = vpack.c.bf16 %v541_v2, %v529_v1  ;;  %v613_v42 = vld [vmem:[%s5699_s2 + $0x698] sm:$0xff]  ;;  %v610_v47 = vld [vmem:[%s5699_s2 + $0x680] sm:$0xff]  ;;  %v612_v50 = vld [vmem:[%s5699_s2 + $0x690] sm:$0xff] }
  0x4a   : > { %915 = vmatmul.mubr.f32.vlgmr.msra.gmra.mrb[0].mxu0 %v4187_v15  ;;  %v623_v51 = vld [vmem:[%s5699_s2 + $0x6e8] sm:$0xff]  ;;  %v625_v53 = vld [vmem:[%s5699_s2 + $0x6f8] sm:$0xff]  ;;  %v622_v58 = vld [vmem:[%s5699_s2 + $0x6e0] sm:$0xff] }
  0x4b   : > { %992 = vmatmul.mubr.f32.vlgmr.msra.gmra.mrb[0].mxu1 %v4187_v15  ;;  %3041 = vmatpush1.bf16.msra.mxu0 %v3040_v17  ;;  %v3060_v17 = vpack.c.bf16 %v538_v7, %v526_v6  ;;  %v635_v52 = vld [vmem:[%s5699_s2 + $0x748] sm:$0xff]  ;;  %v637_v54 = vld [vmem:[%s5699_s2 + $0x758] sm:$0xff]  ;;  %v634_v59 = vld [vmem:[%s5699_s2 + $0x740] sm:$0xff] }
  0x4c   : > { %3105 = vmatpush1.bf16.msra.mxu1 %v3104_v18  ;;  %3043 = vmatprep.subr.bf16.mxu0 %v3042_v19  ;;  %v3124_v18 = vpack.c.bf16 %v540_v10, %v528_v8  ;;  %v3062_v19 = vpack.c.bf16 %v563_v12, %v551_v11  ;;  %v624_v60 = vld [vmem:[%s5699_s2 + $0x6f0] sm:$0xff]  ;;  %v647_v63 = vld [vmem:[%s5699_s2 + $0x7a8] sm:$0xff]  ;;  %v649_v1 = vld [vmem:[%s5699_s2 + $0x7b8] sm:$0xff] }
  0x4d   : > { %3107 = vmatprep.subr.bf16.mxu1 %v3106_v23  ;;  %920 = vmatprep.mubr.f32.mxu0 %v4215_v29  ;;  %v3126_v23 = vpack.c.bf16 %v565_v14, %v553_v13  ;;  %v636_v62 = vld [vmem:[%s5699_s2 + $0x750] sm:$0xff]  ;;  %v659_v0 = vld [vmem:[%s5699_s2 + $0x808] sm:$0xff]  ;;  %v661_v2 = vld [vmem:[%s5699_s2 + $0x818] sm:$0xff] }
  0x4e   : > { %921 = vmatmul.mubr.f32.gmra.mrb[2].mxu0 %v4219_v31  ;;  %997 = vmatprep.mubr.f32.mxu1 %v4215_v29  ;;  %v646_v6 = vld [vmem:[%s5699_s2 + $0x7a0] sm:$0xff]  ;;  %v648_v8 = vld [vmem:[%s5699_s2 + $0x7b0] sm:$0xff]  ;;  %v671_v11 = vld [vmem:[%s5699_s2 + $0x868] sm:$0xff] }
  0x4f   : > { %3045 = vmatpush1.bf16.msra.mxu0 %v3044_v30  ;;  %998 = vmatmul.mubr.f32.gmra.mrb[2].mxu1 %v4219_v31  ;;  %v3064_v30 = vpack.c.bf16 %v562_v21, %v550_v20  ;;  %v658_v7 = vld [vmem:[%s5699_s2 + $0x800] sm:$0xff]  ;;  %v660_v10 = vld [vmem:[%s5699_s2 + $0x810] sm:$0xff]  ;;  %v683_v12 = vld [vmem:[%s5699_s2 + $0x8c8] sm:$0xff] }
  0x50   : > { %3109 = vmatpush1.bf16.msra.mxu1 %v3108_v32  ;;  %3047 = vmatprep.subr.bf16.mxu0 %v3046_v33  ;;  %v3128_v32 = vpack.c.bf16 %v564_v24, %v552_v22  ;;  %v3066_v33 = vpack.c.bf16 %v587_v26, %v575_v25  ;;  %v673_v13 = vld [vmem:[%s5699_s2 + $0x878] sm:$0xff]  ;;  %v670_v20 = vld [vmem:[%s5699_s2 + $0x860] sm:$0xff]  ;;  %v672_v22 = vld [vmem:[%s5699_s2 + $0x870] sm:$0xff] }
  0x51   : > { %3111 = vmatprep.subr.bf16.mxu1 %v3110_v37  ;;  %1068 = vmatprep.mubr.f32.mxu0 %v4056_v16  ;;  %v3130_v37 = vpack.c.bf16 %v589_v28, %v577_v27  ;;  %v685_v14 = vld [vmem:[%s5699_s2 + $0x8d8] sm:$0xff]  ;;  %v682_v21 = vld [vmem:[%s5699_s2 + $0x8c0] sm:$0xff]  ;;  %v684_v24 = vld [vmem:[%s5699_s2 + $0x8d0] sm:$0xff] }
  0x52   : > { %1145 = vmatprep.mubr.f32.mxu1 %v4056_v16  ;;  %v695_v25 = vld [vmem:[%s5699_s2 + $0x928] sm:$0xff]  ;;  %v697_v27 = vld [vmem:[%s5699_s2 + $0x938] sm:$0xff] }
  0x53   : > { %3049 = vmatpush1.bf16.msra.mxu0 %v3048_v43  ;;  %v3068_v43 = vpack.c.bf16 %v586_v35, %v574_v34  ;;  %v707_v26 = vld [vmem:[%s5699_s2 + $0x988] sm:$0xff]  ;;  %v709_v28 = vld [vmem:[%s5699_s2 + $0x998] sm:$0xff]  ;;  %v694_v34 = vld [vmem:[%s5699_s2 + $0x920] sm:$0xff] }
  0x54   : > { %3113 = vmatpush1.bf16.msra.mxu1 %v3112_v44  ;;  %3051 = vmatprep.subr.bf16.mxu0 %v3050_v45  ;;  %v3132_v44 = vpack.c.bf16 %v588_v38, %v576_v36  ;;  %v3070_v45 = vpack.c.bf16 %v611_v40, %v599_v39  ;;  %v706_v35 = vld [vmem:[%s5699_s2 + $0x980] sm:$0xff]  ;;  %v696_v36 = vld [vmem:[%s5699_s2 + $0x930] sm:$0xff]  ;;  %v719_v39 = vld [vmem:[%s5699_s2 + $0x9e8] sm:$0xff] }
  0x55   : > { %3115 = vmatprep.subr.bf16.mxu1 %v3114_v49  ;;  %v3134_v49 = vpack.c.bf16 %v613_v42, %v601_v41  ;;  %v708_v38 = vld [vmem:[%s5699_s2 + $0x990] sm:$0xff]  ;;  %v731_v40 = vld [vmem:[%s5699_s2 + $0xa48] sm:$0xff]  ;;  %v721_v41 = vld [vmem:[%s5699_s2 + $0x9f8] sm:$0xff] }
  0x56   : > { %v733_v42 = vld [vmem:[%s5699_s2 + $0xa58] sm:$0xff] }
  0x57   : > { %3053 = vmatpush1.bf16.msra.mxu0 %v3052_v55  ;;  %v3072_v55 = vpack.c.bf16 %v610_v47, %v598_v46  ;;  %v718_v46 = vld [vmem:[%s5699_s2 + $0x9e0] sm:$0xff] }
  0x58   : > { %3117 = vmatpush1.bf16.msra.mxu1 %v3116_v56  ;;  %3055 = vmatprep.subr.bf16.mxu0 %v3054_v57  ;;  %v3136_v56 = vpack.c.bf16 %v612_v50, %v600_v48  ;;  %v3074_v57 = vpack.c.bf16 %v635_v52, %v623_v51  ;;  %v730_v47 = vld [vmem:[%s5699_s2 + $0xa40] sm:$0xff]  ;;  %v720_v48 = vld [vmem:[%s5699_s2 + $0x9f0] sm:$0xff]  ;;  %v743_v51 = vld [vmem:[%s5699_s2 + $0xaa8] sm:$0xff] }
  0x59   : > { %3119 = vmatprep.subr.bf16.mxu1 %v3118_v61  ;;  %v3138_v61 = vpack.c.bf16 %v637_v54, %v625_v53  ;;  %v732_v50 = vld [vmem:[%s5699_s2 + $0xa50] sm:$0xff]  ;;  %v755_v52 = vld [vmem:[%s5699_s2 + $0xb08] sm:$0xff]  ;;  %v745_v53 = vld [vmem:[%s5699_s2 + $0xab8] sm:$0xff] }
  0x5a   : > { %v757_v54 = vld [vmem:[%s5699_s2 + $0xb18] sm:$0xff] }
  0x5b   : > { %3057 = vmatpush1.bf16.msra.mxu0 %v3056_v3  ;;  %v3076_v3 = vpack.c.bf16 %v634_v59, %v622_v58  ;;  %v742_v58 = vld [vmem:[%s5699_s2 + $0xaa0] sm:$0xff] }
  0x5c   : > { %3121 = vmatpush1.bf16.msra.mxu1 %v3120_v4  ;;  %3059 = vmatprep.subr.bf16.mxu0 %v3058_v5  ;;  %v3140_v4 = vpack.c.bf16 %v636_v62, %v624_v60  ;;  %v3078_v5 = vpack.c.bf16 %v659_v0, %v647_v63  ;;  %v754_v59 = vld [vmem:[%s5699_s2 + $0xb00] sm:$0xff]  ;;  %v744_v60 = vld [vmem:[%s5699_s2 + $0xab0] sm:$0xff]  ;;  %v767_v63 = vld [vmem:[%s5699_s2 + $0xb68] sm:$0xff] }
  0x5d   : > { %3123 = vmatprep.subr.bf16.mxu1 %v3122_v9  ;;  %v3142_v9 = vpack.c.bf16 %v661_v2, %v649_v1  ;;  %v756_v62 = vld [vmem:[%s5699_s2 + $0xb10] sm:$0xff]  ;;  %v779_v0 = vld [vmem:[%s5699_s2 + $0xbc8] sm:$0xff]  ;;  %v769_v1 = vld [vmem:[%s5699_s2 + $0xb78] sm:$0xff] }
  0x5e   : > { %v781_v2 = vld [vmem:[%s5699_s2 + $0xbd8] sm:$0xff] }
  0x5f   : > { %3061 = vmatpush1.bf16.msra.mxu0 %v3060_v17  ;;  %v3080_v17 = vpack.c.bf16 %v658_v7, %v646_v6  ;;  %v766_v6 = vld [vmem:[%s5699_s2 + $0xb60] sm:$0xff] }
  0x60   : > { %3125 = vmatpush1.bf16.msra.mxu1 %v3124_v18  ;;  %3063 = vmatprep.subr.bf16.mxu0 %v3062_v19  ;;  %v3144_v18 = vpack.c.bf16 %v660_v10, %v648_v8  ;;  %v3082_v19 = vpack.c.bf16 %v683_v12, %v671_v11  ;;  %v778_v7 = vld [vmem:[%s5699_s2 + $0xbc0] sm:$0xff]  ;;  %v768_v8 = vld [vmem:[%s5699_s2 + $0xb70] sm:$0xff]  ;;  %v411_v11 = vld [vmem:[%s5699_s2 + $0x48] sm:$0xff] }
  0x61   : > { %3127 = vmatprep.subr.bf16.mxu1 %v3126_v23  ;;  %v3146_v23 = vpack.c.bf16 %v685_v14, %v673_v13  ;;  %v780_v10 = vld [vmem:[%s5699_s2 + $0xbd0] sm:$0xff]  ;;  %v423_v12 = vld [vmem:[%s5699_s2 + $0xa8] sm:$0xff]  ;;  %v413_v13 = vld [vmem:[%s5699_s2 + $0x58] sm:$0xff] }
  0x62   : > { %v425_v14 = vld [vmem:[%s5699_s2 + $0xb8] sm:$0xff] }
  0x63   : > { %3065 = vmatpush1.bf16.msra.mxu0 %v3064_v30  ;;  %v3084_v30 = vpack.c.bf16 %v682_v21, %v670_v20  ;;  %v410_v20 = vld [vmem:[%s5699_s2 + $0x40] sm:$0xff] }
  0x64   : > { %3129 = vmatpush1.bf16.msra.mxu1 %v3128_v32  ;;  %3067 = vmatprep.subr.bf16.mxu0 %v3066_v33  ;;  %v3148_v32 = vpack.c.bf16 %v684_v24, %v672_v22  ;;  %v3086_v33 = vpack.c.bf16 %v707_v26, %v695_v25  ;;  %v422_v21 = vld [vmem:[%s5699_s2 + $0xa0] sm:$0xff]  ;;  %v3230_v22 = vpack.c.bf16 %v425_v14, %v413_v13  ;;  %v424_v24 = vld [vmem:[%s5699_s2 + $0xb0] sm:$0xff]  ;;  %v435_v25 = vld [vmem:[%s5699_s2 + $0x108] sm:$0xff] }
  0x65   : > { %3131 = vmatprep.subr.bf16.mxu1 %v3130_v37  ;;  %v3150_v37 = vpack.c.bf16 %v709_v28, %v697_v27  ;;  %v447_v26 = vld [vmem:[%s5699_s2 + $0x168] sm:$0xff]  ;;  %v437_v27 = vld [vmem:[%s5699_s2 + $0x118] sm:$0xff]  ;;  %v530_v14 = vld [vmem:[%s5699_s2 + $0x400] sm:$0xff] }
  0x66   : > { %v449_v28 = vld [vmem:[%s5699_s2 + $0x178] sm:$0xff] }
  0x67   : > { %3069 = vmatpush1.bf16.msra.mxu0 %v3068_v43  ;;  %v3088_v43 = vpack.c.bf16 %v706_v35, %v694_v34  ;;  %v446_v34 = vld [vmem:[%s5699_s2 + $0x160] sm:$0xff]  ;;  %v436_v35 = vld [vmem:[%s5699_s2 + $0x110] sm:$0xff] }
  0x68   : > { %3133 = vmatpush1.bf16.msra.mxu1 %v3132_v44  ;;  %3071 = vmatprep.subr.bf16.mxu0 %v3070_v45  ;;  %v3152_v44 = vpack.c.bf16 %v708_v38, %v696_v36  ;;  %v3090_v45 = vpack.c.bf16 %v731_v40, %v719_v39  ;;  %v3170_v36 = vpack.c.bf16 %v447_v26, %v435_v25  ;;  %v448_v38 = vld [vmem:[%s5699_s2 + $0x170] sm:$0xff]  ;;  %v459_v39 = vld [vmem:[%s5699_s2 + $0x1c8] sm:$0xff] }
  0x69   : > { %3135 = vmatprep.subr.bf16.mxu1 %v3134_v49  ;;  %v3154_v49 = vpack.c.bf16 %v733_v42, %v721_v41  ;;  %v471_v40 = vld [vmem:[%s5699_s2 + $0x228] sm:$0xff]  ;;  %v461_v41 = vld [vmem:[%s5699_s2 + $0x1d8] sm:$0xff] }
  0x6a   : > { %v473_v42 = vld [vmem:[%s5699_s2 + $0x238] sm:$0xff] }
  0x6b   : > { %3073 = vmatpush1.bf16.msra.mxu0 %v3072_v55  ;;  %v3092_v55 = vpack.c.bf16 %v730_v47, %v718_v46  ;;  %v458_v46 = vld [vmem:[%s5699_s2 + $0x1c0] sm:$0xff] }
  0x6c   : > { %3137 = vmatpush1.bf16.msra.mxu1 %v3136_v56  ;;  %3075 = vmatprep.subr.bf16.mxu0 %v3074_v57  ;;  %v3156_v56 = vpack.c.bf16 %v732_v50, %v720_v48  ;;  %v3094_v57 = vpack.c.bf16 %v755_v52, %v743_v51  ;;  %v470_v47 = vld [vmem:[%s5699_s2 + $0x220] sm:$0xff]  ;;  %v460_v48 = vld [vmem:[%s5699_s2 + $0x1d0] sm:$0xff]  ;;  %v483_v50 = vld [vmem:[%s5699_s2 + $0x288] sm:$0xff] }
  0x6d   : > { %3139 = vmatprep.subr.bf16.mxu1 %v3138_v61  ;;  %v3158_v61 = vpack.c.bf16 %v757_v54, %v745_v53  ;;  %v495_v51 = vld [vmem:[%s5699_s2 + $0x2e8] sm:$0xff]  ;;  %v485_v52 = vld [vmem:[%s5699_s2 + $0x298] sm:$0xff]  ;;  %v3176_v54 = vpack.c.bf16 %v470_v47, %v458_v46  ;;  %v592_v46 = vld [vmem:[%s5699_s2 + $0x5f0] sm:$0xff] }
  0x6e   : > { %v497_v53 = vld [vmem:[%s5699_s2 + $0x2f8] sm:$0xff]  ;;  %v603_v47 = vld [vmem:[%s5699_s2 + $0x648] sm:$0xff] }
  0x6f   : > { %3077 = vmatpush1.bf16.msra.mxu0 %v3076_v3  ;;  %v3096_v3 = vpack.c.bf16 %v754_v59, %v742_v58  ;;  %v484_v58 = vld [vmem:[%s5699_s2 + $0x290] sm:$0xff]  ;;  %v3242_v59 = vpack.c.bf16 %v497_v53, %v485_v52  ;;  %v602_v53 = vld [vmem:[%s5699_s2 + $0x640] sm:$0xff] }
  0x70   : > { %3141 = vmatpush1.bf16.msra.mxu1 %v3140_v4  ;;  %3079 = vmatprep.subr.bf16.mxu0 %v3078_v5  ;;  %v3160_v4 = vpack.c.bf16 %v756_v62, %v744_v60  ;;  %v3098_v5 = vpack.c.bf16 %v779_v0, %v767_v63  ;;  %v507_v60 = vld [vmem:[%s5699_s2 + $0x348] sm:$0xff]  ;;  %v509_v62 = vld [vmem:[%s5699_s2 + $0x358] sm:$0xff] }
  0x71   : > { %3143 = vmatprep.subr.bf16.mxu1 %v3142_v9  ;;  %v3162_v9 = vpack.c.bf16 %v781_v2, %v769_v1  ;;  %v521_v63 = vld [vmem:[%s5699_s2 + $0x3b8] sm:$0xff] }
  0x73   : > { %3081 = vmatpush1.bf16.msra.mxu0 %v3080_v17  ;;  %v3100_v17 = vpack.c.bf16 %v778_v7, %v766_v6  ;;  %v520_v6 = vld [vmem:[%s5699_s2 + $0x3b0] sm:$0xff]  ;;  %v531_v7 = vld [vmem:[%s5699_s2 + $0x408] sm:$0xff] }
  0x74   : > { %3145 = vmatpush1.bf16.msra.mxu1 %v3144_v18  ;;  %3083 = vmatprep.subr.bf16.mxu0 %v3082_v19  ;;  %v3164_v18 = vpack.c.bf16 %v780_v10, %v768_v8  ;;  %v3166_v19 = vpack.c.bf16 %v423_v12, %v411_v11  ;;  %v543_v8 = vld [vmem:[%s5699_s2 + $0x468] sm:$0xff]  ;;  %v545_v10 = vld [vmem:[%s5699_s2 + $0x478] sm:$0xff] }
  0x75   : > { %3147 = vmatprep.subr.bf16.mxu1 %v3146_v23  ;;  %v412_v23 = vld [vmem:[%s5699_s2 + $0x50] sm:$0xff]  ;;  %v3186_v13 = vpack.c.bf16 %v543_v8, %v531_v7 }
  0x77   : > { %3085 = vmatpush1.bf16.msra.mxu0 %v3084_v30  ;;  %v3168_v30 = vpack.c.bf16 %v422_v21, %v410_v20  ;;  %v544_v20 = vld [vmem:[%s5699_s2 + $0x470] sm:$0xff]  ;;  %v555_v21 = vld [vmem:[%s5699_s2 + $0x4c8] sm:$0xff] }
  0x78   : > { %3149 = vmatpush1.bf16.msra.mxu1 %v3148_v32  ;;  %3087 = vmatprep.subr.bf16.mxu0 %v3086_v33  ;;  %v3232_v32 = vpack.c.bf16 %v424_v24, %v412_v23  ;;  %v434_v33 = vld [vmem:[%s5699_s2 + $0x100] sm:$0xff]  ;;  %v557_v23 = vld [vmem:[%s5699_s2 + $0x4d8] sm:$0xff] }
  0x79   : > { %3151 = vmatprep.subr.bf16.mxu1 %v3150_v37  ;;  %v3234_v37 = vpack.c.bf16 %v449_v28, %v437_v27  ;;  %v569_v24 = vld [vmem:[%s5699_s2 + $0x538] sm:$0xff]  ;;  %v554_v28 = vld [vmem:[%s5699_s2 + $0x4c0] sm:$0xff] }
  0x7b   : > { %3089 = vmatpush1.bf16.msra.mxu0 %v3088_v43  ;;  %v3172_v43 = vpack.c.bf16 %v446_v34, %v434_v33  ;;  %v3254_v33 = vpack.c.bf16 %v569_v24, %v557_v23  ;;  %v568_v34 = vld [vmem:[%s5699_s2 + $0x530] sm:$0xff]  ;;  %v674_v24 = vld [vmem:[%s5699_s2 + $0x880] sm:$0xff] }
  0x7c   : > { %3153 = vmatpush1.bf16.msra.mxu1 %v3152_v44  ;;  %3091 = vmatprep.subr.bf16.mxu0 %v3090_v45  ;;  %v3236_v44 = vpack.c.bf16 %v448_v38, %v436_v35  ;;  %v3174_v45 = vpack.c.bf16 %v471_v40, %v459_v39  ;;  %v579_v35 = vld [vmem:[%s5699_s2 + $0x588] sm:$0xff]  ;;  %v593_v38 = vld [vmem:[%s5699_s2 + $0x5f8] sm:$0xff] }
  0x7d   : > { %3155 = vmatprep.subr.bf16.mxu1 %v3154_v49  ;;  %v472_v49 = vld [vmem:[%s5699_s2 + $0x230] sm:$0xff] }
  0x7f   : > { %3093 = vmatpush1.bf16.msra.mxu0 %v3092_v55  ;;  %v3240_v55 = vpack.c.bf16 %v472_v49, %v460_v48  ;;  %v615_v48 = vld [vmem:[%s5699_s2 + $0x6a8] sm:$0xff]  ;;  %v617_v49 = vld [vmem:[%s5699_s2 + $0x6b8] sm:$0xff] }
  0x80   : > { %3157 = vmatpush1.bf16.msra.mxu1 %v3156_v56  ;;  %3095 = vmatprep.subr.bf16.mxu0 %v3094_v57  ;;  %v3178_v56 = vpack.c.bf16 %v495_v51, %v483_v50  ;;  %v494_v57 = vld [vmem:[%s5699_s2 + $0x2e0] sm:$0xff]  ;;  %v3198_v52 = vpack.c.bf16 %v615_v48, %v603_v47 }
  0x81   : > { %3159 = vmatprep.subr.bf16.mxu1 %v3158_v61  ;;  %v519_v61 = vld [vmem:[%s5699_s2 + $0x3a8] sm:$0xff] }
  0x82   : > { %v3182_v2 = vpack.c.bf16 %v519_v61, %v507_v60 }
  0x83   : > { %3097 = vmatpush1.bf16.msra.mxu0 %v3096_v3  ;;  %v506_v3 = vld [vmem:[%s5699_s2 + $0x340] sm:$0xff] }
  0x84   : > { %3161 = vmatpush1.bf16.msra.mxu1 %v3160_v4  ;;  %3099 = vmatprep.subr.bf16.mxu0 %v3098_v5  ;;  %v518_v4 = vld [vmem:[%s5699_s2 + $0x3a0] sm:$0xff]  ;;  %v508_v5 = vld [vmem:[%s5699_s2 + $0x350] sm:$0xff] }
  0x85   : > { %3163 = vmatprep.subr.bf16.mxu1 %v3162_v9  ;;  %v533_v9 = vld [vmem:[%s5699_s2 + $0x418] sm:$0xff]  ;;  %v3184_v11 = vpack.c.bf16 %v518_v4, %v506_v3  ;;  %v3248_v12 = vpack.c.bf16 %v520_v6, %v508_v5  ;;  %v640_v3 = vld [vmem:[%s5699_s2 + $0x770] sm:$0xff]  ;;  %v651_v4 = vld [vmem:[%s5699_s2 + $0x7c8] sm:$0xff] }
  0x86   : > { %v663_v5 = vld [vmem:[%s5699_s2 + $0x828] sm:$0xff]  ;;  %v665_v6 = vld [vmem:[%s5699_s2 + $0x838] sm:$0xff] }
  0x87   : > { %3101 = vmatpush1.bf16.msra.mxu0 %v3100_v17  ;;  %v542_v17 = vld [vmem:[%s5699_s2 + $0x460] sm:$0xff] }
  0x88   : > { %3165 = vmatpush1.bf16.msra.mxu1 %v3164_v18  ;;  %3167 = vmatprep.subr.bf16.mxu0 %v3166_v19  ;;  %v532_v18 = vld [vmem:[%s5699_s2 + $0x410] sm:$0xff]  ;;  %v3250_v19 = vpack.c.bf16 %v545_v10, %v533_v9  ;;  %v3188_v25 = vpack.c.bf16 %v542_v17, %v530_v14  ;;  %v3206_v9 = vpack.c.bf16 %v663_v5, %v651_v4  ;;  %v650_v10 = vld [vmem:[%s5699_s2 + $0x7c0] sm:$0xff]  ;;  %v675_v17 = vld [vmem:[%s5699_s2 + $0x888] sm:$0xff] }
  0x89   : > { %3231 = vmatprep.subr.bf16.mxu1 %v3230_v22  ;;  %v567_v22 = vld [vmem:[%s5699_s2 + $0x528] sm:$0xff]  ;;  %v3252_v26 = vpack.c.bf16 %v544_v20, %v532_v18  ;;  %v664_v14 = vld [vmem:[%s5699_s2 + $0x830] sm:$0xff]  ;;  %v689_v20 = vld [vmem:[%s5699_s2 + $0x8f8] sm:$0xff] }
  0x8a   : > { %1069 = vmatmul.mubr.f32.vlgmr.msra.gmra.mrb[4].mxu0 %v4187_v15  ;;  %v3190_v27 = vpack.c.bf16 %v567_v22, %v555_v21  ;;  %v687_v18 = vld [vmem:[%s5699_s2 + $0x8e8] sm:$0xff] }
  0x8b   : > { %1146 = vmatmul.mubr.f32.vlgmr.msra.gmra.mrb[4].mxu1 %v4187_v15  ;;  %3169 = vmatpush1.bf16.msra.mxu0 %v3168_v30  ;;  %v3238_v15 = vpack.c.bf16 %v473_v42, %v461_v41  ;;  %v566_v30 = vld [vmem:[%s5699_s2 + $0x520] sm:$0xff]  ;;  %v3210_v23 = vpack.c.bf16 %v687_v18, %v675_v17 }
  0x8c   : > { %3233 = vmatpush1.bf16.msra.mxu1 %v3232_v32  ;;  %1074 = vmatprep.mubr.f32.mxu0 %v4215_v29  ;;  %v556_v32 = vld [vmem:[%s5699_s2 + $0x4d0] sm:$0xff]  ;;  %v3192_v39 = vpack.c.bf16 %v566_v30, %v554_v28  ;;  %v578_v42 = vld [vmem:[%s5699_s2 + $0x580] sm:$0xff]  ;;  %v699_v30 = vld [vmem:[%s5699_s2 + $0x948] sm:$0xff] }
  0x8d   : > { %3171 = vmatprep.subr.bf16.mxu0 %v3170_v36  ;;  %3235 = vmatprep.subr.bf16.mxu1 %v3234_v37  ;;  %v591_v36 = vld [vmem:[%s5699_s2 + $0x5e8] sm:$0xff]  ;;  %v581_v37 = vld [vmem:[%s5699_s2 + $0x598] sm:$0xff]  ;;  %v3256_v40 = vpack.c.bf16 %v568_v34, %v556_v32  ;;  %v688_v28 = vld [vmem:[%s5699_s2 + $0x8f0] sm:$0xff] }
  0x8e   : > { %1075 = vmatmul.mubr.f32.gmra.mrb[6].mxu0 %v4219_v31  ;;  %1151 = vmatprep.mubr.f32.mxu1 %v4215_v29  ;;  %v482_v29 = vld [vmem:[%s5699_s2 + $0x280] sm:$0xff]  ;;  %v3194_v41 = vpack.c.bf16 %v591_v36, %v579_v35  ;;  %v711_v32 = vld [vmem:[%s5699_s2 + $0x9a8] sm:$0xff]  ;;  %v713_v34 = vld [vmem:[%s5699_s2 + $0x9b8] sm:$0xff] }
  0x8f   : > { %3173 = vmatpush1.bf16.msra.mxu0 %v3172_v43  ;;  %1152 = vmatmul.mubr.f32.gmra.mrb[6].mxu1 %v4219_v31  ;;  %v496_v31 = vld [vmem:[%s5699_s2 + $0x2f0] sm:$0xff]  ;;  %v3180_v0 = vpack.c.bf16 %v494_v57, %v482_v29  ;;  %v590_v43 = vld [vmem:[%s5699_s2 + $0x5e0] sm:$0xff]  ;;  %v627_v57 = vld [vmem:[%s5699_s2 + $0x708] sm:$0xff] }
  0x90   : > { %3237 = vmatpush1.bf16.msra.mxu1 %v3236_v44  ;;  %3175 = vmatprep.subr.bf16.mxu0 %v3174_v45  ;;  %v3244_v1 = vpack.c.bf16 %v496_v31, %v484_v58  ;;  %v580_v44 = vld [vmem:[%s5699_s2 + $0x590] sm:$0xff]  ;;  %v3258_v45 = vpack.c.bf16 %v593_v38, %v581_v37  ;;  %v3196_v50 = vpack.c.bf16 %v590_v43, %v578_v42  ;;  %v639_v58 = vld [vmem:[%s5699_s2 + $0x768] sm:$0xff]  ;;  %v641_v31 = vld [vmem:[%s5699_s2 + $0x778] sm:$0xff] }
  0x91   : > { %3239 = vmatprep.subr.bf16.mxu1 %v3238_v15  ;;  %1222 = vmatprep.mubr.f32.mxu0 %v4056_v16  ;;  %v605_v15 = vld [vmem:[%s5699_s2 + $0x658] sm:$0xff]  ;;  %v3260_v51 = vpack.c.bf16 %v592_v46, %v580_v44  ;;  %v616_v29 = vld [vmem:[%s5699_s2 + $0x6b0] sm:$0xff]  ;;  %v3214_v37 = vpack.c.bf16 %v711_v32, %v699_v30  ;;  %v698_v38 = vld [vmem:[%s5699_s2 + $0x940] sm:$0xff] }
  0x92   : > { %1299 = vmatprep.mubr.f32.mxu1 %v4056_v16  ;;  %v3246_v16 = vpack.c.bf16 %v521_v63, %v509_v62  ;;  %v3202_v62 = vpack.c.bf16 %v639_v58, %v627_v57  ;;  %v626_v63 = vld [vmem:[%s5699_s2 + $0x700] sm:$0xff]  ;;  %v712_v42 = vld [vmem:[%s5699_s2 + $0x9b0] sm:$0xff]  ;;  %v723_v43 = vld [vmem:[%s5699_s2 + $0xa08] sm:$0xff] }
  0x93   : > { %3177 = vmatpush1.bf16.msra.mxu0 %v3176_v54  ;;  %v614_v54 = vld [vmem:[%s5699_s2 + $0x6a0] sm:$0xff]  ;;  %v735_v44 = vld [vmem:[%s5699_s2 + $0xa68] sm:$0xff]  ;;  %v737_v46 = vld [vmem:[%s5699_s2 + $0xa78] sm:$0xff] }
  0x94   : > { %3241 = vmatpush1.bf16.msra.mxu1 %v3240_v55  ;;  %3179 = vmatprep.subr.bf16.mxu0 %v3178_v56  ;;  %v604_v55 = vld [vmem:[%s5699_s2 + $0x650] sm:$0xff]  ;;  %v3262_v56 = vpack.c.bf16 %v617_v49, %v605_v15  ;;  %v3200_v60 = vpack.c.bf16 %v614_v54, %v602_v53  ;;  %v3218_v15 = vpack.c.bf16 %v735_v44, %v723_v43  ;;  %v722_v49 = vld [vmem:[%s5699_s2 + $0xa00] sm:$0xff]  ;;  %v747_v54 = vld [vmem:[%s5699_s2 + $0xac8] sm:$0xff] }
  0x95   : > { %3243 = vmatprep.subr.bf16.mxu1 %v3242_v59  ;;  %v629_v59 = vld [vmem:[%s5699_s2 + $0x718] sm:$0xff]  ;;  %v3264_v61 = vpack.c.bf16 %v616_v29, %v604_v55  ;;  %v736_v53 = vld [vmem:[%s5699_s2 + $0xa70] sm:$0xff]  ;;  %v759_v55 = vld [vmem:[%s5699_s2 + $0xb28] sm:$0xff] }
  0x96   : > { %v761_v29 = vld [vmem:[%s5699_s2 + $0xb38] sm:$0xff]  ;;  %v1532_v43 = vld [vmem:[%s5701_s4 + $0x1a0] sm:$0xff]  ;;  %v1533_v44 = vld [vmem:[%s5701_s4 + $0x1a8] sm:$0xff] }
  0x97   : > { %3181 = vmatpush1.bf16.msra.mxu0 %v3180_v0  ;;  %v638_v0 = vld [vmem:[%s5699_s2 + $0x760] sm:$0xff] }
  0x98   : > { %3245 = vmatpush1.bf16.msra.mxu1 %v3244_v1  ;;  %3183 = vmatprep.subr.bf16.mxu0 %v3182_v2  ;;  %v628_v1 = vld [vmem:[%s5699_s2 + $0x710] sm:$0xff]  ;;  %v3266_v2 = vpack.c.bf16 %v641_v31, %v629_v59  ;;  %v3204_v7 = vpack.c.bf16 %v638_v0, %v626_v63  ;;  %v3222_v59 = vpack.c.bf16 %v759_v55, %v747_v54  ;;  %v746_v31 = vld [vmem:[%s5699_s2 + $0xac0] sm:$0xff]  ;;  %v771_v0 = vld [vmem:[%s5699_s2 + $0xb88] sm:$0xff] }
  0x99   : > { %3247 = vmatprep.subr.bf16.mxu1 %v3246_v16  ;;  %v653_v16 = vld [vmem:[%s5699_s2 + $0x7d8] sm:$0xff]  ;;  %v3268_v8 = vpack.c.bf16 %v640_v3, %v628_v1  ;;  %v760_v63 = vld [vmem:[%s5699_s2 + $0xb30] sm:$0xff]  ;;  %v783_v1 = vld [vmem:[%s5699_s2 + $0xbe8] sm:$0xff] }
  0x9a   : > { %v785_v3 = vld [vmem:[%s5699_s2 + $0xbf8] sm:$0xff]  ;;  %v1534_v55 = vld [vmem:[%s5701_s4 + $0x1b0] sm:$0xff] }
  0x9b   : > { %3185 = vmatpush1.bf16.msra.mxu0 %v3184_v11  ;;  %v662_v11 = vld [vmem:[%s5699_s2 + $0x820] sm:$0xff]  ;;  %v1503_v54 = vld [vmem:[%s5701_s4 + $0xb8] sm:$0xff] }
  0x9c   : > { %3249 = vmatpush1.bf16.msra.mxu1 %v3248_v12  ;;  %3187 = vmatprep.subr.bf16.mxu0 %v3186_v13  ;;  %v652_v12 = vld [vmem:[%s5699_s2 + $0x7d0] sm:$0xff]  ;;  %v3270_v13 = vpack.c.bf16 %v665_v6, %v653_v16  ;;  %v3208_v21 = vpack.c.bf16 %v662_v11, %v650_v10  ;;  %v3226_v16 = vpack.c.bf16 %v783_v1, %v771_v0  ;;  %v770_v6 = vld [vmem:[%s5699_s2 + $0xb80] sm:$0xff]  ;;  %v1505_v0 = vld [vmem:[%s5701_s4 + $0xc8] sm:$0xff] }
  0x9d   : > { %3251 = vmatprep.subr.bf16.mxu1 %v3250_v19  ;;  %v677_v19 = vld [vmem:[%s5699_s2 + $0x898] sm:$0xff]  ;;  %v3272_v22 = vpack.c.bf16 %v664_v14, %v652_v12  ;;  %v784_v10 = vld [vmem:[%s5699_s2 + $0xbf0] sm:$0xff]  ;;  %v1496_v11 = vld [vmem:[%s5701_s4 + $0x80] sm:$0xff] }
  0x9e   : > { %v1497_v12 = vld [vmem:[%s5701_s4 + $0x88] sm:$0xff]  ;;  %v1536_v1 = vld [vmem:[%s5701_s4 + $0x1c0] sm:$0xff] }
  0x9f   : > { %3189 = vmatpush1.bf16.msra.mxu0 %v3188_v25  ;;  %v686_v25 = vld [vmem:[%s5699_s2 + $0x8e0] sm:$0xff]  ;;  %v1529_v14 = vld [vmem:[%s5701_s4 + $0x188] sm:$0xff] }
  0xa0   : > { %3253 = vmatpush1.bf16.msra.mxu1 %v3252_v26  ;;  %3191 = vmatprep.subr.bf16.mxu0 %v3190_v27  ;;  %v676_v26 = vld [vmem:[%s5699_s2 + $0x890] sm:$0xff]  ;;  %v3274_v27 = vpack.c.bf16 %v689_v20, %v677_v19  ;;  %v3212_v35 = vpack.c.bf16 %v686_v25, %v674_v24  ;;  %v3294_v19 = vpack.c.bf16 %v1497_v12, %v1496_v11  ;;  %v1513_v24 = vld [vmem:[%s5701_s4 + $0x108] sm:$0xff]  ;;  %v1507_v11 = vld [vmem:[%s5701_s4 + $0xd8] sm:$0xff] }
  0xa1   : > { %3255 = vmatprep.subr.bf16.mxu1 %v3254_v33  ;;  %v701_v33 = vld [vmem:[%s5699_s2 + $0x958] sm:$0xff]  ;;  %v3276_v36 = vpack.c.bf16 %v688_v28, %v676_v26  ;;  %v1498_v25 = vld [vmem:[%s5701_s4 + $0x90] sm:$0xff] }
  0xa2   : > { %v1499_v26 = vld [vmem:[%s5701_s4 + $0x98] sm:$0xff]  ;;  %v1538_v12 = vld [vmem:[%s5701_s4 + $0x1d0] sm:$0xff] }
  0xa3   : > { %3193 = vmatpush1.bf16.msra.mxu0 %v3192_v39  ;;  %v710_v39 = vld [vmem:[%s5699_s2 + $0x9a0] sm:$0xff]  ;;  %v1531_v28 = vld [vmem:[%s5701_s4 + $0x198] sm:$0xff] }
  0xa4   : > { %3257 = vmatpush1.bf16.msra.mxu1 %v3256_v40  ;;  %3195 = vmatprep.subr.bf16.mxu0 %v3194_v41  ;;  %v700_v40 = vld [vmem:[%s5699_s2 + $0x950] sm:$0xff]  ;;  %v3278_v41 = vpack.c.bf16 %v713_v34, %v701_v33  ;;  %v3216_v47 = vpack.c.bf16 %v710_v39, %v698_v38  ;;  %v3298_v33 = vpack.c.bf16 %v1499_v26, %v1498_v25  ;;  %v1515_v39 = vld [vmem:[%s5701_s4 + $0x118] sm:$0xff]  ;;  %v1509_v25 = vld [vmem:[%s5701_s4 + $0xe8] sm:$0xff] }
  0xa5   : > { %3259 = vmatprep.subr.bf16.mxu1 %v3258_v45  ;;  %v725_v45 = vld [vmem:[%s5699_s2 + $0xa18] sm:$0xff]  ;;  %v3280_v48 = vpack.c.bf16 %v712_v42, %v700_v40  ;;  %v1482_v34 = vld [vmem:[%s5701_s4 + $0x10] sm:$0xff]  ;;  %v1500_v40 = vld [vmem:[%s5701_s4 + $0xa0] sm:$0xff] }
  0xa6   : > { %v3650_v42 = vld [vmem:[%s4035_s14 + $0x18] sm:$0xff]  ;;  %v1540_v26 = vld [vmem:[%s5701_s4 + $0x1e0] sm:$0xff] }
  0xa7   : > { %3197 = vmatpush1.bf16.msra.mxu0 %v3196_v50  ;;  %v734_v50 = vld [vmem:[%s5699_s2 + $0xa60] sm:$0xff] }
  0xa8   : > { %3261 = vmatpush1.bf16.msra.mxu1 %v3260_v51  ;;  %3199 = vmatprep.subr.bf16.mxu0 %v3198_v52  ;;  %v724_v51 = vld [vmem:[%s5699_s2 + $0xa10] sm:$0xff]  ;;  %v3282_v52 = vpack.c.bf16 %v737_v46, %v725_v45  ;;  %v3220_v57 = vpack.c.bf16 %v734_v50, %v722_v49  ;;  %v1516_v49 = vld [vmem:[%s5701_s4 + $0x120] sm:$0xff] }
  0xa9   : > { %3263 = vmatprep.subr.bf16.mxu1 %v3262_v56  ;;  %v749_v56 = vld [vmem:[%s5699_s2 + $0xad8] sm:$0xff]  ;;  %v3284_v58 = vpack.c.bf16 %v736_v53, %v724_v51  ;;  %v3651_v50 = vld [vmem:[%s4035_s14 + $0x10] sm:$0xff]  ;;  %v3334_v51 = vpack.c.bf16 %v1533_v44, %v1532_v43 }
  0xaa   : > { %v1502_v53 = vld [vmem:[%s5701_s4 + $0xb0] sm:$0xff] }
  0xab   : > { %3201 = vmatpush1.bf16.msra.mxu0 %v3200_v60  ;;  %v758_v60 = vld [vmem:[%s5699_s2 + $0xb20] sm:$0xff] }
  0xac   : > { %3265 = vmatpush1.bf16.msra.mxu1 %v3264_v61  ;;  %3203 = vmatprep.subr.bf16.mxu0 %v3202_v62  ;;  %v748_v61 = vld [vmem:[%s5699_s2 + $0xad0] sm:$0xff]  ;;  %v3286_v62 = vpack.c.bf16 %v761_v29, %v749_v56  ;;  %v3224_v4 = vpack.c.bf16 %v758_v60, %v746_v31  ;;  %v1535_v56 = vld [vmem:[%s5701_s4 + $0x1b8] sm:$0xff] }
  0xad   : > { %3267 = vmatprep.subr.bf16.mxu1 %v3266_v2  ;;  %v773_v2 = vld [vmem:[%s5699_s2 + $0xb98] sm:$0xff]  ;;  %v3288_v5 = vpack.c.bf16 %v760_v63, %v748_v61  ;;  %v1518_v60 = vld [vmem:[%s5701_s4 + $0x130] sm:$0xff]  ;;  %v3338_v61 = vpack.c.bf16 %v1535_v56, %v1534_v55  ;;  %v1504_v63 = vld [vmem:[%s5701_s4 + $0xc0] sm:$0xff] }
  0xae   : > { %v1487_v31 = vld [vmem:[%s5701_s4 + $0x38] sm:$0xff] }
  0xaf   : > { %3205 = vmatpush1.bf16.msra.mxu0 %v3204_v7  ;;  %v782_v7 = vld [vmem:[%s5699_s2 + $0xbe0] sm:$0xff] }
  0xb0   : > { %3269 = vmatpush1.bf16.msra.mxu1 %v3268_v8  ;;  %3207 = vmatprep.subr.bf16.mxu0 %v3206_v9  ;;  %v772_v8 = vld [vmem:[%s5699_s2 + $0xb90] sm:$0xff]  ;;  %v3290_v9 = vpack.c.bf16 %v785_v3, %v773_v2  ;;  %v3228_v17 = vpack.c.bf16 %v782_v7, %v770_v6  ;;  %v1537_v2 = vld [vmem:[%s5701_s4 + $0x1c8] sm:$0xff]  ;;  %v1520_v7 = vld [vmem:[%s5701_s4 + $0x140] sm:$0xff] }
  0xb1   : > { %3271 = vmatprep.subr.bf16.mxu1 %v3270_v13  ;;  %v1528_v13 = vld [vmem:[%s5701_s4 + $0x180] sm:$0xff]  ;;  %v3292_v18 = vpack.c.bf16 %v784_v10, %v772_v8  ;;  %v1489_v6 = vld [vmem:[%s5701_s4 + $0x48] sm:$0xff]  ;;  %v3342_v8 = vpack.c.bf16 %v1537_v2, %v1536_v1  ;;  %v1506_v10 = vld [vmem:[%s5701_s4 + $0xd0] sm:$0xff] }
  0xb2   : > { %v3326_v20 = vpack.c.bf16 %v1529_v14, %v1528_v13  ;;  %v1539_v13 = vld [vmem:[%s5701_s4 + $0x1d8] sm:$0xff] }
  0xb3   : > { %3209 = vmatpush1.bf16.msra.mxu0 %v3208_v21  ;;  %v1480_v21 = vld [vmem:[%s5701_s4] sm:$0xff] }
  0xb4   : > { %3273 = vmatpush1.bf16.msra.mxu1 %v3272_v22  ;;  %3211 = vmatprep.subr.bf16.mxu0 %v3210_v23  ;;  %v1481_v22 = vld [vmem:[%s5701_s4 + $0x8] sm:$0xff]  ;;  %v1512_v23 = vld [vmem:[%s5701_s4 + $0x100] sm:$0xff] }
  0xb5   : > { %3275 = vmatprep.subr.bf16.mxu1 %v3274_v27  ;;  %v1530_v27 = vld [vmem:[%s5701_s4 + $0x190] sm:$0xff]  ;;  %v3296_v30 = vpack.c.bf16 %v1481_v22, %v1480_v21  ;;  %v3328_v32 = vpack.c.bf16 %v1513_v24, %v1512_v23  ;;  %v3346_v22 = vpack.c.bf16 %v1539_v13, %v1538_v12  ;;  %v1523_v23 = vld [vmem:[%s5701_s4 + $0x158] sm:$0xff]  ;;  %v1508_v24 = vld [vmem:[%s5701_s4 + $0xe0] sm:$0xff] }
  0xb6   : > { %v3330_v38 = vpack.c.bf16 %v1531_v28, %v1530_v27  ;;  %v1522_v21 = vld [vmem:[%s5701_s4 + $0x150] sm:$0xff]  ;;  %v1541_v27 = vld [vmem:[%s5701_s4 + $0x1e8] sm:$0xff] }
  0xb7   : > { %3213 = vmatpush1.bf16.msra.mxu0 %v3212_v35  ;;  %v1483_v35 = vld [vmem:[%s5701_s4 + $0x18] sm:$0xff] }
  0xb8   : > { %3277 = vmatpush1.bf16.msra.mxu1 %v3276_v36  ;;  %3215 = vmatprep.subr.bf16.mxu0 %v3214_v37  ;;  %v1514_v36 = vld [vmem:[%s5701_s4 + $0x110] sm:$0xff]  ;;  %v3649_v37 = vld [vmem:[%s4035_s14] sm:$0xff]  ;;  %v3300_v45 = vpack.c.bf16 %v1483_v35, %v1482_v34  ;;  %v1493_v34 = vld [vmem:[%s5701_s4 + $0x68] sm:$0xff] }
  0xb9   : > { %3279 = vmatprep.subr.bf16.mxu1 %v3278_v41  ;;  %v1501_v41 = vld [vmem:[%s5701_s4 + $0xa8] sm:$0xff]  ;;  %v3332_v46 = vpack.c.bf16 %v1515_v39, %v1514_v36  ;;  %v1524_v35 = vld [vmem:[%s5701_s4 + $0x160] sm:$0xff]  ;;  %v3350_v36 = vpack.c.bf16 %v1541_v27, %v1540_v26  ;;  %v1511_v39 = vld [vmem:[%s5701_s4 + $0xf8] sm:$0xff] }
  0xbb   : > { %3217 = vmatpush1.bf16.msra.mxu0 %v3216_v47  ;;  %v3302_v47 = vpack.c.bf16 %v1501_v41, %v1500_v40  ;;  %v1542_v40 = vld [vmem:[%s5701_s4 + $0x1f0] sm:$0xff]  ;;  %v1543_v41 = vld [vmem:[%s5701_s4 + $0x1f8] sm:$0xff] }
  0xbc   : > { %3281 = vmatpush1.bf16.msra.mxu1 %v3280_v48  ;;  %3219 = vmatprep.subr.bf16.mxu0 %v3218_v15  ;;  %v1484_v48 = vld [vmem:[%s5701_s4 + $0x20] sm:$0xff]  ;;  %v1485_v15 = vld [vmem:[%s5701_s4 + $0x28] sm:$0xff] }
  0xbd   : > { %3283 = vmatprep.subr.bf16.mxu1 %v3282_v52  ;;  %v1517_v52 = vld [vmem:[%s5701_s4 + $0x128] sm:$0xff]  ;;  %v3304_v29 = vpack.c.bf16 %v1485_v15, %v1484_v48  ;;  %v3354_v48 = vpack.c.bf16 %v1543_v41, %v1542_v40  ;;  %v1527_v15 = vld [vmem:[%s5701_s4 + $0x178] sm:$0xff] }
  0xbf   : > { %3221 = vmatpush1.bf16.msra.mxu0 %v3220_v57  ;;  %v3336_v57 = vpack.c.bf16 %v1517_v52, %v1516_v49  ;;  %v1560_v49 = vld [vmem:[%s5701_s4 + $0x280] sm:$0xff]  ;;  %v1593_v52 = vld [vmem:[%s5701_s4 + $0x388] sm:$0xff] }
  0xc0   : > { %3285 = vmatpush1.bf16.msra.mxu1 %v3284_v58  ;;  %3223 = vmatprep.subr.bf16.mxu0 %v3222_v59  ;;  %v3306_v58 = vpack.c.bf16 %v1503_v54, %v1502_v53  ;;  %v1486_v59 = vld [vmem:[%s5701_s4 + $0x30] sm:$0xff] }
  0xc1   : > { %3287 = vmatprep.subr.bf16.mxu1 %v3286_v62  ;;  %v1519_v62 = vld [vmem:[%s5701_s4 + $0x138] sm:$0xff]  ;;  %v3308_v3 = vpack.c.bf16 %v1487_v31, %v1486_v59  ;;  %v5156_v59 = vld [vmem:[%s5700_s3] sm:$0xff] }
  0xc3   : > { %3225 = vmatpush1.bf16.msra.mxu0 %v3224_v4  ;;  %v3340_v4 = vpack.c.bf16 %v1519_v62, %v1518_v60 }
  0xc4   : > { %3289 = vmatpush1.bf16.msra.mxu1 %v3288_v5  ;;  %3227 = vmatprep.subr.bf16.mxu0 %v3226_v16  ;;  %v3310_v5 = vpack.c.bf16 %v1505_v0, %v1504_v63  ;;  %v1488_v16 = vld [vmem:[%s5701_s4 + $0x40] sm:$0xff] }
  0xc5   : > { %3291 = vmatprep.subr.bf16.mxu1 %v3290_v9  ;;  %v1521_v9 = vld [vmem:[%s5701_s4 + $0x148] sm:$0xff]  ;;  %v3312_v14 = vpack.c.bf16 %v1489_v6, %v1488_v16 }
  0xc7   : > { %3229 = vmatpush1.bf16.msra.mxu0 %v3228_v17  ;;  %v3344_v17 = vpack.c.bf16 %v1521_v9, %v1520_v7 }
  0xc8   : > { %3293 = vmatpush1.bf16.msra.mxu1 %v3292_v18  ;;  %3295 = vmatprep.subr.bf16.mxu0 %v3294_v19  ;;  %v3314_v18 = vpack.c.bf16 %v1507_v11, %v1506_v10  ;;  %v1490_v19 = vld [vmem:[%s5701_s4 + $0x50] sm:$0xff] }
  0xc9   : > { %3327 = vmatprep.subr.bf16.mxu1 %v3326_v20  ;;  %v1491_v20 = vld [vmem:[%s5701_s4 + $0x58] sm:$0xff] }
  0xca   : > { %1223 = vmatmul.mubr.f32.vlgmr.msra.gmra.mrb[8].mxu0 %v3649_v37  ;;  %v3316_v28 = vpack.c.bf16 %v1491_v20, %v1490_v19 }
  0xcb   : > { %1300 = vmatmul.mubr.f32.vlgmr.msra.gmra.mrb[8].mxu1 %v3649_v37  ;;  %1228 = vmatprep.mubr.f32.mxu0 %v3650_v42  ;;  %v1525_v37 = vld [vmem:[%s5701_s4 + $0x168] sm:$0xff] }
  0xcc   : > { %1305 = vmatprep.mubr.f32.mxu1 %v3650_v42  ;;  %3297 = vmatpush3.bf16.msra.mxu0 %v3296_v30  ;;  %v3348_v30 = vpack.c.bf16 %v1523_v23, %v1522_v21  ;;  %v3352_v43 = vpack.c.bf16 %v1525_v37, %v1524_v35 }
  0xcd   : > { %3329 = vmatpush3.bf16.msra.mxu1 %v3328_v32  ;;  %3299 = vmatprep.subr.bf16.mxu0 %v3298_v33  ;;  %v3318_v32 = vpack.c.bf16 %v1509_v25, %v1508_v24  ;;  %v1492_v33 = vld [vmem:[%s5701_s4 + $0x60] sm:$0xff] }
  0xce   : > { %1229 = vmatmul.mubr.f32.gmra.mrb[10].mxu0 %v3651_v50  ;;  %3331 = vmatprep.subr.bf16.mxu1 %v3330_v38  ;;  %v1510_v38 = vld [vmem:[%s5701_s4 + $0xf0] sm:$0xff]  ;;  %v3320_v42 = vpack.c.bf16 %v1493_v34, %v1492_v33 }
  0xcf   : > { %1306 = vmatmul.mubr.f32.gmra.mrb[10].mxu1 %v3651_v50  ;;  %v3322_v44 = vpack.c.bf16 %v1511_v39, %v1510_v38  ;;  %v1561_v50 = vld [vmem:[%s5701_s4 + $0x288] sm:$0xff] }
  0xd0   : > { %3301 = vmatpush3.bf16.msra.mxu0 %v3300_v45  ;;  %v1494_v45 = vld [vmem:[%s5701_s4 + $0x70] sm:$0xff]  ;;  %v3358_v55 = vpack.c.bf16 %v1561_v50, %v1560_v49  ;;  %v1577_v49 = vld [vmem:[%s5701_s4 + $0x308] sm:$0xff] }
  0xd1   : > { %3333 = vmatpush3.bf16.msra.mxu1 %v3332_v46  ;;  %3303 = vmatprep.subr.bf16.mxu0 %v3302_v47  ;;  %v1495_v46 = vld [vmem:[%s5701_s4 + $0x78] sm:$0xff]  ;;  %v1526_v47 = vld [vmem:[%s5701_s4 + $0x170] sm:$0xff] }
  0xd2   : > { %3335 = vmatprep.subr.bf16.mxu1 %v3334_v51  ;;  %v1592_v51 = vld [vmem:[%s5701_s4 + $0x380] sm:$0xff]  ;;  %v3324_v53 = vpack.c.bf16 %v1495_v46, %v1494_v45  ;;  %v3356_v54 = vpack.c.bf16 %v1527_v15, %v1526_v47  ;;  %v1545_v47 = vld [vmem:[%s5701_s4 + $0x208] sm:$0xff]  ;;  %v1562_v50 = vld [vmem:[%s5701_s4 + $0x290] sm:$0xff] }
  0xd3   : > { %v3390_v56 = vpack.c.bf16 %v1593_v52, %v1592_v51  ;;  %v1544_v46 = vld [vmem:[%s5701_s4 + $0x200] sm:$0xff]  ;;  %v1563_v52 = vld [vmem:[%s5701_s4 + $0x298] sm:$0xff] }
  0xd4   : > { %3305 = vmatpush3.bf16.msra.mxu0 %v3304_v29  ;;  %v790_v29 = vlaneseq  ;;  %v1576_v15 = vld [vmem:[%s5701_s4 + $0x300] sm:$0xff] }
  0xd5   : > { %3337 = vmatpush3.bf16.msra.mxu1 %v3336_v57  ;;  %3307 = vmatprep.subr.bf16.mxu0 %v3306_v58 }
  0xd6   : > { %3339 = vmatprep.subr.bf16.mxu1 %v3338_v61  ;;  %v5150_v57 = vshrl.u32 %v790_v29, 7  ;;  %v3360_v29 = vpack.c.bf16 %v1545_v47, %v1544_v46  ;;  %v1601_v46 = vld [vmem:[%s5701_s4 + $0x3c8] sm:$0xff] }
  0xd8   : > { %3309 = vmatpush3.bf16.msra.mxu0 %v3308_v3  ;;  %v792_v58 = vsub.s32 0, %v5150_v57  ;;  %v800_v31 = vsub.s32 2, %v5150_v57  ;;  %v796_v60 = vsub.s32 1, %v5150_v57  ;;  %v804_v61 = vsub.s32 3, %v5150_v57 }
  0xd9   : > { %3341 = vmatpush3.bf16.msra.mxu1 %v3340_v4  ;;  %3311 = vmatprep.subr.bf16.mxu0 %v3310_v5 }
  0xda   : > { %3343 = vmatprep.subr.bf16.mxu1 %v3342_v8  ;;  %v793_v62 = vrot.slane %v5156_v59, %v792_v58  ;;  %v801_v63 = vrot.slane %v5156_v59, %v800_v31  ;;  %v797_v0 = vrot.slane %v5156_v59, %v796_v60  ;;  %v805_v1 = vrot.slane %v5156_v59, %v804_v61 }
  0xdc   : > { %3313 = vmatpush3.bf16.msra.mxu0 %v3312_v14 }
  0xdd   : > { %3345 = vmatpush3.bf16.msra.mxu1 %v3344_v17  ;;  %3315 = vmatprep.subr.bf16.mxu0 %v3314_v18 }
  0xde   : > { %3347 = vmatprep.subr.bf16.mxu1 %v3346_v22 }
  0xe0   : > { %3317 = vmatpush3.bf16.msra.mxu0 %v3316_v28 }
  0xe1   : > { %3349 = vmatpush3.bf16.msra.mxu1 %v3348_v30  ;;  %3319 = vmatprep.subr.bf16.mxu0 %v3318_v32 }
  0xe2   : > { %3351 = vmatprep.subr.bf16.mxu1 %v3350_v36 }
  0xe4   : > { %3321 = vmatpush3.bf16.msra.mxu0 %v3320_v42 }
  0xe5   : > { %3353 = vmatpush3.bf16.msra.mxu1 %v3352_v43  ;;  %3323 = vmatprep.subr.bf16.mxu0 %v3322_v44 }
  0xe6   : > { %3355 = vmatprep.subr.bf16.mxu1 %v3354_v48 }
  0xe8   : > { %3325 = vmatpush3.bf16.msra.mxu0 %v3324_v53  ;;  %v1594_v53 = vld [vmem:[%s5701_s4 + $0x390] sm:$0xff] }
  0xe9   : > { %3357 = vmatpush3.bf16.msra.mxu1 %v3356_v54  ;;  %3359 = vmatprep.subr.bf16.mxu0 %v3358_v55  ;;  %v1595_v54 = vld [vmem:[%s5701_s4 + $0x398] sm:$0xff] }
  0xea   : > { %3391 = vmatprep.subr.bf16.mxu1 %v3390_v56 }
 0x11d   : > { %v916_v2 = vpop.f32.mrb[0].mxu0 }
 0x11e   : > { %v5173_v3 = vadd.f32 %v916_v2, %v793_v62  ;;  %v993_v4 = vpop.f32.mrb[0].mxu1  ;;  %v918_v5 = vpop.f32.mrb[1].mxu0  ;;  %v1546_v2 = vld [vmem:[%s5701_s4 + $0x210] sm:$0xff] }
 0x11f   : > { %v5175_v16 = vadd.f32 %v993_v4, %v801_v63  ;;  %v5177_v6 = vadd.f32 %v918_v5, %v797_v0  ;;  %v995_v7 = vpop.f32.mrb[1].mxu1  ;;  %v1547_v4 = vld [vmem:[%s5701_s4 + $0x218] sm:$0xff]  ;;  %v1578_v5 = vld [vmem:[%s5701_s4 + $0x310] sm:$0xff] }
 0x120   : > { %v2574_v8 = vmul.f32 -1.442695, %v5173_v3  ;;  %v5180_v9 = vadd.f32 %v995_v7, %v805_v1 }
 0x121   : > { %v2576_v10 = vmul.f32 -1.442695, %v5175_v16  ;;  %v2575_v11 = vmul.f32 -1.442695, %v5177_v6  ;;  %v922_v12 = vpop.f32.mrb[2].mxu0 }
 0x122   : > { %3541 = vpow2.f32 %v2574_v8  ;;  %v2577_v13 = vmul.f32 -1.442695, %v5180_v9  ;;  %v5185_v14 = vadd.f32 %v922_v12, %v793_v62  ;;  %v924_v17 = vpop.f32.mrb[3].mxu0  ;;  %v999_v18 = vpop.f32.mrb[2].mxu1  ;;  %v3394_v8 = vpack.c.bf16 %v1595_v54, %v1594_v53  ;;  %v1585_v53 = vld [vmem:[%s5701_s4 + $0x348] sm:$0xff]  ;;  %v1570_v54 = vld [vmem:[%s5701_s4 + $0x2d0] sm:$0xff] }
 0x123   : > { %3543 = vpow2.f32 %v2576_v10  ;;  %v5187_v19 = vadd.f32 %v924_v17, %v797_v0  ;;  %v5189_v20 = vadd.f32 %v999_v18, %v801_v63  ;;  %v1001_v21 = vpop.f32.mrb[3].mxu1  ;;  %v1564_v10 = vld [vmem:[%s5701_s4 + $0x2a0] sm:$0xff]  ;;  %v1597_v18 = vld [vmem:[%s5701_s4 + $0x3a8] sm:$0xff] }
 0x124   : > { %3545 = vpow2.f32 %v2575_v11  ;;  %v2586_v22 = vmul.f32 -1.442695, %v5185_v14  ;;  %v5192_v23 = vadd.f32 %v1001_v21, %v805_v1  ;;  %v3392_v1 = vpack.c.bf16 %v1577_v49, %v1576_v15  ;;  %v1565_v11 = vld [vmem:[%s5701_s4 + $0x2a8] sm:$0xff]  ;;  %v1596_v17 = vld [vmem:[%s5701_s4 + $0x3a0] sm:$0xff] }
 0x125   : > { %3547 = vpow2.f32 %v2577_v13  ;;  %v2587_v24 = vmul.f32 -1.442695, %v5187_v19  ;;  %v2588_v25 = vmul.f32 -1.442695, %v5189_v20  ;;  %v1552_v49 = vld [vmem:[%s5701_s4 + $0x240] sm:$0xff] }
 0x126   : > { %3549 = vpow2.f32 %v2586_v22  ;;  %v2589_v26 = vmul.f32 -1.442695, %v5192_v23 }
 0x127   : > { %3551 = vpow2.f32 %v2587_v24  ;;  %v3364_v24 = vpack.c.bf16 %v1547_v4, %v1546_v2  ;;  %v1555_v2 = vld [vmem:[%s5701_s4 + $0x258] sm:$0xff]  ;;  %v1586_v4 = vld [vmem:[%s5701_s4 + $0x350] sm:$0xff] }
 0x128   : > { %3553 = vpow2.f32 %v2588_v25  ;;  %v3366_v25 = vpack.c.bf16 %v1565_v11, %v1564_v10 }
 0x129   : > { %3555 = vpow2.f32 %v2589_v26  ;;  %v1548_v26 = vld [vmem:[%s5701_s4 + $0x220] sm:$0xff] }
 0x12c   : > { %v3542_v27 = vpop.eup %3541 }
 0x12d   : > { %v3544_v28 = vpop.eup %3543  ;;  %v1384_v30 = vadd.f32 1.0, %v3542_v27  ;;  %v1549_v27 = vld [vmem:[%s5701_s4 + $0x228] sm:$0xff] }
 0x12e   : > { %v3546_v32 = vpop.eup %3545  ;;  %v1386_v33 = vadd.f32 1.0, %v3544_v28  ;;  %v3398_v28 = vpack.c.bf16 %v1597_v18, %v1596_v17  ;;  %v1588_v17 = vld [vmem:[%s5701_s4 + $0x360] sm:$0xff] }
 0x12f   : > { %v3548_v34 = vpop.eup %3547  ;;  %3557 = vrcp.f32 %v1384_v30  ;;  %v1385_v35 = vadd.f32 1.0, %v3546_v32  ;;  %v1566_v30 = vld [vmem:[%s5701_s4 + $0x2b0] sm:$0xff]  ;;  %v1567_v32 = vld [vmem:[%s5701_s4 + $0x2b8] sm:$0xff] }
 0x130   : > { %v3550_v36 = vpop.eup %3549  ;;  %3559 = vrcp.f32 %v1386_v33  ;;  %v1387_v37 = vadd.f32 1.0, %v3548_v34  ;;  %v1598_v33 = vld [vmem:[%s5701_s4 + $0x3b0] sm:$0xff]  ;;  %v1599_v34 = vld [vmem:[%s5701_s4 + $0x3b8] sm:$0xff] }
 0x131   : > { %v3552_v38 = vpop.eup %3551  ;;  %3561 = vrcp.f32 %v1385_v35  ;;  %v1396_v39 = vadd.f32 1.0, %v3550_v36  ;;  %v3368_v35 = vpack.c.bf16 %v1549_v27, %v1548_v26 }
 0x132   : > { %v3554_v40 = vpop.eup %3553  ;;  %3563 = vrcp.f32 %v1387_v37  ;;  %v1397_v41 = vadd.f32 1.0, %v3552_v38  ;;  %v3370_v37 = vpack.c.bf16 %v1567_v32, %v1566_v30  ;;  %v1550_v38 = vld [vmem:[%s5701_s4 + $0x230] sm:$0xff]  ;;  %v808_v30 = vsub.s32 4, %v5150_v57 }
 0x133   : > { %v3556_v42 = vpop.eup %3555  ;;  %3565 = vrcp.f32 %v1396_v39  ;;  %v1398_v43 = vadd.f32 1.0, %v3554_v40  ;;  %v1551_v39 = vld [vmem:[%s5701_s4 + $0x238] sm:$0xff]  ;;  %v1582_v40 = vld [vmem:[%s5701_s4 + $0x330] sm:$0xff] }
 0x134   : > { %3567 = vrcp.f32 %v1397_v41  ;;  %v1399_v44 = vadd.f32 1.0, %v3556_v42  ;;  %v3402_v41 = vpack.c.bf16 %v1599_v34, %v1598_v33  ;;  %v1583_v42 = vld [vmem:[%s5701_s4 + $0x338] sm:$0xff]  ;;  %v3372_v47 = vpack.c.bf16 %v1551_v39, %v1550_v38  ;;  %v1624_v34 = vld [vmem:[%s5701_s4 + $0x480] sm:$0xff]  ;;  %v1657_v39 = vld [vmem:[%s5701_s4 + $0x588] sm:$0xff] }
 0x135   : > { %3569 = vrcp.f32 %v1398_v43  ;;  %v1568_v43 = vld [vmem:[%s5701_s4 + $0x2c0] sm:$0xff]  ;;  %v1591_v33 = vld [vmem:[%s5701_s4 + $0x378] sm:$0xff] }
 0x136   : > { %3571 = vrcp.f32 %v1399_v44  ;;  %v1569_v44 = vld [vmem:[%s5701_s4 + $0x2c8] sm:$0xff]  ;;  %v1656_v38 = vld [vmem:[%s5701_s4 + $0x580] sm:$0xff] }
 0x137   : > { %v3374_v15 = vpack.c.bf16 %v1569_v44, %v1568_v43  ;;  %v809_v44 = vrot.slane %v5156_v59, %v808_v30  ;;  %v1608_v30 = vld [vmem:[%s5701_s4 + $0x400] sm:$0xff] }
 0x139   : > { %v3558_v45 = vpop.eup %3557 }
 0x13a   : > { %v3560_v48 = vpop.eup %3559  ;;  %v1456_v63 = vmul.f32 %v3558_v45, %v5173_v3  ;;  %v3362_v3 = vpack.c.bf16 %v1563_v52, %v1562_v50  ;;  %v1600_v45 = vld [vmem:[%s5701_s4 + $0x3c0] sm:$0xff]  ;;  %v1553_v50 = vld [vmem:[%s5701_s4 + $0x248] sm:$0xff] }
 0x13b   : > { %v3562_v51 = vpop.eup %3561  ;;  %v1458_v7 = vmul.f32 %v3560_v48, %v5175_v16  ;;  %v3404_v48 = vpack.c.bf16 %v1583_v42, %v1582_v40  ;;  %v3406_v52 = vpack.c.bf16 %v1601_v46, %v1600_v45  ;;  %v820_v40 = vsub.s32 7, %v5150_v57 }
 0x13c   : > { %v3564_v55 = vpop.eup %3563  ;;  %v1457_v56 = vmul.f32 %v3562_v51, %v5177_v6  ;;  %v1584_v51 = vld [vmem:[%s5701_s4 + $0x340] sm:$0xff]  ;;  %v3454_v45 = vpack.c.bf16 %v1657_v39, %v1656_v38  ;;  %v1627_v38 = vld [vmem:[%s5701_s4 + $0x498] sm:$0xff]  ;;  %v1658_v39 = vld [vmem:[%s5701_s4 + $0x590] sm:$0xff] }
 0x13d   : > { %v3566_v62 = vpop.eup %3565  ;;  %v1459_v0 = vmul.f32 %v3564_v55, %v5180_v9  ;;  %v1579_v9 = vld [vmem:[%s5701_s4 + $0x318] sm:$0xff] }
 0x13e   : > { %v3568_v6 = vpop.eup %3567  ;;  %1743 = vmatprep.mubr.f32.mxu0 %v1457_v56  ;;  %v1468_v13 = vmul.f32 %v3566_v62, %v5185_v14  ;;  %v1571_v55 = vld [vmem:[%s5701_s4 + $0x2d8] sm:$0xff]  ;;  %v1602_v56 = vld [vmem:[%s5701_s4 + $0x3d0] sm:$0xff]  ;;  %v3376_v62 = vpack.c.bf16 %v1553_v50, %v1552_v49 }
 0x13f   : > { %v3570_v12 = vpop.eup %3569  ;;  %1818 = vmatprep.mubr.f32.mxu1 %v1459_v0  ;;  %v1469_v16 = vmul.f32 %v3568_v6, %v5187_v19  ;;  %1744 = vmatmul.mubr.f32.vlgmr.msra.gmra.mrb[12].mxu0 %v1456_v63  ;;  %v3396_v19 = vpack.c.bf16 %v1579_v9, %v1578_v5  ;;  %v3408_v63 = vpack.c.bf16 %v1585_v53, %v1584_v51  ;;  %v1587_v6 = vld [vmem:[%s5701_s4 + $0x358] sm:$0xff]  ;;  %v1605_v9 = vld [vmem:[%s5701_s4 + $0x3e8] sm:$0xff] }
 0x140   : > { %v3572_v21 = vpop.eup %3571  ;;  %1819 = vmatmul.mubr.f32.vlgmr.msra.gmra.mrb[12].mxu1 %v1458_v7  ;;  %v1470_v22 = vmul.f32 %v3570_v12, %v5189_v20  ;;  %3361 = vmatpush3.bf16.msra.mxu0 %v3360_v29  ;;  %v1580_v20 = vld [vmem:[%s5701_s4 + $0x320] sm:$0xff]  ;;  %v1603_v29 = vld [vmem:[%s5701_s4 + $0x3d8] sm:$0xff]  ;;  %v3378_v0 = vpack.c.bf16 %v1571_v55, %v1570_v54  ;;  %v3412_v11 = vpack.c.bf16 %v1587_v6, %v1586_v4 }
 0x141   : > { %v1471_v14 = vmul.f32 %v3572_v21, %v5192_v23  ;;  %1748 = vmatprep.mubr.f32.mxu0 %v1469_v16  ;;  %3393 = vmatpush3.bf16.msra.mxu1 %v3392_v1  ;;  %v1581_v23 = vld [vmem:[%s5701_s4 + $0x328] sm:$0xff]  ;;  %v1554_v1 = vld [vmem:[%s5701_s4 + $0x250] sm:$0xff]  ;;  %v3410_v5 = vpack.c.bf16 %v1603_v29, %v1602_v56  ;;  %v1572_v7 = vld [vmem:[%s5701_s4 + $0x2e0] sm:$0xff] }
 0x142   : > { %3363 = vmatprep.subr.bf16.mxu0 %v3362_v3  ;;  %3395 = vmatprep.subr.bf16.mxu1 %v3394_v8  ;;  %v3400_v36 = vpack.c.bf16 %v1581_v23, %v1580_v20  ;;  %v1573_v3 = vld [vmem:[%s5701_s4 + $0x2e8] sm:$0xff]  ;;  %v1604_v8 = vld [vmem:[%s5701_s4 + $0x3e0] sm:$0xff]  ;;  %v3380_v10 = vpack.c.bf16 %v1555_v2, %v1554_v1  ;;  %v1558_v20 = vld [vmem:[%s5701_s4 + $0x270] sm:$0xff] }
 0x143   : > { %1749 = vmatmul.mubr.f32.gmra.mrb[14].mxu0 %v1468_v13  ;;  %1823 = vmatprep.mubr.f32.mxu1 %v1471_v14  ;;  %v3382_v12 = vpack.c.bf16 %v1573_v3, %v1572_v7  ;;  %v1556_v13 = vld [vmem:[%s5701_s4 + $0x260] sm:$0xff]  ;;  %v1557_v16 = vld [vmem:[%s5701_s4 + $0x268] sm:$0xff]  ;;  %v3414_v18 = vpack.c.bf16 %v1605_v9, %v1604_v8  ;;  %v1606_v14 = vld [vmem:[%s5701_s4 + $0x3f0] sm:$0xff] }
 0x144   : > { %1824 = vmatmul.mubr.f32.gmra.mrb[14].mxu1 %v1470_v22  ;;  %3365 = vmatpush3.bf16.msra.mxu0 %v3364_v24  ;;  %v1589_v21 = vld [vmem:[%s5701_s4 + $0x368] sm:$0xff]  ;;  %v1574_v22 = vld [vmem:[%s5701_s4 + $0x2f0] sm:$0xff]  ;;  %v1575_v24 = vld [vmem:[%s5701_s4 + $0x2f8] sm:$0xff] }
 0x145   : > { %3397 = vmatpush3.bf16.msra.mxu1 %v3396_v19  ;;  %3367 = vmatprep.subr.bf16.mxu0 %v3366_v25  ;;  %v1607_v19 = vld [vmem:[%s5701_s4 + $0x3f8] sm:$0xff]  ;;  %v3384_v25 = vpack.c.bf16 %v1557_v16, %v1556_v13  ;;  %v3416_v26 = vpack.c.bf16 %v1589_v21, %v1588_v17  ;;  %v3386_v27 = vpack.c.bf16 %v1575_v24, %v1574_v22  ;;  %v1590_v23 = vld [vmem:[%s5701_s4 + $0x370] sm:$0xff] }
 0x146   : > { %3399 = vmatprep.subr.bf16.mxu1 %v3398_v28  ;;  %v1559_v28 = vld [vmem:[%s5701_s4 + $0x278] sm:$0xff]  ;;  %v3418_v32 = vpack.c.bf16 %v1607_v19, %v1606_v14  ;;  %v3420_v42 = vpack.c.bf16 %v1591_v33, %v1590_v23 }
 0x148   : > { %3369 = vmatpush3.bf16.msra.mxu0 %v3368_v35  ;;  %v1625_v35 = vld [vmem:[%s5701_s4 + $0x488] sm:$0xff] }
 0x149   : > { %3401 = vmatpush3.bf16.msra.mxu1 %v3400_v36  ;;  %3371 = vmatprep.subr.bf16.mxu0 %v3370_v37  ;;  %v816_v36 = vsub.s32 6, %v5150_v57  ;;  %v812_v37 = vsub.s32 5, %v5150_v57  ;;  %v3422_v43 = vpack.c.bf16 %v1625_v35, %v1624_v34  ;;  %v1640_v34 = vld [vmem:[%s5701_s4 + $0x500] sm:$0xff]  ;;  %v1641_v35 = vld [vmem:[%s5701_s4 + $0x508] sm:$0xff] }
 0x14a   : > { %3403 = vmatprep.subr.bf16.mxu1 %v3402_v41  ;;  %v3388_v41 = vpack.c.bf16 %v1559_v28, %v1558_v20 }
 0x14b   : > { %v817_v46 = vrot.slane %v5156_v59, %v816_v36  ;;  %v1626_v36 = vld [vmem:[%s5701_s4 + $0x490] sm:$0xff] }
 0x14c   : > { %3373 = vmatpush3.bf16.msra.mxu0 %v3372_v47  ;;  %v813_v47 = vrot.slane %v5156_v59, %v812_v37 }
 0x14d   : > { %3405 = vmatpush3.bf16.msra.mxu1 %v3404_v48  ;;  %3375 = vmatprep.subr.bf16.mxu0 %v3374_v15  ;;  %v821_v48 = vrot.slane %v5156_v59, %v820_v40  ;;  %v1659_v40 = vld [vmem:[%s5701_s4 + $0x598] sm:$0xff] }
 0x14e   : > { %3407 = vmatprep.subr.bf16.mxu1 %v3406_v52 }
 0x150   : > { %3377 = vmatpush3.bf16.msra.mxu0 %v3376_v62 }
 0x151   : > { %3409 = vmatpush3.bf16.msra.mxu1 %v3408_v63  ;;  %3379 = vmatprep.subr.bf16.mxu0 %v3378_v0 }
 0x152   : > { %3411 = vmatprep.subr.bf16.mxu1 %v3410_v5 }
 0x154   : > { %3381 = vmatpush3.bf16.msra.mxu0 %v3380_v10 }
 0x155   : > { %3413 = vmatpush3.bf16.msra.mxu1 %v3412_v11  ;;  %3383 = vmatprep.subr.bf16.mxu0 %v3382_v12 }
 0x156   : > { %3415 = vmatprep.subr.bf16.mxu1 %v3414_v18 }
 0x158   : > { %3385 = vmatpush3.bf16.msra.mxu0 %v3384_v25 }
 0x159   : > { %3417 = vmatpush3.bf16.msra.mxu1 %v3416_v26  ;;  %3387 = vmatprep.subr.bf16.mxu0 %v3386_v27 }
 0x15a   : > { %3419 = vmatprep.subr.bf16.mxu1 %v3418_v32  ;;  %v1609_v32 = vld [vmem:[%s5701_s4 + $0x408] sm:$0xff] }
 0x15c   : > { %3389 = vmatpush3.bf16.msra.mxu0 %v3388_v41 }
 0x15d   : > { %v1070_v15 = vpop.f32.mrb[4].mxu0  ;;  %3421 = vmatpush3.bf16.msra.mxu1 %v3420_v42  ;;  %3423 = vmatprep.subr.bf16.mxu0 %v3422_v43  ;;  %v3424_v43 = vpack.c.bf16 %v1609_v32, %v1608_v30 }
 0x15e   : > { %v5405_v49 = vadd.f32 %v1070_v15, %v809_v44  ;;  %v1147_v50 = vpop.f32.mrb[4].mxu1  ;;  %v1072_v51 = vpop.f32.mrb[5].mxu0  ;;  %3455 = vmatprep.subr.bf16.mxu1 %v3454_v45  ;;  %v1611_v15 = vld [vmem:[%s5701_s4 + $0x418] sm:$0xff] }
 0x15f   : > { %v5407_v52 = vadd.f32 %v1147_v50, %v817_v46  ;;  %v5409_v53 = vadd.f32 %v1072_v51, %v813_v47  ;;  %v1149_v54 = vpop.f32.mrb[5].mxu1  ;;  %v1642_v50 = vld [vmem:[%s5701_s4 + $0x510] sm:$0xff] }
 0x160   : > { %v2578_v55 = vmul.f32 -1.442695, %v5405_v49  ;;  %v5412_v56 = vadd.f32 %v1149_v54, %v821_v48  ;;  %v3458_v54 = vpack.c.bf16 %v1659_v40, %v1658_v39  ;;  %v1634_v39 = vld [vmem:[%s5701_s4 + $0x4d0] sm:$0xff]  ;;  %v1635_v40 = vld [vmem:[%s5701_s4 + $0x4d8] sm:$0xff] }
 0x161   : > { %v2580_v59 = vmul.f32 -1.442695, %v5407_v52  ;;  %v2579_v29 = vmul.f32 -1.442695, %v5409_v53  ;;  %v1076_v62 = vpop.f32.mrb[6].mxu0 }
 0x162   : > { %3573 = vpow2.f32 %v2578_v55  ;;  %v2581_v63 = vmul.f32 -1.442695, %v5412_v56  ;;  %v5417_v0 = vadd.f32 %v1076_v62, %v809_v44  ;;  %v1078_v1 = vpop.f32.mrb[7].mxu0  ;;  %v1153_v2 = vpop.f32.mrb[6].mxu1  ;;  %v1643_v55 = vld [vmem:[%s5701_s4 + $0x518] sm:$0xff] }
 0x163   : > { %3575 = vpow2.f32 %v2580_v59  ;;  %v5419_v4 = vadd.f32 %v1078_v1, %v813_v47  ;;  %v5421_v5 = vadd.f32 %v1153_v2, %v817_v46  ;;  %v1155_v6 = vpop.f32.mrb[7].mxu1  ;;  %v3456_v47 = vpack.c.bf16 %v1641_v35, %v1640_v34  ;;  %v1629_v59 = vld [vmem:[%s5701_s4 + $0x4a8] sm:$0xff]  ;;  %v1616_v34 = vld [vmem:[%s5701_s4 + $0x440] sm:$0xff] }
 0x164   : > { %3577 = vpow2.f32 %v2579_v29  ;;  %v2590_v7 = vmul.f32 -1.442695, %v5417_v0  ;;  %v5424_v3 = vadd.f32 %v1155_v6, %v821_v48  ;;  %v1610_v48 = vld [vmem:[%s5701_s4 + $0x410] sm:$0xff]  ;;  %v1661_v1 = vld [vmem:[%s5701_s4 + $0x5a8] sm:$0xff] }
 0x165   : > { %3579 = vpow2.f32 %v2581_v63  ;;  %v2591_v8 = vmul.f32 -1.442695, %v5419_v4  ;;  %v2592_v9 = vmul.f32 -1.442695, %v5421_v5  ;;  %v1660_v63 = vld [vmem:[%s5701_s4 + $0x5a0] sm:$0xff]  ;;  %v1617_v35 = vld [vmem:[%s5701_s4 + $0x448] sm:$0xff] }
 0x166   : > { %3581 = vpow2.f32 %v2590_v7  ;;  %v2593_v10 = vmul.f32 -1.442695, %v5424_v3  ;;  %v3428_v7 = vpack.c.bf16 %v1611_v15, %v1610_v48  ;;  %v1650_v48 = vld [vmem:[%s5701_s4 + $0x550] sm:$0xff] }
 0x167   : > { %3583 = vpow2.f32 %v2591_v8 }
 0x168   : > { %3585 = vpow2.f32 %v2592_v9  ;;  %v1612_v9 = vld [vmem:[%s5701_s4 + $0x420] sm:$0xff] }
 0x169   : > { %3587 = vpow2.f32 %v2593_v10  ;;  %v1613_v10 = vld [vmem:[%s5701_s4 + $0x428] sm:$0xff] }
 0x16c   : > { %v3574_v11 = vpop.eup %3573 }
 0x16d   : > { %v3576_v12 = vpop.eup %3575  ;;  %v1388_v13 = vadd.f32 1.0, %v3574_v11  ;;  %v3462_v11 = vpack.c.bf16 %v1661_v1, %v1660_v63  ;;  %v1653_v1 = vld [vmem:[%s5701_s4 + $0x568] sm:$0xff] }
 0x16e   : > { %v3578_v16 = vpop.eup %3577  ;;  %v1390_v17 = vadd.f32 1.0, %v3576_v12  ;;  %v1630_v12 = vld [vmem:[%s5701_s4 + $0x4b0] sm:$0xff] }
 0x16f   : > { %v3580_v18 = vpop.eup %3579  ;;  %3589 = vrcp.f32 %v1388_v13  ;;  %v1389_v21 = vadd.f32 1.0, %v3578_v16  ;;  %v1631_v13 = vld [vmem:[%s5701_s4 + $0x4b8] sm:$0xff]  ;;  %v1662_v16 = vld [vmem:[%s5701_s4 + $0x5b0] sm:$0xff] }
 0x170   : > { %v3582_v22 = vpop.eup %3581  ;;  %3591 = vrcp.f32 %v1390_v17  ;;  %v1391_v24 = vadd.f32 1.0, %v3580_v18  ;;  %v1663_v17 = vld [vmem:[%s5701_s4 + $0x5b8] sm:$0xff]  ;;  %v3432_v18 = vpack.c.bf16 %v1613_v10, %v1612_v9  ;;  %v1622_v10 = vld [vmem:[%s5701_s4 + $0x470] sm:$0xff] }
 0x171   : > { %v3584_v14 = vpop.eup %3583  ;;  %3593 = vrcp.f32 %v1389_v21  ;;  %v1400_v19 = vadd.f32 1.0, %v3582_v22  ;;  %v3434_v22 = vpack.c.bf16 %v1631_v13, %v1630_v12  ;;  %v1655_v12 = vld [vmem:[%s5701_s4 + $0x578] sm:$0xff]  ;;  %v787_v13 = vld [vmem:[%s5700_s3 + $0x8] sm:$0xf] }
 0x172   : > { %v3586_v25 = vpop.eup %3585  ;;  %3595 = vrcp.f32 %v1391_v24  ;;  %v1401_v26 = vadd.f32 1.0, %v3584_v14  ;;  %v1614_v24 = vld [vmem:[%s5701_s4 + $0x430] sm:$0xff]  ;;  %v1615_v14 = vld [vmem:[%s5701_s4 + $0x438] sm:$0xff] }
 0x173   : > { %v3588_v27 = vpop.eup %3587  ;;  %3597 = vrcp.f32 %v1400_v19  ;;  %v1402_v20 = vadd.f32 1.0, %v3586_v25  ;;  %v1646_v19 = vld [vmem:[%s5701_s4 + $0x530] sm:$0xff]  ;;  %v3466_v25 = vpack.c.bf16 %v1663_v17, %v1662_v16  ;;  %v3436_v30 = vpack.c.bf16 %v1615_v14, %v1614_v24 }
 0x174   : > { %3599 = vrcp.f32 %v1401_v26  ;;  %v1403_v28 = vadd.f32 1.0, %v3588_v27  ;;  %v1647_v26 = vld [vmem:[%s5701_s4 + $0x538] sm:$0xff]  ;;  %v1632_v27 = vld [vmem:[%s5701_s4 + $0x4c0] sm:$0xff]  ;;  %v837_v24 = vrot.slane %v787_v13, %v804_v61 }
 0x175   : > { %3601 = vrcp.f32 %v1402_v20  ;;  %v1633_v20 = vld [vmem:[%s5701_s4 + $0x4c8] sm:$0xff]  ;;  %v3468_v32 = vpack.c.bf16 %v1647_v26, %v1646_v19 }
 0x176   : > { %3603 = vrcp.f32 %v1403_v28  ;;  %v1664_v28 = vld [vmem:[%s5701_s4 + $0x5c0] sm:$0xff] }
 0x179   : > { %v3590_v23 = vpop.eup %3589 }
 0x17a   : > { %v3592_v33 = vpop.eup %3591  ;;  %v1460_v45 = vmul.f32 %v3590_v23, %v5405_v49  ;;  %v3426_v49 = vpack.c.bf16 %v1627_v38, %v1626_v36  ;;  %v1665_v23 = vld [vmem:[%s5701_s4 + $0x5c8] sm:$0xff]  ;;  %v1648_v36 = vld [vmem:[%s5701_s4 + $0x540] sm:$0xff] }
 0x17b   : > { %v3594_v37 = vpop.eup %3593  ;;  %v1649_v38 = vld [vmem:[%s5701_s4 + $0x548] sm:$0xff] }
 0x17c   : > { %v3596_v41 = vpop.eup %3595  ;;  %v1461_v42 = vmul.f32 %v3594_v37, %v5409_v53  ;;  %v1462_v53 = vmul.f32 %v3592_v33, %v5407_v52  ;;  %v3438_v33 = vpack.c.bf16 %v1633_v20, %v1632_v27  ;;  %v3470_v37 = vpack.c.bf16 %v1665_v23, %v1664_v28 }
 0x17d   : > { %v3598_v44 = vpop.eup %3597  ;;  %v1463_v46 = vmul.f32 %v3596_v41, %v5412_v56  ;;  %v1628_v56 = vld [vmem:[%s5701_s4 + $0x4a0] sm:$0xff]  ;;  %v1666_v41 = vld [vmem:[%s5701_s4 + $0x5d0] sm:$0xff] }
 0x17e   : > { %v3600_v51 = vpop.eup %3599  ;;  %1893 = vmatprep.mubr.f32.mxu0 %v1461_v42  ;;  %v1472_v62 = vmul.f32 %v3598_v44, %v5417_v0  ;;  %v3430_v8 = vpack.c.bf16 %v1629_v59, %v1628_v56  ;;  %v1667_v42 = vld [vmem:[%s5701_s4 + $0x5d8] sm:$0xff]  ;;  %v3472_v44 = vpack.c.bf16 %v1649_v38, %v1648_v36 }
 0x17f   : > { %v3602_v29 = vpop.eup %3601  ;;  %v1473_v52 = vmul.f32 %v3600_v51, %v5419_v4  ;;  %1968 = vmatprep.mubr.f32.mxu1 %v1463_v46  ;;  %1894 = vmatmul.mubr.f32.vlgmr.msra.gmra.mrb[16].mxu0 %v1460_v45  ;;  %v3460_v4 = vpack.c.bf16 %v1643_v55, %v1642_v50  ;;  %v3442_v45 = vpack.c.bf16 %v1635_v40, %v1634_v39  ;;  %v1618_v46 = vld [vmem:[%s5701_s4 + $0x450] sm:$0xff]  ;;  %v1651_v50 = vld [vmem:[%s5701_s4 + $0x558] sm:$0xff]  ;;  %v1636_v51 = vld [vmem:[%s5701_s4 + $0x4e0] sm:$0xff] }
 0x180   : > { %v3604_v2 = vpop.eup %3603  ;;  %v1474_v6 = vmul.f32 %v3602_v29, %v5421_v5  ;;  %1969 = vmatmul.mubr.f32.vlgmr.msra.gmra.mrb[16].mxu1 %v1462_v53  ;;  %3425 = vmatpush3.bf16.msra.mxu0 %v3424_v43  ;;  %v1644_v5 = vld [vmem:[%s5701_s4 + $0x520] sm:$0xff]  ;;  %v3440_v43 = vpack.c.bf16 %v1617_v35, %v1616_v34  ;;  %v3474_v15 = vpack.c.bf16 %v1667_v42, %v1666_v41  ;;  %v1637_v53 = vld [vmem:[%s5701_s4 + $0x4e8] sm:$0xff] }
 0x181   : > { %v1475_v0 = vmul.f32 %v3604_v2, %v5424_v3  ;;  %1898 = vmatprep.mubr.f32.mxu0 %v1473_v52  ;;  %3457 = vmatpush3.bf16.msra.mxu1 %v3456_v47  ;;  %v1645_v3 = vld [vmem:[%s5701_s4 + $0x528] sm:$0xff]  ;;  %v1619_v47 = vld [vmem:[%s5701_s4 + $0x458] sm:$0xff]  ;;  %v3476_v56 = vpack.c.bf16 %v1651_v50, %v1650_v48  ;;  %v3446_v59 = vpack.c.bf16 %v1637_v53, %v1636_v51  ;;  %v1620_v29 = vld [vmem:[%s5701_s4 + $0x460] sm:$0xff] }
 0x182   : > { %3427 = vmatprep.subr.bf16.mxu0 %v3426_v49  ;;  %3459 = vmatprep.subr.bf16.mxu1 %v3458_v54  ;;  %v3464_v21 = vpack.c.bf16 %v1645_v3, %v1644_v5  ;;  %v1668_v49 = vld [vmem:[%s5701_s4 + $0x5e0] sm:$0xff]  ;;  %v1669_v54 = vld [vmem:[%s5701_s4 + $0x5e8] sm:$0xff]  ;;  %v3444_v55 = vpack.c.bf16 %v1619_v47, %v1618_v46  ;;  %v1638_v2 = vld [vmem:[%s5701_s4 + $0x4f0] sm:$0xff] }
 0x183   : > { %1899 = vmatmul.mubr.f32.gmra.mrb[18].mxu0 %v1472_v62  ;;  %1973 = vmatprep.mubr.f32.mxu1 %v1475_v0  ;;  %v1621_v62 = vld [vmem:[%s5701_s4 + $0x468] sm:$0xff]  ;;  %v1652_v52 = vld [vmem:[%s5701_s4 + $0x560] sm:$0xff]  ;;  %v3478_v63 = vpack.c.bf16 %v1669_v54, %v1668_v49  ;;  %v1671_v0 = vld [vmem:[%s5701_s4 + $0x5f8] sm:$0xff] }
 0x184   : > { %1974 = vmatmul.mubr.f32.gmra.mrb[18].mxu1 %v1474_v6  ;;  %3429 = vmatpush3.bf16.msra.mxu0 %v3428_v7  ;;  %v1639_v6 = vld [vmem:[%s5701_s4 + $0x4f8] sm:$0xff]  ;;  %v1670_v7 = vld [vmem:[%s5701_s4 + $0x5f0] sm:$0xff] }
 0x185   : > { %3461 = vmatpush3.bf16.msra.mxu1 %v3460_v4  ;;  %3431 = vmatprep.subr.bf16.mxu0 %v3430_v8  ;;  %v3448_v4 = vpack.c.bf16 %v1621_v62, %v1620_v29  ;;  %v3480_v8 = vpack.c.bf16 %v1653_v1, %v1652_v52  ;;  %v3450_v9 = vpack.c.bf16 %v1639_v6, %v1638_v2  ;;  %v1623_v5 = vld [vmem:[%s5701_s4 + $0x478] sm:$0xff]  ;;  %v1654_v3 = vld [vmem:[%s5701_s4 + $0x570] sm:$0xff] }
 0x186   : > { %3463 = vmatprep.subr.bf16.mxu1 %v3462_v11  ;;  %v3482_v11 = vpack.c.bf16 %v1671_v0, %v1670_v7  ;;  %v3452_v16 = vpack.c.bf16 %v1623_v5, %v1622_v10  ;;  %v3484_v17 = vpack.c.bf16 %v1655_v12, %v1654_v3 }
 0x188   : > { %3433 = vmatpush3.bf16.msra.mxu0 %v3432_v18  ;;  %v825_v18 = vrot.slane %v787_v13, %v792_v58 }
 0x189   : > { %3465 = vmatpush3.bf16.msra.mxu1 %v3464_v21  ;;  %3435 = vmatprep.subr.bf16.mxu0 %v3434_v22  ;;  %v833_v21 = vrot.slane %v787_v13, %v800_v31  ;;  %v829_v22 = vrot.slane %v787_v13, %v796_v60 }
 0x18a   : > { %3467 = vmatprep.subr.bf16.mxu1 %v3466_v25 }
 0x18c   : > { %3437 = vmatpush3.bf16.msra.mxu0 %v3436_v30 }
 0x18d   : > { %3469 = vmatpush3.bf16.msra.mxu1 %v3468_v32  ;;  %3439 = vmatprep.subr.bf16.mxu0 %v3438_v33 }
 0x18e   : > { %3471 = vmatprep.subr.bf16.mxu1 %v3470_v37 }
 0x190   : > { %3441 = vmatpush3.bf16.msra.mxu0 %v3440_v43 }
 0x191   : > { %3473 = vmatpush3.bf16.msra.mxu1 %v3472_v44  ;;  %3443 = vmatprep.subr.bf16.mxu0 %v3442_v45 }
 0x192   : > { %3475 = vmatprep.subr.bf16.mxu1 %v3474_v15 }
 0x194   : > { %3445 = vmatpush3.bf16.msra.mxu0 %v3444_v55 }
 0x195   : > { %3477 = vmatpush3.bf16.msra.mxu1 %v3476_v56  ;;  %3447 = vmatprep.subr.bf16.mxu0 %v3446_v59 }
 0x196   : > { %3479 = vmatprep.subr.bf16.mxu1 %v3478_v63 }
 0x198   : > { %3449 = vmatpush3.bf16.msra.mxu0 %v3448_v4 }
 0x199   : > { %3481 = vmatpush3.bf16.msra.mxu1 %v3480_v8  ;;  %3451 = vmatprep.subr.bf16.mxu0 %v3450_v9 }
 0x19a   : > { %3483 = vmatprep.subr.bf16.mxu1 %v3482_v11 }
 0x19c   : > { %3453 = vmatpush3.bf16.msra.mxu0 %v3452_v16 }
 0x19d   : > { %v1224_v14 = vpop.f32.mrb[8].mxu0  ;;  %3485 = vmatpush3.bf16.msra.mxu1 %v3484_v17  ;;  %v2598_v17 = vld [vmem:[%s5702_s5] ss:$0 sm:$0xff] }
 0x19e   : > { %v1225_v19 = vadd.f32 %v1224_v14, %v825_v18  ;;  %v1301_v25 = vpop.f32.mrb[8].mxu1  ;;  %v1226_v26 = vpop.f32.mrb[9].mxu0 }
 0x19f   : > { %v1302_v27 = vadd.f32 %v1301_v25, %v833_v21  ;;  %v1227_v20 = vadd.f32 %v1226_v26, %v829_v22  ;;  %v1303_v28 = vpop.f32.mrb[9].mxu1 }
 0x1a0   : > { %v2582_v58 = vmul.f32 -1.442695, %v1225_v19  ;;  %v1304_v23 = vadd.f32 %v1303_v28, %v837_v24 }
 0x1a1   : > { %v2584_v30 = vmul.f32 -1.442695, %v1302_v27  ;;  %v2583_v32 = vmul.f32 -1.442695, %v1227_v20  ;;  %v1230_v31 = vpop.f32.mrb[10].mxu0 }
 0x1a2   : > { %3605 = vpow2.f32 %v2582_v58  ;;  %v2585_v33 = vmul.f32 -1.442695, %v1304_v23  ;;  %v1231_v60 = vadd.f32 %v1230_v31, %v825_v18  ;;  %v1307_v34 = vpop.f32.mrb[10].mxu1  ;;  %v1232_v35 = vpop.f32.mrb[11].mxu0  ;;  %v2144_v31 = vld [vmem:[%s5705_s8 + $0x8] sm:$0xff] }
 0x1a3   : > { %3607 = vpow2.f32 %v2584_v30  ;;  %v1308_v61 = vadd.f32 %v1307_v34, %v833_v21  ;;  %v1233_v36 = vadd.f32 %v1232_v35, %v829_v22  ;;  %v1309_v37 = vpop.f32.mrb[11].mxu1  ;;  %v2146_v34 = vld [vmem:[%s5705_s8 + $0x18] sm:$0xff] }
 0x1a4   : > { %3609 = vpow2.f32 %v2583_v32  ;;  %v2594_v38 = vmul.f32 -1.442695, %v1231_v60  ;;  %v1310_v39 = vadd.f32 %v1309_v37, %v837_v24  ;;  %v2143_v32 = vld [vmem:[%s5705_s8] sm:$0xff] }
 0x1a5   : > { %3611 = vpow2.f32 %v2585_v33  ;;  %v2596_v40 = vmul.f32 -1.442695, %v1308_v61  ;;  %v2595_v41 = vmul.f32 -1.442695, %v1233_v36  ;;  %v3486_v33 = vpack.c.bf16 %v2144_v31, %v2143_v32 }
 0x1a6   : > { %3613 = vpow2.f32 %v2594_v38  ;;  %v2597_v42 = vmul.f32 -1.442695, %v1310_v39 }
 0x1a7   : > { %3615 = vpow2.f32 %v2596_v40  ;;  %3487 = vmatprep.subr.bf16.mxu0 %v3486_v33  ;;  %3499 = vmatprep.subr.bf16.mxu1 %v3486_v33 }
 0x1a8   : > { %3617 = vpow2.f32 %v2595_v41 }
 0x1a9   : > { %3619 = vpow2.f32 %v2597_v42 }
 0x1ac   : > { %v3606_v43 = vpop.eup %3605 }
 0x1ad   : > { %v3608_v44 = vpop.eup %3607  ;;  %v1392_v45 = vadd.f32 1.0, %v3606_v43 }
 0x1ae   : > { %v3610_v46 = vpop.eup %3609  ;;  %v1394_v47 = vadd.f32 1.0, %v3608_v44 }
 0x1af   : > { %v3612_v48 = vpop.eup %3611  ;;  %3621 = vrcp.f32 %v1392_v45  ;;  %v1393_v15 = vadd.f32 1.0, %v3610_v46 }
 0x1b0   : > { %v3614_v50 = vpop.eup %3613  ;;  %3623 = vrcp.f32 %v1394_v47  ;;  %v1395_v51 = vadd.f32 1.0, %v3612_v48 }
 0x1b1   : > { %v3616_v53 = vpop.eup %3615  ;;  %3625 = vrcp.f32 %v1393_v15  ;;  %v1404_v49 = vadd.f32 1.0, %v3614_v50 }
 0x1b2   : > { %v3618_v54 = vpop.eup %3617  ;;  %3627 = vrcp.f32 %v1395_v51  ;;  %v1406_v55 = vadd.f32 1.0, %v3616_v53 }
 0x1b3   : > { %v3620_v56 = vpop.eup %3619  ;;  %3629 = vrcp.f32 %v1404_v49  ;;  %v1405_v59 = vadd.f32 1.0, %v3618_v54 }
 0x1b4   : > { %3631 = vrcp.f32 %v1406_v55  ;;  %v1407_v29 = vadd.f32 1.0, %v3620_v56 }
 0x1b5   : > { %3633 = vrcp.f32 %v1405_v59 }
 0x1b6   : > { %3635 = vrcp.f32 %v1407_v29 }
 0x1b9   : > { %v3622_v62 = vpop.eup %3621 }
 0x1ba   : > { %v3624_v52 = vpop.eup %3623  ;;  %v1464_v7 = vmul.f32 %v3622_v62, %v1225_v19 }
 0x1bb   : > { %v3626_v63 = vpop.eup %3625  ;;  %v1466_v8 = vmul.f32 %v3624_v52, %v1302_v27 }
 0x1bc   : > { %v3628_v1 = vpop.eup %3627  ;;  %v1465_v2 = vmul.f32 %v3626_v63, %v1227_v20 }
 0x1bd   : > { %v3630_v6 = vpop.eup %3629  ;;  %v1467_v0 = vmul.f32 %v3628_v1, %v1304_v23 }
 0x1be   : > { %v3632_v4 = vpop.eup %3631  ;;  %2043 = vmatprep.mubr.f32.mxu0 %v1465_v2  ;;  %v1476_v11 = vmul.f32 %v3630_v6, %v1231_v60  ;;  %v2145_v60 = vld [vmem:[%s5705_s8 + $0x10] sm:$0xff] }
 0x1bf   : > { %v3634_v9 = vpop.eup %3633  ;;  %2118 = vmatprep.mubr.f32.mxu1 %v1467_v0  ;;  %2044 = vmatmul.mubr.f32.vlgmr.msra.gmra.mrb[20].mxu0 %v1464_v7  ;;  %v1478_v12 = vmul.f32 %v3632_v4, %v1308_v61  ;;  %v3490_v35 = vpack.c.bf16 %v2146_v34, %v2145_v60  ;;  %v2147_v61 = vld [vmem:[%s5705_s8 + $0x20] sm:$0xff] }
 0x1c0   : > { %v3636_v10 = vpop.eup %3635  ;;  %v1477_v5 = vmul.f32 %v3634_v9, %v1233_v36  ;;  %2119 = vmatmul.mubr.f32.vlgmr.msra.gmra.mrb[20].mxu1 %v1466_v8  ;;  %3489 = vmatpush3.bf16.msra.mxu0 %v3486_v33  ;;  %v2148_v36 = vld [vmem:[%s5705_s8 + $0x28] sm:$0xff] }
 0x1c1   : > { %v1479_v3 = vmul.f32 %v3636_v10, %v1310_v39  ;;  %3501 = vmatpush3.bf16.msra.mxu1 %v3486_v33  ;;  %3491 = vmatprep.subr.bf16.mxu0 %v3490_v35  ;;  %v3494_v37 = vpack.c.bf16 %v2148_v36, %v2147_v61  ;;  %v2605_v36 = vld [vmem:[%s5703_s6] ss:$0 sm:$0xff] }
 0x1c2   : > { %2048 = vmatprep.mubr.f32.mxu0 %v1477_v5  ;;  %3503 = vmatprep.subr.bf16.mxu1 %v3490_v35 }
 0x1c3   : > { %2123 = vmatprep.mubr.f32.mxu1 %v1479_v3  ;;  %2049 = vmatmul.mubr.f32.gmra.mrb[22].mxu0 %v1476_v11 }
 0x1c4   : > { %2124 = vmatmul.mubr.f32.gmra.mrb[22].mxu1 %v1478_v12  ;;  %3493 = vmatpush3.bf16.msra.mxu0 %v3490_v35 }
 0x1c5   : > { %3505 = vmatpush3.bf16.msra.mxu1 %v3490_v35  ;;  %3495 = vmatprep.subr.bf16.mxu0 %v3494_v37 }
 0x1c6   : > { %3507 = vmatprep.subr.bf16.mxu1 %v3494_v37 }
 0x1c8   : > { %3497 = vmatpush3.bf16.msra.mxu0 %v3494_v37 }
 0x1c9   : > { %3509 = vmatpush3.bf16.msra.mxu1 %v3494_v37 }
 0x212   : > { %v2652_v13 = vpop.f32.mrb[12].mxu0 }
 0x213   : > { %v2690_v16 = vpop.f32.mrb[12].mxu1  ;;  %v2653_v18 = vpop.f32.mrb[13].mxu0 }
 0x214   : > { %v2654_v21 = vadd.f32 %v2653_v18, %v2652_v13  ;;  %v2691_v22 = vpop.f32.mrb[13].mxu1 }
 0x215   : > { %v2692_v24 = vadd.f32 %v2691_v22, %v2690_v16 }
 0x216   : > { %v1746_v14 = vadd.f32 %v2654_v21, %v2598_v17  ;;  %v2655_v19 = vpop.f32.mrb[14].mxu0 }
 0x217   : > { %v2656_v25 = vpop.f32.mrb[15].mxu0  ;;  %v2693_v26 = vpop.f32.mrb[14].mxu1 }
 0x218   : > { %v1821_v27 = vadd.f32 %v2692_v24, %v1746_v14  ;;  %v2657_v20 = vadd.f32 %v2656_v25, %v2655_v19  ;;  %v2694_v28 = vpop.f32.mrb[15].mxu1 }
 0x219   : > { %v2695_v58 = vadd.f32 %v2694_v28, %v2693_v26  ;;  %v2341_v28 = vadd.s32 8, %v5150_v57 }
 0x21a   : > { %v1751_v23 = vadd.f32 %v2657_v20, %v2598_v17  ;;  %v2607_v20 = vld [vmem:[%s383_s21] ss:$0 sm:$0xff] }
 0x21b   : > { %vm2348_vm2 = vcmp.eq.s32.totalorder %v5150_v57, %v2607_v20  ;;  %vm2349_vm4 = vcmp.eq.s32.totalorder %v2341_v28, %v2607_v20 }
 0x21c   : > { %v1826_v30 = vadd.f32 %v2695_v58, %v1751_v23  ;;  %v2343_v58 = vadd.s32 24, %v5150_v57  ;;  %v3676_v23 = vmov 0.0  }
 0x21d   : > { %394 = vst.msk [vmem:[#allocation2] sm:$0xff] %vm393_vm0, %v3676_v23  ;;  %395 = vst.msk [vmem:[#allocation2 + $0x8] sm:$0xff] %vm393_vm0, %v3676_v23  ;;  %v2609_v31 = vsel %vm2349_vm4, 1.0, %v3676_v23 }
 0x21e   : > { %396 = vst.msk [vmem:[#allocation2 + $0x10] sm:$0xff] %vm393_vm0, %v3676_v23  ;;  %397 = vst.msk [vmem:[#allocation2 + $0x18] sm:$0xff] %vm393_vm0, %v3676_v23  ;;  %vm2351_vm5 = vcmp.eq.s32.totalorder %v2343_v58, %v2607_v20 }
 0x252   : > { %v2728_v38 = vpop.f32.mrb[16].mxu0 }
 0x253   : > { %v2766_v39 = vpop.f32.mrb[16].mxu1  ;;  %v2729_v40 = vpop.f32.mrb[17].mxu0 }
 0x254   : > { %v2730_v41 = vadd.f32 %v2729_v40, %v2728_v38  ;;  %v2767_v42 = vpop.f32.mrb[17].mxu1  ;;  %v2606_v40 = vld [vmem:[%s5704_s7] ss:$0 sm:$0xff] }
 0x255   : > { %v2768_v43 = vadd.f32 %v2767_v42, %v2766_v39 }
 0x256   : > { %v1896_v44 = vadd.f32 %v2730_v41, %v1821_v27  ;;  %v2731_v45 = vpop.f32.mrb[18].mxu0  ;;  %v2342_v27 = vadd.s32 16, %v5150_v57  ;;  %v2611_v57 = vsel %vm2351_vm5, 1.0, %v3676_v23 }
 0x257   : > { %v2732_v46 = vpop.f32.mrb[19].mxu0  ;;  %v2769_v47 = vpop.f32.mrb[18].mxu1 }
 0x258   : > { %v1971_v48 = vadd.f32 %v2768_v43, %v1896_v44  ;;  %v2733_v15 = vadd.f32 %v2732_v46, %v2731_v45  ;;  %v2770_v50 = vpop.f32.mrb[19].mxu1  ;;  %vm2350_vm3 = vcmp.eq.s32.totalorder %v2342_v27, %v2607_v20  ;;  %v2361_v46 = vld [vmem:[#allocation2 + $0x8] sm:$0xff] }
 0x259   : > { %v2771_v51 = vadd.f32 %v2770_v50, %v2769_v47  ;;  %v2610_v32 = vsel %vm2350_vm3, 1.0, %v3676_v23  ;;  %v2363_v47 = vld [vmem:[#allocation2 + $0x18] sm:$0xff] }
 0x25a   : > { %v1901_v53 = vadd.f32 %v2733_v15, %v1826_v30  ;;  %v2608_v30 = vsel %vm2348_vm2, 1.0, %v3676_v23  ;;  %v2362_v15 = vld [vmem:[#allocation2 + $0x10] sm:$0xff] }
 0x25c   : > { %v1976_v49 = vadd.f32 %v2771_v51, %v1901_v53 }
 0x292   : > { %v2804_v54 = vpop.f32.mrb[20].mxu0 }
 0x293   : > { %v2842_v55 = vpop.f32.mrb[20].mxu1  ;;  %v2805_v56 = vpop.f32.mrb[21].mxu0 }
 0x294   : > { %v2806_v59 = vadd.f32 %v2805_v56, %v2804_v54  ;;  %v2843_v29 = vpop.f32.mrb[21].mxu1 }
 0x295   : > { %v2844_v62 = vadd.f32 %v2843_v29, %v2842_v55 }
 0x296   : > { %v2046_v52 = vadd.f32 %v2806_v59, %v1971_v48  ;;  %v2807_v63 = vpop.f32.mrb[22].mxu0  ;;  %v2360_v48 = vld [vmem:[#allocation2] sm:$0xff] }
 0x297   : > { %v2845_v1 = vpop.f32.mrb[22].mxu1  ;;  %v2808_v2 = vpop.f32.mrb[23].mxu0 }
 0x298   : > { %v2121_v6 = vadd.f32 %v2844_v62, %v2046_v52  ;;  %v2809_v7 = vadd.f32 %v2808_v2, %v2807_v63  ;;  %v2846_v0 = vpop.f32.mrb[23].mxu1 }
 0x299   : > { %v2847_v4 = vadd.f32 %v2846_v0, %v2845_v1 }
 0x29a   : > { %v2599_v8 = vmul.f32 -1.442695, %v2121_v6  ;;  %v2051_v9 = vadd.f32 %v2809_v7, %v1976_v49 }
 0x29c   : > { %3637 = vpow2.f32 %v2599_v8  ;;  %v2126_v10 = vadd.f32 %v2847_v4, %v2051_v9 }
 0x29e   : > { %v2600_v5 = vmul.f32 -1.442695, %v2126_v10 }
 0x2a0   : > { %3639 = vpow2.f32 %v2600_v5 }
 0x2a6   : > { %v3638_v11 = vpop.eup %3637 }
 0x2a7   : > { %v2135_v3 = vadd.f32 1.0, %v3638_v11 }
 0x2a9   : > { %3641 = vrcp.f32 %v2135_v3 }
 0x2aa   : > { %v3640_v12 = vpop.eup %3639 }
 0x2ab   : > { %v2136_v13 = vadd.f32 1.0, %v3640_v12 }
 0x2ad   : > { %3643 = vrcp.f32 %v2136_v13 }
 0x2b3   : > { %v3642_v16 = vpop.eup %3641 }
 0x2b4   : > { %v2141_v17 = vmul.f32 %v3642_v16, %v2121_v6 }
 0x2b6   : > { %2882 = vmatprep.mubr.msk.f32.mxu0 %vm393_vm0, %v2141_v17 }
 0x2b7   : > { %v3644_v18 = vpop.eup %3643 }
 0x2b8   : > { %v2142_v21 = vmul.f32 %v3644_v18, %v2126_v10 }
 0x2ba   : > { %2883 = vmatmul.mubr.msk.f32.vlgmr.msra.gmra.mrb[24].mxu0 %vm393_vm0, %v2142_v21 }
 0x2bb   : > { %2904 = vmatprep.mubr.msk.f32.mxu0 %vm2364_vm1, %v2608_v30 }
 0x38d   : > { %v2884_v22 = vpop.f32.mrb[24].mxu0 }
 0x38e   : > { %v2232_v24 = vsub.f32 %v2142_v21, %v2884_v22  ;;  %v2222_v14 = vpop.f32.mrb[25].mxu0 }
 0x38f   : > { %v2231_v19 = vsub.f32 %v2141_v17, %v2222_v14 }
 0x390   : > { %v2234_v26 = vmul.f32 %v2232_v24, %v2232_v24 }
 0x391   : > { %v2233_v25 = vmul.f32 %v2231_v19, %v2231_v19 }
 0x393   : > { %2897 = vmatprep.mubr.msk.f32.mxu1 %vm393_vm0, %v2233_v25 }
 0x394   : > { %2898 = vmatmul.mubr.msk.f32.vlgmr.msra.gmra.mrb[24].mxu1 %vm393_vm0, %v2234_v26 }
 0x395   : > { %2907 = vmatprep.mubr.msk.f32.mxu1 %vm2364_vm1, %v2610_v32 }
 0x467   : > { %v2899_v33 = vpop.f32.mrb[24].mxu1 }
 0x468   : > { %v2313_v60 = vadd.f32 1e-05, %v2899_v33  ;;  %v2307_v34 = vpop.f32.mrb[25].mxu1 }
 0x469   : > { %v2308_v35 = vadd.f32 1e-05, %v2307_v34 }
 0x46a   : > { %3645 = vrsqrt.f32 %v2313_v60 }
 0x46b   : > { %3647 = vrsqrt.f32 %v2308_v35 }
 0x474   : > { %v3646_v61 = vpop.eup %3645 }
 0x475   : > { %v3648_v37 = vpop.eup %3647  ;;  %v2319_v38 = vmul.f32 %v3646_v61, %v2232_v24 }
 0x476   : > { %v2318_v39 = vmul.f32 %v3648_v37, %v2231_v19 }
 0x477   : > { %v2328_v41 = vmul.f32 %v2605_v36, %v2319_v38 }
 0x478   : > { %v2327_v42 = vmul.f32 %v2605_v36, %v2318_v39 }
 0x479   : > { %v2337_v43 = vadd.f32 %v2606_v40, %v2328_v41 }
 0x47a   : > { %v2336_v44 = vadd.f32 %v2606_v40, %v2327_v42 }
 0x47c   : > { %v3510_v45 = vpack.c.bf16 %v2337_v43, %v2336_v44 }
 0x47e   : > { %3511 = vmatprep.subr.bf16.mxu0 %v3510_v45  ;;  %3514 = vmatprep.subr.bf16.mxu1 %v3510_v45 }
 0x47f   : > { %3513 = vmatpush3.bf16.msra.mxu0 %v3510_v45  ;;  %3515 = vmatpush3.bf16.msra.mxu1 %v3510_v45 }
 0x482   : > { %2905 = vmatmul.mubr.msk.f32.vlgmr.msra.gmra.mrb[26].mxu0 %vm2364_vm1, %v2609_v31  ;;  %2908 = vmatmul.mubr.msk.f32.vlgmr.msra.gmra.mrb[26].mxu1 %vm2364_vm1, %v2611_v57 }
 0x555   : > { %v2906_v50 = vpop.f32.mrb[26].mxu0  ;;  %v2909_v51 = vpop.f32.mrb[26].mxu1 }
 0x556   : > { %v2463_v53 = vadd.f32 %v2906_v50, %v2361_v46  ;;  %v2465_v49 = vadd.f32 %v2909_v51, %v2363_v47  ;;  %v2443_v54 = vpop.f32.mrb[27].mxu0  ;;  %v2453_v55 = vpop.f32.mrb[27].mxu1 }
 0x557   : > { %v2462_v56 = vadd.f32 %v2443_v54, %v2360_v48  ;;  %v2464_v59 = vadd.f32 %v2453_v55, %v2362_v15 }
 0x558   : > { %2467 = vst.msk [vmem:[#allocation2 + $0x8] sm:$0xff] %vm393_vm0, %v2463_v53  ;;  %2469 = vst.msk [vmem:[#allocation2 + $0x18] sm:$0xff] %vm393_vm0, %v2465_v49 }
 0x559   : > { %2466 = vst.msk [vmem:[#allocation2] sm:$0xff] %vm393_vm0, %v2462_v56  ;;  %2468 = vst.msk [vmem:[#allocation2 + $0x10] sm:$0xff] %vm393_vm0, %v2464_v59 }
 0x55f   : > { %v2474_v29 = vld [vmem:[#allocation2 + $0x8] sm:$0xff]  ;;  %v2476_v62 = vld [vmem:[#allocation2 + $0x18] sm:$0xff] }
 0x560   : > { %2478 = vst.msk [vmem:[%s388_s27 + $0x8] sm:$0xff] %vm393_vm0, %v2474_v29  ;;  %2480 = vst.msk [vmem:[%s388_s27 + $0x18] sm:$0xff] %vm393_vm0, %v2476_v62  ;;  %v2473_v52 = vld [vmem:[#allocation2] sm:$0xff]  ;;  %v2475_v63 = vld [vmem:[#allocation2 + $0x10] sm:$0xff] }
 0x561   : > { %2477 = vst.msk [vmem:[%s388_s27] sm:$0xff] %vm393_vm0, %v2473_v52  ;;  %2479 = vst.msk [vmem:[%s388_s27 + $0x10] sm:$0xff] %vm393_vm0, %v2475_v63 }
 0x562 PF: > { %s19_s11 = sadd.s32 1, %s3674_s11   ;;  %s5707_s30 = smov %s3670_s10 }
 0x563   : > { %p16_p5 = scmp.ge.s32.totalorder %s19_s11, 4   ;;  %s5708_s10 = smov %s5710_s12 }
 0x565   :  { %18 = sbr.rel (!%p16_p5) target bundleno = 2 (0x2), region = 97 }

// kernel: egnn_forward.9
= control target key start
LH: loop header
LB: loop body
LE: loop exit
PB: predicated region body
PF: predicated region fallthrough
CT: control target
= control target key end

     0   :  { %vm58_vm0 = vcmask 1045504   ;;  %vm54_vm1 = vcmask 48128   ;;  %v2603_v0 = vmov 0.0   ;;  %vm2604_vm2 = vmmov 0   ;;  %s4856_s2 = inlined_call_operand.vmem [shape: f32[6,128], index: 2, kind: input, shape index: {}]   ;;  %s4857_s1 = inlined_call_operand.vmem [shape: f32[8,6], index: 1, kind: input, shape index: {}]   ;;  %s4858_s5 = inlined_call_operand.vmem [shape: f32[128,512], index: 5, kind: input, shape index: {}]   ;;  %s4859_s4 = inlined_call_operand.vmem [shape: f32[256,512], index: 4, kind: input, shape index: {}]   ;;  %s4860_s3 = inlined_call_operand.vmem [shape: f32[1,128], index: 3, kind: input, shape index: {}]   ;;  %s4861_s0 = inlined_call_operand.vmem [shape: f32[2,8,256], index: 0, kind: input, shape index: {}]   ;;  %s4862_s7 = inlined_call_operand.vmem [shape: f32[512,512], index: 7, kind: input, shape index: {}]   ;;  %s4863_s6 = inlined_call_operand.vmem [shape: f32[1,512], index: 6, kind: input, shape index: {}]   ;;  %s4864_s9 = inlined_call_operand.vmem [shape: f32[512,512], index: 9, kind: input, shape index: {}]   ;;  %s4865_s8 = inlined_call_operand.vmem [shape: f32[1,512], index: 8, kind: input, shape index: {}]   ;;  %s4866_s10 = inlined_call_operand.vmem [shape: f32[1,512], index: 10, kind: input, shape index: {}]   ;;  %s4867_s11 = inlined_call_operand.vmem [shape: f32[2,8,256], index: 11, kind: output, shape index: {}]  }
   0x1   :  { %1840 = vmatprep.subr.mxu0 %v2603_v0  ;;  %v46_v1 = vld [vmem:[%s4856_s2] sm:$0x3f]  ;;  %1842 = vmatprep.mubr.msk.f32.mxu0 %vm2604_vm2, %v2603_v0  ;;  %v261_v3 = vld [vmem:[%s4858_s5 + $0x8] sm:$0xff]  ;;  %v263_v5 = vld [vmem:[%s4858_s5 + $0x18] sm:$0xff] }
   0x2   :  { %v45_v2 = vld [vmem:[%s4857_s1] sm:$0xff]  ;;  %1841 = vmatpush3.msk.msra.mxu0 %vm58_vm0, %v46_v1  ;;  %v265_v4 = vld [vmem:[%s4858_s5 + $0x28] sm:$0xff]  ;;  %v267_v6 = vld [vmem:[%s4858_s5 + $0x38] sm:$0xff]  ;;  %388 = vmatprep.mubr.f32.mxu1 %v2603_v0 }
   0x3   :  { %1843 = vmatmul.mubr.msk.f32.vlgmr.msra.gmra.mrb[0].mxu0 %vm54_vm1, %v45_v2  ;;  %v1845_v7 = vpack.c.bf16 %v265_v4, %v261_v3  ;;  %v1877_v8 = vpack.c.bf16 %v267_v6, %v263_v5  ;;  %v260_v9 = vld [vmem:[%s4858_s5] sm:$0xff]  ;;  %v262_v11 = vld [vmem:[%s4858_s5 + $0x10] sm:$0xff]  ;;  %v269_v14 = vld [vmem:[%s4858_s5 + $0x48] sm:$0xff] }
   0x4   :  { %v264_v10 = vld [vmem:[%s4858_s5 + $0x20] sm:$0xff]  ;;  %v266_v13 = vld [vmem:[%s4858_s5 + $0x30] sm:$0xff]  ;;  %v273_v15 = vld [vmem:[%s4858_s5 + $0x68] sm:$0xff]  ;;  %459 = vmatprep.mubr.f32.mxu0 %v2603_v0 }
   0x5   :  { %v1847_v12 = vpack.c.bf16 %v264_v10, %v260_v9  ;;  %1846 = vmatprep.subr.bf16.mxu1 %v1845_v7  ;;  %1878 = vmatprep.subr.bf16.mxu0 %v1877_v8  ;;  %v1879_v16 = vpack.c.bf16 %v266_v13, %v262_v11  ;;  %v1849_v17 = vpack.c.bf16 %v273_v15, %v269_v14  ;;  %v271_v18 = vld [vmem:[%s4858_s5 + $0x58] sm:$0xff]  ;;  %v268_v20 = vld [vmem:[%s4858_s5 + $0x40] sm:$0xff]  ;;  %v270_v23 = vld [vmem:[%s4858_s5 + $0x50] sm:$0xff] }
   0x6   :  { %v275_v19 = vld [vmem:[%s4858_s5 + $0x78] sm:$0xff]  ;;  %v272_v22 = vld [vmem:[%s4858_s5 + $0x60] sm:$0xff]  ;;  %v274_v24 = vld [vmem:[%s4858_s5 + $0x70] sm:$0xff] }
   0x7   :  { %1848 = vmatpush1.bf16.msra.mxu1 %v1847_v12  ;;  %v1881_v21 = vpack.c.bf16 %v275_v19, %v271_v18  ;;  %1880 = vmatpush1.bf16.msra.mxu0 %v1879_v16  ;;  %v1851_v25 = vpack.c.bf16 %v272_v22, %v268_v20  ;;  %v1883_v26 = vpack.c.bf16 %v274_v24, %v270_v23  ;;  %v277_v27 = vld [vmem:[%s4858_s5 + $0x88] sm:$0xff]  ;;  %v279_v29 = vld [vmem:[%s4858_s5 + $0x98] sm:$0xff]  ;;  %v276_v32 = vld [vmem:[%s4858_s5 + $0x80] sm:$0xff] }
   0x8   :  { %1850 = vmatprep.subr.bf16.mxu1 %v1849_v17  ;;  %v281_v28 = vld [vmem:[%s4858_s5 + $0xa8] sm:$0xff]  ;;  %v283_v31 = vld [vmem:[%s4858_s5 + $0xb8] sm:$0xff]  ;;  %v280_v33 = vld [vmem:[%s4858_s5 + $0xa0] sm:$0xff] }
   0x9   :  { %1882 = vmatprep.subr.bf16.mxu0 %v1881_v21  ;;  %v1853_v30 = vpack.c.bf16 %v281_v28, %v277_v27  ;;  %v1885_v34 = vpack.c.bf16 %v283_v31, %v279_v29  ;;  %v278_v35 = vld [vmem:[%s4858_s5 + $0x90] sm:$0xff]  ;;  %v285_v37 = vld [vmem:[%s4858_s5 + $0xc8] sm:$0xff]  ;;  %v1855_v38 = vpack.c.bf16 %v280_v33, %v276_v32  ;;  %v287_v40 = vld [vmem:[%s4858_s5 + $0xd8] sm:$0xff] }
   0xa   :  { %v282_v36 = vld [vmem:[%s4858_s5 + $0xb0] sm:$0xff]  ;;  %v289_v39 = vld [vmem:[%s4858_s5 + $0xe8] sm:$0xff]  ;;  %v291_v41 = vld [vmem:[%s4858_s5 + $0xf8] sm:$0xff] }
   0xb   :  { %1852 = vmatpush1.bf16.msra.mxu1 %v1851_v25  ;;  %1884 = vmatpush1.bf16.msra.mxu0 %v1883_v26  ;;  %v1887_v42 = vpack.c.bf16 %v282_v36, %v278_v35  ;;  %v1857_v43 = vpack.c.bf16 %v289_v39, %v285_v37  ;;  %v284_v44 = vld [vmem:[%s4858_s5 + $0xc0] sm:$0xff]  ;;  %v286_v46 = vld [vmem:[%s4858_s5 + $0xd0] sm:$0xff]  ;;  %v1889_v47 = vpack.c.bf16 %v291_v41, %v287_v40  ;;  %v293_v49 = vld [vmem:[%s4858_s5 + $0x108] sm:$0xff] }
   0xc   :  { %1854 = vmatprep.subr.bf16.mxu1 %v1853_v30  ;;  %v288_v45 = vld [vmem:[%s4858_s5 + $0xe0] sm:$0xff]  ;;  %1886 = vmatprep.subr.bf16.mxu0 %v1885_v34  ;;  %v290_v48 = vld [vmem:[%s4858_s5 + $0xf0] sm:$0xff]  ;;  %v297_v50 = vld [vmem:[%s4858_s5 + $0x128] sm:$0xff] }
   0xd   :  { %v295_v51 = vld [vmem:[%s4858_s5 + $0x118] sm:$0xff]  ;;  %v1859_v53 = vpack.c.bf16 %v288_v45, %v284_v44  ;;  %v1891_v54 = vpack.c.bf16 %v290_v48, %v286_v46  ;;  %v1861_v55 = vpack.c.bf16 %v297_v50, %v293_v49  ;;  %v292_v56 = vld [vmem:[%s4858_s5 + $0x100] sm:$0xff]  ;;  %v294_v58 = vld [vmem:[%s4858_s5 + $0x110] sm:$0xff] }
   0xe   :  { %v299_v52 = vld [vmem:[%s4858_s5 + $0x138] sm:$0xff]  ;;  %v296_v57 = vld [vmem:[%s4858_s5 + $0x120] sm:$0xff]  ;;  %v298_v60 = vld [vmem:[%s4858_s5 + $0x130] sm:$0xff] }
   0xf   :  { %1856 = vmatpush1.bf16.msra.mxu1 %v1855_v38  ;;  %1888 = vmatpush1.bf16.msra.mxu0 %v1887_v42  ;;  %v1893_v59 = vpack.c.bf16 %v299_v52, %v295_v51  ;;  %v301_v61 = vld [vmem:[%s4858_s5 + $0x148] sm:$0xff]  ;;  %v303_v63 = vld [vmem:[%s4858_s5 + $0x158] sm:$0xff]  ;;  %v1863_v1 = vpack.c.bf16 %v296_v57, %v292_v56  ;;  %v1895_v2 = vpack.c.bf16 %v298_v60, %v294_v58  ;;  %v300_v4 = vld [vmem:[%s4858_s5 + $0x140] sm:$0xff] }
  0x10   :  { %1858 = vmatprep.subr.bf16.mxu1 %v1857_v43  ;;  %1890 = vmatprep.subr.bf16.mxu0 %v1889_v47  ;;  %v305_v62 = vld [vmem:[%s4858_s5 + $0x168] sm:$0xff]  ;;  %v307_v0 = vld [vmem:[%s4858_s5 + $0x178] sm:$0xff]  ;;  %v304_v5 = vld [vmem:[%s4858_s5 + $0x160] sm:$0xff] }
  0x11   :  { %v1865_v3 = vpack.c.bf16 %v305_v62, %v301_v61  ;;  %v302_v6 = vld [vmem:[%s4858_s5 + $0x150] sm:$0xff]  ;;  %v1897_v7 = vpack.c.bf16 %v307_v0, %v303_v63  ;;  %v309_v9 = vld [vmem:[%s4858_s5 + $0x188] sm:$0xff]  ;;  %v311_v11 = vld [vmem:[%s4858_s5 + $0x198] sm:$0xff]  ;;  %v1867_v13 = vpack.c.bf16 %v304_v5, %v300_v4 }
  0x12   :  { %v306_v8 = vld [vmem:[%s4858_s5 + $0x170] sm:$0xff]  ;;  %v313_v10 = vld [vmem:[%s4858_s5 + $0x1a8] sm:$0xff]  ;;  %v315_v12 = vld [vmem:[%s4858_s5 + $0x1b8] sm:$0xff] }
  0x13   :  { %1860 = vmatpush1.bf16.msra.mxu1 %v1859_v53  ;;  %1892 = vmatpush1.bf16.msra.mxu0 %v1891_v54  ;;  %v1899_v14 = vpack.c.bf16 %v306_v8, %v302_v6  ;;  %v1869_v15 = vpack.c.bf16 %v313_v10, %v309_v9  ;;  %v308_v16 = vld [vmem:[%s4858_s5 + $0x180] sm:$0xff]  ;;  %v310_v18 = vld [vmem:[%s4858_s5 + $0x190] sm:$0xff]  ;;  %v1901_v19 = vpack.c.bf16 %v315_v12, %v311_v11  ;;  %v317_v21 = vld [vmem:[%s4858_s5 + $0x1c8] sm:$0xff] }
  0x14   :  { %1862 = vmatprep.subr.bf16.mxu1 %v1861_v55  ;;  %1894 = vmatprep.subr.bf16.mxu0 %v1893_v59  ;;  %v312_v17 = vld [vmem:[%s4858_s5 + $0x1a0] sm:$0xff]  ;;  %v314_v20 = vld [vmem:[%s4858_s5 + $0x1b0] sm:$0xff]  ;;  %v321_v22 = vld [vmem:[%s4858_s5 + $0x1e8] sm:$0xff] }
  0x15   :  { %v319_v23 = vld [vmem:[%s4858_s5 + $0x1d8] sm:$0xff]  ;;  %v1871_v25 = vpack.c.bf16 %v312_v17, %v308_v16  ;;  %v1903_v26 = vpack.c.bf16 %v314_v20, %v310_v18  ;;  %v1873_v27 = vpack.c.bf16 %v321_v22, %v317_v21  ;;  %v316_v28 = vld [vmem:[%s4858_s5 + $0x1c0] sm:$0xff]  ;;  %v318_v31 = vld [vmem:[%s4858_s5 + $0x1d0] sm:$0xff] }
  0x16   :  { %v323_v24 = vld [vmem:[%s4858_s5 + $0x1f8] sm:$0xff]  ;;  %v320_v29 = vld [vmem:[%s4858_s5 + $0x1e0] sm:$0xff]  ;;  %v322_v32 = vld [vmem:[%s4858_s5 + $0x1f0] sm:$0xff] }
  0x17   :  { %1864 = vmatpush1.bf16.msra.mxu1 %v1863_v1  ;;  %1896 = vmatpush1.bf16.msra.mxu0 %v1895_v2  ;;  %v1905_v30 = vpack.c.bf16 %v323_v24, %v319_v23  ;;  %v1875_v33 = vpack.c.bf16 %v320_v29, %v316_v28  ;;  %v1907_v34 = vpack.c.bf16 %v322_v32, %v318_v31  ;;  %v133_v35 = vld [vmem:[%s4859_s4 + $0x8] sm:$0xff]  ;;  %v135_v37 = vld [vmem:[%s4859_s4 + $0x18] sm:$0xff]  ;;  %v1825_v41 = vld [vmem:[%s4860_s3] ss:$0 sm:$0xff] }
  0x18   :  { %1866 = vmatprep.subr.bf16.mxu1 %v1865_v3  ;;  %1898 = vmatprep.subr.bf16.mxu0 %v1897_v7  ;;  %v137_v36 = vld [vmem:[%s4859_s4 + $0x28] sm:$0xff]  ;;  %v139_v39 = vld [vmem:[%s4859_s4 + $0x38] sm:$0xff]  ;;  %v132_v42 = vld [vmem:[%s4859_s4] sm:$0xff] }
  0x19   :  { %v1909_v38 = vpack.c.bf16 %v137_v36, %v133_v35  ;;  %v1973_v40 = vpack.c.bf16 %v139_v39, %v135_v37  ;;  %v136_v43 = vld [vmem:[%s4859_s4 + $0x20] sm:$0xff]  ;;  %v134_v44 = vld [vmem:[%s4859_s4 + $0x10] sm:$0xff]  ;;  %v141_v46 = vld [vmem:[%s4859_s4 + $0x48] sm:$0xff] }
  0x1a   :  { %v138_v45 = vld [vmem:[%s4859_s4 + $0x30] sm:$0xff]  ;;  %v145_v47 = vld [vmem:[%s4859_s4 + $0x68] sm:$0xff]  ;;  %v143_v48 = vld [vmem:[%s4859_s4 + $0x58] sm:$0xff]  ;;  %v1911_v53 = vpack.c.bf16 %v136_v43, %v132_v42 }
  0x1b   :  { %1868 = vmatpush1.bf16.msra.mxu1 %v1867_v13  ;;  %1900 = vmatpush1.bf16.msra.mxu0 %v1899_v14  ;;  %v147_v49 = vld [vmem:[%s4859_s4 + $0x78] sm:$0xff]  ;;  %v39_v50 = vld [vmem:[%s4861_s0 + $0x8] sm:$0xff]  ;;  %v1975_v54 = vpack.c.bf16 %v138_v45, %v134_v44  ;;  %v140_v55 = vld [vmem:[%s4859_s4 + $0x40] sm:$0xff]  ;;  %v1913_v59 = vpack.c.bf16 %v145_v47, %v141_v46 }
  0x1c   :  { %1870 = vmatprep.subr.bf16.mxu1 %v1869_v15  ;;  %1902 = vmatprep.subr.bf16.mxu0 %v1901_v19  ;;  %v1824_v51 = vld [vmem:[%s4861_s0 + $0x18] sm:$0xff]  ;;  %v144_v56 = vld [vmem:[%s4859_s4 + $0x60] sm:$0xff]  ;;  %v1977_v60 = vpack.c.bf16 %v147_v49, %v143_v48  ;;  %v142_v61 = vld [vmem:[%s4859_s4 + $0x50] sm:$0xff] }
  0x1d   :  { %v146_v62 = vld [vmem:[%s4859_s4 + $0x70] sm:$0xff]  ;;  %v149_v63 = vld [vmem:[%s4859_s4 + $0x88] sm:$0xff]  ;;  %v151_v1 = vld [vmem:[%s4859_s4 + $0x98] sm:$0xff]  ;;  %v44_v3 = vadd.f32 %v1824_v51, %v39_v50  ;;  %v1915_v4 = vpack.c.bf16 %v144_v56, %v140_v55 }
  0x1e   :  { %v153_v0 = vld [vmem:[%s4859_s4 + $0xa8] sm:$0xff]  ;;  %v155_v2 = vld [vmem:[%s4859_s4 + $0xb8] sm:$0xff]  ;;  %v1979_v5 = vpack.c.bf16 %v146_v62, %v142_v61  ;;  %v148_v6 = vld [vmem:[%s4859_s4 + $0x80] sm:$0xff] }
  0x1f   :  { %1872 = vmatpush1.bf16.msra.mxu1 %v1871_v25  ;;  %1904 = vmatpush1.bf16.msra.mxu0 %v1903_v26  ;;  %v152_v7 = vld [vmem:[%s4859_s4 + $0xa0] sm:$0xff]  ;;  %v1917_v8 = vpack.c.bf16 %v153_v0, %v149_v63  ;;  %v1981_v9 = vpack.c.bf16 %v155_v2, %v151_v1  ;;  %v150_v10 = vld [vmem:[%s4859_s4 + $0x90] sm:$0xff]  ;;  %v157_v12 = vld [vmem:[%s4859_s4 + $0xc8] sm:$0xff] }
  0x20   :  { %1874 = vmatprep.subr.bf16.mxu1 %v1873_v27  ;;  %1906 = vmatprep.subr.bf16.mxu0 %v1905_v30  ;;  %v154_v11 = vld [vmem:[%s4859_s4 + $0xb0] sm:$0xff]  ;;  %v161_v13 = vld [vmem:[%s4859_s4 + $0xe8] sm:$0xff]  ;;  %v159_v14 = vld [vmem:[%s4859_s4 + $0xd8] sm:$0xff]  ;;  %v1919_v16 = vpack.c.bf16 %v152_v7, %v148_v6 }
  0x21   :  { %v163_v15 = vld [vmem:[%s4859_s4 + $0xf8] sm:$0xff]  ;;  %v1983_v17 = vpack.c.bf16 %v154_v11, %v150_v10  ;;  %v156_v18 = vld [vmem:[%s4859_s4 + $0xc0] sm:$0xff]  ;;  %v1921_v20 = vpack.c.bf16 %v161_v13, %v157_v12  ;;  %v158_v22 = vld [vmem:[%s4859_s4 + $0xd0] sm:$0xff] }
  0x22   :  { %v160_v19 = vld [vmem:[%s4859_s4 + $0xe0] sm:$0xff]  ;;  %v1985_v21 = vpack.c.bf16 %v163_v15, %v159_v14  ;;  %v162_v23 = vld [vmem:[%s4859_s4 + $0xf0] sm:$0xff]  ;;  %v165_v24 = vld [vmem:[%s4859_s4 + $0x108] sm:$0xff] }
  0x23   :  { %1876 = vmatpush1.bf16.msra.mxu1 %v1875_v33  ;;  %1908 = vmatpush1.bf16.msra.mxu0 %v1907_v34  ;;  %v169_v25 = vld [vmem:[%s4859_s4 + $0x128] sm:$0xff]  ;;  %v167_v26 = vld [vmem:[%s4859_s4 + $0x118] sm:$0xff]  ;;  %v1923_v28 = vpack.c.bf16 %v160_v19, %v156_v18  ;;  %v1987_v29 = vpack.c.bf16 %v162_v23, %v158_v22  ;;  %v164_v30 = vld [vmem:[%s4859_s4 + $0x100] sm:$0xff] }
  0x24   :  { %1910 = vmatprep.subr.bf16.mxu1 %v1909_v38  ;;  %1974 = vmatprep.subr.bf16.mxu0 %v1973_v40  ;;  %v171_v27 = vld [vmem:[%s4859_s4 + $0x138] sm:$0xff]  ;;  %v168_v31 = vld [vmem:[%s4859_s4 + $0x120] sm:$0xff]  ;;  %v1925_v32 = vpack.c.bf16 %v169_v25, %v165_v24  ;;  %v166_v34 = vld [vmem:[%s4859_s4 + $0x110] sm:$0xff] }
  0x25   :  { %v1989_v33 = vpack.c.bf16 %v171_v27, %v167_v26  ;;  %v170_v35 = vld [vmem:[%s4859_s4 + $0x130] sm:$0xff]  ;;  %v173_v36 = vld [vmem:[%s4859_s4 + $0x148] sm:$0xff]  ;;  %v175_v38 = vld [vmem:[%s4859_s4 + $0x158] sm:$0xff]  ;;  %v1927_v40 = vpack.c.bf16 %v168_v31, %v164_v30 }
  0x26   :  { %v177_v37 = vld [vmem:[%s4859_s4 + $0x168] sm:$0xff]  ;;  %v179_v39 = vld [vmem:[%s4859_s4 + $0x178] sm:$0xff]  ;;  %v172_v42 = vld [vmem:[%s4859_s4 + $0x140] sm:$0xff] }
  0x27   :  { %v176_v43 = vld [vmem:[%s4859_s4 + $0x160] sm:$0xff]  ;;  %v1929_v44 = vpack.c.bf16 %v177_v37, %v173_v36  ;;  %v1993_v45 = vpack.c.bf16 %v179_v39, %v175_v38  ;;  %v174_v46 = vld [vmem:[%s4859_s4 + $0x150] sm:$0xff]  ;;  %v181_v48 = vld [vmem:[%s4859_s4 + $0x188] sm:$0xff] }
  0x28   :  { %v178_v47 = vld [vmem:[%s4859_s4 + $0x170] sm:$0xff]  ;;  %v185_v49 = vld [vmem:[%s4859_s4 + $0x1a8] sm:$0xff]  ;;  %v183_v50 = vld [vmem:[%s4859_s4 + $0x198] sm:$0xff] }
  0x29   :  { %v187_v51 = vld [vmem:[%s4859_s4 + $0x1b8] sm:$0xff]  ;;  %v184_v55 = vld [vmem:[%s4859_s4 + $0x1a0] sm:$0xff]  ;;  %v1933_v56 = vpack.c.bf16 %v185_v49, %v181_v48  ;;  %v193_v61 = vld [vmem:[%s4859_s4 + $0x1e8] sm:$0xff] }
  0x2a   :  { %v191_v62 = vld [vmem:[%s4859_s4 + $0x1d8] sm:$0xff]  ;;  %v188_v2 = vld [vmem:[%s4859_s4 + $0x1c0] sm:$0xff]  ;;  %v190_v6 = vld [vmem:[%s4859_s4 + $0x1d0] sm:$0xff] }
  0x2b   :  { %v195_v63 = vld [vmem:[%s4859_s4 + $0x1f8] sm:$0xff]  ;;  %v194_v7 = vld [vmem:[%s4859_s4 + $0x1f0] sm:$0xff]  ;;  %v196_v14 = vld [vmem:[%s4859_s4 + $0x200] sm:$0xff] }
  0x2c   :  { %v199_v10 = vld [vmem:[%s4859_s4 + $0x218] sm:$0xff]  ;;  %v2003_v13 = vpack.c.bf16 %v194_v7, %v190_v6  ;;  %v200_v15 = vld [vmem:[%s4859_s4 + $0x220] sm:$0xff]  ;;  %v198_v18 = vld [vmem:[%s4859_s4 + $0x210] sm:$0xff] }
  0x2d   :  { %v203_v11 = vld [vmem:[%s4859_s4 + $0x238] sm:$0xff]  ;;  %v202_v19 = vld [vmem:[%s4859_s4 + $0x230] sm:$0xff]  ;;  %v1943_v24 = vpack.c.bf16 %v200_v15, %v196_v14  ;;  %v204_v26 = vld [vmem:[%s4859_s4 + $0x240] sm:$0xff] }
  0x2e   :  { %v207_v22 = vld [vmem:[%s4859_s4 + $0x258] sm:$0xff]  ;;  %v2007_v25 = vpack.c.bf16 %v202_v19, %v198_v18  ;;  %v208_v27 = vld [vmem:[%s4859_s4 + $0x260] sm:$0xff]  ;;  %v206_v30 = vld [vmem:[%s4859_s4 + $0x250] sm:$0xff] }
  0x2f   :  { %v211_v23 = vld [vmem:[%s4859_s4 + $0x278] sm:$0xff]  ;;  %v210_v31 = vld [vmem:[%s4859_s4 + $0x270] sm:$0xff]  ;;  %v1947_v36 = vpack.c.bf16 %v208_v27, %v204_v26  ;;  %v212_v38 = vld [vmem:[%s4859_s4 + $0x280] sm:$0xff] }
  0x30   :  { %v2011_v37 = vpack.c.bf16 %v210_v31, %v206_v30  ;;  %v216_v39 = vld [vmem:[%s4859_s4 + $0x2a0] sm:$0xff]  ;;  %v239_v6 = vld [vmem:[%s4859_s4 + $0x358] sm:$0xff]  ;;  %v238_v14 = vld [vmem:[%s4859_s4 + $0x350] sm:$0xff] }
  0x31   :  { %v1951_v48 = vpack.c.bf16 %v216_v39, %v212_v38  ;;  %v243_v7 = vld [vmem:[%s4859_s4 + $0x378] sm:$0xff]  ;;  %v242_v15 = vld [vmem:[%s4859_s4 + $0x370] sm:$0xff] }
  0x32   :  { %v247_v18 = vld [vmem:[%s4859_s4 + $0x398] sm:$0xff]  ;;  %v246_v26 = vld [vmem:[%s4859_s4 + $0x390] sm:$0xff] }
  0x33   :  { %v251_v19 = vld [vmem:[%s4859_s4 + $0x3b8] sm:$0xff]  ;;  %v250_v27 = vld [vmem:[%s4859_s4 + $0x3b0] sm:$0xff] }
  0x34   :  { %v255_v30 = vld [vmem:[%s4859_s4 + $0x3d8] sm:$0xff]  ;;  %v254_v38 = vld [vmem:[%s4859_s4 + $0x3d0] sm:$0xff] }
  0x35   :  { %v259_v31 = vld [vmem:[%s4859_s4 + $0x3f8] sm:$0xff]  ;;  %v258_v39 = vld [vmem:[%s4859_s4 + $0x3f0] sm:$0xff] }
  0xd6   :  { %v128_v52 = vpop.f32.mrb[0].mxu0 }
  0xd7   :  { %v129_v57 = vadd.f32 %v1825_v41, %v128_v52  ;;  %v1844_v58 = vpop.f32.mrb[1].mxu0  ;;  %v1991_v41 = vpack.c.bf16 %v170_v35, %v166_v34  ;;  %v1931_v52 = vpack.c.bf16 %v176_v43, %v172_v42  ;;  %v215_v34 = vld [vmem:[%s4859_s4 + $0x298] sm:$0xff]  ;;  %v214_v42 = vld [vmem:[%s4859_s4 + $0x290] sm:$0xff] }
  0xd8   :  { %v182_v58 = vld [vmem:[%s4859_s4 + $0x190] sm:$0xff]  ;;  %v219_v35 = vld [vmem:[%s4859_s4 + $0x2b8] sm:$0xff] }
  0xd9   :  { %389 = vmatmul.mubr.f32.vlgmr.msra.gmra.mrb[0].mxu1 %v129_v57  ;;  %460 = vmatmul.mubr.f32.vlgmr.msra.gmra.mrb[2].mxu0 %v129_v57  ;;  %v1997_v57 = vpack.c.bf16 %v187_v51, %v183_v50  ;;  %v218_v43 = vld [vmem:[%s4859_s4 + $0x2b0] sm:$0xff]  ;;  %v220_v50 = vld [vmem:[%s4859_s4 + $0x2c0] sm:$0xff] }
  0xda   :  { %1912 = vmatpush1.bf16.msra.mxu1 %v1911_v53  ;;  %1976 = vmatpush1.bf16.msra.mxu0 %v1975_v54  ;;  %v1995_v53 = vpack.c.bf16 %v178_v47, %v174_v46  ;;  %v180_v54 = vld [vmem:[%s4859_s4 + $0x180] sm:$0xff]  ;;  %v223_v46 = vld [vmem:[%s4859_s4 + $0x2d8] sm:$0xff]  ;;  %v2015_v49 = vpack.c.bf16 %v218_v43, %v214_v42 }
  0xdb   :  { %1914 = vmatprep.subr.bf16.mxu1 %v1913_v59  ;;  %1978 = vmatprep.subr.bf16.mxu0 %v1977_v60  ;;  %v186_v59 = vld [vmem:[%s4859_s4 + $0x1b0] sm:$0xff]  ;;  %v189_v60 = vld [vmem:[%s4859_s4 + $0x1c8] sm:$0xff]  ;;  %v1935_v0 = vpack.c.bf16 %v184_v55, %v180_v54  ;;  %v227_v47 = vld [vmem:[%s4859_s4 + $0x2f8] sm:$0xff] }
  0xdc   :  { %530 = vmatprep.mubr.f32.mxu1 %v44_v3  ;;  %601 = vmatprep.mubr.f32.mxu0 %v44_v3  ;;  %v1999_v1 = vpack.c.bf16 %v186_v59, %v182_v58  ;;  %v192_v3 = vld [vmem:[%s4859_s4 + $0x1e0] sm:$0xff]  ;;  %v222_v54 = vld [vmem:[%s4859_s4 + $0x2d0] sm:$0xff]  ;;  %v231_v58 = vld [vmem:[%s4859_s4 + $0x318] sm:$0xff] }
  0xdd   :  { %v1939_v12 = vpack.c.bf16 %v192_v3, %v188_v2  ;;  %v224_v51 = vld [vmem:[%s4859_s4 + $0x2e0] sm:$0xff]  ;;  %v226_v55 = vld [vmem:[%s4859_s4 + $0x2f0] sm:$0xff]  ;;  %v235_v59 = vld [vmem:[%s4859_s4 + $0x338] sm:$0xff] }
  0xde   :  { %1916 = vmatpush1.bf16.msra.mxu1 %v1915_v4  ;;  %1980 = vmatpush1.bf16.msra.mxu0 %v1979_v5  ;;  %v1937_v4 = vpack.c.bf16 %v193_v61, %v189_v60  ;;  %v2001_v5 = vpack.c.bf16 %v195_v63, %v191_v62  ;;  %v1955_v60 = vpack.c.bf16 %v224_v51, %v220_v50  ;;  %v228_v62 = vld [vmem:[%s4859_s4 + $0x300] sm:$0xff]  ;;  %v230_v2 = vld [vmem:[%s4859_s4 + $0x310] sm:$0xff]  ;;  %v665_v42 = vld [vmem:[%s4862_s7 + $0x18] sm:$0xff] }
  0xdf   :  { %1918 = vmatprep.subr.bf16.mxu1 %v1917_v8  ;;  %1982 = vmatprep.subr.bf16.mxu0 %v1981_v9  ;;  %v197_v8 = vld [vmem:[%s4859_s4 + $0x208] sm:$0xff]  ;;  %v2019_v61 = vpack.c.bf16 %v226_v55, %v222_v54  ;;  %v232_v63 = vld [vmem:[%s4859_s4 + $0x320] sm:$0xff]  ;;  %v234_v3 = vld [vmem:[%s4859_s4 + $0x330] sm:$0xff] }
  0xe0   :  { %v201_v9 = vld [vmem:[%s4859_s4 + $0x228] sm:$0xff]  ;;  %v669_v43 = vld [vmem:[%s4862_s7 + $0x38] sm:$0xff] }
  0xe1   :  { %v2165_v51 = vpack.c.bf16 %v669_v43, %v665_v42  ;;  %v671_v54 = vld [vmem:[%s4862_s7 + $0x48] sm:$0xff]  ;;  %v709_v42 = vld [vmem:[%s4862_s7 + $0x178] sm:$0xff] }
  0xe2   :  { %1920 = vmatpush1.bf16.msra.mxu1 %v1919_v16  ;;  %1984 = vmatpush1.bf16.msra.mxu0 %v1983_v17  ;;  %v1941_v16 = vpack.c.bf16 %v201_v9, %v197_v8  ;;  %v2005_v17 = vpack.c.bf16 %v203_v11, %v199_v10  ;;  %v1959_v8 = vpack.c.bf16 %v232_v63, %v228_v62  ;;  %v236_v10 = vld [vmem:[%s4859_s4 + $0x340] sm:$0xff]  ;;  %v675_v55 = vld [vmem:[%s4862_s7 + $0x68] sm:$0xff] }
  0xe3   :  { %1922 = vmatprep.subr.bf16.mxu1 %v1921_v20  ;;  %1986 = vmatprep.subr.bf16.mxu0 %v1985_v21  ;;  %v205_v20 = vld [vmem:[%s4859_s4 + $0x248] sm:$0xff]  ;;  %v2023_v9 = vpack.c.bf16 %v234_v3, %v230_v2  ;;  %v240_v11 = vld [vmem:[%s4859_s4 + $0x360] sm:$0xff]  ;;  %v2041_v63 = vpack.c.bf16 %v675_v55, %v671_v54  ;;  %v676_v2 = vld [vmem:[%s4862_s7 + $0x70] sm:$0xff] }
  0xe4   :  { %v209_v21 = vld [vmem:[%s4859_s4 + $0x268] sm:$0xff]  ;;  %v674_v62 = vld [vmem:[%s4862_s7 + $0x60] sm:$0xff]  ;;  %v717_v54 = vld [vmem:[%s4862_s7 + $0x1b8] sm:$0xff] }
  0xe5   :  { %v679_v3 = vld [vmem:[%s4862_s7 + $0x88] sm:$0xff] }
  0xe6   :  { %1924 = vmatpush1.bf16.msra.mxu1 %v1923_v28  ;;  %1988 = vmatpush1.bf16.msra.mxu0 %v1987_v29  ;;  %v1945_v28 = vpack.c.bf16 %v209_v21, %v205_v20  ;;  %v2009_v29 = vpack.c.bf16 %v211_v23, %v207_v22  ;;  %v1963_v20 = vpack.c.bf16 %v240_v11, %v236_v10  ;;  %v244_v22 = vld [vmem:[%s4859_s4 + $0x380] sm:$0xff] }
  0xe7   :  { %1926 = vmatprep.subr.bf16.mxu1 %v1925_v32  ;;  %1990 = vmatprep.subr.bf16.mxu0 %v1989_v33  ;;  %v213_v32 = vld [vmem:[%s4859_s4 + $0x288] sm:$0xff]  ;;  %v2027_v21 = vpack.c.bf16 %v242_v15, %v238_v14  ;;  %v248_v23 = vld [vmem:[%s4859_s4 + $0x3a0] sm:$0xff]  ;;  %v684_v14 = vld [vmem:[%s4862_s7 + $0xb0] sm:$0xff] }
  0xe8   :  { %v217_v33 = vld [vmem:[%s4859_s4 + $0x2a8] sm:$0xff]  ;;  %v682_v10 = vld [vmem:[%s4862_s7 + $0xa0] sm:$0xff] }
  0xe9   :  { %v687_v15 = vld [vmem:[%s4862_s7 + $0xc8] sm:$0xff] }
  0xea   :  { %1928 = vmatpush1.bf16.msra.mxu1 %v1927_v40  ;;  %1992 = vmatpush1.bf16.msra.mxu0 %v1991_v41  ;;  %v1949_v40 = vpack.c.bf16 %v217_v33, %v213_v32  ;;  %v2013_v41 = vpack.c.bf16 %v219_v35, %v215_v34  ;;  %v1967_v32 = vpack.c.bf16 %v248_v23, %v244_v22  ;;  %v252_v34 = vld [vmem:[%s4859_s4 + $0x3c0] sm:$0xff] }
  0xeb   :  { %1930 = vmatprep.subr.bf16.mxu1 %v1929_v44  ;;  %1994 = vmatprep.subr.bf16.mxu0 %v1993_v45  ;;  %v221_v44 = vld [vmem:[%s4859_s4 + $0x2c8] sm:$0xff]  ;;  %v2031_v33 = vpack.c.bf16 %v250_v27, %v246_v26  ;;  %v256_v35 = vld [vmem:[%s4859_s4 + $0x3e0] sm:$0xff]  ;;  %v692_v26 = vld [vmem:[%s4862_s7 + $0xf0] sm:$0xff] }
  0xec   :  { %v225_v45 = vld [vmem:[%s4859_s4 + $0x2e8] sm:$0xff]  ;;  %v690_v22 = vld [vmem:[%s4862_s7 + $0xe0] sm:$0xff] }
  0xed   :  { %v695_v27 = vld [vmem:[%s4862_s7 + $0x108] sm:$0xff] }
  0xee   :  { %1932 = vmatpush1.bf16.msra.mxu1 %v1931_v52  ;;  %1996 = vmatpush1.bf16.msra.mxu0 %v1995_v53  ;;  %v1953_v52 = vpack.c.bf16 %v225_v45, %v221_v44  ;;  %v2017_v53 = vpack.c.bf16 %v227_v47, %v223_v46  ;;  %v38_v44 = vld [vmem:[%s4861_s0] sm:$0xff]  ;;  %v1971_v45 = vpack.c.bf16 %v256_v35, %v252_v34  ;;  %v1823_v47 = vld [vmem:[%s4861_s0 + $0x10] sm:$0xff] }
  0xef   :  { %1934 = vmatprep.subr.bf16.mxu1 %v1933_v56  ;;  %1998 = vmatprep.subr.bf16.mxu0 %v1997_v57  ;;  %v229_v56 = vld [vmem:[%s4859_s4 + $0x308] sm:$0xff]  ;;  %v2035_v46 = vpack.c.bf16 %v258_v39, %v254_v38  ;;  %v698_v34 = vld [vmem:[%s4862_s7 + $0x120] sm:$0xff]  ;;  %v700_v38 = vld [vmem:[%s4862_s7 + $0x130] sm:$0xff] }
  0xf0   :  { %v233_v57 = vld [vmem:[%s4859_s4 + $0x328] sm:$0xff] }
  0xf1   :  { %v703_v39 = vld [vmem:[%s4862_s7 + $0x148] sm:$0xff] }
  0xf2   :  { %1936 = vmatpush1.bf16.msra.mxu1 %v1935_v0  ;;  %2000 = vmatpush1.bf16.msra.mxu0 %v1999_v1  ;;  %v1957_v0 = vpack.c.bf16 %v233_v57, %v229_v56  ;;  %v2021_v1 = vpack.c.bf16 %v235_v59, %v231_v58  ;;  %v673_v56 = vld [vmem:[%s4862_s7 + $0x58] sm:$0xff]  ;;  %v43_v58 = vadd.f32 %v1823_v47, %v38_v44 }
  0xf3   :  { %1938 = vmatprep.subr.bf16.mxu1 %v1937_v4  ;;  %2002 = vmatprep.subr.bf16.mxu0 %v2001_v5  ;;  %v237_v4 = vld [vmem:[%s4859_s4 + $0x348] sm:$0xff]  ;;  %v677_v57 = vld [vmem:[%s4862_s7 + $0x78] sm:$0xff] }
  0xf4   :  { %v241_v5 = vld [vmem:[%s4859_s4 + $0x368] sm:$0xff] }
  0xf6   :  { %1940 = vmatpush1.bf16.msra.mxu1 %v1939_v12  ;;  %2004 = vmatpush1.bf16.msra.mxu0 %v2003_v13  ;;  %v1961_v12 = vpack.c.bf16 %v241_v5, %v237_v4  ;;  %v2025_v13 = vpack.c.bf16 %v243_v7, %v239_v6  ;;  %v683_v4 = vld [vmem:[%s4862_s7 + $0xa8] sm:$0xff]  ;;  %v681_v5 = vld [vmem:[%s4862_s7 + $0x98] sm:$0xff] }
  0xf7   :  { %1942 = vmatprep.subr.bf16.mxu1 %v1941_v16  ;;  %2006 = vmatprep.subr.bf16.mxu0 %v2005_v17  ;;  %v245_v16 = vld [vmem:[%s4859_s4 + $0x388] sm:$0xff]  ;;  %v685_v6 = vld [vmem:[%s4862_s7 + $0xb8] sm:$0xff]  ;;  %v2045_v11 = vpack.c.bf16 %v683_v4, %v679_v3 }
  0xf8   :  { %v249_v17 = vld [vmem:[%s4859_s4 + $0x3a8] sm:$0xff] }
  0xfa   :  { %1944 = vmatpush1.bf16.msra.mxu1 %v1943_v24  ;;  %2008 = vmatpush1.bf16.msra.mxu0 %v2007_v25  ;;  %v1965_v24 = vpack.c.bf16 %v249_v17, %v245_v16  ;;  %v2029_v25 = vpack.c.bf16 %v251_v19, %v247_v18  ;;  %v691_v16 = vld [vmem:[%s4862_s7 + $0xe8] sm:$0xff]  ;;  %v689_v17 = vld [vmem:[%s4862_s7 + $0xd8] sm:$0xff] }
  0xfb   :  { %1946 = vmatprep.subr.bf16.mxu1 %v1945_v28  ;;  %2010 = vmatprep.subr.bf16.mxu0 %v2009_v29  ;;  %v253_v28 = vld [vmem:[%s4859_s4 + $0x3c8] sm:$0xff]  ;;  %v693_v18 = vld [vmem:[%s4862_s7 + $0xf8] sm:$0xff]  ;;  %v2049_v23 = vpack.c.bf16 %v691_v16, %v687_v15 }
  0xfc   :  { %v257_v29 = vld [vmem:[%s4859_s4 + $0x3e8] sm:$0xff]  ;;  %v729_v16 = vld [vmem:[%s4862_s7 + $0x218] sm:$0xff] }
  0xfe   :  { %1948 = vmatpush1.bf16.msra.mxu1 %v1947_v36  ;;  %2012 = vmatpush1.bf16.msra.mxu0 %v2011_v37  ;;  %v1969_v36 = vpack.c.bf16 %v257_v29, %v253_v28  ;;  %v2033_v37 = vpack.c.bf16 %v259_v31, %v255_v30  ;;  %v699_v28 = vld [vmem:[%s4862_s7 + $0x128] sm:$0xff]  ;;  %v697_v29 = vld [vmem:[%s4862_s7 + $0x118] sm:$0xff] }
  0xff   :  { %1950 = vmatprep.subr.bf16.mxu1 %v1949_v40  ;;  %2014 = vmatprep.subr.bf16.mxu0 %v2013_v41  ;;  %v663_v40 = vld [vmem:[%s4862_s7 + $0x8] sm:$0xff]  ;;  %v701_v30 = vld [vmem:[%s4862_s7 + $0x138] sm:$0xff]  ;;  %v2053_v35 = vpack.c.bf16 %v699_v28, %v695_v27 }
 0x100   :  { %v667_v41 = vld [vmem:[%s4862_s7 + $0x28] sm:$0xff]  ;;  %v737_v27 = vld [vmem:[%s4862_s7 + $0x258] sm:$0xff] }
 0x101   :  { %v2037_v50 = vpack.c.bf16 %v667_v41, %v663_v40  ;;  %v707_v40 = vld [vmem:[%s4862_s7 + $0x168] sm:$0xff]  ;;  %v705_v41 = vld [vmem:[%s4862_s7 + $0x158] sm:$0xff] }
 0x102   :  { %1952 = vmatpush1.bf16.msra.mxu1 %v1951_v48  ;;  %2016 = vmatpush1.bf16.msra.mxu0 %v2015_v49  ;;  %v662_v48 = vld [vmem:[%s4862_s7] sm:$0xff]  ;;  %v2057_v47 = vpack.c.bf16 %v707_v40, %v703_v39  ;;  %v745_v39 = vld [vmem:[%s4862_s7 + $0x298] sm:$0xff] }
 0x103   :  { %1954 = vmatprep.subr.bf16.mxu1 %v1953_v52  ;;  %2018 = vmatprep.subr.bf16.mxu0 %v2017_v53  ;;  %v666_v49 = vld [vmem:[%s4862_s7 + $0x20] sm:$0xff]  ;;  %v664_v52 = vld [vmem:[%s4862_s7 + $0x10] sm:$0xff] }
 0x104   :  { %v668_v53 = vld [vmem:[%s4862_s7 + $0x30] sm:$0xff]  ;;  %v2039_v59 = vpack.c.bf16 %v666_v49, %v662_v48  ;;  %v2185_v48 = vpack.c.bf16 %v709_v42, %v705_v41  ;;  %v749_v41 = vld [vmem:[%s4862_s7 + $0x2b8] sm:$0xff]  ;;  %v742_v42 = vld [vmem:[%s4862_s7 + $0x280] sm:$0xff] }
 0x105   :  { %v704_v49 = vld [vmem:[%s4862_s7 + $0x150] sm:$0xff] }
 0x106   :  { %1956 = vmatpush1.bf16.msra.mxu1 %v1955_v60  ;;  %2020 = vmatpush1.bf16.msra.mxu0 %v2019_v61  ;;  %v2167_v60 = vpack.c.bf16 %v668_v53, %v664_v52  ;;  %v670_v61 = vld [vmem:[%s4862_s7 + $0x40] sm:$0xff]  ;;  %v715_v52 = vld [vmem:[%s4862_s7 + $0x1a8] sm:$0xff]  ;;  %v713_v53 = vld [vmem:[%s4862_s7 + $0x198] sm:$0xff] }
 0x107   :  { %1958 = vmatprep.subr.bf16.mxu1 %v1957_v0  ;;  %2022 = vmatprep.subr.bf16.mxu0 %v2021_v1  ;;  %v2169_v0 = vpack.c.bf16 %v677_v57, %v673_v56  ;;  %v672_v1 = vld [vmem:[%s4862_s7 + $0x50] sm:$0xff]  ;;  %v2043_v7 = vpack.c.bf16 %v674_v62, %v670_v61  ;;  %v710_v57 = vld [vmem:[%s4862_s7 + $0x180] sm:$0xff] }
 0x108   :  { %v712_v61 = vld [vmem:[%s4862_s7 + $0x190] sm:$0xff] }
 0x109   :  { %v716_v62 = vld [vmem:[%s4862_s7 + $0x1b0] sm:$0xff] }
 0x10a   :  { %1960 = vmatpush1.bf16.msra.mxu1 %v1959_v8  ;;  %2024 = vmatpush1.bf16.msra.mxu0 %v2023_v9  ;;  %v2171_v8 = vpack.c.bf16 %v676_v2, %v672_v1  ;;  %v678_v9 = vld [vmem:[%s4862_s7 + $0x80] sm:$0xff]  ;;  %v721_v1 = vld [vmem:[%s4862_s7 + $0x1d8] sm:$0xff]  ;;  %v2191_v4 = vpack.c.bf16 %v716_v62, %v712_v61  ;;  %v759_v61 = vld [vmem:[%s4862_s7 + $0x308] sm:$0xff] }
 0x10b   :  { %1962 = vmatprep.subr.bf16.mxu1 %v1961_v12  ;;  %2026 = vmatprep.subr.bf16.mxu0 %v2025_v13  ;;  %v2173_v12 = vpack.c.bf16 %v685_v6, %v681_v5  ;;  %v680_v13 = vld [vmem:[%s4862_s7 + $0x90] sm:$0xff]  ;;  %v2047_v19 = vpack.c.bf16 %v682_v10, %v678_v9  ;;  %v725_v2 = vld [vmem:[%s4862_s7 + $0x1f8] sm:$0xff]  ;;  %v718_v5 = vld [vmem:[%s4862_s7 + $0x1c0] sm:$0xff] }
 0x10c   :  { %v720_v9 = vld [vmem:[%s4862_s7 + $0x1d0] sm:$0xff]  ;;  %v763_v62 = vld [vmem:[%s4862_s7 + $0x328] sm:$0xff] }
 0x10d   :  { %v724_v10 = vld [vmem:[%s4862_s7 + $0x1f0] sm:$0xff] }
 0x10e   :  { %1964 = vmatpush1.bf16.msra.mxu1 %v1963_v20  ;;  %2028 = vmatpush1.bf16.msra.mxu0 %v2027_v21  ;;  %v2175_v20 = vpack.c.bf16 %v684_v14, %v680_v13  ;;  %v686_v21 = vld [vmem:[%s4862_s7 + $0xc0] sm:$0xff]  ;;  %v727_v13 = vld [vmem:[%s4862_s7 + $0x208] sm:$0xff] }
 0x10f   :  { %1966 = vmatprep.subr.bf16.mxu1 %v1965_v24  ;;  %2030 = vmatprep.subr.bf16.mxu0 %v2029_v25  ;;  %v2177_v24 = vpack.c.bf16 %v693_v18, %v689_v17  ;;  %v688_v25 = vld [vmem:[%s4862_s7 + $0xd0] sm:$0xff]  ;;  %v2051_v31 = vpack.c.bf16 %v690_v22, %v686_v21  ;;  %v731_v14 = vld [vmem:[%s4862_s7 + $0x228] sm:$0xff]  ;;  %v733_v17 = vld [vmem:[%s4862_s7 + $0x238] sm:$0xff] }
 0x110   :  { %v2069_v15 = vpack.c.bf16 %v731_v14, %v727_v13  ;;  %v2197_v18 = vpack.c.bf16 %v733_v17, %v729_v16  ;;  %v728_v21 = vld [vmem:[%s4862_s7 + $0x210] sm:$0xff]  ;;  %v773_v13 = vld [vmem:[%s4862_s7 + $0x378] sm:$0xff]  ;;  %v766_v14 = vld [vmem:[%s4862_s7 + $0x340] sm:$0xff] }
 0x112   :  { %1968 = vmatpush1.bf16.msra.mxu1 %v1967_v32  ;;  %2032 = vmatpush1.bf16.msra.mxu0 %v2031_v33  ;;  %v2179_v32 = vpack.c.bf16 %v692_v26, %v688_v25  ;;  %v694_v33 = vld [vmem:[%s4862_s7 + $0x100] sm:$0xff]  ;;  %v735_v25 = vld [vmem:[%s4862_s7 + $0x248] sm:$0xff] }
 0x113   :  { %1970 = vmatprep.subr.bf16.mxu1 %v1969_v36  ;;  %2034 = vmatprep.subr.bf16.mxu0 %v2033_v37  ;;  %v2181_v36 = vpack.c.bf16 %v701_v30, %v697_v29  ;;  %v696_v37 = vld [vmem:[%s4862_s7 + $0x110] sm:$0xff]  ;;  %v2055_v43 = vpack.c.bf16 %v698_v34, %v694_v33  ;;  %v739_v26 = vld [vmem:[%s4862_s7 + $0x268] sm:$0xff]  ;;  %v741_v29 = vld [vmem:[%s4862_s7 + $0x278] sm:$0xff] }
 0x114   :  { %v2183_v44 = vpack.c.bf16 %v700_v38, %v696_v37  ;;  %v2073_v28 = vpack.c.bf16 %v739_v26, %v735_v25  ;;  %v734_v30 = vld [vmem:[%s4862_s7 + $0x240] sm:$0xff]  ;;  %v736_v34 = vld [vmem:[%s4862_s7 + $0x250] sm:$0xff]  ;;  %v743_v37 = vld [vmem:[%s4862_s7 + $0x288] sm:$0xff] }
 0x115   :  { %v747_v38 = vld [vmem:[%s4862_s7 + $0x2a8] sm:$0xff]  ;;  %v781_v25 = vld [vmem:[%s4862_s7 + $0x3b8] sm:$0xff]  ;;  %v774_v26 = vld [vmem:[%s4862_s7 + $0x380] sm:$0xff] }
 0x116   :  { %1972 = vmatpush1.bf16.msra.mxu1 %v1971_v45  ;;  %2036 = vmatpush1.bf16.msra.mxu0 %v2035_v46  ;;  %v702_v45 = vld [vmem:[%s4862_s7 + $0x140] sm:$0xff]  ;;  %v2077_v40 = vpack.c.bf16 %v747_v38, %v743_v37  ;;  %v789_v37 = vld [vmem:[%s4862_s7 + $0x3f8] sm:$0xff] }
 0x117   :  { %2038 = vmatprep.subr.bf16.mxu1 %v2037_v50  ;;  %2166 = vmatprep.subr.bf16.mxu0 %v2165_v51  ;;  %v706_v46 = vld [vmem:[%s4862_s7 + $0x160] sm:$0xff]  ;;  %v708_v50 = vld [vmem:[%s4862_s7 + $0x170] sm:$0xff]  ;;  %v711_v51 = vld [vmem:[%s4862_s7 + $0x188] sm:$0xff] }
 0x118   :  { %v2059_v55 = vpack.c.bf16 %v706_v46, %v702_v45  ;;  %v2187_v56 = vpack.c.bf16 %v708_v50, %v704_v49  ;;  %v744_v46 = vld [vmem:[%s4862_s7 + $0x290] sm:$0xff]  ;;  %v751_v49 = vld [vmem:[%s4862_s7 + $0x2c8] sm:$0xff]  ;;  %v782_v38 = vld [vmem:[%s4862_s7 + $0x3c0] sm:$0xff] }
 0x119   :  { %531 = vmatmul.mubr.f32.vlgmr.msra.gmra.mrb[0].mxu1 %v43_v58  ;;  %602 = vmatmul.mubr.f32.vlgmr.msra.gmra.mrb[2].mxu0 %v43_v58  ;;  %v714_v58 = vld [vmem:[%s4862_s7 + $0x1a0] sm:$0xff]  ;;  %v755_v50 = vld [vmem:[%s4862_s7 + $0x2e8] sm:$0xff] }
 0x11a   :  { %2040 = vmatpush1.bf16.msra.mxu1 %v2039_v59  ;;  %2168 = vmatpush1.bf16.msra.mxu0 %v2167_v60  ;;  %v2061_v59 = vpack.c.bf16 %v715_v52, %v711_v51  ;;  %v2189_v60 = vpack.c.bf16 %v717_v54, %v713_v53  ;;  %v2063_v3 = vpack.c.bf16 %v714_v58, %v710_v57  ;;  %v753_v51 = vld [vmem:[%s4862_s7 + $0x2d8] sm:$0xff]  ;;  %v750_v54 = vld [vmem:[%s4862_s7 + $0x2c0] sm:$0xff]  ;;  %v752_v58 = vld [vmem:[%s4862_s7 + $0x2d0] sm:$0xff] }
 0x11b   :  { %2042 = vmatprep.subr.bf16.mxu1 %v2041_v63  ;;  %2170 = vmatprep.subr.bf16.mxu0 %v2169_v0  ;;  %v719_v63 = vld [vmem:[%s4862_s7 + $0x1c8] sm:$0xff]  ;;  %v2081_v52 = vpack.c.bf16 %v755_v50, %v751_v49  ;;  %v757_v53 = vld [vmem:[%s4862_s7 + $0x2f8] sm:$0xff] }
 0x11c   :  { %v723_v0 = vld [vmem:[%s4862_s7 + $0x1e8] sm:$0xff]  ;;  %v797_v49 = vld [vmem:[%s4862_s7 + $0x438] sm:$0xff] }
 0x11d   :  { %v2065_v6 = vpack.c.bf16 %v723_v0, %v719_v63  ;;  %v761_v63 = vld [vmem:[%s4862_s7 + $0x318] sm:$0xff]  ;;  %v2085_v0 = vpack.c.bf16 %v763_v62, %v759_v61 }
 0x11e   :  { %2044 = vmatpush1.bf16.msra.mxu1 %v2043_v7  ;;  %2172 = vmatpush1.bf16.msra.mxu0 %v2171_v8  ;;  %v2193_v7 = vpack.c.bf16 %v725_v2, %v721_v1  ;;  %v722_v8 = vld [vmem:[%s4862_s7 + $0x1e0] sm:$0xff]  ;;  %v765_v1 = vld [vmem:[%s4862_s7 + $0x338] sm:$0xff] }
 0x11f   :  { %2046 = vmatprep.subr.bf16.mxu1 %v2045_v11  ;;  %2174 = vmatprep.subr.bf16.mxu0 %v2173_v12  ;;  %v2067_v11 = vpack.c.bf16 %v722_v8, %v718_v5  ;;  %v2195_v12 = vpack.c.bf16 %v724_v10, %v720_v9  ;;  %v758_v2 = vld [vmem:[%s4862_s7 + $0x300] sm:$0xff]  ;;  %v767_v9 = vld [vmem:[%s4862_s7 + $0x348] sm:$0xff] }
 0x120   :  { %v771_v10 = vld [vmem:[%s4862_s7 + $0x368] sm:$0xff] }
 0x122   :  { %2048 = vmatpush1.bf16.msra.mxu1 %v2047_v19  ;;  %2176 = vmatpush1.bf16.msra.mxu0 %v2175_v20  ;;  %v726_v19 = vld [vmem:[%s4862_s7 + $0x200] sm:$0xff] }
 0x123   :  { %2050 = vmatprep.subr.bf16.mxu1 %v2049_v23  ;;  %2178 = vmatprep.subr.bf16.mxu0 %v2177_v24  ;;  %v730_v20 = vld [vmem:[%s4862_s7 + $0x220] sm:$0xff]  ;;  %v732_v23 = vld [vmem:[%s4862_s7 + $0x230] sm:$0xff] }
 0x124   :  { %v2071_v22 = vpack.c.bf16 %v730_v20, %v726_v19  ;;  %v2199_v24 = vpack.c.bf16 %v732_v23, %v728_v21  ;;  %v772_v19 = vld [vmem:[%s4862_s7 + $0x370] sm:$0xff]  ;;  %v775_v21 = vld [vmem:[%s4862_s7 + $0x388] sm:$0xff]  ;;  %v777_v23 = vld [vmem:[%s4862_s7 + $0x398] sm:$0xff] }
 0x126   :  { %2052 = vmatpush1.bf16.msra.mxu1 %v2051_v31  ;;  %2180 = vmatpush1.bf16.msra.mxu0 %v2179_v32  ;;  %v738_v31 = vld [vmem:[%s4862_s7 + $0x260] sm:$0xff]  ;;  %v2201_v32 = vpack.c.bf16 %v741_v29, %v737_v27 }
 0x127   :  { %2054 = vmatprep.subr.bf16.mxu1 %v2053_v35  ;;  %2182 = vmatprep.subr.bf16.mxu0 %v2181_v36  ;;  %v2075_v33 = vpack.c.bf16 %v738_v31, %v734_v30  ;;  %v740_v35 = vld [vmem:[%s4862_s7 + $0x270] sm:$0xff]  ;;  %v778_v27 = vld [vmem:[%s4862_s7 + $0x3a0] sm:$0xff] }
 0x128   :  { %v2203_v36 = vpack.c.bf16 %v740_v35, %v736_v34  ;;  %v2095_v29 = vpack.c.bf16 %v778_v27, %v774_v26  ;;  %v776_v30 = vld [vmem:[%s4862_s7 + $0x390] sm:$0xff]  ;;  %v787_v34 = vld [vmem:[%s4862_s7 + $0x3e8] sm:$0xff]  ;;  %v785_v35 = vld [vmem:[%s4862_s7 + $0x3d8] sm:$0xff] }
 0x129   :  { %v780_v31 = vld [vmem:[%s4862_s7 + $0x3b0] sm:$0xff] }
 0x12a   :  { %2056 = vmatpush1.bf16.msra.mxu1 %v2055_v43  ;;  %2184 = vmatpush1.bf16.msra.mxu0 %v2183_v44  ;;  %v746_v43 = vld [vmem:[%s4862_s7 + $0x2a0] sm:$0xff]  ;;  %v2205_v44 = vpack.c.bf16 %v749_v41, %v745_v39 }
 0x12b   :  { %2058 = vmatprep.subr.bf16.mxu1 %v2057_v47  ;;  %2186 = vmatprep.subr.bf16.mxu0 %v2185_v48  ;;  %v2079_v45 = vpack.c.bf16 %v746_v43, %v742_v42  ;;  %v748_v47 = vld [vmem:[%s4862_s7 + $0x2b0] sm:$0xff]  ;;  %v786_v39 = vld [vmem:[%s4862_s7 + $0x3e0] sm:$0xff] }
 0x12c   :  { %v2207_v48 = vpack.c.bf16 %v748_v47, %v744_v46  ;;  %v2099_v41 = vpack.c.bf16 %v786_v39, %v782_v38  ;;  %v784_v42 = vld [vmem:[%s4862_s7 + $0x3d0] sm:$0xff]  ;;  %v795_v46 = vld [vmem:[%s4862_s7 + $0x428] sm:$0xff]  ;;  %v793_v47 = vld [vmem:[%s4862_s7 + $0x418] sm:$0xff] }
 0x12d   :  { %v788_v43 = vld [vmem:[%s4862_s7 + $0x3f0] sm:$0xff]  ;;  %v2229_v50 = vpack.c.bf16 %v797_v49, %v793_v47  ;;  %v809_v38 = vld [vmem:[%s4862_s7 + $0x498] sm:$0xff]  ;;  %v815_v49 = vld [vmem:[%s4862_s7 + $0x4c8] sm:$0xff] }
 0x12e   :  { %2060 = vmatpush1.bf16.msra.mxu1 %v2059_v55  ;;  %2188 = vmatpush1.bf16.msra.mxu0 %v2187_v56  ;;  %v754_v55 = vld [vmem:[%s4862_s7 + $0x2e0] sm:$0xff]  ;;  %v2209_v56 = vpack.c.bf16 %v757_v53, %v753_v51  ;;  %v610_v51 = vlaneseq  ;;  %v813_v39 = vld [vmem:[%s4862_s7 + $0x4b8] sm:$0xff]  ;;  %v808_v47 = vld [vmem:[%s4862_s7 + $0x490] sm:$0xff] }
 0x12f   :  { %2062 = vmatprep.subr.bf16.mxu1 %v2061_v59  ;;  %2190 = vmatprep.subr.bf16.mxu0 %v2189_v60  ;;  %v2083_v57 = vpack.c.bf16 %v754_v55, %v750_v54  ;;  %v756_v59 = vld [vmem:[%s4862_s7 + $0x2f0] sm:$0xff]  ;;  %v608_v55 = vld [vmem:[%s4863_s6] sm:$0xf] }
 0x130   :  { %v2211_v60 = vpack.c.bf16 %v756_v59, %v752_v58 }
 0x132   :  { %2064 = vmatpush1.bf16.msra.mxu1 %v2063_v3  ;;  %2192 = vmatpush1.bf16.msra.mxu0 %v2191_v4  ;;  %v762_v3 = vld [vmem:[%s4862_s7 + $0x320] sm:$0xff]  ;;  %v2213_v4 = vpack.c.bf16 %v765_v1, %v761_v63 }
 0x133   :  { %2066 = vmatprep.subr.bf16.mxu1 %v2065_v6  ;;  %2194 = vmatprep.subr.bf16.mxu0 %v2193_v7  ;;  %v2087_v5 = vpack.c.bf16 %v762_v3, %v758_v2  ;;  %v760_v6 = vld [vmem:[%s4862_s7 + $0x310] sm:$0xff] }
 0x134   :  { %v764_v7 = vld [vmem:[%s4862_s7 + $0x330] sm:$0xff] }
 0x135   :  { %v2215_v8 = vpack.c.bf16 %v764_v7, %v760_v6 }
 0x136   :  { %2068 = vmatpush1.bf16.msra.mxu1 %v2067_v11  ;;  %2196 = vmatpush1.bf16.msra.mxu0 %v2195_v12  ;;  %v769_v11 = vld [vmem:[%s4862_s7 + $0x358] sm:$0xff]  ;;  %v2089_v12 = vpack.c.bf16 %v771_v10, %v767_v9 }
 0x137   :  { %2070 = vmatprep.subr.bf16.mxu1 %v2069_v15  ;;  %2198 = vmatprep.subr.bf16.mxu0 %v2197_v18  ;;  %v770_v15 = vld [vmem:[%s4862_s7 + $0x360] sm:$0xff]  ;;  %v2217_v16 = vpack.c.bf16 %v773_v13, %v769_v11  ;;  %v768_v18 = vld [vmem:[%s4862_s7 + $0x350] sm:$0xff] }
 0x138   :  { %v2091_v17 = vpack.c.bf16 %v770_v15, %v766_v14  ;;  %v2219_v20 = vpack.c.bf16 %v772_v19, %v768_v18  ;;  %v790_v15 = vld [vmem:[%s4862_s7 + $0x400] sm:$0xff]  ;;  %v796_v18 = vld [vmem:[%s4862_s7 + $0x430] sm:$0xff] }
 0x13a   :  { %2072 = vmatpush1.bf16.msra.mxu1 %v2071_v22  ;;  %2200 = vmatpush1.bf16.msra.mxu0 %v2199_v24  ;;  %v779_v22 = vld [vmem:[%s4862_s7 + $0x3a8] sm:$0xff] }
 0x13b   :  { %2074 = vmatprep.subr.bf16.mxu1 %v2073_v28  ;;  %2202 = vmatprep.subr.bf16.mxu0 %v2201_v32  ;;  %v2093_v24 = vpack.c.bf16 %v779_v22, %v775_v21  ;;  %v2221_v28 = vpack.c.bf16 %v781_v25, %v777_v23  ;;  %v2223_v32 = vpack.c.bf16 %v780_v31, %v776_v30  ;;  %v803_v22 = vld [vmem:[%s4862_s7 + $0x468] sm:$0xff]  ;;  %v801_v23 = vld [vmem:[%s4862_s7 + $0x458] sm:$0xff]  ;;  %v802_v30 = vld [vmem:[%s4862_s7 + $0x460] sm:$0xff] }
 0x13e   :  { %2076 = vmatpush1.bf16.msra.mxu1 %v2075_v33  ;;  %2204 = vmatpush1.bf16.msra.mxu0 %v2203_v36  ;;  %v783_v33 = vld [vmem:[%s4862_s7 + $0x3c8] sm:$0xff] }
 0x13f   :  { %2078 = vmatprep.subr.bf16.mxu1 %v2077_v40  ;;  %2206 = vmatprep.subr.bf16.mxu0 %v2205_v44  ;;  %v2097_v36 = vpack.c.bf16 %v787_v34, %v783_v33  ;;  %v2225_v40 = vpack.c.bf16 %v789_v37, %v785_v35  ;;  %v2227_v44 = vpack.c.bf16 %v788_v43, %v784_v42  ;;  %v804_v33 = vld [vmem:[%s4862_s7 + $0x470] sm:$0xff]  ;;  %v807_v34 = vld [vmem:[%s4862_s7 + $0x488] sm:$0xff]  ;;  %v806_v43 = vld [vmem:[%s4862_s7 + $0x480] sm:$0xff] }
 0x140   :  { %v811_v37 = vld [vmem:[%s4862_s7 + $0x4a8] sm:$0xff] }
 0x142   :  { %2080 = vmatpush1.bf16.msra.mxu1 %v2079_v45  ;;  %2208 = vmatpush1.bf16.msra.mxu0 %v2207_v48  ;;  %v791_v45 = vld [vmem:[%s4862_s7 + $0x408] sm:$0xff] }
 0x143   :  { %2082 = vmatprep.subr.bf16.mxu1 %v2081_v52  ;;  %2210 = vmatprep.subr.bf16.mxu0 %v2209_v56  ;;  %v2101_v48 = vpack.c.bf16 %v795_v46, %v791_v45  ;;  %v611_v52 = vshrl.u32 %v610_v51, 7  ;;  %v2109_v45 = vpack.c.bf16 %v811_v37, %v807_v34  ;;  %v2237_v46 = vpack.c.bf16 %v813_v39, %v809_v38  ;;  %v817_v51 = vld [vmem:[%s4862_s7 + $0x4d8] sm:$0xff]  ;;  %v844_v37 = vld [vmem:[%s4862_s7 + $0x5b0] sm:$0xff]  ;;  %v847_v38 = vld [vmem:[%s4862_s7 + $0x5c8] sm:$0xff] }
 0x144   :  { %v851_v39 = vld [vmem:[%s4862_s7 + $0x5e8] sm:$0xff] }
 0x145   :  { %v3658_v53 = vsub.s32 0, %v611_v52  ;;  %v3660_v54 = vsub.s32 2, %v611_v52  ;;  %v3665_v56 = vsub.s32 1, %v611_v52 }
 0x146   :  { %2084 = vmatpush1.bf16.msra.mxu1 %v2083_v57  ;;  %2212 = vmatpush1.bf16.msra.mxu0 %v2211_v60  ;;  %v3667_v57 = vsub.s32 3, %v611_v52  ;;  %v821_v52 = vld [vmem:[%s4862_s7 + $0x4f8] sm:$0xff] }
 0x147   :  { %2086 = vmatprep.subr.bf16.mxu1 %v2085_v0  ;;  %2214 = vmatprep.subr.bf16.mxu0 %v2213_v4  ;;  %v613_v58 = vrot.slane %v608_v55, %v3658_v53  ;;  %v621_v59 = vrot.slane %v608_v55, %v3660_v54  ;;  %v617_v60 = vrot.slane %v608_v55, %v3665_v56 }
 0x148   :  { %v625_v61 = vrot.slane %v608_v55, %v3667_v57 }
 0x14a   :  { %2088 = vmatpush1.bf16.msra.mxu1 %v2087_v5  ;;  %2216 = vmatpush1.bf16.msra.mxu0 %v2215_v8 }
 0x14b   :  { %2090 = vmatprep.subr.bf16.mxu1 %v2089_v12  ;;  %2218 = vmatprep.subr.bf16.mxu0 %v2217_v16  ;;  %v794_v16 = vld [vmem:[%s4862_s7 + $0x420] sm:$0xff] }
 0x14c   :  { %v2103_v27 = vpack.c.bf16 %v794_v16, %v790_v15  ;;  %v835_v15 = vld [vmem:[%s4862_s7 + $0x568] sm:$0xff]  ;;  %v833_v16 = vld [vmem:[%s4862_s7 + $0x558] sm:$0xff] }
 0x14e   :  { %2092 = vmatpush1.bf16.msra.mxu1 %v2091_v17  ;;  %2220 = vmatpush1.bf16.msra.mxu0 %v2219_v20  ;;  %v792_v17 = vld [vmem:[%s4862_s7 + $0x410] sm:$0xff]  ;;  %v799_v20 = vld [vmem:[%s4862_s7 + $0x448] sm:$0xff] }
 0x14f   :  { %2094 = vmatprep.subr.bf16.mxu1 %v2093_v24  ;;  %2222 = vmatprep.subr.bf16.mxu0 %v2221_v28  ;;  %v805_v24 = vld [vmem:[%s4862_s7 + $0x478] sm:$0xff]  ;;  %v2231_v28 = vpack.c.bf16 %v796_v18, %v792_v17  ;;  %v2105_v35 = vpack.c.bf16 %v803_v22, %v799_v20  ;;  %v830_v20 = vld [vmem:[%s4862_s7 + $0x540] sm:$0xff] }
 0x150   :  { %v837_v17 = vld [vmem:[%s4862_s7 + $0x578] sm:$0xff] }
 0x152   :  { %2096 = vmatpush1.bf16.msra.mxu1 %v2095_v29  ;;  %2224 = vmatpush1.bf16.msra.mxu0 %v2223_v32  ;;  %v798_v29 = vld [vmem:[%s4862_s7 + $0x440] sm:$0xff]  ;;  %v800_v32 = vld [vmem:[%s4862_s7 + $0x450] sm:$0xff] }
 0x153   :  { %2098 = vmatprep.subr.bf16.mxu1 %v2097_v36  ;;  %2226 = vmatprep.subr.bf16.mxu0 %v2225_v40  ;;  %v2233_v36 = vpack.c.bf16 %v805_v24, %v801_v23  ;;  %v2235_v42 = vpack.c.bf16 %v804_v33, %v800_v32  ;;  %v2249_v23 = vpack.c.bf16 %v837_v17, %v833_v16  ;;  %v832_v24 = vld [vmem:[%s4862_s7 + $0x550] sm:$0xff]  ;;  %v838_v32 = vld [vmem:[%s4862_s7 + $0x580] sm:$0xff]  ;;  %v871_v16 = vld [vmem:[%s4862_s7 + $0x688] sm:$0xff] }
 0x154   :  { %v842_v33 = vld [vmem:[%s4862_s7 + $0x5a0] sm:$0xff]  ;;  %v875_v17 = vld [vmem:[%s4862_s7 + $0x6a8] sm:$0xff] }
 0x156   :  { %2100 = vmatpush1.bf16.msra.mxu1 %v2099_v41  ;;  %2228 = vmatpush1.bf16.msra.mxu0 %v2227_v44  ;;  %v2107_v41 = vpack.c.bf16 %v802_v30, %v798_v29  ;;  %v810_v44 = vld [vmem:[%s4862_s7 + $0x4a0] sm:$0xff]  ;;  %v845_v29 = vld [vmem:[%s4862_s7 + $0x5b8] sm:$0xff] }
 0x157   :  { %2102 = vmatprep.subr.bf16.mxu1 %v2101_v48  ;;  %2230 = vmatprep.subr.bf16.mxu0 %v2229_v50  ;;  %v812_v48 = vld [vmem:[%s4862_s7 + $0x4b0] sm:$0xff]  ;;  %v819_v50 = vld [vmem:[%s4862_s7 + $0x4e8] sm:$0xff]  ;;  %v2111_v55 = vpack.c.bf16 %v810_v44, %v806_v43  ;;  %v846_v44 = vld [vmem:[%s4862_s7 + $0x5c0] sm:$0xff] }
 0x1ec   :  { %v532_v62 = vpop.f32.mrb[0].mxu1  ;;  %v603_v63 = vpop.f32.mrb[2].mxu0 }
 0x1ed   :  { %v630_v0 = vadd.f32 %v613_v58, %v532_v62  ;;  %v3673_v1 = vadd.f32 %v621_v59, %v603_v63  ;;  %v534_v2 = vpop.f32.mrb[1].mxu1  ;;  %v605_v3 = vpop.f32.mrb[3].mxu0  ;;  %v2239_v58 = vpack.c.bf16 %v812_v48, %v808_v47  ;;  %v814_v59 = vld [vmem:[%s4862_s7 + $0x4c0] sm:$0xff]  ;;  %v2241_v62 = vpack.c.bf16 %v821_v52, %v817_v51  ;;  %v816_v63 = vld [vmem:[%s4862_s7 + $0x4d0] sm:$0xff]  ;;  %v859_v51 = vld [vmem:[%s4862_s7 + $0x628] sm:$0xff] }
 0x1ee   :  { %v631_v4 = vadd.f32 %v617_v60, %v534_v2  ;;  %v633_v5 = vadd.f32 %v625_v61, %v605_v3  ;;  %v818_v60 = vld [vmem:[%s4862_s7 + $0x4e0] sm:$0xff]  ;;  %v2113_v61 = vpack.c.bf16 %v819_v50, %v815_v49  ;;  %v823_v2 = vld [vmem:[%s4862_s7 + $0x508] sm:$0xff]  ;;  %v848_v48 = vld [vmem:[%s4862_s7 + $0x5d0] sm:$0xff] }
 0x1ef   :  { %v1828_v6 = vmul.f32 -1.442695, %v630_v0  ;;  %v827_v3 = vld [vmem:[%s4862_s7 + $0x528] sm:$0xff]  ;;  %v852_v49 = vld [vmem:[%s4862_s7 + $0x5f0] sm:$0xff]  ;;  %v857_v52 = vld [vmem:[%s4862_s7 + $0x618] sm:$0xff] }
 0x1f0   :  { %v1829_v7 = vmul.f32 -1.442695, %v631_v4  ;;  %v1831_v8 = vmul.f32 -1.442695, %v633_v5  ;;  %v855_v50 = vld [vmem:[%s4862_s7 + $0x608] sm:$0xff] }
 0x1f1   :  { %2571 = vpow2.f32 %v1828_v6  ;;  %v2115_v6 = vpack.c.bf16 %v818_v60, %v814_v59  ;;  %v2259_v59 = vpack.c.bf16 %v852_v49, %v848_v48  ;;  %v854_v60 = vld [vmem:[%s4862_s7 + $0x600] sm:$0xff] }
 0x1f2   :  { %2573 = vpow2.f32 %v1829_v7 }
 0x1f3   :  { %2575 = vpow2.f32 %v1831_v8  ;;  %v822_v8 = vld [vmem:[%s4862_s7 + $0x500] sm:$0xff] }
 0x1fb   :  { %v2572_v9 = vpop.eup %2571 }
 0x1fc   :  { %v646_v10 = vadd.f32 1.0, %v2572_v9  ;;  %v2574_v11 = vpop.eup %2573  ;;  %v826_v9 = vld [vmem:[%s4862_s7 + $0x520] sm:$0xff] }
 0x1fd   :  { %v2576_v12 = vpop.eup %2575  ;;  %v647_v13 = vadd.f32 1.0, %v2574_v11  ;;  %v2119_v18 = vpack.c.bf16 %v826_v9, %v822_v8 }
 0x1fe   :  { %2577 = vrcp.f32 %v646_v10  ;;  %v649_v14 = vadd.f32 1.0, %v2576_v12  ;;  %v2117_v10 = vpack.c.bf16 %v827_v3, %v823_v2  ;;  %v824_v12 = vld [vmem:[%s4862_s7 + $0x510] sm:$0xff]  ;;  %v863_v3 = vld [vmem:[%s4862_s7 + $0x648] sm:$0xff] }
 0x1ff   :  { %2579 = vrcp.f32 %v647_v13  ;;  %v828_v13 = vld [vmem:[%s4862_s7 + $0x530] sm:$0xff] }
 0x200   :  { %2581 = vrcp.f32 %v649_v14  ;;  %v831_v14 = vld [vmem:[%s4862_s7 + $0x548] sm:$0xff]  ;;  %v860_v2 = vld [vmem:[%s4862_s7 + $0x630] sm:$0xff] }
 0x201   :  { %v2121_v22 = vpack.c.bf16 %v835_v15, %v831_v14  ;;  %v864_v14 = vld [vmem:[%s4862_s7 + $0x650] sm:$0xff] }
 0x202   :  { %v868_v15 = vld [vmem:[%s4862_s7 + $0x670] sm:$0xff] }
 0x208   :  { %v2578_v19 = vpop.eup %2577 }
 0x209   :  { %v2580_v21 = vpop.eup %2579  ;;  %v658_v31 = vmul.f32 %v2578_v19, %v630_v0  ;;  %v820_v0 = vld [vmem:[%s4862_s7 + $0x4f0] sm:$0xff]  ;;  %v2247_v19 = vpack.c.bf16 %v828_v13, %v824_v12 }
 0x20a   :  { %v2582_v25 = vpop.eup %2581  ;;  %v659_v26 = vmul.f32 %v2580_v21, %v631_v4  ;;  %v825_v4 = vld [vmem:[%s4862_s7 + $0x518] sm:$0xff]  ;;  %v2243_v7 = vpack.c.bf16 %v820_v0, %v816_v63  ;;  %v834_v21 = vld [vmem:[%s4862_s7 + $0x560] sm:$0xff]  ;;  %v856_v0 = vld [vmem:[%s4862_s7 + $0x610] sm:$0xff] }
 0x20b   :  { %v661_v40 = vmul.f32 %v2582_v25, %v633_v5  ;;  %v829_v5 = vld [vmem:[%s4862_s7 + $0x538] sm:$0xff]  ;;  %v836_v25 = vld [vmem:[%s4862_s7 + $0x570] sm:$0xff]  ;;  %v2123_v30 = vpack.c.bf16 %v834_v21, %v830_v20  ;;  %v2263_v9 = vpack.c.bf16 %v860_v2, %v856_v0  ;;  %v2267_v21 = vpack.c.bf16 %v868_v15, %v864_v14  ;;  %v894_v0 = vld [vmem:[%s4862_s7 + $0x740] sm:$0xff] }
 0x20c   :  { %1004 = vmatprep.mubr.f32.mxu1 %v659_v26  ;;  %1146 = vmatprep.mubr.f32.mxu0 %v659_v26  ;;  %v2245_v11 = vpack.c.bf16 %v829_v5, %v825_v4  ;;  %v839_v26 = vld [vmem:[%s4862_s7 + $0x588] sm:$0xff]  ;;  %v865_v5 = vld [vmem:[%s4862_s7 + $0x658] sm:$0xff]  ;;  %v898_v2 = vld [vmem:[%s4862_s7 + $0x760] sm:$0xff] }
 0x20d   :  { %1005 = vmatmul.mubr.f32.vlgmr.msra.gmra.mrb[2].mxu1 %v658_v31  ;;  %1147 = vmatmul.mubr.f32.vlgmr.msra.gmra.mrb[4].mxu0 %v658_v31  ;;  %v2251_v31 = vpack.c.bf16 %v836_v25, %v832_v24  ;;  %v867_v4 = vld [vmem:[%s4862_s7 + $0x668] sm:$0xff]  ;;  %v2141_v24 = vpack.c.bf16 %v875_v17, %v871_v16  ;;  %v906_v14 = vld [vmem:[%s4862_s7 + $0x7a0] sm:$0xff]  ;;  %v904_v17 = vld [vmem:[%s4862_s7 + $0x790] sm:$0xff] }
 0x20e   :  { %2104 = vmatpush1.bf16.msra.mxu1 %v2103_v27  ;;  %2232 = vmatpush1.bf16.msra.mxu0 %v2231_v28  ;;  %v843_v27 = vld [vmem:[%s4862_s7 + $0x5a8] sm:$0xff]  ;;  %v841_v28 = vld [vmem:[%s4862_s7 + $0x598] sm:$0xff]  ;;  %v2137_v12 = vpack.c.bf16 %v867_v4, %v863_v3 }
 0x20f   :  { %1075 = vmatprep.mubr.f32.mxu1 %v661_v40  ;;  %1217 = vmatprep.mubr.f32.mxu0 %v661_v40  ;;  %v2125_v34 = vpack.c.bf16 %v843_v27, %v839_v26  ;;  %v849_v40 = vld [vmem:[%s4862_s7 + $0x5d8] sm:$0xff]  ;;  %v872_v26 = vld [vmem:[%s4862_s7 + $0x690] sm:$0xff] }
 0x210   :  { %2106 = vmatprep.subr.bf16.mxu1 %v2105_v35  ;;  %2234 = vmatprep.subr.bf16.mxu0 %v2233_v36  ;;  %v2253_v35 = vpack.c.bf16 %v845_v29, %v841_v28  ;;  %v840_v36 = vld [vmem:[%s4862_s7 + $0x590] sm:$0xff]  ;;  %v879_v28 = vld [vmem:[%s4862_s7 + $0x6c8] sm:$0xff] }
 0x211   :  { %v2255_v43 = vpack.c.bf16 %v844_v37, %v840_v36  ;;  %v876_v27 = vld [vmem:[%s4862_s7 + $0x6b0] sm:$0xff]  ;;  %v883_v29 = vld [vmem:[%s4862_s7 + $0x6e8] sm:$0xff] }
 0x212   :  { %2108 = vmatpush1.bf16.msra.mxu1 %v2107_v41  ;;  %2236 = vmatpush1.bf16.msra.mxu0 %v2235_v42  ;;  %v853_v41 = vld [vmem:[%s4862_s7 + $0x5f8] sm:$0xff]  ;;  %v2127_v42 = vpack.c.bf16 %v842_v33, %v838_v32  ;;  %v2271_v33 = vpack.c.bf16 %v876_v27, %v872_v26  ;;  %v2145_v36 = vpack.c.bf16 %v883_v29, %v879_v28  ;;  %v914_v26 = vld [vmem:[%s4862_s7 + $0x7e0] sm:$0xff]  ;;  %v912_v29 = vld [vmem:[%s4862_s7 + $0x7d0] sm:$0xff] }
 0x213   :  { %2110 = vmatprep.subr.bf16.mxu1 %v2109_v45  ;;  %2238 = vmatprep.subr.bf16.mxu0 %v2237_v46  ;;  %v850_v45 = vld [vmem:[%s4862_s7 + $0x5e0] sm:$0xff]  ;;  %v2129_v46 = vpack.c.bf16 %v851_v39, %v847_v38  ;;  %v2257_v47 = vpack.c.bf16 %v853_v41, %v849_v40  ;;  %v880_v38 = vld [vmem:[%s4862_s7 + $0x6d0] sm:$0xff]  ;;  %v887_v40 = vld [vmem:[%s4862_s7 + $0x708] sm:$0xff] }
 0x214   :  { %v884_v39 = vld [vmem:[%s4862_s7 + $0x6f0] sm:$0xff]  ;;  %v891_v41 = vld [vmem:[%s4862_s7 + $0x728] sm:$0xff] }
 0x215   :  { %v2149_v49 = vpack.c.bf16 %v891_v41, %v887_v40  ;;  %v1254_v41 = vld [vmem:[%s4864_s9 + $0x10] sm:$0xff] }
 0x216   :  { %2112 = vmatpush1.bf16.msra.mxu1 %v2111_v55  ;;  %2240 = vmatpush1.bf16.msra.mxu0 %v2239_v58  ;;  %v861_v55 = vld [vmem:[%s4862_s7 + $0x638] sm:$0xff]  ;;  %v2131_v58 = vpack.c.bf16 %v850_v45, %v846_v44  ;;  %v2275_v45 = vpack.c.bf16 %v884_v39, %v880_v38  ;;  %v1256_v38 = vld [vmem:[%s4864_s9 + $0x20] sm:$0xff] }
 0x217   :  { %2114 = vmatprep.subr.bf16.mxu1 %v2113_v61  ;;  %2242 = vmatprep.subr.bf16.mxu0 %v2241_v62  ;;  %v858_v61 = vld [vmem:[%s4862_s7 + $0x620] sm:$0xff]  ;;  %v2133_v62 = vpack.c.bf16 %v859_v51, %v855_v50  ;;  %v2261_v63 = vpack.c.bf16 %v861_v55, %v857_v52  ;;  %v888_v51 = vld [vmem:[%s4862_s7 + $0x710] sm:$0xff]  ;;  %v895_v55 = vld [vmem:[%s4862_s7 + $0x748] sm:$0xff] }
 0x218   :  { %v2135_v8 = vpack.c.bf16 %v858_v61, %v854_v60  ;;  %v892_v52 = vld [vmem:[%s4862_s7 + $0x730] sm:$0xff]  ;;  %v901_v60 = vld [vmem:[%s4862_s7 + $0x778] sm:$0xff] }
 0x21a   :  { %2116 = vmatpush1.bf16.msra.mxu1 %v2115_v6  ;;  %2244 = vmatpush1.bf16.msra.mxu0 %v2243_v7  ;;  %v869_v6 = vld [vmem:[%s4862_s7 + $0x678] sm:$0xff]  ;;  %v1830_v7 = vmul.f32 -1.442695, %v3673_v1 }
 0x21b   :  { %2118 = vmatprep.subr.bf16.mxu1 %v2117_v10  ;;  %2246 = vmatprep.subr.bf16.mxu0 %v2245_v11  ;;  %v862_v10 = vld [vmem:[%s4862_s7 + $0x640] sm:$0xff]  ;;  %v2265_v13 = vpack.c.bf16 %v869_v6, %v865_v5  ;;  %v896_v5 = vld [vmem:[%s4862_s7 + $0x750] sm:$0xff] }
 0x21c   :  { %v866_v11 = vld [vmem:[%s4862_s7 + $0x660] sm:$0xff]  ;;  %2583 = vpow2.f32 %v1830_v7  ;;  %v900_v6 = vld [vmem:[%s4862_s7 + $0x770] sm:$0xff]  ;;  %v903_v7 = vld [vmem:[%s4862_s7 + $0x788] sm:$0xff] }
 0x21d   :  { %v2139_v20 = vpack.c.bf16 %v866_v11, %v862_v10  ;;  %v909_v10 = vld [vmem:[%s4862_s7 + $0x7b8] sm:$0xff]  ;;  %v2155_v11 = vpack.c.bf16 %v898_v2, %v894_v0 }
 0x21e   :  { %2120 = vmatpush1.bf16.msra.mxu1 %v2119_v18  ;;  %2248 = vmatpush1.bf16.msra.mxu0 %v2247_v19  ;;  %v873_v18 = vld [vmem:[%s4862_s7 + $0x698] sm:$0xff] }
 0x21f   :  { %2122 = vmatprep.subr.bf16.mxu1 %v2121_v22  ;;  %2250 = vmatprep.subr.bf16.mxu0 %v2249_v23  ;;  %v877_v19 = vld [vmem:[%s4862_s7 + $0x6b8] sm:$0xff]  ;;  %v870_v22 = vld [vmem:[%s4862_s7 + $0x680] sm:$0xff] }
 0x220   :  { %v874_v23 = vld [vmem:[%s4862_s7 + $0x6a0] sm:$0xff]  ;;  %v2269_v25 = vpack.c.bf16 %v877_v19, %v873_v18  ;;  %v908_v18 = vld [vmem:[%s4862_s7 + $0x7b0] sm:$0xff]  ;;  %v911_v19 = vld [vmem:[%s4862_s7 + $0x7c8] sm:$0xff] }
 0x221   :  { %v2143_v32 = vpack.c.bf16 %v874_v23, %v870_v22  ;;  %v917_v22 = vld [vmem:[%s4862_s7 + $0x7f8] sm:$0xff] }
 0x222   :  { %2124 = vmatpush1.bf16.msra.mxu1 %v2123_v30  ;;  %2252 = vmatpush1.bf16.msra.mxu0 %v2251_v31  ;;  %v881_v30 = vld [vmem:[%s4862_s7 + $0x6d8] sm:$0xff] }
 0x223   :  { %2126 = vmatprep.subr.bf16.mxu1 %v2125_v34  ;;  %2254 = vmatprep.subr.bf16.mxu0 %v2253_v35  ;;  %v885_v31 = vld [vmem:[%s4862_s7 + $0x6f8] sm:$0xff]  ;;  %v878_v34 = vld [vmem:[%s4862_s7 + $0x6c0] sm:$0xff] }
 0x224   :  { %v882_v35 = vld [vmem:[%s4862_s7 + $0x6e0] sm:$0xff]  ;;  %v2273_v37 = vpack.c.bf16 %v885_v31, %v881_v30  ;;  %v916_v30 = vld [vmem:[%s4862_s7 + $0x7f0] sm:$0xff]  ;;  %v1253_v31 = vld [vmem:[%s4864_s9 + $0x8] sm:$0xff] }
 0x225   :  { %v2147_v44 = vpack.c.bf16 %v882_v35, %v878_v34  ;;  %v1259_v34 = vld [vmem:[%s4864_s9 + $0x38] sm:$0xff] }
 0x226   :  { %2128 = vmatpush1.bf16.msra.mxu1 %v2127_v42  ;;  %2256 = vmatpush1.bf16.msra.mxu0 %v2255_v43  ;;  %v889_v42 = vld [vmem:[%s4862_s7 + $0x718] sm:$0xff]  ;;  %v2584_v48 = vpop.eup %2583 }
 0x227   :  { %2130 = vmatprep.subr.bf16.mxu1 %v2129_v46  ;;  %2258 = vmatprep.subr.bf16.mxu0 %v2257_v47  ;;  %v893_v43 = vld [vmem:[%s4862_s7 + $0x738] sm:$0xff]  ;;  %v886_v46 = vld [vmem:[%s4862_s7 + $0x700] sm:$0xff]  ;;  %v648_v61 = vadd.f32 1.0, %v2584_v48 }
 0x228   :  { %v890_v47 = vld [vmem:[%s4862_s7 + $0x720] sm:$0xff]  ;;  %v2277_v50 = vpack.c.bf16 %v893_v43, %v889_v42  ;;  %v1258_v42 = vld [vmem:[%s4864_s9 + $0x30] sm:$0xff]  ;;  %v1261_v43 = vld [vmem:[%s4864_s9 + $0x48] sm:$0xff] }
 0x229   :  { %2585 = vrcp.f32 %v648_v61  ;;  %v1269_v61 = vld [vmem:[%s4864_s9 + $0x88] sm:$0xff] }
 0x22a   :  { %2132 = vmatpush1.bf16.msra.mxu1 %v2131_v58  ;;  %2260 = vmatpush1.bf16.msra.mxu0 %v2259_v59  ;;  %v899_v58 = vld [vmem:[%s4862_s7 + $0x768] sm:$0xff]  ;;  %v897_v59 = vld [vmem:[%s4862_s7 + $0x758] sm:$0xff] }
 0x22b   :  { %2134 = vmatprep.subr.bf16.mxu1 %v2133_v62  ;;  %2262 = vmatprep.subr.bf16.mxu0 %v2261_v63  ;;  %v2151_v62 = vpack.c.bf16 %v890_v47, %v886_v46  ;;  %v2279_v63 = vpack.c.bf16 %v892_v52, %v888_v51  ;;  %v2153_v3 = vpack.c.bf16 %v899_v58, %v895_v55  ;;  %v1263_v46 = vld [vmem:[%s4864_s9 + $0x58] sm:$0xff]  ;;  %v1264_v51 = vld [vmem:[%s4864_s9 + $0x60] sm:$0xff] }
 0x22c   :  { %v2281_v4 = vpack.c.bf16 %v901_v60, %v897_v59  ;;  %v1267_v47 = vld [vmem:[%s4864_s9 + $0x78] sm:$0xff]  ;;  %v1262_v59 = vld [vmem:[%s4864_s9 + $0x50] sm:$0xff] }
 0x22d   :  { %v2425_v58 = vpack.c.bf16 %v1267_v47, %v1263_v46  ;;  %v1266_v60 = vld [vmem:[%s4864_s9 + $0x70] sm:$0xff]  ;;  %v1305_v46 = vld [vmem:[%s4864_s9 + $0x1a8] sm:$0xff]  ;;  %v1303_v47 = vld [vmem:[%s4864_s9 + $0x198] sm:$0xff] }
 0x22e   :  { %2136 = vmatpush1.bf16.msra.mxu1 %v2135_v8  ;;  %2264 = vmatpush1.bf16.msra.mxu0 %v2263_v9  ;;  %v907_v8 = vld [vmem:[%s4862_s7 + $0x7a8] sm:$0xff]  ;;  %v905_v9 = vld [vmem:[%s4862_s7 + $0x798] sm:$0xff]  ;;  %v2427_v2 = vpack.c.bf16 %v1266_v60, %v1262_v59  ;;  %v1302_v59 = vld [vmem:[%s4864_s9 + $0x190] sm:$0xff] }
 0x22f   :  { %2138 = vmatprep.subr.bf16.mxu1 %v2137_v12  ;;  %2266 = vmatprep.subr.bf16.mxu0 %v2265_v13  ;;  %v2283_v12 = vpack.c.bf16 %v900_v6, %v896_v5  ;;  %v902_v13 = vld [vmem:[%s4862_s7 + $0x780] sm:$0xff]  ;;  %v2157_v15 = vpack.c.bf16 %v907_v8, %v903_v7  ;;  %v2285_v16 = vpack.c.bf16 %v909_v10, %v905_v9  ;;  %v1270_v7 = vld [vmem:[%s4864_s9 + $0x90] sm:$0xff]  ;;  %v1277_v9 = vld [vmem:[%s4864_s9 + $0xc8] sm:$0xff] }
 0x230   :  { %v2159_v23 = vpack.c.bf16 %v906_v14, %v902_v13  ;;  %v1274_v8 = vld [vmem:[%s4864_s9 + $0xb0] sm:$0xff]  ;;  %v1281_v10 = vld [vmem:[%s4864_s9 + $0xe8] sm:$0xff] }
 0x231   :  { %v2431_v14 = vpack.c.bf16 %v1274_v8, %v1270_v7  ;;  %v1306_v60 = vld [vmem:[%s4864_s9 + $0x1b0] sm:$0xff] }
 0x232   :  { %2140 = vmatpush1.bf16.msra.mxu1 %v2139_v20  ;;  %2268 = vmatpush1.bf16.msra.mxu0 %v2267_v21  ;;  %v915_v20 = vld [vmem:[%s4862_s7 + $0x7e8] sm:$0xff]  ;;  %v913_v21 = vld [vmem:[%s4862_s7 + $0x7d8] sm:$0xff]  ;;  %v1310_v7 = vld [vmem:[%s4864_s9 + $0x1d0] sm:$0xff] }
 0x233   :  { %2142 = vmatprep.subr.bf16.mxu1 %v2141_v24  ;;  %2270 = vmatprep.subr.bf16.mxu0 %v2269_v25  ;;  %v2287_v24 = vpack.c.bf16 %v908_v18, %v904_v17  ;;  %v910_v25 = vld [vmem:[%s4862_s7 + $0x7c0] sm:$0xff]  ;;  %v2161_v27 = vpack.c.bf16 %v915_v20, %v911_v19  ;;  %v2289_v28 = vpack.c.bf16 %v917_v22, %v913_v21  ;;  %v1278_v19 = vld [vmem:[%s4864_s9 + $0xd0] sm:$0xff]  ;;  %v1285_v21 = vld [vmem:[%s4864_s9 + $0x108] sm:$0xff] }
 0x234   :  { %v2163_v35 = vpack.c.bf16 %v914_v26, %v910_v25  ;;  %v2305_v17 = vpack.c.bf16 %v1281_v10, %v1277_v9  ;;  %v1282_v20 = vld [vmem:[%s4864_s9 + $0xf0] sm:$0xff]  ;;  %v1289_v22 = vld [vmem:[%s4864_s9 + $0x128] sm:$0xff] }
 0x235   :  { %v2435_v26 = vpack.c.bf16 %v1282_v20, %v1278_v19  ;;  %v1314_v8 = vld [vmem:[%s4864_s9 + $0x1f0] sm:$0xff] }
 0x236   :  { %2144 = vmatpush1.bf16.msra.mxu1 %v2143_v32  ;;  %2272 = vmatpush1.bf16.msra.mxu0 %v2271_v33  ;;  %v1257_v32 = vld [vmem:[%s4864_s9 + $0x28] sm:$0xff]  ;;  %v1255_v33 = vld [vmem:[%s4864_s9 + $0x18] sm:$0xff]  ;;  %v2451_v10 = vpack.c.bf16 %v1314_v8, %v1310_v7  ;;  %v1318_v19 = vld [vmem:[%s4864_s9 + $0x210] sm:$0xff] }
 0x237   :  { %2146 = vmatprep.subr.bf16.mxu1 %v2145_v36  ;;  %2274 = vmatprep.subr.bf16.mxu0 %v2273_v37  ;;  %v2291_v36 = vpack.c.bf16 %v916_v30, %v912_v29  ;;  %v1252_v37 = vld [vmem:[%s4864_s9] sm:$0xff]  ;;  %v2293_v39 = vpack.c.bf16 %v1257_v32, %v1253_v31  ;;  %v2421_v40 = vpack.c.bf16 %v1259_v34, %v1255_v33  ;;  %v1286_v31 = vld [vmem:[%s4864_s9 + $0x110] sm:$0xff]  ;;  %v1293_v33 = vld [vmem:[%s4864_s9 + $0x148] sm:$0xff] }
 0x238   :  { %v2295_v48 = vpack.c.bf16 %v1256_v38, %v1252_v37  ;;  %v2309_v29 = vpack.c.bf16 %v1289_v22, %v1285_v21  ;;  %v1290_v32 = vld [vmem:[%s4864_s9 + $0x130] sm:$0xff]  ;;  %v1297_v34 = vld [vmem:[%s4864_s9 + $0x168] sm:$0xff] }
 0x239   :  { %v2439_v38 = vpack.c.bf16 %v1290_v32, %v1286_v31  ;;  %v1322_v21 = vld [vmem:[%s4864_s9 + $0x230] sm:$0xff] }
 0x23a   :  { %2148 = vmatpush1.bf16.msra.mxu1 %v2147_v44  ;;  %2276 = vmatpush1.bf16.msra.mxu0 %v2275_v45  ;;  %v2586_v44 = vpop.eup %2585  ;;  %v1265_v45 = vld [vmem:[%s4864_s9 + $0x68] sm:$0xff]  ;;  %v2455_v22 = vpack.c.bf16 %v1322_v21, %v1318_v19  ;;  %v1326_v32 = vld [vmem:[%s4864_s9 + $0x250] sm:$0xff] }
 0x23b   :  { %2150 = vmatprep.subr.bf16.mxu1 %v2149_v49  ;;  %2278 = vmatprep.subr.bf16.mxu0 %v2277_v50  ;;  %v2423_v49 = vpack.c.bf16 %v1258_v42, %v1254_v41  ;;  %v1260_v50 = vld [vmem:[%s4864_s9 + $0x40] sm:$0xff]  ;;  %v660_v52 = vmul.f32 %v2586_v44, %v3673_v1  ;;  %v2297_v55 = vpack.c.bf16 %v1265_v45, %v1261_v43  ;;  %v1273_v1 = vld [vmem:[%s4864_s9 + $0xa8] sm:$0xff]  ;;  %v1294_v43 = vld [vmem:[%s4864_s9 + $0x150] sm:$0xff] }
 0x23c   :  { %v2299_v0 = vpack.c.bf16 %v1264_v51, %v1260_v50  ;;  %v2301_v5 = vpack.c.bf16 %v1273_v1, %v1269_v61  ;;  %v2313_v41 = vpack.c.bf16 %v1297_v34, %v1293_v33  ;;  %v1298_v44 = vld [vmem:[%s4864_s9 + $0x170] sm:$0xff]  ;;  %v1301_v45 = vld [vmem:[%s4864_s9 + $0x188] sm:$0xff]  ;;  %v1300_v51 = vld [vmem:[%s4864_s9 + $0x180] sm:$0xff] }
 0x23d   :  { %v2443_v50 = vpack.c.bf16 %v1298_v44, %v1294_v43  ;;  %v1309_v61 = vld [vmem:[%s4864_s9 + $0x1c8] sm:$0xff]  ;;  %v1330_v33 = vld [vmem:[%s4864_s9 + $0x270] sm:$0xff] }
 0x23e   :  { %2152 = vmatpush1.bf16.msra.mxu1 %v2151_v62  ;;  %2280 = vmatpush1.bf16.msra.mxu0 %v2279_v63  ;;  %v1271_v62 = vld [vmem:[%s4864_s9 + $0x98] sm:$0xff]  ;;  %v1313_v1 = vld [vmem:[%s4864_s9 + $0x1e8] sm:$0xff]  ;;  %v2459_v34 = vpack.c.bf16 %v1330_v33, %v1326_v32  ;;  %v1334_v44 = vld [vmem:[%s4864_s9 + $0x290] sm:$0xff] }
 0x23f   :  { %2154 = vmatprep.subr.bf16.mxu1 %v2153_v3  ;;  %2282 = vmatprep.subr.bf16.mxu0 %v2281_v4  ;;  %v1275_v63 = vld [vmem:[%s4864_s9 + $0xb8] sm:$0xff]  ;;  %v1268_v3 = vld [vmem:[%s4864_s9 + $0x80] sm:$0xff]  ;;  %v1350_v8 = vld [vmem:[%s4864_s9 + $0x310] sm:$0xff] }
 0x240   :  { %v1272_v4 = vld [vmem:[%s4864_s9 + $0xa0] sm:$0xff]  ;;  %v2429_v6 = vpack.c.bf16 %v1275_v63, %v1271_v62  ;;  %v1311_v62 = vld [vmem:[%s4864_s9 + $0x1d8] sm:$0xff]  ;;  %v1362_v21 = vld [vmem:[%s4864_s9 + $0x370] sm:$0xff] }
 0x241   :  { %v2303_v13 = vpack.c.bf16 %v1272_v4, %v1268_v3  ;;  %v1315_v63 = vld [vmem:[%s4864_s9 + $0x1f8] sm:$0xff]  ;;  %v1308_v3 = vld [vmem:[%s4864_s9 + $0x1c0] sm:$0xff]  ;;  %v2321_v4 = vpack.c.bf16 %v1313_v1, %v1309_v61  ;;  %v1346_v61 = vld [vmem:[%s4864_s9 + $0x2f0] sm:$0xff] }
 0x242   :  { %2156 = vmatpush1.bf16.msra.mxu1 %v2155_v11  ;;  %2284 = vmatpush1.bf16.msra.mxu0 %v2283_v12  ;;  %v1279_v11 = vld [vmem:[%s4864_s9 + $0xd8] sm:$0xff]  ;;  %v1366_v32 = vld [vmem:[%s4864_s9 + $0x390] sm:$0xff] }
 0x243   :  { %2158 = vmatprep.subr.bf16.mxu1 %v2157_v15  ;;  %2286 = vmatprep.subr.bf16.mxu0 %v2285_v16  ;;  %v1283_v12 = vld [vmem:[%s4864_s9 + $0xf8] sm:$0xff]  ;;  %v1276_v15 = vld [vmem:[%s4864_s9 + $0xc0] sm:$0xff]  ;;  %v1370_v33 = vld [vmem:[%s4864_s9 + $0x3b0] sm:$0xff] }
 0x244   :  { %v1280_v16 = vld [vmem:[%s4864_s9 + $0xe0] sm:$0xff]  ;;  %v2433_v18 = vpack.c.bf16 %v1283_v12, %v1279_v11  ;;  %v1317_v11 = vld [vmem:[%s4864_s9 + $0x208] sm:$0xff] }
 0x245   :  { %v2307_v25 = vpack.c.bf16 %v1280_v16, %v1276_v15  ;;  %v1321_v12 = vld [vmem:[%s4864_s9 + $0x228] sm:$0xff]  ;;  %v1323_v15 = vld [vmem:[%s4864_s9 + $0x238] sm:$0xff] }
 0x246   :  { %2160 = vmatpush1.bf16.msra.mxu1 %v2159_v23  ;;  %2288 = vmatpush1.bf16.msra.mxu0 %v2287_v24  ;;  %v1287_v23 = vld [vmem:[%s4864_s9 + $0x118] sm:$0xff] }
 0x247   :  { %2162 = vmatprep.subr.bf16.mxu1 %v2161_v27  ;;  %2290 = vmatprep.subr.bf16.mxu0 %v2289_v28  ;;  %v1291_v24 = vld [vmem:[%s4864_s9 + $0x138] sm:$0xff]  ;;  %v1284_v27 = vld [vmem:[%s4864_s9 + $0x100] sm:$0xff] }
 0x248   :  { %v1288_v28 = vld [vmem:[%s4864_s9 + $0x120] sm:$0xff]  ;;  %v2437_v30 = vpack.c.bf16 %v1291_v24, %v1287_v23  ;;  %v1325_v23 = vld [vmem:[%s4864_s9 + $0x248] sm:$0xff] }
 0x249   :  { %v2311_v37 = vpack.c.bf16 %v1288_v28, %v1284_v27  ;;  %v1329_v24 = vld [vmem:[%s4864_s9 + $0x268] sm:$0xff]  ;;  %v1331_v27 = vld [vmem:[%s4864_s9 + $0x278] sm:$0xff]  ;;  %v1324_v28 = vld [vmem:[%s4864_s9 + $0x240] sm:$0xff] }
 0x24a   :  { %2164 = vmatpush1.bf16.msra.mxu1 %v2163_v35  ;;  %2292 = vmatpush1.bf16.msra.mxu0 %v2291_v36  ;;  %v1295_v35 = vld [vmem:[%s4864_s9 + $0x158] sm:$0xff] }
 0x24b   :  { %2294 = vmatprep.subr.bf16.mxu1 %v2293_v39  ;;  %2422 = vmatprep.subr.bf16.mxu0 %v2421_v40  ;;  %v1299_v36 = vld [vmem:[%s4864_s9 + $0x178] sm:$0xff]  ;;  %v1292_v39 = vld [vmem:[%s4864_s9 + $0x140] sm:$0xff] }
 0x24c   :  { %v1296_v40 = vld [vmem:[%s4864_s9 + $0x160] sm:$0xff]  ;;  %v2441_v42 = vpack.c.bf16 %v1299_v36, %v1295_v35  ;;  %v1333_v35 = vld [vmem:[%s4864_s9 + $0x288] sm:$0xff] }
 0x24d   :  { %1076 = vmatmul.mubr.f32.vlgmr.msra.gmra.mrb[2].mxu1 %v660_v52  ;;  %1218 = vmatmul.mubr.f32.vlgmr.msra.gmra.mrb[4].mxu0 %v660_v52  ;;  %v1304_v52 = vld [vmem:[%s4864_s9 + $0x1a0] sm:$0xff]  ;;  %v1337_v36 = vld [vmem:[%s4864_s9 + $0x2a8] sm:$0xff] }
 0x24e   :  { %2296 = vmatpush1.bf16.msra.mxu1 %v2295_v48  ;;  %2424 = vmatpush1.bf16.msra.mxu0 %v2423_v49  ;;  %v1307_v48 = vld [vmem:[%s4864_s9 + $0x1b8] sm:$0xff]  ;;  %v2315_v49 = vpack.c.bf16 %v1296_v40, %v1292_v39  ;;  %v1332_v40 = vld [vmem:[%s4864_s9 + $0x280] sm:$0xff] }
 0x24f   :  { %2298 = vmatprep.subr.bf16.mxu1 %v2297_v55  ;;  %2426 = vmatprep.subr.bf16.mxu0 %v2425_v58  ;;  %v2317_v55 = vpack.c.bf16 %v1305_v46, %v1301_v45  ;;  %v2445_v58 = vpack.c.bf16 %v1307_v48, %v1303_v47  ;;  %v1339_v39 = vld [vmem:[%s4864_s9 + $0x2b8] sm:$0xff]  ;;  %v1338_v45 = vld [vmem:[%s4864_s9 + $0x2b0] sm:$0xff]  ;;  %v1341_v47 = vld [vmem:[%s4864_s9 + $0x2c8] sm:$0xff] }
 0x250   :  { %v2463_v46 = vpack.c.bf16 %v1338_v45, %v1334_v44  ;;  %v1345_v48 = vld [vmem:[%s4864_s9 + $0x2e8] sm:$0xff]  ;;  %v1374_v44 = vld [vmem:[%s4864_s9 + $0x3d0] sm:$0xff] }
 0x251   :  { %v1378_v45 = vld [vmem:[%s4864_s9 + $0x3f0] sm:$0xff] }
 0x252   :  { %2300 = vmatpush1.bf16.msra.mxu1 %v2299_v0  ;;  %2428 = vmatpush1.bf16.msra.mxu0 %v2427_v2  ;;  %v2319_v0 = vpack.c.bf16 %v1304_v52, %v1300_v51  ;;  %v2447_v2 = vpack.c.bf16 %v1306_v60, %v1302_v59  ;;  %v1347_v51 = vld [vmem:[%s4864_s9 + $0x2f8] sm:$0xff]  ;;  %v1340_v52 = vld [vmem:[%s4864_s9 + $0x2c0] sm:$0xff]  ;;  %v1342_v60 = vld [vmem:[%s4864_s9 + $0x2d0] sm:$0xff] }
 0x253   :  { %2302 = vmatprep.subr.bf16.mxu1 %v2301_v5  ;;  %2430 = vmatprep.subr.bf16.mxu0 %v2429_v6  ;;  %v2449_v5 = vpack.c.bf16 %v1315_v63, %v1311_v62  ;;  %v1312_v6 = vld [vmem:[%s4864_s9 + $0x1e0] sm:$0xff]  ;;  %v2467_v1 = vpack.c.bf16 %v1346_v61, %v1342_v60  ;;  %v1349_v62 = vld [vmem:[%s4864_s9 + $0x308] sm:$0xff] }
 0x254   :  { %v2323_v9 = vpack.c.bf16 %v1312_v6, %v1308_v3  ;;  %v1353_v63 = vld [vmem:[%s4864_s9 + $0x328] sm:$0xff]  ;;  %v1355_v3 = vld [vmem:[%s4864_s9 + $0x338] sm:$0xff] }
 0x256   :  { %2304 = vmatpush1.bf16.msra.mxu1 %v2303_v13  ;;  %2432 = vmatpush1.bf16.msra.mxu0 %v2431_v14  ;;  %v1319_v13 = vld [vmem:[%s4864_s9 + $0x218] sm:$0xff]  ;;  %v2325_v14 = vpack.c.bf16 %v1321_v12, %v1317_v11  ;;  %v1357_v11 = vld [vmem:[%s4864_s9 + $0x348] sm:$0xff] }
 0x257   :  { %2306 = vmatprep.subr.bf16.mxu1 %v2305_v17  ;;  %2434 = vmatprep.subr.bf16.mxu0 %v2433_v18  ;;  %v2453_v16 = vpack.c.bf16 %v1323_v15, %v1319_v13  ;;  %v1316_v17 = vld [vmem:[%s4864_s9 + $0x200] sm:$0xff]  ;;  %v1361_v12 = vld [vmem:[%s4864_s9 + $0x368] sm:$0xff]  ;;  %v1359_v13 = vld [vmem:[%s4864_s9 + $0x358] sm:$0xff] }
 0x258   :  { %v1320_v18 = vld [vmem:[%s4864_s9 + $0x220] sm:$0xff]  ;;  %v1363_v15 = vld [vmem:[%s4864_s9 + $0x378] sm:$0xff] }
 0x259   :  { %v2327_v20 = vpack.c.bf16 %v1320_v18, %v1316_v17  ;;  %v1360_v17 = vld [vmem:[%s4864_s9 + $0x360] sm:$0xff]  ;;  %v2473_v18 = vpack.c.bf16 %v1363_v15, %v1359_v13  ;;  %v1382_v15 = vld [vmem:[%s4864_s9 + $0x410] sm:$0xff] }
 0x25a   :  { %2308 = vmatpush1.bf16.msra.mxu1 %v2307_v25  ;;  %2436 = vmatpush1.bf16.msra.mxu0 %v2435_v26  ;;  %v1327_v25 = vld [vmem:[%s4864_s9 + $0x258] sm:$0xff]  ;;  %v2329_v26 = vpack.c.bf16 %v1329_v24, %v1325_v23  ;;  %v1365_v23 = vld [vmem:[%s4864_s9 + $0x388] sm:$0xff]  ;;  %v1380_v13 = vld [vmem:[%s4864_s9 + $0x400] sm:$0xff] }
 0x25b   :  { %2310 = vmatprep.subr.bf16.mxu1 %v2309_v29  ;;  %2438 = vmatprep.subr.bf16.mxu0 %v2437_v30  ;;  %v1328_v29 = vld [vmem:[%s4864_s9 + $0x260] sm:$0xff]  ;;  %v2457_v30 = vpack.c.bf16 %v1331_v27, %v1327_v25  ;;  %v1369_v24 = vld [vmem:[%s4864_s9 + $0x3a8] sm:$0xff]  ;;  %v1367_v25 = vld [vmem:[%s4864_s9 + $0x398] sm:$0xff] }
 0x25c   :  { %v2331_v31 = vpack.c.bf16 %v1328_v29, %v1324_v28  ;;  %v1371_v27 = vld [vmem:[%s4864_s9 + $0x3b8] sm:$0xff]  ;;  %v1364_v28 = vld [vmem:[%s4864_s9 + $0x380] sm:$0xff] }
 0x25d   :  { %v1368_v29 = vld [vmem:[%s4864_s9 + $0x3a0] sm:$0xff] }
 0x25e   :  { %2312 = vmatpush1.bf16.msra.mxu1 %v2311_v37  ;;  %2440 = vmatpush1.bf16.msra.mxu0 %v2439_v38  ;;  %v1335_v37 = vld [vmem:[%s4864_s9 + $0x298] sm:$0xff]  ;;  %v2333_v38 = vpack.c.bf16 %v1337_v36, %v1333_v35  ;;  %v1373_v35 = vld [vmem:[%s4864_s9 + $0x3c8] sm:$0xff] }
 0x25f   :  { %2314 = vmatprep.subr.bf16.mxu1 %v2313_v41  ;;  %2442 = vmatprep.subr.bf16.mxu0 %v2441_v42  ;;  %v1336_v41 = vld [vmem:[%s4864_s9 + $0x2a0] sm:$0xff]  ;;  %v2461_v42 = vpack.c.bf16 %v1339_v39, %v1335_v37  ;;  %v1377_v36 = vld [vmem:[%s4864_s9 + $0x3e8] sm:$0xff]  ;;  %v1375_v37 = vld [vmem:[%s4864_s9 + $0x3d8] sm:$0xff] }
 0x260   :  { %v2335_v43 = vpack.c.bf16 %v1336_v41, %v1332_v40  ;;  %v1379_v39 = vld [vmem:[%s4864_s9 + $0x3f8] sm:$0xff]  ;;  %v1372_v40 = vld [vmem:[%s4864_s9 + $0x3c0] sm:$0xff] }
 0x261   :  { %v1376_v41 = vld [vmem:[%s4864_s9 + $0x3e0] sm:$0xff] }
 0x262   :  { %2316 = vmatpush1.bf16.msra.mxu1 %v2315_v49  ;;  %2444 = vmatpush1.bf16.msra.mxu0 %v2443_v50  ;;  %v1343_v49 = vld [vmem:[%s4864_s9 + $0x2d8] sm:$0xff]  ;;  %v2337_v50 = vpack.c.bf16 %v1345_v48, %v1341_v47  ;;  %v1381_v47 = vld [vmem:[%s4864_s9 + $0x408] sm:$0xff] }
 0x263   :  { %2318 = vmatprep.subr.bf16.mxu1 %v2317_v55  ;;  %2446 = vmatprep.subr.bf16.mxu0 %v2445_v58  ;;  %v1344_v55 = vld [vmem:[%s4864_s9 + $0x2e0] sm:$0xff]  ;;  %v2465_v58 = vpack.c.bf16 %v1347_v51, %v1343_v49  ;;  %v1385_v48 = vld [vmem:[%s4864_s9 + $0x428] sm:$0xff]  ;;  %v1383_v49 = vld [vmem:[%s4864_s9 + $0x418] sm:$0xff] }
 0x264   :  { %v2339_v59 = vpack.c.bf16 %v1344_v55, %v1340_v52  ;;  %v1387_v51 = vld [vmem:[%s4864_s9 + $0x438] sm:$0xff]  ;;  %v4448_v55 = vld [vmem:[%s4865_s8] sm:$0xf] }
 0x265   :  { %v2485_v52 = vpack.c.bf16 %v1387_v51, %v1383_v49  ;;  %v935_v60 = vrot.slane %v4448_v55, %v3667_v57  ;;  %v1407_v49 = vld [vmem:[%s4864_s9 + $0x4d8] sm:$0xff] }
 0x266   :  { %2320 = vmatpush1.bf16.msra.mxu1 %v2319_v0  ;;  %2448 = vmatpush1.bf16.msra.mxu0 %v2447_v2  ;;  %v1351_v0 = vld [vmem:[%s4864_s9 + $0x318] sm:$0xff]  ;;  %v2341_v2 = vpack.c.bf16 %v1353_v63, %v1349_v62 }
 0x267   :  { %2322 = vmatprep.subr.bf16.mxu1 %v2321_v4  ;;  %2450 = vmatprep.subr.bf16.mxu0 %v2449_v5  ;;  %v1348_v4 = vld [vmem:[%s4864_s9 + $0x300] sm:$0xff]  ;;  %v2469_v6 = vpack.c.bf16 %v1355_v3, %v1351_v0 }
 0x268   :  { %v1352_v5 = vld [vmem:[%s4864_s9 + $0x320] sm:$0xff] }
 0x269   :  { %v2343_v7 = vpack.c.bf16 %v1352_v5, %v1348_v4 }
 0x26a   :  { %2324 = vmatpush1.bf16.msra.mxu1 %v2323_v9  ;;  %2452 = vmatpush1.bf16.msra.mxu0 %v2451_v10  ;;  %v1354_v9 = vld [vmem:[%s4864_s9 + $0x330] sm:$0xff] }
 0x26b   :  { %2326 = vmatprep.subr.bf16.mxu1 %v2325_v14  ;;  %2454 = vmatprep.subr.bf16.mxu0 %v2453_v16  ;;  %v2471_v10 = vpack.c.bf16 %v1354_v9, %v1350_v8  ;;  %v2345_v14 = vpack.c.bf16 %v1361_v12, %v1357_v11  ;;  %v1356_v16 = vld [vmem:[%s4864_s9 + $0x340] sm:$0xff] }
 0x26c   :  { %v2347_v19 = vpack.c.bf16 %v1360_v17, %v1356_v16  ;;  %v1386_v16 = vld [vmem:[%s4864_s9 + $0x430] sm:$0xff] }
 0x26e   :  { %2328 = vmatpush1.bf16.msra.mxu1 %v2327_v20  ;;  %2456 = vmatpush1.bf16.msra.mxu0 %v2455_v22  ;;  %v1358_v20 = vld [vmem:[%s4864_s9 + $0x350] sm:$0xff] }
 0x26f   :  { %2330 = vmatprep.subr.bf16.mxu1 %v2329_v26  ;;  %2458 = vmatprep.subr.bf16.mxu0 %v2457_v30  ;;  %v2475_v22 = vpack.c.bf16 %v1362_v21, %v1358_v20  ;;  %v2349_v26 = vpack.c.bf16 %v1369_v24, %v1365_v23  ;;  %v2477_v30 = vpack.c.bf16 %v1371_v27, %v1367_v25  ;;  %v1393_v20 = vld [vmem:[%s4864_s9 + $0x468] sm:$0xff]  ;;  %v1391_v21 = vld [vmem:[%s4864_s9 + $0x458] sm:$0xff]  ;;  %v1388_v27 = vld [vmem:[%s4864_s9 + $0x440] sm:$0xff] }
 0x272   :  { %2332 = vmatpush1.bf16.msra.mxu1 %v2331_v31  ;;  %2460 = vmatpush1.bf16.msra.mxu0 %v2459_v34  ;;  %v2351_v31 = vpack.c.bf16 %v1368_v29, %v1364_v28  ;;  %v2479_v34 = vpack.c.bf16 %v1370_v33, %v1366_v32  ;;  %v1392_v28 = vld [vmem:[%s4864_s9 + $0x460] sm:$0xff]  ;;  %v1397_v32 = vld [vmem:[%s4864_s9 + $0x488] sm:$0xff] }
 0x273   :  { %2334 = vmatprep.subr.bf16.mxu1 %v2333_v38  ;;  %2462 = vmatprep.subr.bf16.mxu0 %v2461_v42  ;;  %v2353_v38 = vpack.c.bf16 %v1377_v36, %v1373_v35  ;;  %v2481_v42 = vpack.c.bf16 %v1379_v39, %v1375_v37  ;;  %v1401_v35 = vld [vmem:[%s4864_s9 + $0x4a8] sm:$0xff]  ;;  %v1399_v36 = vld [vmem:[%s4864_s9 + $0x498] sm:$0xff]  ;;  %v2363_v39 = vpack.c.bf16 %v1392_v28, %v1388_v27 }
 0x274   :  { %v1403_v37 = vld [vmem:[%s4864_s9 + $0x4b8] sm:$0xff] }
 0x275   :  { %v1431_v27 = vld [vmem:[%s4864_s9 + $0x598] sm:$0xff] }
 0x276   :  { %2336 = vmatpush1.bf16.msra.mxu1 %v2335_v43  ;;  %2464 = vmatpush1.bf16.msra.mxu0 %v2463_v46  ;;  %v2355_v43 = vpack.c.bf16 %v1376_v41, %v1372_v40  ;;  %v2483_v46 = vpack.c.bf16 %v1378_v45, %v1374_v44  ;;  %v1396_v41 = vld [vmem:[%s4864_s9 + $0x480] sm:$0xff]  ;;  %v2493_v44 = vpack.c.bf16 %v1403_v37, %v1399_v36  ;;  %v1398_v45 = vld [vmem:[%s4864_s9 + $0x490] sm:$0xff]  ;;  %v1435_v28 = vld [vmem:[%s4864_s9 + $0x5b8] sm:$0xff] }
 0x277   :  { %2338 = vmatprep.subr.bf16.mxu1 %v2337_v50  ;;  %2466 = vmatprep.subr.bf16.mxu0 %v2465_v58  ;;  %v2357_v50 = vpack.c.bf16 %v1385_v48, %v1381_v47  ;;  %v923_v58 = vrot.slane %v4448_v55, %v3658_v53  ;;  %v1405_v47 = vld [vmem:[%s4864_s9 + $0x4c8] sm:$0xff]  ;;  %v1434_v36 = vld [vmem:[%s4864_s9 + $0x5b0] sm:$0xff] }
 0x278   :  { %v1409_v48 = vld [vmem:[%s4864_s9 + $0x4e8] sm:$0xff] }
 0x279   :  { %v1437_v37 = vld [vmem:[%s4864_s9 + $0x5c8] sm:$0xff] }
 0x27a   :  { %2340 = vmatpush1.bf16.msra.mxu1 %v2339_v59  ;;  %2468 = vmatpush1.bf16.msra.mxu0 %v2467_v1  ;;  %v927_v59 = vrot.slane %v4448_v55, %v3665_v56 }
 0x27b   :  { %2342 = vmatprep.subr.bf16.mxu1 %v2341_v2  ;;  %2470 = vmatprep.subr.bf16.mxu0 %v2469_v6 }
 0x27e   :  { %2344 = vmatpush1.bf16.msra.mxu1 %v2343_v7  ;;  %2472 = vmatpush1.bf16.msra.mxu0 %v2471_v10 }
 0x27f   :  { %2346 = vmatprep.subr.bf16.mxu1 %v2345_v14  ;;  %2474 = vmatprep.subr.bf16.mxu0 %v2473_v18  ;;  %v1384_v14 = vld [vmem:[%s4864_s9 + $0x420] sm:$0xff]  ;;  %v1389_v18 = vld [vmem:[%s4864_s9 + $0x448] sm:$0xff] }
 0x280   :  { %v2359_v25 = vpack.c.bf16 %v1384_v14, %v1380_v13  ;;  %v2361_v33 = vpack.c.bf16 %v1393_v20, %v1389_v18  ;;  %v1421_v13 = vld [vmem:[%s4864_s9 + $0x548] sm:$0xff]  ;;  %v1424_v20 = vld [vmem:[%s4864_s9 + $0x560] sm:$0xff] }
 0x281   :  { %v1425_v14 = vld [vmem:[%s4864_s9 + $0x568] sm:$0xff] }
 0x282   :  { %2348 = vmatpush1.bf16.msra.mxu1 %v2347_v19  ;;  %2476 = vmatpush1.bf16.msra.mxu0 %v2475_v22  ;;  %v1395_v22 = vld [vmem:[%s4864_s9 + $0x478] sm:$0xff] }
 0x283   :  { %2350 = vmatprep.subr.bf16.mxu1 %v2349_v26  ;;  %2478 = vmatprep.subr.bf16.mxu0 %v2477_v30  ;;  %v2487_v26 = vpack.c.bf16 %v1386_v16, %v1382_v15  ;;  %v1390_v30 = vld [vmem:[%s4864_s9 + $0x450] sm:$0xff]  ;;  %v1423_v15 = vld [vmem:[%s4864_s9 + $0x558] sm:$0xff] }
 0x284   :  { %v1427_v16 = vld [vmem:[%s4864_s9 + $0x578] sm:$0xff] }
 0x286   :  { %2352 = vmatpush1.bf16.msra.mxu1 %v2351_v31  ;;  %2480 = vmatpush1.bf16.msra.mxu0 %v2479_v34  ;;  %v1394_v31 = vld [vmem:[%s4864_s9 + $0x470] sm:$0xff]  ;;  %v2489_v34 = vpack.c.bf16 %v1395_v22, %v1391_v21  ;;  %v2377_v21 = vpack.c.bf16 %v1425_v14, %v1421_v13  ;;  %v2505_v22 = vpack.c.bf16 %v1427_v16, %v1423_v15  ;;  %v1461_v16 = vld [vmem:[%s4864_s9 + $0x688] sm:$0xff] }
 0x287   :  { %2354 = vmatprep.subr.bf16.mxu1 %v2353_v38  ;;  %2482 = vmatprep.subr.bf16.mxu0 %v2481_v42  ;;  %v2491_v40 = vpack.c.bf16 %v1394_v31, %v1390_v30  ;;  %v1400_v42 = vld [vmem:[%s4864_s9 + $0x4a0] sm:$0xff]  ;;  %v1454_v14 = vld [vmem:[%s4864_s9 + $0x650] sm:$0xff] }
 0x288   :  { %v2367_v51 = vpack.c.bf16 %v1400_v42, %v1396_v41  ;;  %v1428_v31 = vld [vmem:[%s4864_s9 + $0x580] sm:$0xff]  ;;  %v931_v41 = vrot.slane %v4448_v55, %v3660_v54  ;;  %v1438_v55 = vld [vmem:[%s4864_s9 + $0x5d0] sm:$0xff] }
 0x289   :  { %v1458_v15 = vld [vmem:[%s4864_s9 + $0x670] sm:$0xff] }
 0x28a   :  { %2356 = vmatpush1.bf16.msra.mxu1 %v2355_v43  ;;  %2484 = vmatpush1.bf16.msra.mxu0 %v2483_v46  ;;  %v2365_v43 = vpack.c.bf16 %v1401_v35, %v1397_v32  ;;  %v1402_v46 = vld [vmem:[%s4864_s9 + $0x4b0] sm:$0xff]  ;;  %v1432_v32 = vld [vmem:[%s4864_s9 + $0x5a0] sm:$0xff] }
 0x28b   :  { %2358 = vmatprep.subr.bf16.mxu1 %v2357_v50  ;;  %2486 = vmatprep.subr.bf16.mxu0 %v2485_v52  ;;  %v1411_v50 = vld [vmem:[%s4864_s9 + $0x4f8] sm:$0xff]  ;;  %v2495_v52 = vpack.c.bf16 %v1402_v46, %v1398_v45  ;;  %v1430_v35 = vld [vmem:[%s4864_s9 + $0x590] sm:$0xff]  ;;  %v2383_v42 = vpack.c.bf16 %v1432_v32, %v1428_v31  ;;  %v1440_v45 = vld [vmem:[%s4864_s9 + $0x5e0] sm:$0xff] }
 0x28c   :  { %v1475_v31 = vld [vmem:[%s4864_s9 + $0x6f8] sm:$0xff] }
 0x320   :  { %v1077_v61 = vpop.f32.mrb[2].mxu1  ;;  %v4456_v1 = vpop.f32.mrb[4].mxu0 }
 0x321   :  { %v2549_v62 = vadd.f32 %v1077_v61, %v923_v58  ;;  %v1079_v63 = vpop.f32.mrb[3].mxu1  ;;  %v1221_v0 = vpop.f32.mrb[5].mxu0  ;;  %v1404_v58 = vld [vmem:[%s4864_s9 + $0x4c0] sm:$0xff]  ;;  %v2497_v61 = vpack.c.bf16 %v1411_v50, %v1407_v49  ;;  %v1445_v49 = vld [vmem:[%s4864_s9 + $0x608] sm:$0xff] }
 0x322   :  { %v2550_v2 = vadd.f32 %v1079_v63, %v927_v59  ;;  %v2552_v3 = vadd.f32 %v1221_v0, %v935_v60  ;;  %v1408_v59 = vld [vmem:[%s4864_s9 + $0x4e0] sm:$0xff]  ;;  %v2369_v60 = vpack.c.bf16 %v1409_v48, %v1405_v47  ;;  %v1410_v63 = vld [vmem:[%s4864_s9 + $0x4f0] sm:$0xff]  ;;  %v1413_v0 = vld [vmem:[%s4864_s9 + $0x508] sm:$0xff] }
 0x323   :  { %v1832_v4 = vmul.f32 -1.442695, %v2549_v62  ;;  %v1442_v48 = vld [vmem:[%s4864_s9 + $0x5f0] sm:$0xff]  ;;  %v1449_v50 = vld [vmem:[%s4864_s9 + $0x628] sm:$0xff] }
 0x324   :  { %v1833_v5 = vmul.f32 -1.442695, %v2550_v2  ;;  %v1835_v6 = vmul.f32 -1.442695, %v2552_v3 }
 0x325   :  { %2587 = vpow2.f32 %v1832_v4  ;;  %v1419_v4 = vld [vmem:[%s4864_s9 + $0x538] sm:$0xff] }
 0x326   :  { %2589 = vpow2.f32 %v1833_v5  ;;  %v2371_v5 = vpack.c.bf16 %v1408_v59, %v1404_v58  ;;  %v4653_v58 = vadd.f32 %v4456_v1, %v931_v41  ;;  %v1446_v1 = vld [vmem:[%s4864_s9 + $0x610] sm:$0xff]  ;;  %v1481_v41 = vld [vmem:[%s4864_s9 + $0x728] sm:$0xff] }
 0x327   :  { %2591 = vpow2.f32 %v1835_v6 }
 0x32f   :  { %v2588_v7 = vpop.eup %2587 }
 0x330   :  { %v1236_v8 = vadd.f32 1.0, %v2588_v7  ;;  %v2590_v9 = vpop.eup %2589  ;;  %v1412_v7 = vld [vmem:[%s4864_s9 + $0x500] sm:$0xff] }
 0x331   :  { %v2592_v10 = vpop.eup %2591  ;;  %v1237_v11 = vadd.f32 1.0, %v2590_v9 }
 0x332   :  { %2593 = vrcp.f32 %v1236_v8  ;;  %v1239_v12 = vadd.f32 1.0, %v2592_v10  ;;  %v1416_v8 = vld [vmem:[%s4864_s9 + $0x520] sm:$0xff] }
 0x333   :  { %2595 = vrcp.f32 %v1237_v11  ;;  %v1414_v11 = vld [vmem:[%s4864_s9 + $0x510] sm:$0xff] }
 0x334   :  { %2597 = vrcp.f32 %v1239_v12  ;;  %v1418_v12 = vld [vmem:[%s4864_s9 + $0x530] sm:$0xff] }
 0x335   :  { %v2503_v18 = vpack.c.bf16 %v1418_v12, %v1414_v11  ;;  %v1456_v11 = vld [vmem:[%s4864_s9 + $0x660] sm:$0xff] }
 0x33c   :  { %v2594_v17 = vpop.eup %2593 }
 0x33d   :  { %v2596_v19 = vpop.eup %2595  ;;  %v1248_v29 = vmul.f32 %v2594_v17, %v2549_v62  ;;  %v1406_v62 = vld [vmem:[%s4864_s9 + $0x4d0] sm:$0xff]  ;;  %v2375_v17 = vpack.c.bf16 %v1416_v8, %v1412_v7  ;;  %v1834_v7 = vmul.f32 -1.442695, %v4653_v58 }
 0x33e   :  { %v2598_v23 = vpop.eup %2597  ;;  %v1249_v24 = vmul.f32 %v2596_v19, %v2550_v2  ;;  %v1417_v2 = vld [vmem:[%s4864_s9 + $0x528] sm:$0xff]  ;;  %v2499_v6 = vpack.c.bf16 %v1410_v63, %v1406_v62  ;;  %v1420_v19 = vld [vmem:[%s4864_s9 + $0x540] sm:$0xff]  ;;  %v2389_v63 = vpack.c.bf16 %v1449_v50, %v1445_v49  ;;  %v1478_v50 = vld [vmem:[%s4864_s9 + $0x710] sm:$0xff] }
 0x33f   :  { %v1251_v38 = vmul.f32 %v2598_v23, %v2552_v3  ;;  %v1415_v3 = vld [vmem:[%s4864_s9 + $0x518] sm:$0xff]  ;;  %v2373_v9 = vpack.c.bf16 %v1417_v2, %v1413_v0  ;;  %v1422_v23 = vld [vmem:[%s4864_s9 + $0x550] sm:$0xff]  ;;  %v1448_v62 = vld [vmem:[%s4864_s9 + $0x620] sm:$0xff]  ;;  %2599 = vpow2.f32 %v1834_v7 }
 0x340   :  { %1594 = vmatprep.mubr.f32.mxu1 %v1249_v24  ;;  %1736 = vmatprep.mubr.f32.mxu0 %v1249_v24  ;;  %v2501_v10 = vpack.c.bf16 %v1419_v4, %v1415_v3  ;;  %v1426_v24 = vld [vmem:[%s4864_s9 + $0x570] sm:$0xff]  ;;  %v1453_v3 = vld [vmem:[%s4864_s9 + $0x648] sm:$0xff] }
 0x341   :  { %1595 = vmatmul.mubr.f32.vlgmr.msra.gmra.mrb[4].mxu1 %v1248_v29  ;;  %1737 = vmatmul.mubr.f32.vlgmr.msra.gmra.mrb[6].mxu0 %v1248_v29  ;;  %v2379_v29 = vpack.c.bf16 %v1424_v20, %v1420_v19  ;;  %v2507_v30 = vpack.c.bf16 %v1426_v24, %v1422_v23  ;;  %v1450_v2 = vld [vmem:[%s4864_s9 + $0x630] sm:$0xff]  ;;  %v1457_v4 = vld [vmem:[%s4864_s9 + $0x668] sm:$0xff]  ;;  %v1467_v19 = vld [vmem:[%s4864_s9 + $0x6b8] sm:$0xff] }
 0x342   :  { %2360 = vmatpush1.bf16.msra.mxu1 %v2359_v25  ;;  %2488 = vmatpush1.bf16.msra.mxu0 %v2487_v26  ;;  %v1429_v25 = vld [vmem:[%s4864_s9 + $0x588] sm:$0xff]  ;;  %v2393_v12 = vpack.c.bf16 %v1457_v4, %v1453_v3  ;;  %v1464_v23 = vld [vmem:[%s4864_s9 + $0x6a0] sm:$0xff] }
 0x343   :  { %1665 = vmatprep.mubr.f32.mxu1 %v1251_v38  ;;  %1807 = vmatprep.mubr.f32.mxu0 %v1251_v38  ;;  %v1433_v26 = vld [vmem:[%s4864_s9 + $0x5a8] sm:$0xff] }
 0x344   :  { %2362 = vmatprep.subr.bf16.mxu1 %v2361_v33  ;;  %2490 = vmatprep.subr.bf16.mxu0 %v2489_v34  ;;  %v2381_v33 = vpack.c.bf16 %v1433_v26, %v1429_v25  ;;  %v2509_v34 = vpack.c.bf16 %v1435_v28, %v1431_v27  ;;  %v1441_v38 = vld [vmem:[%s4864_s9 + $0x5e8] sm:$0xff]  ;;  %v1462_v26 = vld [vmem:[%s4864_s9 + $0x690] sm:$0xff] }
 0x345   :  { %v2385_v46 = vpack.c.bf16 %v1441_v38, %v1437_v37  ;;  %v1466_v27 = vld [vmem:[%s4864_s9 + $0x6b0] sm:$0xff]  ;;  %v1469_v28 = vld [vmem:[%s4864_s9 + $0x6c8] sm:$0xff] }
 0x346   :  { %2364 = vmatpush1.bf16.msra.mxu1 %v2363_v39  ;;  %2492 = vmatpush1.bf16.msra.mxu0 %v2491_v40  ;;  %v1439_v39 = vld [vmem:[%s4864_s9 + $0x5d8] sm:$0xff]  ;;  %v1470_v38 = vld [vmem:[%s4864_s9 + $0x6d0] sm:$0xff]  ;;  %v1493_v7 = vld [vmem:[%s4864_s9 + $0x788] sm:$0xff] }
 0x347   :  { %2366 = vmatprep.subr.bf16.mxu1 %v2365_v43  ;;  %2494 = vmatprep.subr.bf16.mxu0 %v2493_v44  ;;  %v1443_v40 = vld [vmem:[%s4864_s9 + $0x5f8] sm:$0xff]  ;;  %v2511_v43 = vpack.c.bf16 %v1434_v36, %v1430_v35  ;;  %v1436_v44 = vld [vmem:[%s4864_s9 + $0x5c0] sm:$0xff] }
 0x348   :  { %v2513_v47 = vpack.c.bf16 %v1443_v40, %v1439_v39  ;;  %v2387_v59 = vpack.c.bf16 %v1440_v45, %v1436_v44  ;;  %v1472_v35 = vld [vmem:[%s4864_s9 + $0x6e0] sm:$0xff]  ;;  %v1474_v39 = vld [vmem:[%s4864_s9 + $0x6f0] sm:$0xff]  ;;  %v1477_v40 = vld [vmem:[%s4864_s9 + $0x708] sm:$0xff] }
 0x349   :  { %v2531_v45 = vpack.c.bf16 %v1474_v39, %v1470_v38 }
 0x34a   :  { %2368 = vmatpush1.bf16.msra.mxu1 %v2367_v51  ;;  %2496 = vmatpush1.bf16.msra.mxu0 %v2495_v52  ;;  %v1447_v51 = vld [vmem:[%s4864_s9 + $0x618] sm:$0xff] }
 0x34b   :  { %2370 = vmatprep.subr.bf16.mxu1 %v2369_v60  ;;  %2498 = vmatprep.subr.bf16.mxu0 %v2497_v61  ;;  %v1451_v52 = vld [vmem:[%s4864_s9 + $0x638] sm:$0xff]  ;;  %v2515_v60 = vpack.c.bf16 %v1442_v48, %v1438_v55  ;;  %v1444_v61 = vld [vmem:[%s4864_s9 + $0x600] sm:$0xff]  ;;  %v2600_v55 = vpop.eup %2599  ;;  %v2405_v48 = vpack.c.bf16 %v1481_v41, %v1477_v40 }
 0x34c   :  { %v2517_v0 = vpack.c.bf16 %v1451_v52, %v1447_v51  ;;  %v2391_v8 = vpack.c.bf16 %v1448_v62, %v1444_v61  ;;  %v1482_v51 = vld [vmem:[%s4864_s9 + $0x730] sm:$0xff]  ;;  %v1485_v52 = vld [vmem:[%s4864_s9 + $0x748] sm:$0xff]  ;;  %v1491_v61 = vld [vmem:[%s4864_s9 + $0x778] sm:$0xff]  ;;  %v1238_v62 = vadd.f32 1.0, %v2600_v55 }
 0x34e   :  { %2372 = vmatpush1.bf16.msra.mxu1 %v2371_v5  ;;  %2500 = vmatpush1.bf16.msra.mxu0 %v2499_v6  ;;  %v1455_v5 = vld [vmem:[%s4864_s9 + $0x658] sm:$0xff]  ;;  %2601 = vrcp.f32 %v1238_v62 }
 0x34f   :  { %2374 = vmatprep.subr.bf16.mxu1 %v2373_v9  ;;  %2502 = vmatprep.subr.bf16.mxu0 %v2501_v10  ;;  %v1459_v6 = vld [vmem:[%s4864_s9 + $0x678] sm:$0xff]  ;;  %v2519_v9 = vpack.c.bf16 %v1450_v2, %v1446_v1  ;;  %v1452_v10 = vld [vmem:[%s4864_s9 + $0x640] sm:$0xff] }
 0x350   :  { %v2521_v13 = vpack.c.bf16 %v1459_v6, %v1455_v5  ;;  %v2395_v20 = vpack.c.bf16 %v1456_v11, %v1452_v10  ;;  %v1484_v1 = vld [vmem:[%s4864_s9 + $0x740] sm:$0xff]  ;;  %v1486_v5 = vld [vmem:[%s4864_s9 + $0x750] sm:$0xff]  ;;  %v1499_v10 = vld [vmem:[%s4864_s9 + $0x7b8] sm:$0xff] }
 0x351   :  { %v1488_v2 = vld [vmem:[%s4864_s9 + $0x760] sm:$0xff]  ;;  %v1490_v6 = vld [vmem:[%s4864_s9 + $0x770] sm:$0xff] }
 0x352   :  { %2376 = vmatpush1.bf16.msra.mxu1 %v2375_v17  ;;  %2504 = vmatpush1.bf16.msra.mxu0 %v2503_v18  ;;  %v1465_v17 = vld [vmem:[%s4864_s9 + $0x6a8] sm:$0xff]  ;;  %v1463_v18 = vld [vmem:[%s4864_s9 + $0x698] sm:$0xff]  ;;  %v2411_v11 = vpack.c.bf16 %v1488_v2, %v1484_v1 }
 0x353   :  { %2378 = vmatprep.subr.bf16.mxu1 %v2377_v21  ;;  %2506 = vmatprep.subr.bf16.mxu0 %v2505_v22  ;;  %v2523_v21 = vpack.c.bf16 %v1458_v15, %v1454_v14  ;;  %v1460_v22 = vld [vmem:[%s4864_s9 + $0x680] sm:$0xff]  ;;  %v2397_v24 = vpack.c.bf16 %v1465_v17, %v1461_v16  ;;  %v2525_v25 = vpack.c.bf16 %v1467_v19, %v1463_v18  ;;  %v1494_v17 = vld [vmem:[%s4864_s9 + $0x790] sm:$0xff]  ;;  %v1501_v19 = vld [vmem:[%s4864_s9 + $0x7c8] sm:$0xff] }
 0x354   :  { %v2399_v32 = vpack.c.bf16 %v1464_v23, %v1460_v22  ;;  %v1496_v14 = vld [vmem:[%s4864_s9 + $0x7a0] sm:$0xff]  ;;  %v1498_v18 = vld [vmem:[%s4864_s9 + $0x7b0] sm:$0xff]  ;;  %v1507_v22 = vld [vmem:[%s4864_s9 + $0x7f8] sm:$0xff] }
 0x356   :  { %2380 = vmatpush1.bf16.msra.mxu1 %v2379_v29  ;;  %2508 = vmatpush1.bf16.msra.mxu0 %v2507_v30  ;;  %v1473_v29 = vld [vmem:[%s4864_s9 + $0x6e8] sm:$0xff]  ;;  %v1471_v30 = vld [vmem:[%s4864_s9 + $0x6d8] sm:$0xff] }
 0x357   :  { %2382 = vmatprep.subr.bf16.mxu1 %v2381_v33  ;;  %2510 = vmatprep.subr.bf16.mxu0 %v2509_v34  ;;  %v2527_v33 = vpack.c.bf16 %v1466_v27, %v1462_v26  ;;  %v1468_v34 = vld [vmem:[%s4864_s9 + $0x6c0] sm:$0xff]  ;;  %v2401_v36 = vpack.c.bf16 %v1473_v29, %v1469_v28  ;;  %v2529_v37 = vpack.c.bf16 %v1475_v31, %v1471_v30  ;;  %v1502_v29 = vld [vmem:[%s4864_s9 + $0x7d0] sm:$0xff] }
 0x358   :  { %v2403_v44 = vpack.c.bf16 %v1472_v35, %v1468_v34  ;;  %v1504_v28 = vld [vmem:[%s4864_s9 + $0x7e0] sm:$0xff]  ;;  %v1506_v30 = vld [vmem:[%s4864_s9 + $0x7f0] sm:$0xff] }
 0x359   :  { %v1508_v35 = vld [vmem:[%s4866_s10] sm:$0xf] }
 0x35a   :  { %2384 = vmatpush1.bf16.msra.mxu1 %v2383_v42  ;;  %2512 = vmatpush1.bf16.msra.mxu0 %v2511_v43  ;;  %v1479_v42 = vld [vmem:[%s4864_s9 + $0x718] sm:$0xff]  ;;  %v1517_v38 = vrot.slane %v1508_v35, %v3665_v56  ;;  %v1525_v39 = vrot.slane %v1508_v35, %v3667_v57 }
 0x35b   :  { %2386 = vmatprep.subr.bf16.mxu1 %v2385_v46  ;;  %2514 = vmatprep.subr.bf16.mxu0 %v2513_v47  ;;  %v1483_v43 = vld [vmem:[%s4864_s9 + $0x738] sm:$0xff]  ;;  %v1476_v46 = vld [vmem:[%s4864_s9 + $0x700] sm:$0xff] }
 0x35c   :  { %v1480_v47 = vld [vmem:[%s4864_s9 + $0x720] sm:$0xff]  ;;  %v2533_v49 = vpack.c.bf16 %v1483_v43, %v1479_v42 }
 0x35e   :  { %2388 = vmatpush1.bf16.msra.mxu1 %v2387_v59  ;;  %2516 = vmatpush1.bf16.msra.mxu0 %v2515_v60  ;;  %v1489_v59 = vld [vmem:[%s4864_s9 + $0x768] sm:$0xff]  ;;  %v1487_v60 = vld [vmem:[%s4864_s9 + $0x758] sm:$0xff] }
 0x35f   :  { %2390 = vmatprep.subr.bf16.mxu1 %v2389_v63  ;;  %2518 = vmatprep.subr.bf16.mxu0 %v2517_v0  ;;  %v2407_v63 = vpack.c.bf16 %v1480_v47, %v1476_v46  ;;  %v2535_v0 = vpack.c.bf16 %v1482_v51, %v1478_v50  ;;  %v2409_v3 = vpack.c.bf16 %v1489_v59, %v1485_v52 }
 0x360   :  { %v2537_v4 = vpack.c.bf16 %v1491_v61, %v1487_v60 }
 0x362   :  { %2392 = vmatpush1.bf16.msra.mxu1 %v2391_v8  ;;  %2520 = vmatpush1.bf16.msra.mxu0 %v2519_v9  ;;  %v1497_v8 = vld [vmem:[%s4864_s9 + $0x7a8] sm:$0xff]  ;;  %v1495_v9 = vld [vmem:[%s4864_s9 + $0x798] sm:$0xff] }
 0x363   :  { %2394 = vmatprep.subr.bf16.mxu1 %v2393_v12  ;;  %2522 = vmatprep.subr.bf16.mxu0 %v2521_v13  ;;  %v2539_v12 = vpack.c.bf16 %v1490_v6, %v1486_v5  ;;  %v1492_v13 = vld [vmem:[%s4864_s9 + $0x780] sm:$0xff]  ;;  %v2413_v15 = vpack.c.bf16 %v1497_v8, %v1493_v7  ;;  %v2541_v16 = vpack.c.bf16 %v1499_v10, %v1495_v9 }
 0x364   :  { %v2415_v23 = vpack.c.bf16 %v1496_v14, %v1492_v13 }
 0x366   :  { %2396 = vmatpush1.bf16.msra.mxu1 %v2395_v20  ;;  %2524 = vmatpush1.bf16.msra.mxu0 %v2523_v21  ;;  %v1505_v20 = vld [vmem:[%s4864_s9 + $0x7e8] sm:$0xff]  ;;  %v1503_v21 = vld [vmem:[%s4864_s9 + $0x7d8] sm:$0xff] }
 0x367   :  { %2398 = vmatprep.subr.bf16.mxu1 %v2397_v24  ;;  %2526 = vmatprep.subr.bf16.mxu0 %v2525_v25  ;;  %v2543_v24 = vpack.c.bf16 %v1498_v18, %v1494_v17  ;;  %v1500_v25 = vld [vmem:[%s4864_s9 + $0x7c0] sm:$0xff]  ;;  %v2417_v26 = vpack.c.bf16 %v1505_v20, %v1501_v19  ;;  %v2545_v27 = vpack.c.bf16 %v1507_v22, %v1503_v21 }
 0x368   :  { %v2419_v31 = vpack.c.bf16 %v1504_v28, %v1500_v25 }
 0x36a   :  { %2400 = vmatpush1.bf16.msra.mxu1 %v2399_v32  ;;  %2528 = vmatpush1.bf16.msra.mxu0 %v2527_v33  ;;  %v2547_v32 = vpack.c.bf16 %v1506_v30, %v1502_v29  ;;  %v2602_v33 = vpop.eup %2601 }
 0x36b   :  { %2402 = vmatprep.subr.bf16.mxu1 %v2401_v36  ;;  %2530 = vmatprep.subr.bf16.mxu0 %v2529_v37  ;;  %v1250_v34 = vmul.f32 %v2602_v33, %v4653_v58  ;;  %v1513_v36 = vrot.slane %v1508_v35, %v3658_v53  ;;  %v1521_v37 = vrot.slane %v1508_v35, %v3660_v54 }
 0x36e   :  { %2404 = vmatpush1.bf16.msra.mxu1 %v2403_v44  ;;  %2532 = vmatpush1.bf16.msra.mxu0 %v2531_v45 }
 0x36f   :  { %2406 = vmatprep.subr.bf16.mxu1 %v2405_v48  ;;  %2534 = vmatprep.subr.bf16.mxu0 %v2533_v49 }
 0x372   :  { %2408 = vmatpush1.bf16.msra.mxu1 %v2407_v63  ;;  %2536 = vmatpush1.bf16.msra.mxu0 %v2535_v0 }
 0x373   :  { %2410 = vmatprep.subr.bf16.mxu1 %v2409_v3  ;;  %2538 = vmatprep.subr.bf16.mxu0 %v2537_v4 }
 0x376   :  { %2412 = vmatpush1.bf16.msra.mxu1 %v2411_v11  ;;  %2540 = vmatpush1.bf16.msra.mxu0 %v2539_v12 }
 0x377   :  { %2414 = vmatprep.subr.bf16.mxu1 %v2413_v15  ;;  %2542 = vmatprep.subr.bf16.mxu0 %v2541_v16 }
 0x37a   :  { %2416 = vmatpush1.bf16.msra.mxu1 %v2415_v23  ;;  %2544 = vmatpush1.bf16.msra.mxu0 %v2543_v24 }
 0x37b   :  { %2418 = vmatprep.subr.bf16.mxu1 %v2417_v26  ;;  %2546 = vmatprep.subr.bf16.mxu0 %v2545_v27 }
 0x37e   :  { %2420 = vmatpush1.bf16.msra.mxu1 %v2419_v31  ;;  %2548 = vmatpush1.bf16.msra.mxu0 %v2547_v32 }
 0x381   :  { %1666 = vmatmul.mubr.f32.vlgmr.msra.gmra.mrb[4].mxu1 %v1250_v34  ;;  %1808 = vmatmul.mubr.f32.vlgmr.msra.gmra.mrb[6].mxu0 %v1250_v34 }
 0x454   :  { %v1667_v40 = vpop.f32.mrb[4].mxu1  ;;  %v1809_v41 = vpop.f32.mrb[6].mxu0 }
 0x455   :  { %v2553_v42 = vadd.f32 %v1667_v40, %v1513_v36  ;;  %v2555_v43 = vadd.f32 %v1809_v41, %v1521_v37  ;;  %v1669_v44 = vpop.f32.mrb[5].mxu1  ;;  %v1811_v58 = vpop.f32.mrb[7].mxu0 }
 0x456   :  { %v2554_v45 = vadd.f32 %v1669_v44, %v1517_v38  ;;  %v2556_v46 = vadd.f32 %v1811_v58, %v1525_v39 }
 0x457   :  { %1814 = vst [vmem:[%s4867_s11] sm:$0xff] %v2553_v42  ;;  %1836 = vst [vmem:[%s4867_s11 + $0x10] sm:$0xff] %v2555_v43 }
 0x458   :  { %1815 = vst [vmem:[%s4867_s11 + $0x8] sm:$0xff] %v2554_v45  ;;  %1837 = vst [vmem:[%s4867_s11 + $0x18] sm:$0xff] %v2556_v46 }

</bundles_post_ra>
